<compile_context>
chip_gen: v5e
topology: v5e:2x2
jax: 0.10.0
libtpu: 0.0.40
codegen_flags: <defaults>
</compile_context>

<pallas_src>
import functools
import math

import jax
import jax.numpy as jnp
from jax.experimental import pallas as pl
from jax.experimental.pallas import tpu as pltpu

F32 = jnp.float32
BF16 = jnp.bfloat16
NEG_INF = -1e9


# ----------------------------------------------------------------------------
# generation-dependent sizing (v5e/v6e: 128 MiB VMEM, v7x: 64 MiB)
# ----------------------------------------------------------------------------
def _tpu_vmem_capacity():
    try:
        info = pltpu.get_tpu_info()
        for name in ("vmem_capacity_bytes", "vmem_size_bytes", "vmem_bytes"):
            v = getattr(info, name, None)
            if v:
                return int(v)
    except Exception:
        pass
    return 64 * 1024 * 1024  # conservative fallback (v7x-sized)


_VMEM_CAP = _tpu_vmem_capacity()
_IS_BIG_VMEM = _VMEM_CAP >= 100 * 1024 * 1024            # v5e / v6e
VMEM_LIMIT = 64 * 1024 * 1024 if _IS_BIG_VMEM else 40 * 1024 * 1024

if _IS_BIG_VMEM:   # big tiles: amortize ~0.35us/step grid overhead, fewer HBM re-streams
    _BM, _BN, _BK = 512, 1024, 512
    _BQ, _BKV, _BV = 256, 1024, 1024
else:              # v7x: 64 MiB physical, keep blocks smaller
    _BM, _BN, _BK = 256, 512, 512
    _BQ, _BKV, _BV = 256, 512, 512

_HAS_BUFFERED = hasattr(pl, "Buffered")


def _cp(sems):
    return pltpu.CompilerParams(dimension_semantics=sems, vmem_limit_bytes=VMEM_LIMIT)


def _pick_bm(m):
    return m if m <= _BM else _BM


def _pick_bm_full_row(m, d):
    """Row tile for kernels that keep full-D f32 rows resident (LN epilogues)."""
    cap = max(8, (((VMEM_LIMIT // 16) // (d * 4)) // 8) * 8)
    t = min(_BM, cap)
    return m if m <= t else t


def _pick_bn(n):
    return n if n <= _BN else _BN


def _pick_bk(k):
    """Reduction tile: must divide K exactly (a padded K edge would corrupt the acc)."""
    if k <= _BK:
        return k
    b = (_BK // 128) * 128
    while b >= 128:
        if k % b == 0:
            return b
        b -= 128
    return k  # TODO(synk): K with no 128-multiple divisor falls back to full-K streaming


def _wspec(shape, index_map, k_steps):
    """Weight BlockSpec; 3 pipeline buffers on big-VMEM parts when K is really streamed."""
    if _HAS_BUFFERED and _IS_BIG_VMEM and k_steps > 2:
        try:
            return pl.BlockSpec(shape, index_map, pipeline_mode=pl.Buffered(3))
        except TypeError:
            pass
    return pl.BlockSpec(shape, index_map)


# ----------------------------------------------------------------------------
# tiled matmul (+ optional gelu) and matmul + residual + LayerNorm epilogue
# ----------------------------------------------------------------------------
def _linear_kernel(x_ref, w_ref, b_ref, o_ref, acc_ref, *, act):
    @pl.when(pl.program_id(2) == 0)
    def _():
        acc_ref[...] = jnp.zeros_like(acc_ref)

    acc_ref[...] += jnp.dot(x_ref[...], w_ref[...], preferred_element_type=jnp.float32)

    @pl.when(pl.program_id(2) == pl.num_programs(2) - 1)
    def _():
        y = acc_ref[...] + b_ref[...]
        if act == "gelu":  # exact (erf) gelu, torch.nn.functional.gelu default
            y = 0.5 * y * (1.0 + jax.lax.erf(y * (1.0 / math.sqrt(2.0))))
        o_ref[...] = y.astype(o_ref.dtype)


def linear(x2d, w, b, act="none"):
    """y = act(x @ w + b).  x2d: (M, K), w: (K, N), b: (N,).  bf16 in, bf16 out."""
    M, K = x2d.shape
    N = w.shape[1]
    bm, bn, bk = _pick_bm(M), _pick_bn(N), _pick_bk(K)
    k_steps = K // bk
    return pl.pallas_call(
        functools.partial(_linear_kernel, act=act),
        out_shape=jax.ShapeDtypeStruct((M, N), BF16),
        grid=(pl.cdiv(M, bm), pl.cdiv(N, bn), k_steps),
        in_specs=[
            pl.BlockSpec((bm, bk), lambda i, j, k: (i, k)),
            _wspec((bk, bn), lambda i, j, k: (k, j), k_steps),
            pl.BlockSpec((1, bn), lambda i, j, k: (0, j)),
        ],
        out_specs=pl.BlockSpec((bm, bn), lambda i, j, k: (i, j)),
        scratch_shapes=[pltpu.VMEM((bm, bn), jnp.float32)],
        compiler_params=_cp(("parallel", "parallel", "arbitrary")),
    )(x2d.astype(BF16), w.astype(BF16), b.reshape(1, N).astype(F32))


def _linear_add_ln_kernel(x_ref, w_ref, b_ref, r_ref, g_ref, bt_ref,
                          o_ref, acc_ref, *, eps):
    @pl.when(pl.program_id(1) == 0)
    def _():
        acc_ref[...] = jnp.zeros_like(acc_ref)

    acc_ref[...] += jnp.dot(x_ref[...], w_ref[...], preferred_element_type=jnp.float32)

    @pl.when(pl.program_id(1) == pl.num_programs(1) - 1)
    def _():
        h = acc_ref[...] + b_ref[...] + r_ref[...].astype(jnp.float32)
        mu = jnp.mean(h, axis=-1, keepdims=True)
        var = jnp.mean((h - mu) ** 2, axis=-1, keepdims=True)
        y = (h - mu) * jax.lax.rsqrt(var + eps) * g_ref[...] + bt_ref[...]
        o_ref[...] = y.astype(o_ref.dtype)


def linear_add_ln(x2d, w, b, res2d, gamma, beta, eps=1e-12):
    """LayerNorm((x @ w + b) + residual).  Projection + add&LN fused; N = full D."""
    M, K = x2d.shape
    D = w.shape[1]
    bm, bk = _pick_bm_full_row(M, D), _pick_bk(K)
    k_steps = K // bk
    return pl.pallas_call(
        functools.partial(_linear_add_ln_kernel, eps=eps),
        out_shape=jax.ShapeDtypeStruct((M, D), BF16),
        grid=(pl.cdiv(M, bm), k_steps),
        in_specs=[
            pl.BlockSpec((bm, bk), lambda i, k: (i, k)),
            _wspec((bk, D), lambda i, k: (k, 0), k_steps),
            pl.BlockSpec((1, D), lambda i, k: (0, 0)),
            pl.BlockSpec((bm, D), lambda i, k: (i, 0)),
            pl.BlockSpec((1, D), lambda i, k: (0, 0)),
            pl.BlockSpec((1, D), lambda i, k: (0, 0)),
        ],
        out_specs=pl.BlockSpec((bm, D), lambda i, k: (i, 0)),
        scratch_shapes=[pltpu.VMEM((bm, D), jnp.float32)],
        compiler_params=_cp(("parallel", "arbitrary")),
    )(x2d.astype(BF16), w.astype(BF16), b.reshape(1, D).astype(F32),
      res2d.astype(BF16), gamma.reshape(1, D).astype(F32),
      beta.reshape(1, D).astype(F32))


# ----------------------------------------------------------------------------
# standalone LayerNorm (embedding LN) — bf16 streaming, f32 stats
# ----------------------------------------------------------------------------
def _ln_kernel(x_ref, g_ref, b_ref, o_ref, *, eps):
    h = x_ref[...].astype(jnp.float32)
    mu = jnp.mean(h, axis=-1, keepdims=True)
    var = jnp.mean((h - mu) ** 2, axis=-1, keepdims=True)
    o_ref[...] = ((h - mu) * jax.lax.rsqrt(var + eps) * g_ref[...]
                  + b_ref[...]).astype(o_ref.dtype)


def layernorm(x2d, gamma, beta, eps=1e-12):
    M, D = x2d.shape
    bm = _pick_bm_full_row(M, D)
    return pl.pallas_call(
        functools.partial(_ln_kernel, eps=eps),
        out_shape=jax.ShapeDtypeStruct((M, D), BF16),
        grid=(pl.cdiv(M, bm),),
        in_specs=[
            pl.BlockSpec((bm, D), lambda i: (i, 0)),
            pl.BlockSpec((1, D), lambda i: (0, 0)),
            pl.BlockSpec((1, D), lambda i: (0, 0)),
        ],
        out_specs=pl.BlockSpec((bm, D), lambda i: (i, 0)),
        compiler_params=_cp(("parallel",)),
    )(x2d.astype(BF16), gamma.reshape(1, D).astype(F32), beta.reshape(1, D).astype(F32))


# ----------------------------------------------------------------------------
# flash attention: reads projection output directly in (B, S, [3|2], H, Dh) layout
# (no host transposes), tiles query + kv axes, skips masked causal kv tiles.
# ----------------------------------------------------------------------------
def _flash_attn_kernel(q_ref, k_ref, v_ref, o_ref, m_sc, l_sc, acc_sc,
                       *, scale, causal, bq, bkv, sk, n_heads):
    iq = pl.program_id(1)   # query tile
    jk = pl.program_id(2)   # kv tile (reduction axis)
    n_kv = pl.num_programs(2)

    @pl.when(jk == 0)
    def _():
        m_sc[...] = jnp.full(m_sc.shape, -jnp.inf, m_sc.dtype)
        l_sc[...] = jnp.zeros(l_sc.shape, l_sc.dtype)
        acc_sc[...] = jnp.zeros(acc_sc.shape, acc_sc.dtype)

    def _compute():
        # mask built once per kv step, shared across all heads
        mask = None
        if causal:
            q_pos = iq * bq + jax.lax.broadcasted_iota(jnp.int32, (bq, bkv), 0)
            k_pos = jk * bkv + jax.lax.broadcasted_iota(jnp.int32, (bq, bkv), 1)
            mask = q_pos >= k_pos
        if sk % bkv != 0:  # partial last kv tile -> mask out-of-range keys in-kernel
            k_pos = jk * bkv + jax.lax.broadcasted_iota(jnp.int32, (bq, bkv), 1)
            valid = k_pos < sk
            mask = valid if mask is None else jnp.logical_and(mask, valid)

        for h in range(n_heads):          # static head loop -> one (bq,bkv) score live at a time
            q = q_ref[:, h, :]            # (bq, Dh) bf16
            k = k_ref[:, h, :]            # (bkv, Dh) bf16
            s = jax.lax.dot_general(q, k, (((1,), (1,)), ((), ())),
                                    preferred_element_type=jnp.float32) * scale
            if mask is not None:
                s = jnp.where(mask, s, NEG_INF)
            m_prev = m_sc[h]
            m_new = jnp.maximum(m_prev, jnp.max(s, axis=-1, keepdims=True))
            alpha = jnp.exp(m_prev - m_new)
            p = jnp.exp(s - m_new)
            l_sc[h] = alpha * l_sc[h] + jnp.sum(p, axis=-1, keepdims=True)
            acc_sc[h] = alpha * acc_sc[h] + jax.lax.dot_general(
                p.astype(v_ref.dtype), v_ref[:, h, :], (((1,), (0,)), ((), ())),
                preferred_element_type=jnp.float32)
            m_sc[h] = m_new

    if causal:
        # skip kv tiles that lie entirely above the causal diagonal for this q tile
        @pl.when(jk * bkv < (iq + 1) * bq)
        def _():
            _compute()
    else:
        _compute()

    @pl.when(jk == n_kv - 1)
    def _():
        for h in range(n_heads):
            l = l_sc[h]
            inv = pl.reciprocal(l, approx=True)
            inv = inv * (2.0 - l * inv)          # one Newton step -> ~f32-exact divide
            o_ref[:, h, :] = (acc_sc[h] * inv).astype(o_ref.dtype)


def _attention_call(q_arr, k_arr, v_arr, q_spec, k_spec, v_spec,
                    B, Sq, Sk, H, Dh, bq, bkv, causal):
    return pl.pallas_call(
        functools.partial(_flash_attn_kernel, scale=1.0 / math.sqrt(Dh),
                          causal=causal, bq=bq, bkv=bkv, sk=Sk, n_heads=H),
        out_shape=jax.ShapeDtypeStruct((B, Sq, H, Dh), BF16),
        grid=(B, pl.cdiv(Sq, bq), pl.cdiv(Sk, bkv)),
        in_specs=[q_spec, k_spec, v_spec],
        out_specs=pl.BlockSpec((None, bq, H, Dh), lambda b, i, j: (b, i, 0, 0)),
        scratch_shapes=[
            pltpu.VMEM((H, bq, 1), jnp.float32),
            pltpu.VMEM((H, bq, 1), jnp.float32),
            pltpu.VMEM((H, bq, Dh), jnp.float32),
        ],
        compiler_params=_cp(("parallel", "parallel", "arbitrary")),
    )(q_arr, k_arr, v_arr)


def self_attention(qkv5, causal):
    """qkv5: (B, S, 3, H, Dh) bf16 (packed QKV projection).  Returns (B, S, H, Dh)."""
    B, S, _, H, Dh = qkv5.shape
    bq, bkv = min(S, _BQ), min(S, _BKV)
    q_spec = pl.BlockSpec((None, bq, None, H, Dh), lambda b, i, j: (b, i, 0, 0, 0))
    k_spec = pl.BlockSpec((None, bkv, None, H, Dh), lambda b, i, j: (b, j, 1, 0, 0))
    v_spec = pl.BlockSpec((None, bkv, None, H, Dh), lambda b, i, j: (b, j, 2, 0, 0))
    return _attention_call(qkv5, qkv5, qkv5, q_spec, k_spec, v_spec,
                           B, S, S, H, Dh, bq, bkv, causal)


def cross_attention(q4, kv5):
    """q4: (B, Sq, H, Dh), kv5: (B, Sk, 2, H, Dh) (packed KV).  Returns (B, Sq, H, Dh)."""
    B, Sq, H, Dh = q4.shape
    Sk = kv5.shape[1]
    bq, bkv = min(Sq, _BQ), min(Sk, _BKV)
    q_spec = pl.BlockSpec((None, bq, H, Dh), lambda b, i, j: (b, i, 0, 0))
    k_spec = pl.BlockSpec((None, bkv, None, H, Dh), lambda b, i, j: (b, j, 0, 0, 0))
    v_spec = pl.BlockSpec((None, bkv, None, H, Dh), lambda b, i, j: (b, j, 1, 0, 0))
    return _attention_call(q4, kv5, kv5, q_spec, k_spec, v_spec,
                           B, Sq, Sk, H, Dh, bq, bkv, causal=False)


# ----------------------------------------------------------------------------
# weight-tied lm_head + softmax, vocab-tiled (online max / sum-exp, then normalize)
# ----------------------------------------------------------------------------
def _lm_stats_kernel(h_ref, tok_ref, m_ref, l_ref, *, bv, vocab):
    j = pl.program_id(1)

    @pl.when(j == 0)
    def _():
        m_ref[...] = jnp.full(m_ref.shape, -jnp.inf, m_ref.dtype)
        l_ref[...] = jnp.zeros(l_ref.shape, l_ref.dtype)

    logits = jax.lax.dot_general(h_ref[...], tok_ref[...], (((1,), (1,)), ((), ())),
                                 preferred_element_type=jnp.float32)
    if vocab % bv != 0:  # mask padded vocab columns of the partial last tile
        v_idx = j * bv + jax.lax.broadcasted_iota(jnp.int32, logits.shape, 1)
        logits = jnp.where(v_idx < vocab, logits, NEG_INF)

    m_prev = m_ref[...]
    m_new = jnp.maximum(m_prev, jnp.max(logits, axis=-1, keepdims=True))
    l_ref[...] = (l_ref[...] * jnp.exp(m_prev - m_new)
                  + jnp.sum(jnp.exp(logits - m_new), axis=-1, keepdims=True))
    m_ref[...] = m_new


def _lm_probs_kernel(h_ref, tok_ref, m_ref, l_ref, o_ref):
    logits = jax.lax.dot_general(h_ref[...], tok_ref[...], (((1,), (1,)), ((), ())),
                                 preferred_element_type=jnp.float32)
    l = l_ref[...]
    inv = pl.reciprocal(l, approx=True)
    inv = inv * (2.0 - l * inv)                     # Newton step -> ~f32-exact
    o_ref[...] = (jnp.exp(logits - m_ref[...]) * inv).astype(o_ref.dtype)


def lm_head_softmax(hidden2d, tok):
    """hidden2d: (M, D) bf16, tok: (vocab, D) (tied embedding).  Returns f32 probs (M, vocab)."""
    M, D = hidden2d.shape
    V = tok.shape[0]
    bm = _pick_bm(M)
    bv = min(V, _BV)
    n_m, n_v = pl.cdiv(M, bm), pl.cdiv(V, bv)
    h_b = hidden2d.astype(BF16)
    tok_b = tok.astype(BF16)

    m_stat, l_stat = pl.pallas_call(
        functools.partial(_lm_stats_kernel, bv=bv, vocab=V),
        out_shape=(jax.ShapeDtypeStruct((M, 1), F32),
                   jax.ShapeDtypeStruct((M, 1), F32)),
        grid=(n_m, n_v),
        in_specs=[pl.BlockSpec((bm, D), lambda i, j: (i, 0)),
                  pl.BlockSpec((bv, D), lambda i, j: (j, 0))],
        out_specs=[pl.BlockSpec((bm, 1), lambda i, j: (i, 0)),
                   pl.BlockSpec((bm, 1), lambda i, j: (i, 0))],
        compiler_params=_cp(("parallel", "arbitrary")),
    )(h_b, tok_b)

    # TODO(synk): probabilities emitted in f32 to match torch.softmax output precision;
    #             switch to bf16 (or log-probs) to halve the largest HBM write if acceptable.
    return pl.pallas_call(
        _lm_probs_kernel,
        out_shape=jax.ShapeDtypeStruct((M, V), F32),
        grid=(n_m, n_v),
        in_specs=[pl.BlockSpec((bm, D), lambda i, j: (i, 0)),
                  pl.BlockSpec((bv, D), lambda i, j: (j, 0)),
                  pl.BlockSpec((bm, 1), lambda i, j: (i, 0)),
                  pl.BlockSpec((bm, 1), lambda i, j: (i, 0))],
        out_specs=pl.BlockSpec((bm, bv), lambda i, j: (i, j)),
        compiler_params=_cp(("parallel", "parallel")),
    )(h_b, tok_b, m_stat, l_stat)


# ----------------------------------------------------------------------------
# Model glue (plain JAX): embedding lookups, free reshapes, layer composition
# ----------------------------------------------------------------------------
def embed(params, input_ids, eps=1e-12):
    emb = params["embedding"]
    B, S = input_ids.shape
    D = emb["tok"].shape[1]
    x = emb["tok"][input_ids] + emb["pos"][:S][None, :, :] + emb["typ"][0][None, None, :]
    x = layernorm(x.reshape(B * S, D), emb["ln_g"], emb["ln_b"], eps)
    return x.reshape(B, S, D)


def self_attn_block(x, p, ln_g, ln_b, n_heads, causal, eps):
    B, S, D = x.shape
    Dh = D // n_heads
    x2d = x.reshape(B * S, D)
    qkv = linear(x2d, p["wqkv"], p["bqkv"])                 # fused QKV projection
    qkv5 = qkv.reshape(B, S, 3, n_heads, Dh)                # free reshape (no transpose)
    o = self_attention(qkv5, causal)                        # (B, S, H, Dh)
    o2d = o.reshape(B * S, D)                               # free reshape
    y = linear_add_ln(o2d, p["wo"], p["bo"], x2d, ln_g, ln_b, eps)
    return y.reshape(B, S, D)


def cross_attn_block(x_q, x_kv, p, ln_g, ln_b, n_heads, eps):
    B, Sq, D = x_q.shape
    Sk = x_kv.shape[1]
    Dh = D // n_heads
    xq2d = x_q.reshape(B * Sq, D)
    q4 = linear(xq2d, p["wq"], p["bq"]).reshape(B, Sq, n_heads, Dh)
    kv5 = linear(x_kv.reshape(B * Sk, D), p["wkv"], p["bkv"]).reshape(B, Sk, 2, n_heads, Dh)
    o = cross_attention(q4, kv5)                            # (B, Sq, H, Dh)
    o2d = o.reshape(B * Sq, D)
    y = linear_add_ln(o2d, p["wo"], p["bo"], xq2d, ln_g, ln_b, eps)
    return y.reshape(B, Sq, D)


def ffn_block(x, w1, b1, w2, b2, ln_g, ln_b, eps):
    B, S, D = x.shape
    x2d = x.reshape(B * S, D)
    h = linear(x2d, w1, b1, act="gelu")
    y = linear_add_ln(h, w2, b2, x2d, ln_g, ln_b, eps)      # w2 matmul + add&LN fused
    return y.reshape(B, S, D)


def encoder_forward(params, input_ids, n_heads, eps=1e-12):
    x = embed(params, input_ids, eps)
    for lp in params["layers"]:
        x = self_attn_block(x, lp["attn"], lp["ln1_g"], lp["ln1_b"],
                            n_heads, causal=False, eps=eps)
        x = ffn_block(x, lp["w1"], lp["b1"], lp["w2"], lp["b2"],
                      lp["ln2_g"], lp["ln2_b"], eps)
    return x


def decoder_forward(params, labels, enc1, enc2, n_heads, eps=1e-12):
    x = embed(params, labels, eps)
    for lp in params["layers"]:
        x = self_attn_block(x, lp["self_attn"], lp["ln1_g"], lp["ln1_b"],
                            n_heads, causal=True, eps=eps)
        x = cross_attn_block(x, enc1, lp["cross1"], lp["ln2_g"], lp["ln2_b"], n_heads, eps)
        x = cross_attn_block(x, enc2, lp["cross2"], lp["ln3_g"], lp["ln3_b"], n_heads, eps)
        x = ffn_block(x, lp["w1"], lp["b1"], lp["w2"], lp["b2"],
                      lp["ln4_g"], lp["ln4_b"], eps)
    return x


def multimodal_transformer_forward(params, first_ids, second_ids, labels, n_heads):
    # encoder states are used as both 'key' and 'value' sources (see PyTorch forward)
    enc1 = encoder_forward(params["first_encoder"], first_ids, n_heads)
    enc2 = encoder_forward(params["second_encoder"], second_ids, n_heads)
    hidden = decoder_forward(params["decoder"], labels, enc1, enc2, n_heads)
    B, S, D = hidden.shape
    # lm_head tied to the decoder token embedding (share_decoder_head_weights=True);
    # the transpose is expressed inside the kernels' dot_general, never materialized.
    tok = params["decoder"]["embedding"]["tok"]
    lm_probs = lm_head_softmax(hidden.reshape(B * S, D), tok).reshape(B, S, -1)
    # TODO(synk): compute_loss / label-smoothing loss, attention-score outputs and
    #             cached-encoder-state branches are not exercised (defaults are off).
    return {"lm_probs": lm_probs}


# ----------------------------------------------------------------------------
# Deterministic parameter initialization
# ----------------------------------------------------------------------------
class KeyGen:
    def __init__(self, seed):
        self.key = jax.random.PRNGKey(seed)

    def __call__(self):
        self.key, sub = jax.random.split(self.key)
        return sub


def _w(kg, shape):
    return (0.02 * jax.random.normal(kg(), shape, dtype=F32)).astype(F32)


def init_embedding(kg, vocab, max_len, type_vocab, d, pad_id):
    tok = _w(kg, (vocab, d)).at[pad_id].set(0.0)  # nn.Embedding padding_idx -> zero row
    return dict(tok=tok, pos=_w(kg, (max_len, d)), typ=_w(kg, (type_vocab, d)),
                ln_g=jnp.ones((d,), F32), ln_b=jnp.zeros((d,), F32))


def init_attn_self(kg, d):
    wq, wk, wv, wo = _w(kg, (d, d)), _w(kg, (d, d)), _w(kg, (d, d)), _w(kg, (d, d))
    return dict(wqkv=jnp.concatenate([wq, wk, wv], axis=1),
                bqkv=jnp.zeros((3 * d,), F32),
                wo=wo, bo=jnp.zeros((d,), F32))


def init_attn_cross(kg, d):
    wq, wk, wv, wo = _w(kg, (d, d)), _w(kg, (d, d)), _w(kg, (d, d)), _w(kg, (d, d))
    return dict(wq=wq, bq=jnp.zeros((d,), F32),
                wkv=jnp.concatenate([wk, wv], axis=1),
                bkv=jnp.zeros((2 * d,), F32),
                wo=wo, bo=jnp.zeros((d,), F32))


def init_encoder(kg, vocab, max_len, type_vocab, d, dff, n_layers, pad_id):
    layers = []
    for _ in range(n_layers):
        layers.append(dict(
            attn=init_attn_self(kg, d),
            ln1_g=jnp.ones((d,), F32), ln1_b=jnp.zeros((d,), F32),
            w1=_w(kg, (d, dff)), b1=jnp.zeros((dff,), F32),
            w2=_w(kg, (dff, d)), b2=jnp.zeros((d,), F32),
            ln2_g=jnp.ones((d,), F32), ln2_b=jnp.zeros((d,), F32)))
    return dict(embedding=init_embedding(kg, vocab, max_len, type_vocab, d, pad_id),
                layers=layers)


def init_decoder(kg, vocab, max_len, type_vocab, d, dff, n_layers, pad_id):
    layers = []
    for _ in range(n_layers):
        layers.append(dict(
            self_attn=init_attn_self(kg, d),
            cross1=init_attn_cross(kg, d), cross2=init_attn_cross(kg, d),
            ln1_g=jnp.ones((d,), F32), ln1_b=jnp.zeros((d,), F32),
            ln2_g=jnp.ones((d,), F32), ln2_b=jnp.zeros((d,), F32),
            ln3_g=jnp.ones((d,), F32), ln3_b=jnp.zeros((d,), F32),
            w1=_w(kg, (d, dff)), b1=jnp.zeros((dff,), F32),
            w2=_w(kg, (dff, d)), b2=jnp.zeros((d,), F32),
            ln4_g=jnp.ones((d,), F32), ln4_b=jnp.zeros((d,), F32)))
    return dict(embedding=init_embedding(kg, vocab, max_len, type_vocab, d, pad_id),
                layers=layers)


# ----------------------------------------------------------------------------
if __name__ == "__main__":
    # Small config consistent with the module's constructor signature
    d_model, n_heads, dff = 32, 4, 64
    enc_layers, dec_layers = 2, 2
    vocab1, vocab2, vocab_dec = 50, 60, 40
    max_len, pad_id, type_vocab = 16, 0, 2
    batch, seq_enc1, seq_enc2, seq_dec = 2, 8, 8, 8

    kg = KeyGen(0)
    params = dict(
        first_encoder=init_encoder(kg, vocab1, max_len, type_vocab, d_model, dff,
                                   enc_layers, pad_id),
        second_encoder=init_encoder(kg, vocab2, max_len, type_vocab, d_model, dff,
                                    enc_layers, pad_id),
        decoder=init_decoder(kg, vocab_dec, max_len, type_vocab, d_model, dff,
                             dec_layers, pad_id),
    )

    dkey = jax.random.PRNGKey(0)
    k1, k2, k3 = jax.random.split(dkey, 3)
    first_ids = jax.random.randint(k1, (batch, seq_enc1), 1, vocab1, dtype=jnp.int32)
    second_ids = jax.random.randint(k2, (batch, seq_enc2), 1, vocab2, dtype=jnp.int32)
    labels = jax.random.randint(k3, (batch, seq_dec), 1, vocab_dec, dtype=jnp.int32)

    fwd = jax.jit(functools.partial(multimodal_transformer_forward, n_heads=n_heads))
    out = fwd(params, first_ids, second_ids, labels)
    jax.block_until_ready(out)

    lm_probs = out["lm_probs"]
    assert lm_probs.shape == (batch, seq_dec, vocab_dec)
    assert bool(jnp.all(jnp.isfinite(lm_probs)))
    # rows of the softmax output must sum to 1
    assert bool(jnp.allclose(jnp.sum(lm_probs, axis=-1), 1.0, atol=1e-3))
    print("KERNEL_OK")
</pallas_src>

<mosaic_0001>
module attributes {stable_mosaic.version = 11 : i64} {
  func.func @_ln_kernel(%arg0: i32, %arg1: memref<16x32xbf16, #tpu.memory_space<vmem>>, %arg2: memref<1x32xf32, #tpu.memory_space<vmem>>, %arg3: memref<1x32xf32, #tpu.memory_space<vmem>>, %arg4: memref<16x32xbf16, #tpu.memory_space<vmem>>) attributes {dimension_semantics = [#tpu.dimension_semantics<parallel>], iteration_bounds = array<i64: 1>, scalar_prefetch = 0 : i64, scratch_operands = 0 : i64, tpu.core_type = #tpu.core_type<tc>, window_params = [{transform_indices = @transform_0, window_bounds = array<i64: 16, 32>}, {pipeline_mode = #tpu.pipeline_mode<synchronous>, transform_indices = @transform_1, window_bounds = array<i64: 1, 32>}, {pipeline_mode = #tpu.pipeline_mode<synchronous>, transform_indices = @transform_2, window_bounds = array<i64: 1, 32>}, {transform_indices = @transform_3, window_bounds = array<i64: 16, 32>}]} {
    %c0 = arith.constant 0 : index
    %c0_0 = arith.constant 0 : index
    %0 = vector.load %arg1[%c0, %c0_0] : memref<16x32xbf16, #tpu.memory_space<vmem>>, vector<16x32xbf16>
    %1 = arith.extf %0 : vector<16x32xbf16> to vector<16x32xf32>
    %cst = arith.constant dense<0.000000e+00> : vector<16xf32>
    %2 = vector.multi_reduction <add>, %1, %cst [1] : vector<16x32xf32> to vector<16xf32>
    %3 = vector.shape_cast %2 : vector<16xf32> to vector<16x1xf32>
    %cst_1 = arith.constant 3.200000e+01 : f32
    %4 = vector.broadcast %cst_1 : f32 to vector<16x1xf32>
    %5 = arith.divf %3, %4 : vector<16x1xf32>
    %6 = vector.broadcast %5 : vector<16x1xf32> to vector<16x32xf32>
    %7 = arith.subf %1, %6 : vector<16x32xf32>
    %8 = arith.mulf %7, %7 : vector<16x32xf32>
    %cst_2 = arith.constant dense<0.000000e+00> : vector<16xf32>
    %9 = vector.multi_reduction <add>, %8, %cst_2 [1] : vector<16x32xf32> to vector<16xf32>
    %10 = vector.shape_cast %9 : vector<16xf32> to vector<16x1xf32>
    %cst_3 = arith.constant 3.200000e+01 : f32
    %11 = vector.broadcast %cst_3 : f32 to vector<16x1xf32>
    %12 = arith.divf %10, %11 : vector<16x1xf32>
    %13 = vector.broadcast %5 : vector<16x1xf32> to vector<16x32xf32>
    %14 = arith.subf %1, %13 : vector<16x32xf32>
    %cst_4 = arith.constant 9.99999996E-13 : f32
    %15 = vector.broadcast %cst_4 : f32 to vector<16x1xf32>
    %16 = arith.addf %12, %15 : vector<16x1xf32>
    %17 = math.rsqrt %16 : vector<16x1xf32>
    %18 = vector.broadcast %17 : vector<16x1xf32> to vector<16x32xf32>
    %19 = arith.mulf %14, %18 : vector<16x32xf32>
    %c0_5 = arith.constant 0 : index
    %c0_6 = arith.constant 0 : index
    %20 = vector.load %arg2[%c0_5, %c0_6] : memref<1x32xf32, #tpu.memory_space<vmem>>, vector<1x32xf32>
    %21 = vector.broadcast %20 : vector<1x32xf32> to vector<16x32xf32>
    %22 = arith.mulf %19, %21 : vector<16x32xf32>
    %c0_7 = arith.constant 0 : index
    %c0_8 = arith.constant 0 : index
    %23 = vector.load %arg3[%c0_7, %c0_8] : memref<1x32xf32, #tpu.memory_space<vmem>>, vector<1x32xf32>
    %24 = vector.broadcast %23 : vector<1x32xf32> to vector<16x32xf32>
    %25 = arith.addf %22, %24 : vector<16x32xf32>
    %26 = arith.truncf %25 : vector<16x32xf32> to vector<16x32xbf16>
    %c0_9 = arith.constant 0 : index
    %c0_10 = arith.constant 0 : index
    %27 = vector.load %arg4[%c0_9, %c0_10] : memref<16x32xbf16, #tpu.memory_space<vmem>>, vector<16x32xbf16>
    tpu.vector_store %arg4[%c0_9, %c0_10], %26 {strides = array<i32>} : memref<16x32xbf16, #tpu.memory_space<vmem>>, vector<16x32xbf16>,
    return
  }
  func.func @transform_0(%arg0: i32) -> (i32, i32) {
    %c0_i32 = arith.constant 0 : i32
    %c0_i32_0 = arith.constant 0 : i32
    return %arg0, %c0_i32 : i32, i32
  }
  func.func @transform_1(%arg0: i32) -> (i32, i32) {
    %c0_i32 = arith.constant 0 : i32
    %c0_i32_0 = arith.constant 0 : i32
    %c0_i32_1 = arith.constant 0 : i32
    return %c0_i32, %c0_i32_0 : i32, i32
  }
  func.func @transform_2(%arg0: i32) -> (i32, i32) {
    %c0_i32 = arith.constant 0 : i32
    %c0_i32_0 = arith.constant 0 : i32
    %c0_i32_1 = arith.constant 0 : i32
    return %c0_i32, %c0_i32_0 : i32, i32
  }
  func.func @transform_3(%arg0: i32) -> (i32, i32) {
    %c0_i32 = arith.constant 0 : i32
    %c0_i32_0 = arith.constant 0 : i32
    return %arg0, %c0_i32 : i32, i32
  }
}

module attributes {stable_mosaic.version = 11 : i64} {
  func.func @_linear_kernel(%arg0: i32, %arg1: i32, %arg2: i32, %arg3: memref<16x32xbf16, #tpu.memory_space<vmem>>, %arg4: memref<32x96xbf16, #tpu.memory_space<vmem>>, %arg5: memref<1x96xf32, #tpu.memory_space<vmem>>, %arg6: memref<16x96xbf16, #tpu.memory_space<vmem>>, %arg7: memref<16x96xf32, #tpu.memory_space<vmem>>) attributes {dimension_semantics = [#tpu.dimension_semantics<parallel>, #tpu.dimension_semantics<parallel>, #tpu.dimension_semantics<arbitrary>], iteration_bounds = array<i64: 1, 1, 1>, scalar_prefetch = 0 : i64, scratch_operands = 1 : i64, tpu.core_type = #tpu.core_type<tc>, window_params = [{transform_indices = @transform_0, window_bounds = array<i64: 16, 32>}, {transform_indices = @transform_1, window_bounds = array<i64: 32, 96>}, {transform_indices = @transform_2, window_bounds = array<i64: 1, 96>}, {transform_indices = @transform_3, window_bounds = array<i64: 16, 96>}]} {
    %c0_i32 = arith.constant 0 : i32
    %0 = arith.cmpi eq, %arg2, %c0_i32 : i32
    %1 = arith.extui %0 : i1 to i32
    %c0_i32_0 = arith.constant 0 : i32
    %2 = arith.cmpi ne, %1, %c0_i32_0 : i32
    scf.if %2 {
      %cst_10 = arith.constant 0.000000e+00 : f32
      %12 = vector.broadcast %cst_10 : f32 to vector<16x96xf32>
      %c0_11 = arith.constant 0 : index
      %c0_12 = arith.constant 0 : index
      %13 = vector.load %arg7[%c0_11, %c0_12] : memref<16x96xf32, #tpu.memory_space<vmem>>, vector<16x96xf32>
      tpu.vector_store %arg7[%c0_11, %c0_12], %12 {strides = array<i32>} : memref<16x96xf32, #tpu.memory_space<vmem>>, vector<16x96xf32>,
    } else {
    }
    %c0 = arith.constant 0 : index
    %c0_1 = arith.constant 0 : index
    %3 = vector.load %arg7[%c0, %c0_1] : memref<16x96xf32, #tpu.memory_space<vmem>>, vector<16x96xf32>
    %c0_2 = arith.constant 0 : index
    %c0_3 = arith.constant 0 : index
    %4 = vector.load %arg3[%c0_2, %c0_3] : memref<16x32xbf16, #tpu.memory_space<vmem>>, vector<16x32xbf16>
    %c0_4 = arith.constant 0 : index
    %c0_5 = arith.constant 0 : index
    %5 = vector.load %arg4[%c0_4, %c0_5] : memref<32x96xbf16, #tpu.memory_space<vmem>>, vector<32x96xbf16>
    %cst = arith.constant dense<0.000000e+00> : vector<16x96xf32>
    %6 = tpu.matmul %4, %5, %cst {dimension_numbers = #tpu.dot_dimension_numbers<[1], [0], [0], [1], [0, 0, 1, 1], [], []>} : vector<16x32xbf16>, vector<32x96xbf16>, vector<16x96xf32> -> vector<16x96xf32>
    %7 = arith.addf %3, %6 : vector<16x96xf32>
    %c0_6 = arith.constant 0 : index
    %c0_7 = arith.constant 0 : index
    %8 = vector.load %arg7[%c0_6, %c0_7] : memref<16x96xf32, #tpu.memory_space<vmem>>, vector<16x96xf32>
    tpu.vector_store %arg7[%c0_6, %c0_7], %7 {strides = array<i32>} : memref<16x96xf32, #tpu.memory_space<vmem>>, vector<16x96xf32>,
    %c0_i32_8 = arith.constant 0 : i32
    %9 = arith.cmpi eq, %arg2, %c0_i32_8 : i32
    %10 = arith.extui %9 : i1 to i32
    %c0_i32_9 = arith.constant 0 : i32
    %11 = arith.cmpi ne, %10, %c0_i32_9 : i32
    scf.if %11 {
      %c0_10 = arith.constant 0 : index
      %c0_11 = arith.constant 0 : index
      %12 = vector.load %arg7[%c0_10, %c0_11] : memref<16x96xf32, #tpu.memory_space<vmem>>, vector<16x96xf32>
      %c0_12 = arith.constant 0 : index
      %c0_13 = arith.constant 0 : index
      %13 = vector.load %arg5[%c0_12, %c0_13] : memref<1x96xf32, #tpu.memory_space<vmem>>, vector<1x96xf32>
      %14 = vector.broadcast %13 : vector<1x96xf32> to vector<16x96xf32>
      %15 = arith.addf %12, %14 : vector<16x96xf32>
      %16 = arith.truncf %15 : vector<16x96xf32> to vector<16x96xbf16>
      %c0_14 = arith.constant 0 : index
      %c0_15 = arith.constant 0 : index
      %17 = vector.load %arg6[%c0_14, %c0_15] : memref<16x96xbf16, #tpu.memory_space<vmem>>, vector<16x96xbf16>
      tpu.vector_store %arg6[%c0_14, %c0_15], %16 {strides = array<i32>} : memref<16x96xbf16, #tpu.memory_space<vmem>>, vector<16x96xbf16>,
    } else {
    }
    return
  }
  func.func @transform_0(%arg0: i32, %arg1: i32, %arg2: i32) -> (i32, i32) {
    %c0_i32 = arith.constant 0 : i32
    return %arg0, %arg2 : i32, i32
  }
  func.func @transform_1(%arg0: i32, %arg1: i32, %arg2: i32) -> (i32, i32) {
    %c0_i32 = arith.constant 0 : i32
    return %arg2, %arg1 : i32, i32
  }
  func.func @transform_2(%arg0: i32, %arg1: i32, %arg2: i32) -> (i32, i32) {
    %c0_i32 = arith.constant 0 : i32
    %c0_i32_0 = arith.constant 0 : i32
    return %c0_i32, %arg1 : i32, i32
  }
  func.func @transform_3(%arg0: i32, %arg1: i32, %arg2: i32) -> (i32, i32) {
    %c0_i32 = arith.constant 0 : i32
    return %arg0, %arg1 : i32, i32
  }
}

module attributes {stable_mosaic.version = 11 : i64} {
  func.func @_flash_attn_kernel(%arg0: i32, %arg1: i32, %arg2: i32, %arg3: memref<1x8x1x4x8xbf16, #tpu.memory_space<vmem>>, %arg4: memref<1x8x1x4x8xbf16, #tpu.memory_space<vmem>>, %arg5: memref<1x8x1x4x8xbf16, #tpu.memory_space<vmem>>, %arg6: memref<1x8x4x8xbf16, #tpu.memory_space<vmem>>, %arg7: memref<4x8x1xf32, #tpu.memory_space<vmem>>, %arg8: memref<4x8x1xf32, #tpu.memory_space<vmem>>, %arg9: memref<4x8x8xf32, #tpu.memory_space<vmem>>) attributes {dimension_semantics = [#tpu.dimension_semantics<parallel>, #tpu.dimension_semantics<parallel>, #tpu.dimension_semantics<arbitrary>], iteration_bounds = array<i64: 2, 1, 1>, scalar_prefetch = 0 : i64, scratch_operands = 3 : i64, tpu.core_type = #tpu.core_type<tc>, window_params = [{transform_indices = @transform_0, window_bounds = array<i64: 1, 8, 1, 4, 8>}, {transform_indices = @transform_1, window_bounds = array<i64: 1, 8, 1, 4, 8>}, {transform_indices = @transform_2, window_bounds = array<i64: 1, 8, 1, 4, 8>}, {transform_indices = @transform_3, window_bounds = array<i64: 1, 8, 4, 8>}]} {
    %c0_i32 = arith.constant 0 : i32
    %0 = arith.cmpi eq, %arg2, %c0_i32 : i32
    %1 = arith.extui %0 : i1 to i32
    %c0_i32_0 = arith.constant 0 : i32
    %2 = arith.cmpi ne, %1, %c0_i32_0 : i32
    scf.if %2 {
      %cst = arith.constant 0xFF800000 : f32
      %12 = vector.broadcast %cst : f32 to vector<4x8x1xf32>
      %c0 = arith.constant 0 : index
      %c0_5 = arith.constant 0 : index
      %c0_6 = arith.constant 0 : index
      %13 = vector.load %arg7[%c0, %c0_5, %c0_6] : memref<4x8x1xf32, #tpu.memory_space<vmem>>, vector<4x8x1xf32>
      tpu.vector_store %arg7[%c0, %c0_5, %c0_6], %12 {strides = array<i32>} : memref<4x8x1xf32, #tpu.memory_space<vmem>>, vector<4x8x1xf32>,
      %cst_7 = arith.constant 0.000000e+00 : f32
      %14 = vector.broadcast %cst_7 : f32 to vector<4x8x1xf32>
      %c0_8 = arith.constant 0 : index
      %c0_9 = arith.constant 0 : index
      %c0_10 = arith.constant 0 : index
      %15 = vector.load %arg8[%c0_8, %c0_9, %c0_10] : memref<4x8x1xf32, #tpu.memory_space<vmem>>, vector<4x8x1xf32>
      tpu.vector_store %arg8[%c0_8, %c0_9, %c0_10], %14 {strides = array<i32>} : memref<4x8x1xf32, #tpu.memory_space<vmem>>, vector<4x8x1xf32>,
      %cst_11 = arith.constant 0.000000e+00 : f32
      %16 = vector.broadcast %cst_11 : f32 to vector<4x8x8xf32>
      %c0_12 = arith.constant 0 : index
      %c0_13 = arith.constant 0 : index
      %c0_14 = arith.constant 0 : index
      %17 = vector.load %arg9[%c0_12, %c0_13, %c0_14] : memref<4x8x8xf32, #tpu.memory_space<vmem>>, vector<4x8x8xf32>
      tpu.vector_store %arg9[%c0_12, %c0_13, %c0_14], %16 {strides = array<i32>} : memref<4x8x8xf32, #tpu.memory_space<vmem>>, vector<4x8x8xf32>,
    } else {
    }
    %c8_i32 = arith.constant 8 : i32
    %3 = arith.muli %arg2, %c8_i32 : i32
    %c1_i32 = arith.constant 1 : i32
    %4 = arith.addi %arg1, %c1_i32 : i32
    %c8_i32_1 = arith.constant 8 : i32
    %5 = arith.muli %4, %c8_i32_1 : i32
    %6 = arith.cmpi slt, %3, %5 : i32
    %7 = arith.extui %6 : i1 to i32
    %c0_i32_2 = arith.constant 0 : i32
    %8 = arith.cmpi ne, %7, %c0_i32_2 : i32
    scf.if %8 {
      %c8_i32_5 = arith.constant 8 : i32
      %12 = arith.muli %arg1, %c8_i32_5 : i32
      %13 = tpu.iota {dimensions = array<i32: 0>} : vector<8x8xi32>
      %14 = vector.broadcast %12 : i32 to vector<8x8xi32>
      %15 = arith.addi %14, %13 : vector<8x8xi32>
      %c8_i32_6 = arith.constant 8 : i32
      %16 = arith.muli %arg2, %c8_i32_6 : i32
      %17 = tpu.iota {dimensions = array<i32: 1>} : vector<8x8xi32>
      %18 = vector.broadcast %16 : i32 to vector<8x8xi32>
      %19 = arith.addi %18, %17 : vector<8x8xi32>
      %20 = arith.cmpi sge, %15, %19 : vector<8x8xi32>
      %c0 = arith.constant 0 : index
      %c0_7 = arith.constant 0 : index
      %c0_8 = arith.constant 0 : index
      %c0_9 = arith.constant 0 : index
      %c0_10 = arith.constant 0 : index
      %21 = vector.load %arg3[%c0, %c0_7, %c0_8, %c0_9, %c0_10] : memref<1x8x1x4x8xbf16, #tpu.memory_space<vmem>>, vector<1x8x1x1x8xbf16>
      %22 = vector.shape_cast %21 : vector<1x8x1x1x8xbf16> to vector<8x8xbf16>
      %c0_11 = arith.constant 0 : index
      %c0_12 = arith.constant 0 : index
      %c0_13 = arith.constant 0 : index
      %c0_14 = arith.constant 0 : index
      %c0_15 = arith.constant 0 : index
      %23 = vector.load %arg4[%c0_11, %c0_12, %c0_13, %c0_14, %c0_15] : memref<1x8x1x4x8xbf16, #tpu.memory_space<vmem>>, vector<1x8x1x1x8xbf16>
      %24 = vector.shape_cast %23 : vector<1x8x1x1x8xbf16> to vector<8x8xbf16>
      %cst = arith.constant dense<0.000000e+00> : vector<8x8xf32>
      %25 = tpu.matmul %22, %24, %cst {dimension_numbers = #tpu.dot_dimension_numbers<[1], [1], [0], [0], [0, 0, 1, 0], [], []>} : vector<8x8xbf16>, vector<8x8xbf16>, vector<8x8xf32> -> vector<8x8xf32>
      %cst_16 = arith.constant 0.353553385 : f32
      %26 = vector.broadcast %cst_16 : f32 to vector<8x8xf32>
      %27 = arith.mulf %25, %26 : vector<8x8xf32>
      %cst_17 = arith.constant -1.000000e+09 : f32
      %28 = vector.broadcast %cst_17 : f32 to vector<8x8xf32>
      %29 = arith.select %20, %27, %28 : vector<8x8xi1>, vector<8x8xf32>
      %c0_18 = arith.constant 0 : index
      %c0_19 = arith.constant 0 : index
      %c0_20 = arith.constant 0 : index
      %30 = vector.load %arg7[%c0_18, %c0_19, %c0_20] : memref<4x8x1xf32, #tpu.memory_space<vmem>>, vector<1x8x1xf32>
      %31 = vector.shape_cast %30 : vector<1x8x1xf32> to vector<8x1xf32>
      %cst_21 = arith.constant dense<0xFF800000> : vector<8xf32>
      %32 = vector.multi_reduction <maximumf>, %29, %cst_21 [1] : vector<8x8xf32> to vector<8xf32>
      %33 = vector.shape_cast %32 : vector<8xf32> to vector<8x1xf32>
      %34 = arith.maximumf %31, %33 : vector<8x1xf32>
      %35 = arith.subf %31, %34 : vector<8x1xf32>
      %36 = math.exp %35 : vector<8x1xf32>
      %37 = vector.broadcast %34 : vector<8x1xf32> to vector<8x8xf32>
      %38 = arith.subf %29, %37 : vector<8x8xf32>
      %39 = math.exp %38 : vector<8x8xf32>
      %c0_22 = arith.constant 0 : index
      %c0_23 = arith.constant 0 : index
      %c0_24 = arith.constant 0 : index
      %40 = vector.load %arg8[%c0_22, %c0_23, %c0_24] : memref<4x8x1xf32, #tpu.memory_space<vmem>>, vector<1x8x1xf32>
      %41 = vector.shape_cast %40 : vector<1x8x1xf32> to vector<8x1xf32>
      %42 = arith.mulf %36, %41 : vector<8x1xf32>
      %cst_25 = arith.constant dense<0.000000e+00> : vector<8xf32>
      %43 = vector.multi_reduction <add>, %39, %cst_25 [1] : vector<8x8xf32> to vector<8xf32>
      %44 = vector.shape_cast %43 : vector<8xf32> to vector<8x1xf32>
      %45 = arith.addf %42, %44 : vector<8x1xf32>
      %c0_26 = arith.constant 0 : index
      %c0_27 = arith.constant 0 : index
      %c0_28 = arith.constant 0 : index
      %46 = vector.load %arg8[%c0_26, %c0_27, %c0_28] : memref<4x8x1xf32, #tpu.memory_space<vmem>>, vector<1x8x1xf32>
      %47 = vector.shape_cast %46 : vector<1x8x1xf32> to vector<8x1xf32>
      %48 = vector.shape_cast %45 : vector<8x1xf32> to vector<1x8x1xf32>
      tpu.vector_store %arg8[%c0_26, %c0_27, %c0_28], %48 {strides = array<i32>} : memref<4x8x1xf32, #tpu.memory_space<vmem>>, vector<1x8x1xf32>,
      %c0_29 = arith.constant 0 : index
      %c0_30 = arith.constant 0 : index
      %c0_31 = arith.constant 0 : index
      %49 = vector.load %arg9[%c0_29, %c0_30, %c0_31] : memref<4x8x8xf32, #tpu.memory_space<vmem>>, vector<1x8x8xf32>
      %50 = vector.shape_cast %49 : vector<1x8x8xf32> to vector<8x8xf32>
      %51 = vector.broadcast %36 : vector<8x1xf32> to vector<8x8xf32>
      %52 = arith.mulf %51, %50 : vector<8x8xf32>
      %53 = arith.truncf %39 : vector<8x8xf32> to vector<8x8xbf16>
      %c0_32 = arith.constant 0 : index
      %c0_33 = arith.constant 0 : index
      %c0_34 = arith.constant 0 : index
      %c0_35 = arith.constant 0 : index
      %c0_36 = arith.constant 0 : index
      %54 = vector.load %arg5[%c0_32, %c0_33, %c0_34, %c0_35, %c0_36] : memref<1x8x1x4x8xbf16, #tpu.memory_space<vmem>>, vector<1x8x1x1x8xbf16>
      %55 = vector.shape_cast %54 : vector<1x8x1x1x8xbf16> to vector<8x8xbf16>
      %cst_37 = arith.constant dense<0.000000e+00> : vector<8x8xf32>
      %56 = tpu.matmul %53, %55, %cst_37 {dimension_numbers = #tpu.dot_dimension_numbers<[1], [0], [0], [1], [0, 0, 1, 1], [], []>} : vector<8x8xbf16>, vector<8x8xbf16>, vector<8x8xf32> -> vector<8x8xf32>
      %57 = arith.addf %52, %56 : vector<8x8xf32>
      %c0_38 = arith.constant 0 : index
      %c0_39 = arith.constant 0 : index
      %c0_40 = arith.constant 0 : index
      %58 = vector.load %arg9[%c0_38, %c0_39, %c0_40] : memref<4x8x8xf32, #tpu.memory_space<vmem>>, vector<1x8x8xf32>
      %59 = vector.shape_cast %58 : vector<1x8x8xf32> to vector<8x8xf32>
      %60 = vector.shape_cast %57 : vector<8x8xf32> to vector<1x8x8xf32>
      tpu.vector_store %arg9[%c0_38, %c0_39, %c0_40], %60 {strides = array<i32>} : memref<4x8x8xf32, #tpu.memory_space<vmem>>, vector<1x8x8xf32>,
      %c0_41 = arith.constant 0 : index
      %c0_42 = arith.constant 0 : index
      %c0_43 = arith.constant 0 : index
      %61 = vector.load %arg7[%c0_41, %c0_42, %c0_43] : memref<4x8x1xf32, #tpu.memory_space<vmem>>, vector<1x8x1xf32>
      %62 = vector.shape_cast %61 : vector<1x8x1xf32> to vector<8x1xf32>
      %63 = vector.shape_cast %34 : vector<8x1xf32> to vector<1x8x1xf32>
      tpu.vector_store %arg7[%c0_41, %c0_42, %c0_43], %63 {strides = array<i32>} : memref<4x8x1xf32, #tpu.memory_space<vmem>>, vector<1x8x1xf32>,
      %c0_44 = arith.constant 0 : index
      %c0_45 = arith.constant 0 : index
      %c0_46 = arith.constant 0 : index
      %c1 = arith.constant 1 : index
      %c0_47 = arith.constant 0 : index
      %64 = vector.load %arg3[%c0_44, %c0_45, %c0_46, %c1, %c0_47] : memref<1x8x1x4x8xbf16, #tpu.memory_space<vmem>>, vector<1x8x1x1x8xbf16>
      %65 = vector.shape_cast %64 : vector<1x8x1x1x8xbf16> to vector<8x8xbf16>
      %c0_48 = arith.constant 0 : index
      %c0_49 = arith.constant 0 : index
      %c0_50 = arith.constant 0 : index
      %c1_51 = arith.constant 1 : index
      %c0_52 = arith.constant 0 : index
      %66 = vector.load %arg4[%c0_48, %c0_49, %c0_50, %c1_51, %c0_52] : memref<1x8x1x4x8xbf16, #tpu.memory_space<vmem>>, vector<1x8x1x1x8xbf16>
      %67 = vector.shape_cast %66 : vector<1x8x1x1x8xbf16> to vector<8x8xbf16>
      %cst_53 = arith.constant dense<0.000000e+00> : vector<8x8xf32>
      %68 = tpu.matmul %65, %67, %cst_53 {dimension_numbers = #tpu.dot_dimension_numbers<[1], [1], [0], [0], [0, 0, 1, 0], [], []>} : vector<8x8xbf16>, vector<8x8xbf16>, vector<8x8xf32> -> vector<8x8xf32>
      %cst_54 = arith.constant 0.353553385 : f32
      %69 = vector.broadcast %cst_54 : f32 to vector<8x8xf32>
      %70 = arith.mulf %68, %69 : vector<8x8xf32>
      %cst_55 = arith.constant -1.000000e+09 : f32
      %71 = vector.broadcast %cst_55 : f32 to vector<8x8xf32>
      %72 = arith.select %20, %70, %71 : vector<8x8xi1>, vector<8x8xf32>
      %c1_56 = arith.constant 1 : index
      %c0_57 = arith.constant 0 : index
      %c0_58 = arith.constant 0 : index
      %73 = vector.load %arg7[%c1_56, %c0_57, %c0_58] : memref<4x8x1xf32, #tpu.memory_space<vmem>>, vector<1x8x1xf32>
      %74 = vector.shape_cast %73 : vector<1x8x1xf32> to vector<8x1xf32>
      %cst_59 = arith.constant dense<0xFF800000> : vector<8xf32>
      %75 = vector.multi_reduction <maximumf>, %72, %cst_59 [1] : vector<8x8xf32> to vector<8xf32>
      %76 = vector.shape_cast %75 : vector<8xf32> to vector<8x1xf32>
      %77 = arith.maximumf %74, %76 : vector<8x1xf32>
      %78 = arith.subf %74, %77 : vector<8x1xf32>
      %79 = math.exp %78 : vector<8x1xf32>
      %80 = vector.broadcast %77 : vector<8x1xf32> to vector<8x8xf32>
      %81 = arith.subf %72, %80 : vector<8x8xf32>
      %82 = math.exp %81 : vector<8x8xf32>
      %c1_60 = arith.constant 1 : index
      %c0_61 = arith.constant 0 : index
      %c0_62 = arith.constant 0 : index
      %83 = vector.load %arg8[%c1_60, %c0_61, %c0_62] : memref<4x8x1xf32, #tpu.memory_space<vmem>>, vector<1x8x1xf32>
      %84 = vector.shape_cast %83 : vector<1x8x1xf32> to vector<8x1xf32>
      %85 = arith.mulf %79, %84 : vector<8x1xf32>
      %cst_63 = arith.constant dense<0.000000e+00> : vector<8xf32>
      %86 = vector.multi_reduction <add>, %82, %cst_63 [1] : vector<8x8xf32> to vector<8xf32>
      %87 = vector.shape_cast %86 : vector<8xf32> to vector<8x1xf32>
      %88 = arith.addf %85, %87 : vector<8x1xf32>
      %c1_64 = arith.constant 1 : index
      %c0_65 = arith.constant 0 : index
      %c0_66 = arith.constant 0 : index
      %89 = vector.load %arg8[%c1_64, %c0_65, %c0_66] : memref<4x8x1xf32, #tpu.memory_space<vmem>>, vector<1x8x1xf32>
      %90 = vector.shape_cast %89 : vector<1x8x1xf32> to vector<8x1xf32>
      %91 = vector.shape_cast %88 : vector<8x1xf32> to vector<1x8x1xf32>
      tpu.vector_store %arg8[%c1_64, %c0_65, %c0_66], %91 {strides = array<i32>} : memref<4x8x1xf32, #tpu.memory_space<vmem>>, vector<1x8x1xf32>,
      %c1_67 = arith.constant 1 : index
      %c0_68 = arith.constant 0 : index
      %c0_69 = arith.constant 0 : index
      %92 = vector.load %arg9[%c1_67, %c0_68, %c0_69] : memref<4x8x8xf32, #tpu.memory_space<vmem>>, vector<1x8x8xf32>
      %93 = vector.shape_cast %92 : vector<1x8x8xf32> to vector<8x8xf32>
      %94 = vector.broadcast %79 : vector<8x1xf32> to vector<8x8xf32>
      %95 = arith.mulf %94, %93 : vector<8x8xf32>
      %96 = arith.truncf %82 : vector<8x8xf32> to vector<8x8xbf16>
      %c0_70 = arith.constant 0 : index
      %c0_71 = arith.constant 0 : index
      %c0_72 = arith.constant 0 : index
      %c1_73 = arith.constant 1 : index
      %c0_74 = arith.constant 0 : index
      %97 = vector.load %arg5[%c0_70, %c0_71, %c0_72, %c1_73, %c0_74] : memref<1x8x1x4x8xbf16, #tpu.memory_space<vmem>>, vector<1x8x1x1x8xbf16>
      %98 = vector.shape_cast %97 : vector<1x8x1x1x8xbf16> to vector<8x8xbf16>
      %cst_75 = arith.constant dense<0.000000e+00> : vector<8x8xf32>
      %99 = tpu.matmul %96, %98, %cst_75 {dimension_numbers = #tpu.dot_dimension_numbers<[1], [0], [0], [1], [0, 0, 1, 1], [], []>} : vector<8x8xbf16>, vector<8x8xbf16>, vector<8x8xf32> -> vector<8x8xf32>
      %100 = arith.addf %95, %99 : vector<8x8xf32>
      %c1_76 = arith.constant 1 : index
      %c0_77 = arith.constant 0 : index
      %c0_78 = arith.constant 0 : index
      %101 = vector.load %arg9[%c1_76, %c0_77, %c0_78] : memref<4x8x8xf32, #tpu.memory_space<vmem>>, vector<1x8x8xf32>
      %102 = vector.shape_cast %101 : vector<1x8x8xf32> to vector<8x8xf32>
      %103 = vector.shape_cast %100 : vector<8x8xf32> to vector<1x8x8xf32>
      tpu.vector_store %arg9[%c1_76, %c0_77, %c0_78], %103 {strides = array<i32>} : memref<4x8x8xf32, #tpu.memory_space<vmem>>, vector<1x8x8xf32>,
      %c1_79 = arith.constant 1 : index
      %c0_80 = arith.constant 0 : index
      %c0_81 = arith.constant 0 : index
      %104 = vector.load %arg7[%c1_79, %c0_80, %c0_81] : memref<4x8x1xf32, #tpu.memory_space<vmem>>, vector<1x8x1xf32>
      %105 = vector.shape_cast %104 : vector<1x8x1xf32> to vector<8x1xf32>
      %106 = vector.shape_cast %77 : vector<8x1xf32> to vector<1x8x1xf32>
      tpu.vector_store %arg7[%c1_79, %c0_80, %c0_81], %106 {strides = array<i32>} : memref<4x8x1xf32, #tpu.memory_space<vmem>>, vector<1x8x1xf32>,
      %c0_82 = arith.constant 0 : index
      %c0_83 = arith.constant 0 : index
      %c0_84 = arith.constant 0 : index
      %c2 = arith.constant 2 : index
      %c0_85 = arith.constant 0 : index
      %107 = vector.load %arg3[%c0_82, %c0_83, %c0_84, %c2, %c0_85] : memref<1x8x1x4x8xbf16, #tpu.memory_space<vmem>>, vector<1x8x1x1x8xbf16>
      %108 = vector.shape_cast %107 : vector<1x8x1x1x8xbf16> to vector<8x8xbf16>
      %c0_86 = arith.constant 0 : index
      %c0_87 = arith.constant 0 : index
      %c0_88 = arith.constant 0 : index
      %c2_89 = arith.constant 2 : index
      %c0_90 = arith.constant 0 : index
      %109 = vector.load %arg4[%c0_86, %c0_87, %c0_88, %c2_89, %c0_90] : memref<1x8x1x4x8xbf16, #tpu.memory_space<vmem>>, vector<1x8x1x1x8xbf16>
      %110 = vector.shape_cast %109 : vector<1x8x1x1x8xbf16> to vector<8x8xbf16>
      %cst_91 = arith.constant dense<0.000000e+00> : vector<8x8xf32>
      %111 = tpu.matmul %108, %110, %cst_91 {dimension_numbers = #tpu.dot_dimension_numbers<[1], [1], [0], [0], [0, 0, 1, 0], [], []>} : vector<8x8xbf16>, vector<8x8xbf16>, vector<8x8xf32> -> vector<8x8xf32>
      %cst_92 = arith.constant 0.353553385 : f32
      %112 = vector.broadcast %cst_92 : f32 to vector<8x8xf32>
      %113 = arith.mulf %111, %112 : vector<8x8xf32>
      %cst_93 = arith.constant -1.000000e+09 : f32
      %114 = vector.broadcast %cst_93 : f32 to vector<8x8xf32>
      %115 = arith.select %20, %113, %114 : vector<8x8xi1>, vector<8x8xf32>
      %c2_94 = arith.constant 2 : index
      %c0_95 = arith.constant 0 : index
      %c0_96 = arith.constant 0 : index
      %116 = vector.load %arg7[%c2_94, %c0_95, %c0_96] : memref<4x8x1xf32, #tpu.memory_space<vmem>>, vector<1x8x1xf32>
      %117 = vector.shape_cast %116 : vector<1x8x1xf32> to vector<8x1xf32>
      %cst_97 = arith.constant dense<0xFF800000> : vector<8xf32>
      %118 = vector.multi_reduction <maximumf>, %115, %cst_97 [1] : vector<8x8xf32> to vector<8xf32>
      %119 = vector.shape_cast %118 : vector<8xf32> to vector<8x1xf32>
      %120 = arith.maximumf %117, %119 : vector<8x1xf32>
      %121 = arith.subf %117, %120 : vector<8x1xf32>
      %122 = math.exp %121 : vector<8x1xf32>
      %123 = vector.broadcast %120 : vector<8x1xf32> to vector<8x8xf32>
      %124 = arith.subf %115, %123 : vector<8x8xf32>
      %125 = math.exp %124 : vector<8x8xf32>
      %c2_98 = arith.constant 2 : index
      %c0_99 = arith.constant 0 : index
      %c0_100 = arith.constant 0 : index
      %126 = vector.load %arg8[%c2_98, %c0_99, %c0_100] : memref<4x8x1xf32, #tpu.memory_space<vmem>>, vector<1x8x1xf32>
      %127 = vector.shape_cast %126 : vector<1x8x1xf32> to vector<8x1xf32>
      %128 = arith.mulf %122, %127 : vector<8x1xf32>
      %cst_101 = arith.constant dense<0.000000e+00> : vector<8xf32>
      %129 = vector.multi_reduction <add>, %125, %cst_101 [1] : vector<8x8xf32> to vector<8xf32>
      %130 = vector.shape_cast %129 : vector<8xf32> to vector<8x1xf32>
      %131 = arith.addf %128, %130 : vector<8x1xf32>
      %c2_102 = arith.constant 2 : index
      %c0_103 = arith.constant 0 : index
      %c0_104 = arith.constant 0 : index
      %132 = vector.load %arg8[%c2_102, %c0_103, %c0_104] : memref<4x8x1xf32, #tpu.memory_space<vmem>>, vector<1x8x1xf32>
      %133 = vector.shape_cast %132 : vector<1x8x1xf32> to vector<8x1xf32>
      %134 = vector.shape_cast %131 : vector<8x1xf32> to vector<1x8x1xf32>
      tpu.vector_store %arg8[%c2_102, %c0_103, %c0_104], %134 {strides = array<i32>} : memref<4x8x1xf32, #tpu.memory_space<vmem>>, vector<1x8x1xf32>,
      %c2_105 = arith.constant 2 : index
      %c0_106 = arith.constant 0 : index
      %c0_107 = arith.constant 0 : index
      %135 = vector.load %arg9[%c2_105, %c0_106, %c0_107] : memref<4x8x8xf32, #tpu.memory_space<vmem>>, vector<1x8x8xf32>
      %136 = vector.shape_cast %135 : vector<1x8x8xf32> to vector<8x8xf32>
      %137 = vector.broadcast %122 : vector<8x1xf32> to vector<8x8xf32>
      %138 = arith.mulf %137, %136 : vector<8x8xf32>
      %139 = arith.truncf %125 : vector<8x8xf32> to vector<8x8xbf16>
      %c0_108 = arith.constant 0 : index
      %c0_109 = arith.constant 0 : index
      %c0_110 = arith.constant 0 : index
      %c2_111 = arith.constant 2 : index
      %c0_112 = arith.constant 0 : index
      %140 = vector.load %arg5[%c0_108, %c0_109, %c0_110, %c2_111, %c0_112] : memref<1x8x1x4x8xbf16, #tpu.memory_space<vmem>>, vector<1x8x1x1x8xbf16>
      %141 = vector.shape_cast %140 : vector<1x8x1x1x8xbf16> to vector<8x8xbf16>
      %cst_113 = arith.constant dense<0.000000e+00> : vector<8x8xf32>
      %142 = tpu.matmul %139, %141, %cst_113 {dimension_numbers = #tpu.dot_dimension_numbers<[1], [0], [0], [1], [0, 0, 1, 1], [], []>} : vector<8x8xbf16>, vector<8x8xbf16>, vector<8x8xf32> -> vector<8x8xf32>
      %143 = arith.addf %138, %142 : vector<8x8xf32>
      %c2_114 = arith.constant 2 : index
      %c0_115 = arith.constant 0 : index
      %c0_116 = arith.constant 0 : index
      %144 = vector.load %arg9[%c2_114, %c0_115, %c0_116] : memref<4x8x8xf32, #tpu.memory_space<vmem>>, vector<1x8x8xf32>
      %145 = vector.shape_cast %144 : vector<1x8x8xf32> to vector<8x8xf32>
      %146 = vector.shape_cast %143 : vector<8x8xf32> to vector<1x8x8xf32>
      tpu.vector_store %arg9[%c2_114, %c0_115, %c0_116], %146 {strides = array<i32>} : memref<4x8x8xf32, #tpu.memory_space<vmem>>, vector<1x8x8xf32>,
      %c2_117 = arith.constant 2 : index
      %c0_118 = arith.constant 0 : index
      %c0_119 = arith.constant 0 : index
      %147 = vector.load %arg7[%c2_117, %c0_118, %c0_119] : memref<4x8x1xf32, #tpu.memory_space<vmem>>, vector<1x8x1xf32>
      %148 = vector.shape_cast %147 : vector<1x8x1xf32> to vector<8x1xf32>
      %149 = vector.shape_cast %120 : vector<8x1xf32> to vector<1x8x1xf32>
      tpu.vector_store %arg7[%c2_117, %c0_118, %c0_119], %149 {strides = array<i32>} : memref<4x8x1xf32, #tpu.memory_space<vmem>>, vector<1x8x1xf32>,
      %c0_120 = arith.constant 0 : index
      %c0_121 = arith.constant 0 : index
      %c0_122 = arith.constant 0 : index
      %c3 = arith.constant 3 : index
      %c0_123 = arith.constant 0 : index
      %150 = vector.load %arg3[%c0_120, %c0_121, %c0_122, %c3, %c0_123] : memref<1x8x1x4x8xbf16, #tpu.memory_space<vmem>>, vector<1x8x1x1x8xbf16>
      %151 = vector.shape_cast %150 : vector<1x8x1x1x8xbf16> to vector<8x8xbf16>
      %c0_124 = arith.constant 0 : index
      %c0_125 = arith.constant 0 : index
      %c0_126 = arith.constant 0 : index
      %c3_127 = arith.constant 3 : index
      %c0_128 = arith.constant 0 : index
      %152 = vector.load %arg4[%c0_124, %c0_125, %c0_126, %c3_127, %c0_128] : memref<1x8x1x4x8xbf16, #tpu.memory_space<vmem>>, vector<1x8x1x1x8xbf16>
      %153 = vector.shape_cast %152 : vector<1x8x1x1x8xbf16> to vector<8x8xbf16>
      %cst_129 = arith.constant dense<0.000000e+00> : vector<8x8xf32>
      %154 = tpu.matmul %151, %153, %cst_129 {dimension_numbers = #tpu.dot_dimension_numbers<[1], [1], [0], [0], [0, 0, 1, 0], [], []>} : vector<8x8xbf16>, vector<8x8xbf16>, vector<8x8xf32> -> vector<8x8xf32>
      %cst_130 = arith.constant 0.353553385 : f32
      %155 = vector.broadcast %cst_130 : f32 to vector<8x8xf32>
      %156 = arith.mulf %154, %155 : vector<8x8xf32>
      %cst_131 = arith.constant -1.000000e+09 : f32
      %157 = vector.broadcast %cst_131 : f32 to vector<8x8xf32>
      %158 = arith.select %20, %156, %157 : vector<8x8xi1>, vector<8x8xf32>
      %c3_132 = arith.constant 3 : index
      %c0_133 = arith.constant 0 : index
      %c0_134 = arith.constant 0 : index
      %159 = vector.load %arg7[%c3_132, %c0_133, %c0_134] : memref<4x8x1xf32, #tpu.memory_space<vmem>>, vector<1x8x1xf32>
      %160 = vector.shape_cast %159 : vector<1x8x1xf32> to vector<8x1xf32>
      %cst_135 = arith.constant dense<0xFF800000> : vector<8xf32>
      %161 = vector.multi_reduction <maximumf>, %158, %cst_135 [1] : vector<8x8xf32> to vector<8xf32>
      %162 = vector.shape_cast %161 : vector<8xf32> to vector<8x1xf32>
      %163 = arith.maximumf %160, %162 : vector<8x1xf32>
      %164 = arith.subf %160, %163 : vector<8x1xf32>
      %165 = math.exp %164 : vector<8x1xf32>
      %166 = vector.broadcast %163 : vector<8x1xf32> to vector<8x8xf32>
      %167 = arith.subf %158, %166 : vector<8x8xf32>
      %168 = math.exp %167 : vector<8x8xf32>
      %c3_136 = arith.constant 3 : index
      %c0_137 = arith.constant 0 : index
      %c0_138 = arith.constant 0 : index
      %169 = vector.load %arg8[%c3_136, %c0_137, %c0_138] : memref<4x8x1xf32, #tpu.memory_space<vmem>>, vector<1x8x1xf32>
      %170 = vector.shape_cast %169 : vector<1x8x1xf32> to vector<8x1xf32>
      %171 = arith.mulf %165, %170 : vector<8x1xf32>
      %cst_139 = arith.constant dense<0.000000e+00> : vector<8xf32>
      %172 = vector.multi_reduction <add>, %168, %cst_139 [1] : vector<8x8xf32> to vector<8xf32>
      %173 = vector.shape_cast %172 : vector<8xf32> to vector<8x1xf32>
      %174 = arith.addf %171, %173 : vector<8x1xf32>
      %c3_140 = arith.constant 3 : index
      %c0_141 = arith.constant 0 : index
      %c0_142 = arith.constant 0 : index
      %175 = vector.load %arg8[%c3_140, %c0_141, %c0_142] : memref<4x8x1xf32, #tpu.memory_space<vmem>>, vector<1x8x1xf32>
      %176 = vector.shape_cast %175 : vector<1x8x1xf32> to vector<8x1xf32>
      %177 = vector.shape_cast %174 : vector<8x1xf32> to vector<1x8x1xf32>
      tpu.vector_store %arg8[%c3_140, %c0_141, %c0_142], %177 {strides = array<i32>} : memref<4x8x1xf32, #tpu.memory_space<vmem>>, vector<1x8x1xf32>,
      %c3_143 = arith.constant 3 : index
      %c0_144 = arith.constant 0 : index
      %c0_145 = arith.constant 0 : index
      %178 = vector.load %arg9[%c3_143, %c0_144, %c0_145] : memref<4x8x8xf32, #tpu.memory_space<vmem>>, vector<1x8x8xf32>
      %179 = vector.shape_cast %178 : vector<1x8x8xf32> to vector<8x8xf32>
      %180 = vector.broadcast %165 : vector<8x1xf32> to vector<8x8xf32>
      %181 = arith.mulf %180, %179 : vector<8x8xf32>
      %182 = arith.truncf %168 : vector<8x8xf32> to vector<8x8xbf16>
      %c0_146 = arith.constant 0 : index
      %c0_147 = arith.constant 0 : index
      %c0_148 = arith.constant 0 : index
      %c3_149 = arith.constant 3 : index
      %c0_150 = arith.constant 0 : index
      %183 = vector.load %arg5[%c0_146, %c0_147, %c0_148, %c3_149, %c0_150] : memref<1x8x1x4x8xbf16, #tpu.memory_space<vmem>>, vector<1x8x1x1x8xbf16>
      %184 = vector.shape_cast %183 : vector<1x8x1x1x8xbf16> to vector<8x8xbf16>
      %cst_151 = arith.constant dense<0.000000e+00> : vector<8x8xf32>
      %185 = tpu.matmul %182, %184, %cst_151 {dimension_numbers = #tpu.dot_dimension_numbers<[1], [0], [0], [1], [0, 0, 1, 1], [], []>} : vector<8x8xbf16>, vector<8x8xbf16>, vector<8x8xf32> -> vector<8x8xf32>
      %186 = arith.addf %181, %185 : vector<8x8xf32>
      %c3_152 = arith.constant 3 : index
      %c0_153 = arith.constant 0 : index
      %c0_154 = arith.constant 0 : index
      %187 = vector.load %arg9[%c3_152, %c0_153, %c0_154] : memref<4x8x8xf32, #tpu.memory_space<vmem>>, vector<1x8x8xf32>
      %188 = vector.shape_cast %187 : vector<1x8x8xf32> to vector<8x8xf32>
      %189 = vector.shape_cast %186 : vector<8x8xf32> to vector<1x8x8xf32>
      tpu.vector_store %arg9[%c3_152, %c0_153, %c0_154], %189 {strides = array<i32>} : memref<4x8x8xf32, #tpu.memory_space<vmem>>, vector<1x8x8xf32>,
      %c3_155 = arith.constant 3 : index
      %c0_156 = arith.constant 0 : index
      %c0_157 = arith.constant 0 : index
      %190 = vector.load %arg7[%c3_155, %c0_156, %c0_157] : memref<4x8x1xf32, #tpu.memory_space<vmem>>, vector<1x8x1xf32>
      %191 = vector.shape_cast %190 : vector<1x8x1xf32> to vector<8x1xf32>
      %192 = vector.shape_cast %163 : vector<8x1xf32> to vector<1x8x1xf32>
      tpu.vector_store %arg7[%c3_155, %c0_156, %c0_157], %192 {strides = array<i32>} : memref<4x8x1xf32, #tpu.memory_space<vmem>>, vector<1x8x1xf32>,
    } else {
    }
    %c0_i32_3 = arith.constant 0 : i32
    %9 = arith.cmpi eq, %arg2, %c0_i32_3 : i32
    %10 = arith.extui %9 : i1 to i32
    %c0_i32_4 = arith.constant 0 : i32
    %11 = arith.cmpi ne, %10, %c0_i32_4 : i32
    scf.if %11 {
      %c0 = arith.constant 0 : index
      %c0_5 = arith.constant 0 : index
      %c0_6 = arith.constant 0 : index
      %12 = vector.load %arg8[%c0, %c0_5, %c0_6] : memref<4x8x1xf32, #tpu.memory_space<vmem>>, vector<1x8x1xf32>
      %13 = vector.shape_cast %12 : vector<1x8x1xf32> to vector<8x1xf32>
      %14 = tpu.reciprocal %13 {approx = true} : vector<8x1xf32> -> vector<8x1xf32>
      %15 = arith.mulf %13, %14 : vector<8x1xf32>
      %cst = arith.constant 2.000000e+00 : f32
      %16 = vector.broadcast %cst : f32 to vector<8x1xf32>
      %17 = arith.subf %16, %15 : vector<8x1xf32>
      %18 = arith.mulf %14, %17 : vector<8x1xf32>
      %c0_7 = arith.constant 0 : index
      %c0_8 = arith.constant 0 : index
      %c0_9 = arith.constant 0 : index
      %19 = vector.load %arg9[%c0_7, %c0_8, %c0_9] : memref<4x8x8xf32, #tpu.memory_space<vmem>>, vector<1x8x8xf32>
      %20 = vector.shape_cast %19 : vector<1x8x8xf32> to vector<8x8xf32>
      %21 = vector.broadcast %18 : vector<8x1xf32> to vector<8x8xf32>
      %22 = arith.mulf %20, %21 : vector<8x8xf32>
      %23 = arith.truncf %22 : vector<8x8xf32> to vector<8x8xbf16>
      %c0_10 = arith.constant 0 : index
      %c0_11 = arith.constant 0 : index
      %c0_12 = arith.constant 0 : index
      %c0_13 = arith.constant 0 : index
      %24 = vector.load %arg6[%c0_10, %c0_11, %c0_12, %c0_13] : memref<1x8x4x8xbf16, #tpu.memory_space<vmem>>, vector<1x8x1x8xbf16>
      %25 = vector.shape_cast %24 : vector<1x8x1x8xbf16> to vector<8x8xbf16>
      %26 = vector.shape_cast %23 : vector<8x8xbf16> to vector<1x8x1x8xbf16>
      tpu.vector_store %arg6[%c0_10, %c0_11, %c0_12, %c0_13], %26 {strides = array<i32>} : memref<1x8x4x8xbf16, #tpu.memory_space<vmem>>, vector<1x8x1x8xbf16>,
      %c1 = arith.constant 1 : index
      %c0_14 = arith.constant 0 : index
      %c0_15 = arith.constant 0 : index
      %27 = vector.load %arg8[%c1, %c0_14, %c0_15] : memref<4x8x1xf32, #tpu.memory_space<vmem>>, vector<1x8x1xf32>
      %28 = vector.shape_cast %27 : vector<1x8x1xf32> to vector<8x1xf32>
      %29 = tpu.reciprocal %28 {approx = true} : vector<8x1xf32> -> vector<8x1xf32>
      %30 = arith.mulf %28, %29 : vector<8x1xf32>
      %cst_16 = arith.constant 2.000000e+00 : f32
      %31 = vector.broadcast %cst_16 : f32 to vector<8x1xf32>
      %32 = arith.subf %31, %30 : vector<8x1xf32>
      %33 = arith.mulf %29, %32 : vector<8x1xf32>
      %c1_17 = arith.constant 1 : index
      %c0_18 = arith.constant 0 : index
      %c0_19 = arith.constant 0 : index
      %34 = vector.load %arg9[%c1_17, %c0_18, %c0_19] : memref<4x8x8xf32, #tpu.memory_space<vmem>>, vector<1x8x8xf32>
      %35 = vector.shape_cast %34 : vector<1x8x8xf32> to vector<8x8xf32>
      %36 = vector.broadcast %33 : vector<8x1xf32> to vector<8x8xf32>
      %37 = arith.mulf %35, %36 : vector<8x8xf32>
      %38 = arith.truncf %37 : vector<8x8xf32> to vector<8x8xbf16>
      %c0_20 = arith.constant 0 : index
      %c0_21 = arith.constant 0 : index
      %c1_22 = arith.constant 1 : index
      %c0_23 = arith.constant 0 : index
      %39 = vector.load %arg6[%c0_20, %c0_21, %c1_22, %c0_23] : memref<1x8x4x8xbf16, #tpu.memory_space<vmem>>, vector<1x8x1x8xbf16>
      %40 = vector.shape_cast %39 : vector<1x8x1x8xbf16> to vector<8x8xbf16>
      %41 = vector.shape_cast %38 : vector<8x8xbf16> to vector<1x8x1x8xbf16>
      tpu.vector_store %arg6[%c0_20, %c0_21, %c1_22, %c0_23], %41 {strides = array<i32>} : memref<1x8x4x8xbf16, #tpu.memory_space<vmem>>, vector<1x8x1x8xbf16>,
      %c2 = arith.constant 2 : index
      %c0_24 = arith.constant 0 : index
      %c0_25 = arith.constant 0 : index
      %42 = vector.load %arg8[%c2, %c0_24, %c0_25] : memref<4x8x1xf32, #tpu.memory_space<vmem>>, vector<1x8x1xf32>
      %43 = vector.shape_cast %42 : vector<1x8x1xf32> to vector<8x1xf32>
      %44 = tpu.reciprocal %43 {approx = true} : vector<8x1xf32> -> vector<8x1xf32>
      %45 = arith.mulf %43, %44 : vector<8x1xf32>
      %cst_26 = arith.constant 2.000000e+00 : f32
      %46 = vector.broadcast %cst_26 : f32 to vector<8x1xf32>
      %47 = arith.subf %46, %45 : vector<8x1xf32>
      %48 = arith.mulf %44, %47 : vector<8x1xf32>
      %c2_27 = arith.constant 2 : index
      %c0_28 = arith.constant 0 : index
      %c0_29 = arith.constant 0 : index
      %49 = vector.load %arg9[%c2_27, %c0_28, %c0_29] : memref<4x8x8xf32, #tpu.memory_space<vmem>>, vector<1x8x8xf32>
      %50 = vector.shape_cast %49 : vector<1x8x8xf32> to vector<8x8xf32>
      %51 = vector.broadcast %48 : vector<8x1xf32> to vector<8x8xf32>
      %52 = arith.mulf %50, %51 : vector<8x8xf32>
      %53 = arith.truncf %52 : vector<8x8xf32> to vector<8x8xbf16>
      %c0_30 = arith.constant 0 : index
      %c0_31 = arith.constant 0 : index
      %c2_32 = arith.constant 2 : index
      %c0_33 = arith.constant 0 : index
      %54 = vector.load %arg6[%c0_30, %c0_31, %c2_32, %c0_33] : memref<1x8x4x8xbf16, #tpu.memory_space<vmem>>, vector<1x8x1x8xbf16>
      %55 = vector.shape_cast %54 : vector<1x8x1x8xbf16> to vector<8x8xbf16>
      %56 = vector.shape_cast %53 : vector<8x8xbf16> to vector<1x8x1x8xbf16>
      tpu.vector_store %arg6[%c0_30, %c0_31, %c2_32, %c0_33], %56 {strides = array<i32>} : memref<1x8x4x8xbf16, #tpu.memory_space<vmem>>, vector<1x8x1x8xbf16>,
      %c3 = arith.constant 3 : index
      %c0_34 = arith.constant 0 : index
      %c0_35 = arith.constant 0 : index
      %57 = vector.load %arg8[%c3, %c0_34, %c0_35] : memref<4x8x1xf32, #tpu.memory_space<vmem>>, vector<1x8x1xf32>
      %58 = vector.shape_cast %57 : vector<1x8x1xf32> to vector<8x1xf32>
      %59 = tpu.reciprocal %58 {approx = true} : vector<8x1xf32> -> vector<8x1xf32>
      %60 = arith.mulf %58, %59 : vector<8x1xf32>
      %cst_36 = arith.constant 2.000000e+00 : f32
      %61 = vector.broadcast %cst_36 : f32 to vector<8x1xf32>
      %62 = arith.subf %61, %60 : vector<8x1xf32>
      %63 = arith.mulf %59, %62 : vector<8x1xf32>
      %c3_37 = arith.constant 3 : index
      %c0_38 = arith.constant 0 : index
      %c0_39 = arith.constant 0 : index
      %64 = vector.load %arg9[%c3_37, %c0_38, %c0_39] : memref<4x8x8xf32, #tpu.memory_space<vmem>>, vector<1x8x8xf32>
      %65 = vector.shape_cast %64 : vector<1x8x8xf32> to vector<8x8xf32>
      %66 = vector.broadcast %63 : vector<8x1xf32> to vector<8x8xf32>
      %67 = arith.mulf %65, %66 : vector<8x8xf32>
      %68 = arith.truncf %67 : vector<8x8xf32> to vector<8x8xbf16>
      %c0_40 = arith.constant 0 : index
      %c0_41 = arith.constant 0 : index
      %c3_42 = arith.constant 3 : index
      %c0_43 = arith.constant 0 : index
      %69 = vector.load %arg6[%c0_40, %c0_41, %c3_42, %c0_43] : memref<1x8x4x8xbf16, #tpu.memory_space<vmem>>, vector<1x8x1x8xbf16>
      %70 = vector.shape_cast %69 : vector<1x8x1x8xbf16> to vector<8x8xbf16>
      %71 = vector.shape_cast %68 : vector<8x8xbf16> to vector<1x8x1x8xbf16>
      tpu.vector_store %arg6[%c0_40, %c0_41, %c3_42, %c0_43], %71 {strides = array<i32>} : memref<1x8x4x8xbf16, #tpu.memory_space<vmem>>, vector<1x8x1x8xbf16>,
    } else {
    }
    return
  }
  func.func @transform_0(%arg0: i32, %arg1: i32, %arg2: i32) -> (i32, i32, i32, i32, i32) {
    %c0_i32 = arith.constant 0 : i32
    %c0_i32_0 = arith.constant 0 : i32
    %c0_i32_1 = arith.constant 0 : i32
    %c0_i32_2 = arith.constant 0 : i32
    return %arg0, %arg1, %c0_i32, %c0_i32_0, %c0_i32_1 : i32, i32, i32, i32, i32
  }
  func.func @transform_1(%arg0: i32, %arg1: i32, %arg2: i32) -> (i32, i32, i32, i32, i32) {
    %c1_i32 = arith.constant 1 : i32
    %c0_i32 = arith.constant 0 : i32
    %c0_i32_0 = arith.constant 0 : i32
    %c0_i32_1 = arith.constant 0 : i32
    return %arg0, %arg2, %c1_i32, %c0_i32, %c0_i32_0 : i32, i32, i32, i32, i32
  }
  func.func @transform_2(%arg0: i32, %arg1: i32, %arg2: i32) -> (i32, i32, i32, i32, i32) {
    %c2_i32 = arith.constant 2 : i32
    %c0_i32 = arith.constant 0 : i32
    %c0_i32_0 = arith.constant 0 : i32
    %c0_i32_1 = arith.constant 0 : i32
    return %arg0, %arg2, %c2_i32, %c0_i32, %c0_i32_0 : i32, i32, i32, i32, i32
  }
  func.func @transform_3(%arg0: i32, %arg1: i32, %arg2: i32) -> (i32, i32, i32, i32) {
    %c0_i32 = arith.constant 0 : i32
    %c0_i32_0 = arith.constant 0 : i32
    %c0_i32_1 = arith.constant 0 : i32
    return %arg0, %arg1, %c0_i32, %c0_i32_0 : i32, i32, i32, i32
  }
}

module attributes {stable_mosaic.version = 11 : i64} {
  func.func @_linear_add_ln_kernel(%arg0: i32, %arg1: i32, %arg2: memref<16x32xbf16, #tpu.memory_space<vmem>>, %arg3: memref<32x32xbf16, #tpu.memory_space<vmem>>, %arg4: memref<1x32xf32, #tpu.memory_space<vmem>>, %arg5: memref<16x32xbf16, #tpu.memory_space<vmem>>, %arg6: memref<1x32xf32, #tpu.memory_space<vmem>>, %arg7: memref<1x32xf32, #tpu.memory_space<vmem>>, %arg8: memref<16x32xbf16, #tpu.memory_space<vmem>>, %arg9: memref<16x32xf32, #tpu.memory_space<vmem>>) attributes {dimension_semantics = [#tpu.dimension_semantics<parallel>, #tpu.dimension_semantics<arbitrary>], iteration_bounds = array<i64: 1, 1>, scalar_prefetch = 0 : i64, scratch_operands = 1 : i64, tpu.core_type = #tpu.core_type<tc>, window_params = [{transform_indices = @transform_0, window_bounds = array<i64: 16, 32>}, {transform_indices = @transform_1, window_bounds = array<i64: 32, 32>}, {pipeline_mode = #tpu.pipeline_mode<synchronous>, transform_indices = @transform_2, window_bounds = array<i64: 1, 32>}, {transform_indices = @transform_3, window_bounds = array<i64: 16, 32>}, {pipeline_mode = #tpu.pipeline_mode<synchronous>, transform_indices = @transform_4, window_bounds = array<i64: 1, 32>}, {pipeline_mode = #tpu.pipeline_mode<synchronous>, transform_indices = @transform_5, window_bounds = array<i64: 1, 32>}, {transform_indices = @transform_6, window_bounds = array<i64: 16, 32>}]} {
    %c0_i32 = arith.constant 0 : i32
    %0 = arith.cmpi eq, %arg1, %c0_i32 : i32
    %1 = arith.extui %0 : i1 to i32
    %c0_i32_0 = arith.constant 0 : i32
    %2 = arith.cmpi ne, %1, %c0_i32_0 : i32
    scf.if %2 {
      %cst_10 = arith.constant 0.000000e+00 : f32
      %12 = vector.broadcast %cst_10 : f32 to vector<16x32xf32>
      %c0_11 = arith.constant 0 : index
      %c0_12 = arith.constant 0 : index
      %13 = vector.load %arg9[%c0_11, %c0_12] : memref<16x32xf32, #tpu.memory_space<vmem>>, vector<16x32xf32>
      tpu.vector_store %arg9[%c0_11, %c0_12], %12 {strides = array<i32>} : memref<16x32xf32, #tpu.memory_space<vmem>>, vector<16x32xf32>,
    } else {
    }
    %c0 = arith.constant 0 : index
    %c0_1 = arith.constant 0 : index
    %3 = vector.load %arg9[%c0, %c0_1] : memref<16x32xf32, #tpu.memory_space<vmem>>, vector<16x32xf32>
    %c0_2 = arith.constant 0 : index
    %c0_3 = arith.constant 0 : index
    %4 = vector.load %arg2[%c0_2, %c0_3] : memref<16x32xbf16, #tpu.memory_space<vmem>>, vector<16x32xbf16>
    %c0_4 = arith.constant 0 : index
    %c0_5 = arith.constant 0 : index
    %5 = vector.load %arg3[%c0_4, %c0_5] : memref<32x32xbf16, #tpu.memory_space<vmem>>, vector<32x32xbf16>
    %cst = arith.constant dense<0.000000e+00> : vector<16x32xf32>
    %6 = tpu.matmul %4, %5, %cst {dimension_numbers = #tpu.dot_dimension_numbers<[1], [0], [0], [1], [0, 0, 1, 1], [], []>} : vector<16x32xbf16>, vector<32x32xbf16>, vector<16x32xf32> -> vector<16x32xf32>
    %7 = arith.addf %3, %6 : vector<16x32xf32>
    %c0_6 = arith.constant 0 : index
    %c0_7 = arith.constant 0 : index
    %8 = vector.load %arg9[%c0_6, %c0_7] : memref<16x32xf32, #tpu.memory_space<vmem>>, vector<16x32xf32>
    tpu.vector_store %arg9[%c0_6, %c0_7], %7 {strides = array<i32>} : memref<16x32xf32, #tpu.memory_space<vmem>>, vector<16x32xf32>,
    %c0_i32_8 = arith.constant 0 : i32
    %9 = arith.cmpi eq, %arg1, %c0_i32_8 : i32
    %10 = arith.extui %9 : i1 to i32
    %c0_i32_9 = arith.constant 0 : i32
    %11 = arith.cmpi ne, %10, %c0_i32_9 : i32
    scf.if %11 {
      %c0_10 = arith.constant 0 : index
      %c0_11 = arith.constant 0 : index
      %12 = vector.load %arg9[%c0_10, %c0_11] : memref<16x32xf32, #tpu.memory_space<vmem>>, vector<16x32xf32>
      %c0_12 = arith.constant 0 : index
      %c0_13 = arith.constant 0 : index
      %13 = vector.load %arg4[%c0_12, %c0_13] : memref<1x32xf32, #tpu.memory_space<vmem>>, vector<1x32xf32>
      %14 = vector.broadcast %13 : vector<1x32xf32> to vector<16x32xf32>
      %15 = arith.addf %12, %14 : vector<16x32xf32>
      %c0_14 = arith.constant 0 : index
      %c0_15 = arith.constant 0 : index
      %16 = vector.load %arg5[%c0_14, %c0_15] : memref<16x32xbf16, #tpu.memory_space<vmem>>, vector<16x32xbf16>
      %17 = arith.extf %16 : vector<16x32xbf16> to vector<16x32xf32>
      %18 = arith.addf %15, %17 : vector<16x32xf32>
      %cst_16 = arith.constant dense<0.000000e+00> : vector<16xf32>
      %19 = vector.multi_reduction <add>, %18, %cst_16 [1] : vector<16x32xf32> to vector<16xf32>
      %20 = vector.shape_cast %19 : vector<16xf32> to vector<16x1xf32>
      %cst_17 = arith.constant 3.200000e+01 : f32
      %21 = vector.broadcast %cst_17 : f32 to vector<16x1xf32>
      %22 = arith.divf %20, %21 : vector<16x1xf32>
      %23 = vector.broadcast %22 : vector<16x1xf32> to vector<16x32xf32>
      %24 = arith.subf %18, %23 : vector<16x32xf32>
      %25 = arith.mulf %24, %24 : vector<16x32xf32>
      %cst_18 = arith.constant dense<0.000000e+00> : vector<16xf32>
      %26 = vector.multi_reduction <add>, %25, %cst_18 [1] : vector<16x32xf32> to vector<16xf32>
      %27 = vector.shape_cast %26 : vector<16xf32> to vector<16x1xf32>
      %cst_19 = arith.constant 3.200000e+01 : f32
      %28 = vector.broadcast %cst_19 : f32 to vector<16x1xf32>
      %29 = arith.divf %27, %28 : vector<16x1xf32>
      %30 = vector.broadcast %22 : vector<16x1xf32> to vector<16x32xf32>
      %31 = arith.subf %18, %30 : vector<16x32xf32>
      %cst_20 = arith.constant 9.99999996E-13 : f32
      %32 = vector.broadcast %cst_20 : f32 to vector<16x1xf32>
      %33 = arith.addf %29, %32 : vector<16x1xf32>
      %34 = math.rsqrt %33 : vector<16x1xf32>
      %35 = vector.broadcast %34 : vector<16x1xf32> to vector<16x32xf32>
      %36 = arith.mulf %31, %35 : vector<16x32xf32>
      %c0_21 = arith.constant 0 : index
      %c0_22 = arith.constant 0 : index
      %37 = vector.load %arg6[%c0_21, %c0_22] : memref<1x32xf32, #tpu.memory_space<vmem>>, vector<1x32xf32>
      %38 = vector.broadcast %37 : vector<1x32xf32> to vector<16x32xf32>
      %39 = arith.mulf %36, %38 : vector<16x32xf32>
      %c0_23 = arith.constant 0 : index
      %c0_24 = arith.constant 0 : index
      %40 = vector.load %arg7[%c0_23, %c0_24] : memref<1x32xf32, #tpu.memory_space<vmem>>, vector<1x32xf32>
      %41 = vector.broadcast %40 : vector<1x32xf32> to vector<16x32xf32>
      %42 = arith.addf %39, %41 : vector<16x32xf32>
      %43 = arith.truncf %42 : vector<16x32xf32> to vector<16x32xbf16>
      %c0_25 = arith.constant 0 : index
      %c0_26 = arith.constant 0 : index
      %44 = vector.load %arg8[%c0_25, %c0_26] : memref<16x32xbf16, #tpu.memory_space<vmem>>, vector<16x32xbf16>
      tpu.vector_store %arg8[%c0_25, %c0_26], %43 {strides = array<i32>} : memref<16x32xbf16, #tpu.memory_space<vmem>>, vector<16x32xbf16>,
    } else {
    }
    return
  }
  func.func @transform_0(%arg0: i32, %arg1: i32) -> (i32, i32) {
    %c0_i32 = arith.constant 0 : i32
    return %arg0, %arg1 : i32, i32
  }
  func.func @transform_1(%arg0: i32, %arg1: i32) -> (i32, i32) {
    %c0_i32 = arith.constant 0 : i32
    %c0_i32_0 = arith.constant 0 : i32
    return %arg1, %c0_i32 : i32, i32
  }
  func.func @transform_2(%arg0: i32, %arg1: i32) -> (i32, i32) {
    %c0_i32 = arith.constant 0 : i32
    %c0_i32_0 = arith.constant 0 : i32
    %c0_i32_1 = arith.constant 0 : i32
    return %c0_i32, %c0_i32_0 : i32, i32
  }
  func.func @transform_3(%arg0: i32, %arg1: i32) -> (i32, i32) {
    %c0_i32 = arith.constant 0 : i32
    %c0_i32_0 = arith.constant 0 : i32
    return %arg0, %c0_i32 : i32, i32
  }
  func.func @transform_4(%arg0: i32, %arg1: i32) -> (i32, i32) {
    %c0_i32 = arith.constant 0 : i32
    %c0_i32_0 = arith.constant 0 : i32
    %c0_i32_1 = arith.constant 0 : i32
    return %c0_i32, %c0_i32_0 : i32, i32
  }
  func.func @transform_5(%arg0: i32, %arg1: i32) -> (i32, i32) {
    %c0_i32 = arith.constant 0 : i32
    %c0_i32_0 = arith.constant 0 : i32
    %c0_i32_1 = arith.constant 0 : i32
    return %c0_i32, %c0_i32_0 : i32, i32
  }
  func.func @transform_6(%arg0: i32, %arg1: i32) -> (i32, i32) {
    %c0_i32 = arith.constant 0 : i32
    %c0_i32_0 = arith.constant 0 : i32
    return %arg0, %c0_i32 : i32, i32
  }
}

module attributes {stable_mosaic.version = 11 : i64} {
  func.func @_linear_kernel(%arg0: i32, %arg1: i32, %arg2: i32, %arg3: memref<16x32xbf16, #tpu.memory_space<vmem>>, %arg4: memref<32x32xbf16, #tpu.memory_space<vmem>>, %arg5: memref<1x32xf32, #tpu.memory_space<vmem>>, %arg6: memref<16x32xbf16, #tpu.memory_space<vmem>>, %arg7: memref<16x32xf32, #tpu.memory_space<vmem>>) attributes {dimension_semantics = [#tpu.dimension_semantics<parallel>, #tpu.dimension_semantics<parallel>, #tpu.dimension_semantics<arbitrary>], iteration_bounds = array<i64: 1, 1, 1>, scalar_prefetch = 0 : i64, scratch_operands = 1 : i64, tpu.core_type = #tpu.core_type<tc>, window_params = [{transform_indices = @transform_0, window_bounds = array<i64: 16, 32>}, {transform_indices = @transform_1, window_bounds = array<i64: 32, 32>}, {transform_indices = @transform_2, window_bounds = array<i64: 1, 32>}, {transform_indices = @transform_3, window_bounds = array<i64: 16, 32>}]} {
    %c0_i32 = arith.constant 0 : i32
    %0 = arith.cmpi eq, %arg2, %c0_i32 : i32
    %1 = arith.extui %0 : i1 to i32
    %c0_i32_0 = arith.constant 0 : i32
    %2 = arith.cmpi ne, %1, %c0_i32_0 : i32
    scf.if %2 {
      %cst_10 = arith.constant 0.000000e+00 : f32
      %12 = vector.broadcast %cst_10 : f32 to vector<16x32xf32>
      %c0_11 = arith.constant 0 : index
      %c0_12 = arith.constant 0 : index
      %13 = vector.load %arg7[%c0_11, %c0_12] : memref<16x32xf32, #tpu.memory_space<vmem>>, vector<16x32xf32>
      tpu.vector_store %arg7[%c0_11, %c0_12], %12 {strides = array<i32>} : memref<16x32xf32, #tpu.memory_space<vmem>>, vector<16x32xf32>,
    } else {
    }
    %c0 = arith.constant 0 : index
    %c0_1 = arith.constant 0 : index
    %3 = vector.load %arg7[%c0, %c0_1] : memref<16x32xf32, #tpu.memory_space<vmem>>, vector<16x32xf32>
    %c0_2 = arith.constant 0 : index
    %c0_3 = arith.constant 0 : index
    %4 = vector.load %arg3[%c0_2, %c0_3] : memref<16x32xbf16, #tpu.memory_space<vmem>>, vector<16x32xbf16>
    %c0_4 = arith.constant 0 : index
    %c0_5 = arith.constant 0 : index
    %5 = vector.load %arg4[%c0_4, %c0_5] : memref<32x32xbf16, #tpu.memory_space<vmem>>, vector<32x32xbf16>
    %cst = arith.constant dense<0.000000e+00> : vector<16x32xf32>
    %6 = tpu.matmul %4, %5, %cst {dimension_numbers = #tpu.dot_dimension_numbers<[1], [0], [0], [1], [0, 0, 1, 1], [], []>} : vector<16x32xbf16>, vector<32x32xbf16>, vector<16x32xf32> -> vector<16x32xf32>
    %7 = arith.addf %3, %6 : vector<16x32xf32>
    %c0_6 = arith.constant 0 : index
    %c0_7 = arith.constant 0 : index
    %8 = vector.load %arg7[%c0_6, %c0_7] : memref<16x32xf32, #tpu.memory_space<vmem>>, vector<16x32xf32>
    tpu.vector_store %arg7[%c0_6, %c0_7], %7 {strides = array<i32>} : memref<16x32xf32, #tpu.memory_space<vmem>>, vector<16x32xf32>,
    %c0_i32_8 = arith.constant 0 : i32
    %9 = arith.cmpi eq, %arg2, %c0_i32_8 : i32
    %10 = arith.extui %9 : i1 to i32
    %c0_i32_9 = arith.constant 0 : i32
    %11 = arith.cmpi ne, %10, %c0_i32_9 : i32
    scf.if %11 {
      %c0_10 = arith.constant 0 : index
      %c0_11 = arith.constant 0 : index
      %12 = vector.load %arg7[%c0_10, %c0_11] : memref<16x32xf32, #tpu.memory_space<vmem>>, vector<16x32xf32>
      %c0_12 = arith.constant 0 : index
      %c0_13 = arith.constant 0 : index
      %13 = vector.load %arg5[%c0_12, %c0_13] : memref<1x32xf32, #tpu.memory_space<vmem>>, vector<1x32xf32>
      %14 = vector.broadcast %13 : vector<1x32xf32> to vector<16x32xf32>
      %15 = arith.addf %12, %14 : vector<16x32xf32>
      %16 = arith.truncf %15 : vector<16x32xf32> to vector<16x32xbf16>
      %c0_14 = arith.constant 0 : index
      %c0_15 = arith.constant 0 : index
      %17 = vector.load %arg6[%c0_14, %c0_15] : memref<16x32xbf16, #tpu.memory_space<vmem>>, vector<16x32xbf16>
      tpu.vector_store %arg6[%c0_14, %c0_15], %16 {strides = array<i32>} : memref<16x32xbf16, #tpu.memory_space<vmem>>, vector<16x32xbf16>,
    } else {
    }
    return
  }
  func.func @transform_0(%arg0: i32, %arg1: i32, %arg2: i32) -> (i32, i32) {
    %c0_i32 = arith.constant 0 : i32
    return %arg0, %arg2 : i32, i32
  }
  func.func @transform_1(%arg0: i32, %arg1: i32, %arg2: i32) -> (i32, i32) {
    %c0_i32 = arith.constant 0 : i32
    return %arg2, %arg1 : i32, i32
  }
  func.func @transform_2(%arg0: i32, %arg1: i32, %arg2: i32) -> (i32, i32) {
    %c0_i32 = arith.constant 0 : i32
    %c0_i32_0 = arith.constant 0 : i32
    return %c0_i32, %arg1 : i32, i32
  }
  func.func @transform_3(%arg0: i32, %arg1: i32, %arg2: i32) -> (i32, i32) {
    %c0_i32 = arith.constant 0 : i32
    return %arg0, %arg1 : i32, i32
  }
}

module attributes {stable_mosaic.version = 11 : i64} {
  func.func @_linear_kernel(%arg0: i32, %arg1: i32, %arg2: i32, %arg3: memref<16x32xbf16, #tpu.memory_space<vmem>>, %arg4: memref<32x64xbf16, #tpu.memory_space<vmem>>, %arg5: memref<1x64xf32, #tpu.memory_space<vmem>>, %arg6: memref<16x64xbf16, #tpu.memory_space<vmem>>, %arg7: memref<16x64xf32, #tpu.memory_space<vmem>>) attributes {dimension_semantics = [#tpu.dimension_semantics<parallel>, #tpu.dimension_semantics<parallel>, #tpu.dimension_semantics<arbitrary>], iteration_bounds = array<i64: 1, 1, 1>, scalar_prefetch = 0 : i64, scratch_operands = 1 : i64, tpu.core_type = #tpu.core_type<tc>, window_params = [{transform_indices = @transform_0, window_bounds = array<i64: 16, 32>}, {transform_indices = @transform_1, window_bounds = array<i64: 32, 64>}, {transform_indices = @transform_2, window_bounds = array<i64: 1, 64>}, {transform_indices = @transform_3, window_bounds = array<i64: 16, 64>}]} {
    %c0_i32 = arith.constant 0 : i32
    %0 = arith.cmpi eq, %arg2, %c0_i32 : i32
    %1 = arith.extui %0 : i1 to i32
    %c0_i32_0 = arith.constant 0 : i32
    %2 = arith.cmpi ne, %1, %c0_i32_0 : i32
    scf.if %2 {
      %cst_10 = arith.constant 0.000000e+00 : f32
      %12 = vector.broadcast %cst_10 : f32 to vector<16x64xf32>
      %c0_11 = arith.constant 0 : index
      %c0_12 = arith.constant 0 : index
      %13 = vector.load %arg7[%c0_11, %c0_12] : memref<16x64xf32, #tpu.memory_space<vmem>>, vector<16x64xf32>
      tpu.vector_store %arg7[%c0_11, %c0_12], %12 {strides = array<i32>} : memref<16x64xf32, #tpu.memory_space<vmem>>, vector<16x64xf32>,
    } else {
    }
    %c0 = arith.constant 0 : index
    %c0_1 = arith.constant 0 : index
    %3 = vector.load %arg7[%c0, %c0_1] : memref<16x64xf32, #tpu.memory_space<vmem>>, vector<16x64xf32>
    %c0_2 = arith.constant 0 : index
    %c0_3 = arith.constant 0 : index
    %4 = vector.load %arg3[%c0_2, %c0_3] : memref<16x32xbf16, #tpu.memory_space<vmem>>, vector<16x32xbf16>
    %c0_4 = arith.constant 0 : index
    %c0_5 = arith.constant 0 : index
    %5 = vector.load %arg4[%c0_4, %c0_5] : memref<32x64xbf16, #tpu.memory_space<vmem>>, vector<32x64xbf16>
    %cst = arith.constant dense<0.000000e+00> : vector<16x64xf32>
    %6 = tpu.matmul %4, %5, %cst {dimension_numbers = #tpu.dot_dimension_numbers<[1], [0], [0], [1], [0, 0, 1, 1], [], []>} : vector<16x32xbf16>, vector<32x64xbf16>, vector<16x64xf32> -> vector<16x64xf32>
    %7 = arith.addf %3, %6 : vector<16x64xf32>
    %c0_6 = arith.constant 0 : index
    %c0_7 = arith.constant 0 : index
    %8 = vector.load %arg7[%c0_6, %c0_7] : memref<16x64xf32, #tpu.memory_space<vmem>>, vector<16x64xf32>
    tpu.vector_store %arg7[%c0_6, %c0_7], %7 {strides = array<i32>} : memref<16x64xf32, #tpu.memory_space<vmem>>, vector<16x64xf32>,
    %c0_i32_8 = arith.constant 0 : i32
    %9 = arith.cmpi eq, %arg2, %c0_i32_8 : i32
    %10 = arith.extui %9 : i1 to i32
    %c0_i32_9 = arith.constant 0 : i32
    %11 = arith.cmpi ne, %10, %c0_i32_9 : i32
    scf.if %11 {
      %c0_10 = arith.constant 0 : index
      %c0_11 = arith.constant 0 : index
      %12 = vector.load %arg7[%c0_10, %c0_11] : memref<16x64xf32, #tpu.memory_space<vmem>>, vector<16x64xf32>
      %c0_12 = arith.constant 0 : index
      %c0_13 = arith.constant 0 : index
      %13 = vector.load %arg5[%c0_12, %c0_13] : memref<1x64xf32, #tpu.memory_space<vmem>>, vector<1x64xf32>
      %14 = vector.broadcast %13 : vector<1x64xf32> to vector<16x64xf32>
      %15 = arith.addf %12, %14 : vector<16x64xf32>
      %cst_14 = arith.constant 5.000000e-01 : f32
      %16 = vector.broadcast %cst_14 : f32 to vector<16x64xf32>
      %17 = arith.mulf %16, %15 : vector<16x64xf32>
      %cst_15 = arith.constant 0.707106769 : f32
      %18 = vector.broadcast %cst_15 : f32 to vector<16x64xf32>
      %19 = arith.mulf %15, %18 : vector<16x64xf32>
      %20 = math.erf %19 : vector<16x64xf32>
      %cst_16 = arith.constant 1.000000e+00 : f32
      %21 = vector.broadcast %cst_16 : f32 to vector<16x64xf32>
      %22 = arith.addf %21, %20 : vector<16x64xf32>
      %23 = arith.mulf %17, %22 : vector<16x64xf32>
      %24 = arith.truncf %23 : vector<16x64xf32> to vector<16x64xbf16>
      %c0_17 = arith.constant 0 : index
      %c0_18 = arith.constant 0 : index
      %25 = vector.load %arg6[%c0_17, %c0_18] : memref<16x64xbf16, #tpu.memory_space<vmem>>, vector<16x64xbf16>
      tpu.vector_store %arg6[%c0_17, %c0_18], %24 {strides = array<i32>} : memref<16x64xbf16, #tpu.memory_space<vmem>>, vector<16x64xbf16>,
    } else {
    }
    return
  }
  func.func @transform_0(%arg0: i32, %arg1: i32, %arg2: i32) -> (i32, i32) {
    %c0_i32 = arith.constant 0 : i32
    return %arg0, %arg2 : i32, i32
  }
  func.func @transform_1(%arg0: i32, %arg1: i32, %arg2: i32) -> (i32, i32) {
    %c0_i32 = arith.constant 0 : i32
    return %arg2, %arg1 : i32, i32
  }
  func.func @transform_2(%arg0: i32, %arg1: i32, %arg2: i32) -> (i32, i32) {
    %c0_i32 = arith.constant 0 : i32
    %c0_i32_0 = arith.constant 0 : i32
    return %c0_i32, %arg1 : i32, i32
  }
  func.func @transform_3(%arg0: i32, %arg1: i32, %arg2: i32) -> (i32, i32) {
    %c0_i32 = arith.constant 0 : i32
    return %arg0, %arg1 : i32, i32
  }
}

module attributes {stable_mosaic.version = 11 : i64} {
  func.func @_linear_add_ln_kernel(%arg0: i32, %arg1: i32, %arg2: memref<16x64xbf16, #tpu.memory_space<vmem>>, %arg3: memref<64x32xbf16, #tpu.memory_space<vmem>>, %arg4: memref<1x32xf32, #tpu.memory_space<vmem>>, %arg5: memref<16x32xbf16, #tpu.memory_space<vmem>>, %arg6: memref<1x32xf32, #tpu.memory_space<vmem>>, %arg7: memref<1x32xf32, #tpu.memory_space<vmem>>, %arg8: memref<16x32xbf16, #tpu.memory_space<vmem>>, %arg9: memref<16x32xf32, #tpu.memory_space<vmem>>) attributes {dimension_semantics = [#tpu.dimension_semantics<parallel>, #tpu.dimension_semantics<arbitrary>], iteration_bounds = array<i64: 1, 1>, scalar_prefetch = 0 : i64, scratch_operands = 1 : i64, tpu.core_type = #tpu.core_type<tc>, window_params = [{transform_indices = @transform_0, window_bounds = array<i64: 16, 64>}, {transform_indices = @transform_1, window_bounds = array<i64: 64, 32>}, {pipeline_mode = #tpu.pipeline_mode<synchronous>, transform_indices = @transform_2, window_bounds = array<i64: 1, 32>}, {transform_indices = @transform_3, window_bounds = array<i64: 16, 32>}, {pipeline_mode = #tpu.pipeline_mode<synchronous>, transform_indices = @transform_4, window_bounds = array<i64: 1, 32>}, {pipeline_mode = #tpu.pipeline_mode<synchronous>, transform_indices = @transform_5, window_bounds = array<i64: 1, 32>}, {transform_indices = @transform_6, window_bounds = array<i64: 16, 32>}]} {
    %c0_i32 = arith.constant 0 : i32
    %0 = arith.cmpi eq, %arg1, %c0_i32 : i32
    %1 = arith.extui %0 : i1 to i32
    %c0_i32_0 = arith.constant 0 : i32
    %2 = arith.cmpi ne, %1, %c0_i32_0 : i32
    scf.if %2 {
      %cst_10 = arith.constant 0.000000e+00 : f32
      %12 = vector.broadcast %cst_10 : f32 to vector<16x32xf32>
      %c0_11 = arith.constant 0 : index
      %c0_12 = arith.constant 0 : index
      %13 = vector.load %arg9[%c0_11, %c0_12] : memref<16x32xf32, #tpu.memory_space<vmem>>, vector<16x32xf32>
      tpu.vector_store %arg9[%c0_11, %c0_12], %12 {strides = array<i32>} : memref<16x32xf32, #tpu.memory_space<vmem>>, vector<16x32xf32>,
    } else {
    }
    %c0 = arith.constant 0 : index
    %c0_1 = arith.constant 0 : index
    %3 = vector.load %arg9[%c0, %c0_1] : memref<16x32xf32, #tpu.memory_space<vmem>>, vector<16x32xf32>
    %c0_2 = arith.constant 0 : index
    %c0_3 = arith.constant 0 : index
    %4 = vector.load %arg2[%c0_2, %c0_3] : memref<16x64xbf16, #tpu.memory_space<vmem>>, vector<16x64xbf16>
    %c0_4 = arith.constant 0 : index
    %c0_5 = arith.constant 0 : index
    %5 = vector.load %arg3[%c0_4, %c0_5] : memref<64x32xbf16, #tpu.memory_space<vmem>>, vector<64x32xbf16>
    %cst = arith.constant dense<0.000000e+00> : vector<16x32xf32>
    %6 = tpu.matmul %4, %5, %cst {dimension_numbers = #tpu.dot_dimension_numbers<[1], [0], [0], [1], [0, 0, 1, 1], [], []>} : vector<16x64xbf16>, vector<64x32xbf16>, vector<16x32xf32> -> vector<16x32xf32>
    %7 = arith.addf %3, %6 : vector<16x32xf32>
    %c0_6 = arith.constant 0 : index
    %c0_7 = arith.constant 0 : index
    %8 = vector.load %arg9[%c0_6, %c0_7] : memref<16x32xf32, #tpu.memory_space<vmem>>, vector<16x32xf32>
    tpu.vector_store %arg9[%c0_6, %c0_7], %7 {strides = array<i32>} : memref<16x32xf32, #tpu.memory_space<vmem>>, vector<16x32xf32>,
    %c0_i32_8 = arith.constant 0 : i32
    %9 = arith.cmpi eq, %arg1, %c0_i32_8 : i32
    %10 = arith.extui %9 : i1 to i32
    %c0_i32_9 = arith.constant 0 : i32
    %11 = arith.cmpi ne, %10, %c0_i32_9 : i32
    scf.if %11 {
      %c0_10 = arith.constant 0 : index
      %c0_11 = arith.constant 0 : index
      %12 = vector.load %arg9[%c0_10, %c0_11] : memref<16x32xf32, #tpu.memory_space<vmem>>, vector<16x32xf32>
      %c0_12 = arith.constant 0 : index
      %c0_13 = arith.constant 0 : index
      %13 = vector.load %arg4[%c0_12, %c0_13] : memref<1x32xf32, #tpu.memory_space<vmem>>, vector<1x32xf32>
      %14 = vector.broadcast %13 : vector<1x32xf32> to vector<16x32xf32>
      %15 = arith.addf %12, %14 : vector<16x32xf32>
      %c0_14 = arith.constant 0 : index
      %c0_15 = arith.constant 0 : index
      %16 = vector.load %arg5[%c0_14, %c0_15] : memref<16x32xbf16, #tpu.memory_space<vmem>>, vector<16x32xbf16>
      %17 = arith.extf %16 : vector<16x32xbf16> to vector<16x32xf32>
      %18 = arith.addf %15, %17 : vector<16x32xf32>
      %cst_16 = arith.constant dense<0.000000e+00> : vector<16xf32>
      %19 = vector.multi_reduction <add>, %18, %cst_16 [1] : vector<16x32xf32> to vector<16xf32>
      %20 = vector.shape_cast %19 : vector<16xf32> to vector<16x1xf32>
      %cst_17 = arith.constant 3.200000e+01 : f32
      %21 = vector.broadcast %cst_17 : f32 to vector<16x1xf32>
      %22 = arith.divf %20, %21 : vector<16x1xf32>
      %23 = vector.broadcast %22 : vector<16x1xf32> to vector<16x32xf32>
      %24 = arith.subf %18, %23 : vector<16x32xf32>
      %25 = arith.mulf %24, %24 : vector<16x32xf32>
      %cst_18 = arith.constant dense<0.000000e+00> : vector<16xf32>
      %26 = vector.multi_reduction <add>, %25, %cst_18 [1] : vector<16x32xf32> to vector<16xf32>
      %27 = vector.shape_cast %26 : vector<16xf32> to vector<16x1xf32>
      %cst_19 = arith.constant 3.200000e+01 : f32
      %28 = vector.broadcast %cst_19 : f32 to vector<16x1xf32>
      %29 = arith.divf %27, %28 : vector<16x1xf32>
      %30 = vector.broadcast %22 : vector<16x1xf32> to vector<16x32xf32>
      %31 = arith.subf %18, %30 : vector<16x32xf32>
      %cst_20 = arith.constant 9.99999996E-13 : f32
      %32 = vector.broadcast %cst_20 : f32 to vector<16x1xf32>
      %33 = arith.addf %29, %32 : vector<16x1xf32>
      %34 = math.rsqrt %33 : vector<16x1xf32>
      %35 = vector.broadcast %34 : vector<16x1xf32> to vector<16x32xf32>
      %36 = arith.mulf %31, %35 : vector<16x32xf32>
      %c0_21 = arith.constant 0 : index
      %c0_22 = arith.constant 0 : index
      %37 = vector.load %arg6[%c0_21, %c0_22] : memref<1x32xf32, #tpu.memory_space<vmem>>, vector<1x32xf32>
      %38 = vector.broadcast %37 : vector<1x32xf32> to vector<16x32xf32>
      %39 = arith.mulf %36, %38 : vector<16x32xf32>
      %c0_23 = arith.constant 0 : index
      %c0_24 = arith.constant 0 : index
      %40 = vector.load %arg7[%c0_23, %c0_24] : memref<1x32xf32, #tpu.memory_space<vmem>>, vector<1x32xf32>
      %41 = vector.broadcast %40 : vector<1x32xf32> to vector<16x32xf32>
      %42 = arith.addf %39, %41 : vector<16x32xf32>
      %43 = arith.truncf %42 : vector<16x32xf32> to vector<16x32xbf16>
      %c0_25 = arith.constant 0 : index
      %c0_26 = arith.constant 0 : index
      %44 = vector.load %arg8[%c0_25, %c0_26] : memref<16x32xbf16, #tpu.memory_space<vmem>>, vector<16x32xbf16>
      tpu.vector_store %arg8[%c0_25, %c0_26], %43 {strides = array<i32>} : memref<16x32xbf16, #tpu.memory_space<vmem>>, vector<16x32xbf16>,
    } else {
    }
    return
  }
  func.func @transform_0(%arg0: i32, %arg1: i32) -> (i32, i32) {
    %c0_i32 = arith.constant 0 : i32
    return %arg0, %arg1 : i32, i32
  }
  func.func @transform_1(%arg0: i32, %arg1: i32) -> (i32, i32) {
    %c0_i32 = arith.constant 0 : i32
    %c0_i32_0 = arith.constant 0 : i32
    return %arg1, %c0_i32 : i32, i32
  }
  func.func @transform_2(%arg0: i32, %arg1: i32) -> (i32, i32) {
    %c0_i32 = arith.constant 0 : i32
    %c0_i32_0 = arith.constant 0 : i32
    %c0_i32_1 = arith.constant 0 : i32
    return %c0_i32, %c0_i32_0 : i32, i32
  }
  func.func @transform_3(%arg0: i32, %arg1: i32) -> (i32, i32) {
    %c0_i32 = arith.constant 0 : i32
    %c0_i32_0 = arith.constant 0 : i32
    return %arg0, %c0_i32 : i32, i32
  }
  func.func @transform_4(%arg0: i32, %arg1: i32) -> (i32, i32) {
    %c0_i32 = arith.constant 0 : i32
    %c0_i32_0 = arith.constant 0 : i32
    %c0_i32_1 = arith.constant 0 : i32
    return %c0_i32, %c0_i32_0 : i32, i32
  }
  func.func @transform_5(%arg0: i32, %arg1: i32) -> (i32, i32) {
    %c0_i32 = arith.constant 0 : i32
    %c0_i32_0 = arith.constant 0 : i32
    %c0_i32_1 = arith.constant 0 : i32
    return %c0_i32, %c0_i32_0 : i32, i32
  }
  func.func @transform_6(%arg0: i32, %arg1: i32) -> (i32, i32) {
    %c0_i32 = arith.constant 0 : i32
    %c0_i32_0 = arith.constant 0 : i32
    return %arg0, %c0_i32 : i32, i32
  }
}

module attributes {stable_mosaic.version = 11 : i64} {
  func.func @_flash_attn_kernel(%arg0: i32, %arg1: i32, %arg2: i32, %arg3: memref<1x8x1x4x8xbf16, #tpu.memory_space<vmem>>, %arg4: memref<1x8x1x4x8xbf16, #tpu.memory_space<vmem>>, %arg5: memref<1x8x1x4x8xbf16, #tpu.memory_space<vmem>>, %arg6: memref<1x8x4x8xbf16, #tpu.memory_space<vmem>>, %arg7: memref<4x8x1xf32, #tpu.memory_space<vmem>>, %arg8: memref<4x8x1xf32, #tpu.memory_space<vmem>>, %arg9: memref<4x8x8xf32, #tpu.memory_space<vmem>>) attributes {dimension_semantics = [#tpu.dimension_semantics<parallel>, #tpu.dimension_semantics<parallel>, #tpu.dimension_semantics<arbitrary>], iteration_bounds = array<i64: 2, 1, 1>, scalar_prefetch = 0 : i64, scratch_operands = 3 : i64, tpu.core_type = #tpu.core_type<tc>, window_params = [{transform_indices = @transform_0, window_bounds = array<i64: 1, 8, 1, 4, 8>}, {transform_indices = @transform_1, window_bounds = array<i64: 1, 8, 1, 4, 8>}, {transform_indices = @transform_2, window_bounds = array<i64: 1, 8, 1, 4, 8>}, {transform_indices = @transform_3, window_bounds = array<i64: 1, 8, 4, 8>}]} {
    %c0_i32 = arith.constant 0 : i32
    %0 = arith.cmpi eq, %arg2, %c0_i32 : i32
    %1 = arith.extui %0 : i1 to i32
    %c0_i32_0 = arith.constant 0 : i32
    %2 = arith.cmpi ne, %1, %c0_i32_0 : i32
    scf.if %2 {
      %cst_150 = arith.constant 0xFF800000 : f32
      %170 = vector.broadcast %cst_150 : f32 to vector<4x8x1xf32>
      %c0_151 = arith.constant 0 : index
      %c0_152 = arith.constant 0 : index
      %c0_153 = arith.constant 0 : index
      %171 = vector.load %arg7[%c0_151, %c0_152, %c0_153] : memref<4x8x1xf32, #tpu.memory_space<vmem>>, vector<4x8x1xf32>
      tpu.vector_store %arg7[%c0_151, %c0_152, %c0_153], %170 {strides = array<i32>} : memref<4x8x1xf32, #tpu.memory_space<vmem>>, vector<4x8x1xf32>,
      %cst_154 = arith.constant 0.000000e+00 : f32
      %172 = vector.broadcast %cst_154 : f32 to vector<4x8x1xf32>
      %c0_155 = arith.constant 0 : index
      %c0_156 = arith.constant 0 : index
      %c0_157 = arith.constant 0 : index
      %173 = vector.load %arg8[%c0_155, %c0_156, %c0_157] : memref<4x8x1xf32, #tpu.memory_space<vmem>>, vector<4x8x1xf32>
      tpu.vector_store %arg8[%c0_155, %c0_156, %c0_157], %172 {strides = array<i32>} : memref<4x8x1xf32, #tpu.memory_space<vmem>>, vector<4x8x1xf32>,
      %cst_158 = arith.constant 0.000000e+00 : f32
      %174 = vector.broadcast %cst_158 : f32 to vector<4x8x8xf32>
      %c0_159 = arith.constant 0 : index
      %c0_160 = arith.constant 0 : index
      %c0_161 = arith.constant 0 : index
      %175 = vector.load %arg9[%c0_159, %c0_160, %c0_161] : memref<4x8x8xf32, #tpu.memory_space<vmem>>, vector<4x8x8xf32>
      tpu.vector_store %arg9[%c0_159, %c0_160, %c0_161], %174 {strides = array<i32>} : memref<4x8x8xf32, #tpu.memory_space<vmem>>, vector<4x8x8xf32>,
    } else {
    }
    %c0 = arith.constant 0 : index
    %c0_1 = arith.constant 0 : index
    %c0_2 = arith.constant 0 : index
    %c0_3 = arith.constant 0 : index
    %c0_4 = arith.constant 0 : index
    %3 = vector.load %arg3[%c0, %c0_1, %c0_2, %c0_3, %c0_4] : memref<1x8x1x4x8xbf16, #tpu.memory_space<vmem>>, vector<1x8x1x1x8xbf16>
    %4 = vector.shape_cast %3 : vector<1x8x1x1x8xbf16> to vector<8x8xbf16>
    %c0_5 = arith.constant 0 : index
    %c0_6 = arith.constant 0 : index
    %c0_7 = arith.constant 0 : index
    %c0_8 = arith.constant 0 : index
    %c0_9 = arith.constant 0 : index
    %5 = vector.load %arg4[%c0_5, %c0_6, %c0_7, %c0_8, %c0_9] : memref<1x8x1x4x8xbf16, #tpu.memory_space<vmem>>, vector<1x8x1x1x8xbf16>
    %6 = vector.shape_cast %5 : vector<1x8x1x1x8xbf16> to vector<8x8xbf16>
    %cst = arith.constant dense<0.000000e+00> : vector<8x8xf32>
    %7 = tpu.matmul %4, %6, %cst {dimension_numbers = #tpu.dot_dimension_numbers<[1], [1], [0], [0], [0, 0, 1, 0], [], []>} : vector<8x8xbf16>, vector<8x8xbf16>, vector<8x8xf32> -> vector<8x8xf32>
    %cst_10 = arith.constant 0.353553385 : f32
    %8 = vector.broadcast %cst_10 : f32 to vector<8x8xf32>
    %9 = arith.mulf %7, %8 : vector<8x8xf32>
    %c0_11 = arith.constant 0 : index
    %c0_12 = arith.constant 0 : index
    %c0_13 = arith.constant 0 : index
    %10 = vector.load %arg7[%c0_11, %c0_12, %c0_13] : memref<4x8x1xf32, #tpu.memory_space<vmem>>, vector<1x8x1xf32>
    %11 = vector.shape_cast %10 : vector<1x8x1xf32> to vector<8x1xf32>
    %cst_14 = arith.constant dense<0xFF800000> : vector<8xf32>
    %12 = vector.multi_reduction <maximumf>, %9, %cst_14 [1] : vector<8x8xf32> to vector<8xf32>
    %13 = vector.shape_cast %12 : vector<8xf32> to vector<8x1xf32>
    %14 = arith.maximumf %11, %13 : vector<8x1xf32>
    %15 = arith.subf %11, %14 : vector<8x1xf32>
    %16 = math.exp %15 : vector<8x1xf32>
    %17 = vector.broadcast %14 : vector<8x1xf32> to vector<8x8xf32>
    %18 = arith.subf %9, %17 : vector<8x8xf32>
    %19 = math.exp %18 : vector<8x8xf32>
    %c0_15 = arith.constant 0 : index
    %c0_16 = arith.constant 0 : index
    %c0_17 = arith.constant 0 : index
    %20 = vector.load %arg8[%c0_15, %c0_16, %c0_17] : memref<4x8x1xf32, #tpu.memory_space<vmem>>, vector<1x8x1xf32>
    %21 = vector.shape_cast %20 : vector<1x8x1xf32> to vector<8x1xf32>
    %22 = arith.mulf %16, %21 : vector<8x1xf32>
    %cst_18 = arith.constant dense<0.000000e+00> : vector<8xf32>
    %23 = vector.multi_reduction <add>, %19, %cst_18 [1] : vector<8x8xf32> to vector<8xf32>
    %24 = vector.shape_cast %23 : vector<8xf32> to vector<8x1xf32>
    %25 = arith.addf %22, %24 : vector<8x1xf32>
    %c0_19 = arith.constant 0 : index
    %c0_20 = arith.constant 0 : index
    %c0_21 = arith.constant 0 : index
    %26 = vector.load %arg8[%c0_19, %c0_20, %c0_21] : memref<4x8x1xf32, #tpu.memory_space<vmem>>, vector<1x8x1xf32>
    %27 = vector.shape_cast %26 : vector<1x8x1xf32> to vector<8x1xf32>
    %28 = vector.shape_cast %25 : vector<8x1xf32> to vector<1x8x1xf32>
    tpu.vector_store %arg8[%c0_19, %c0_20, %c0_21], %28 {strides = array<i32>} : memref<4x8x1xf32, #tpu.memory_space<vmem>>, vector<1x8x1xf32>,
    %c0_22 = arith.constant 0 : index
    %c0_23 = arith.constant 0 : index
    %c0_24 = arith.constant 0 : index
    %29 = vector.load %arg9[%c0_22, %c0_23, %c0_24] : memref<4x8x8xf32, #tpu.memory_space<vmem>>, vector<1x8x8xf32>
    %30 = vector.shape_cast %29 : vector<1x8x8xf32> to vector<8x8xf32>
    %31 = vector.broadcast %16 : vector<8x1xf32> to vector<8x8xf32>
    %32 = arith.mulf %31, %30 : vector<8x8xf32>
    %33 = arith.truncf %19 : vector<8x8xf32> to vector<8x8xbf16>
    %c0_25 = arith.constant 0 : index
    %c0_26 = arith.constant 0 : index
    %c0_27 = arith.constant 0 : index
    %c0_28 = arith.constant 0 : index
    %c0_29 = arith.constant 0 : index
    %34 = vector.load %arg5[%c0_25, %c0_26, %c0_27, %c0_28, %c0_29] : memref<1x8x1x4x8xbf16, #tpu.memory_space<vmem>>, vector<1x8x1x1x8xbf16>
    %35 = vector.shape_cast %34 : vector<1x8x1x1x8xbf16> to vector<8x8xbf16>
    %cst_30 = arith.constant dense<0.000000e+00> : vector<8x8xf32>
    %36 = tpu.matmul %33, %35, %cst_30 {dimension_numbers = #tpu.dot_dimension_numbers<[1], [0], [0], [1], [0, 0, 1, 1], [], []>} : vector<8x8xbf16>, vector<8x8xbf16>, vector<8x8xf32> -> vector<8x8xf32>
    %37 = arith.addf %32, %36 : vector<8x8xf32>
    %c0_31 = arith.constant 0 : index
    %c0_32 = arith.constant 0 : index
    %c0_33 = arith.constant 0 : index
    %38 = vector.load %arg9[%c0_31, %c0_32, %c0_33] : memref<4x8x8xf32, #tpu.memory_space<vmem>>, vector<1x8x8xf32>
    %39 = vector.shape_cast %38 : vector<1x8x8xf32> to vector<8x8xf32>
    %40 = vector.shape_cast %37 : vector<8x8xf32> to vector<1x8x8xf32>
    tpu.vector_store %arg9[%c0_31, %c0_32, %c0_33], %40 {strides = array<i32>} : memref<4x8x8xf32, #tpu.memory_space<vmem>>, vector<1x8x8xf32>,
    %c0_34 = arith.constant 0 : index
    %c0_35 = arith.constant 0 : index
    %c0_36 = arith.constant 0 : index
    %41 = vector.load %arg7[%c0_34, %c0_35, %c0_36] : memref<4x8x1xf32, #tpu.memory_space<vmem>>, vector<1x8x1xf32>
    %42 = vector.shape_cast %41 : vector<1x8x1xf32> to vector<8x1xf32>
    %43 = vector.shape_cast %14 : vector<8x1xf32> to vector<1x8x1xf32>
    tpu.vector_store %arg7[%c0_34, %c0_35, %c0_36], %43 {strides = array<i32>} : memref<4x8x1xf32, #tpu.memory_space<vmem>>, vector<1x8x1xf32>,
    %c0_37 = arith.constant 0 : index
    %c0_38 = arith.constant 0 : index
    %c0_39 = arith.constant 0 : index
    %c1 = arith.constant 1 : index
    %c0_40 = arith.constant 0 : index
    %44 = vector.load %arg3[%c0_37, %c0_38, %c0_39, %c1, %c0_40] : memref<1x8x1x4x8xbf16, #tpu.memory_space<vmem>>, vector<1x8x1x1x8xbf16>
    %45 = vector.shape_cast %44 : vector<1x8x1x1x8xbf16> to vector<8x8xbf16>
    %c0_41 = arith.constant 0 : index
    %c0_42 = arith.constant 0 : index
    %c0_43 = arith.constant 0 : index
    %c1_44 = arith.constant 1 : index
    %c0_45 = arith.constant 0 : index
    %46 = vector.load %arg4[%c0_41, %c0_42, %c0_43, %c1_44, %c0_45] : memref<1x8x1x4x8xbf16, #tpu.memory_space<vmem>>, vector<1x8x1x1x8xbf16>
    %47 = vector.shape_cast %46 : vector<1x8x1x1x8xbf16> to vector<8x8xbf16>
    %cst_46 = arith.constant dense<0.000000e+00> : vector<8x8xf32>
    %48 = tpu.matmul %45, %47, %cst_46 {dimension_numbers = #tpu.dot_dimension_numbers<[1], [1], [0], [0], [0, 0, 1, 0], [], []>} : vector<8x8xbf16>, vector<8x8xbf16>, vector<8x8xf32> -> vector<8x8xf32>
    %cst_47 = arith.constant 0.353553385 : f32
    %49 = vector.broadcast %cst_47 : f32 to vector<8x8xf32>
    %50 = arith.mulf %48, %49 : vector<8x8xf32>
    %c1_48 = arith.constant 1 : index
    %c0_49 = arith.constant 0 : index
    %c0_50 = arith.constant 0 : index
    %51 = vector.load %arg7[%c1_48, %c0_49, %c0_50] : memref<4x8x1xf32, #tpu.memory_space<vmem>>, vector<1x8x1xf32>
    %52 = vector.shape_cast %51 : vector<1x8x1xf32> to vector<8x1xf32>
    %cst_51 = arith.constant dense<0xFF800000> : vector<8xf32>
    %53 = vector.multi_reduction <maximumf>, %50, %cst_51 [1] : vector<8x8xf32> to vector<8xf32>
    %54 = vector.shape_cast %53 : vector<8xf32> to vector<8x1xf32>
    %55 = arith.maximumf %52, %54 : vector<8x1xf32>
    %56 = arith.subf %52, %55 : vector<8x1xf32>
    %57 = math.exp %56 : vector<8x1xf32>
    %58 = vector.broadcast %55 : vector<8x1xf32> to vector<8x8xf32>
    %59 = arith.subf %50, %58 : vector<8x8xf32>
    %60 = math.exp %59 : vector<8x8xf32>
    %c1_52 = arith.constant 1 : index
    %c0_53 = arith.constant 0 : index
    %c0_54 = arith.constant 0 : index
    %61 = vector.load %arg8[%c1_52, %c0_53, %c0_54] : memref<4x8x1xf32, #tpu.memory_space<vmem>>, vector<1x8x1xf32>
    %62 = vector.shape_cast %61 : vector<1x8x1xf32> to vector<8x1xf32>
    %63 = arith.mulf %57, %62 : vector<8x1xf32>
    %cst_55 = arith.constant dense<0.000000e+00> : vector<8xf32>
    %64 = vector.multi_reduction <add>, %60, %cst_55 [1] : vector<8x8xf32> to vector<8xf32>
    %65 = vector.shape_cast %64 : vector<8xf32> to vector<8x1xf32>
    %66 = arith.addf %63, %65 : vector<8x1xf32>
    %c1_56 = arith.constant 1 : index
    %c0_57 = arith.constant 0 : index
    %c0_58 = arith.constant 0 : index
    %67 = vector.load %arg8[%c1_56, %c0_57, %c0_58] : memref<4x8x1xf32, #tpu.memory_space<vmem>>, vector<1x8x1xf32>
    %68 = vector.shape_cast %67 : vector<1x8x1xf32> to vector<8x1xf32>
    %69 = vector.shape_cast %66 : vector<8x1xf32> to vector<1x8x1xf32>
    tpu.vector_store %arg8[%c1_56, %c0_57, %c0_58], %69 {strides = array<i32>} : memref<4x8x1xf32, #tpu.memory_space<vmem>>, vector<1x8x1xf32>,
    %c1_59 = arith.constant 1 : index
    %c0_60 = arith.constant 0 : index
    %c0_61 = arith.constant 0 : index
    %70 = vector.load %arg9[%c1_59, %c0_60, %c0_61] : memref<4x8x8xf32, #tpu.memory_space<vmem>>, vector<1x8x8xf32>
    %71 = vector.shape_cast %70 : vector<1x8x8xf32> to vector<8x8xf32>
    %72 = vector.broadcast %57 : vector<8x1xf32> to vector<8x8xf32>
    %73 = arith.mulf %72, %71 : vector<8x8xf32>
    %74 = arith.truncf %60 : vector<8x8xf32> to vector<8x8xbf16>
    %c0_62 = arith.constant 0 : index
    %c0_63 = arith.constant 0 : index
    %c0_64 = arith.constant 0 : index
    %c1_65 = arith.constant 1 : index
    %c0_66 = arith.constant 0 : index
    %75 = vector.load %arg5[%c0_62, %c0_63, %c0_64, %c1_65, %c0_66] : memref<1x8x1x4x8xbf16, #tpu.memory_space<vmem>>, vector<1x8x1x1x8xbf16>
    %76 = vector.shape_cast %75 : vector<1x8x1x1x8xbf16> to vector<8x8xbf16>
    %cst_67 = arith.constant dense<0.000000e+00> : vector<8x8xf32>
    %77 = tpu.matmul %74, %76, %cst_67 {dimension_numbers = #tpu.dot_dimension_numbers<[1], [0], [0], [1], [0, 0, 1, 1], [], []>} : vector<8x8xbf16>, vector<8x8xbf16>, vector<8x8xf32> -> vector<8x8xf32>
    %78 = arith.addf %73, %77 : vector<8x8xf32>
    %c1_68 = arith.constant 1 : index
    %c0_69 = arith.constant 0 : index
    %c0_70 = arith.constant 0 : index
    %79 = vector.load %arg9[%c1_68, %c0_69, %c0_70] : memref<4x8x8xf32, #tpu.memory_space<vmem>>, vector<1x8x8xf32>
    %80 = vector.shape_cast %79 : vector<1x8x8xf32> to vector<8x8xf32>
    %81 = vector.shape_cast %78 : vector<8x8xf32> to vector<1x8x8xf32>
    tpu.vector_store %arg9[%c1_68, %c0_69, %c0_70], %81 {strides = array<i32>} : memref<4x8x8xf32, #tpu.memory_space<vmem>>, vector<1x8x8xf32>,
    %c1_71 = arith.constant 1 : index
    %c0_72 = arith.constant 0 : index
    %c0_73 = arith.constant 0 : index
    %82 = vector.load %arg7[%c1_71, %c0_72, %c0_73] : memref<4x8x1xf32, #tpu.memory_space<vmem>>, vector<1x8x1xf32>
    %83 = vector.shape_cast %82 : vector<1x8x1xf32> to vector<8x1xf32>
    %84 = vector.shape_cast %55 : vector<8x1xf32> to vector<1x8x1xf32>
    tpu.vector_store %arg7[%c1_71, %c0_72, %c0_73], %84 {strides = array<i32>} : memref<4x8x1xf32, #tpu.memory_space<vmem>>, vector<1x8x1xf32>,
    %c0_74 = arith.constant 0 : index
    %c0_75 = arith.constant 0 : index
    %c0_76 = arith.constant 0 : index
    %c2 = arith.constant 2 : index
    %c0_77 = arith.constant 0 : index
    %85 = vector.load %arg3[%c0_74, %c0_75, %c0_76, %c2, %c0_77] : memref<1x8x1x4x8xbf16, #tpu.memory_space<vmem>>, vector<1x8x1x1x8xbf16>
    %86 = vector.shape_cast %85 : vector<1x8x1x1x8xbf16> to vector<8x8xbf16>
    %c0_78 = arith.constant 0 : index
    %c0_79 = arith.constant 0 : index
    %c0_80 = arith.constant 0 : index
    %c2_81 = arith.constant 2 : index
    %c0_82 = arith.constant 0 : index
    %87 = vector.load %arg4[%c0_78, %c0_79, %c0_80, %c2_81, %c0_82] : memref<1x8x1x4x8xbf16, #tpu.memory_space<vmem>>, vector<1x8x1x1x8xbf16>
    %88 = vector.shape_cast %87 : vector<1x8x1x1x8xbf16> to vector<8x8xbf16>
    %cst_83 = arith.constant dense<0.000000e+00> : vector<8x8xf32>
    %89 = tpu.matmul %86, %88, %cst_83 {dimension_numbers = #tpu.dot_dimension_numbers<[1], [1], [0], [0], [0, 0, 1, 0], [], []>} : vector<8x8xbf16>, vector<8x8xbf16>, vector<8x8xf32> -> vector<8x8xf32>
    %cst_84 = arith.constant 0.353553385 : f32
    %90 = vector.broadcast %cst_84 : f32 to vector<8x8xf32>
    %91 = arith.mulf %89, %90 : vector<8x8xf32>
    %c2_85 = arith.constant 2 : index
    %c0_86 = arith.constant 0 : index
    %c0_87 = arith.constant 0 : index
    %92 = vector.load %arg7[%c2_85, %c0_86, %c0_87] : memref<4x8x1xf32, #tpu.memory_space<vmem>>, vector<1x8x1xf32>
    %93 = vector.shape_cast %92 : vector<1x8x1xf32> to vector<8x1xf32>
    %cst_88 = arith.constant dense<0xFF800000> : vector<8xf32>
    %94 = vector.multi_reduction <maximumf>, %91, %cst_88 [1] : vector<8x8xf32> to vector<8xf32>
    %95 = vector.shape_cast %94 : vector<8xf32> to vector<8x1xf32>
    %96 = arith.maximumf %93, %95 : vector<8x1xf32>
    %97 = arith.subf %93, %96 : vector<8x1xf32>
    %98 = math.exp %97 : vector<8x1xf32>
    %99 = vector.broadcast %96 : vector<8x1xf32> to vector<8x8xf32>
    %100 = arith.subf %91, %99 : vector<8x8xf32>
    %101 = math.exp %100 : vector<8x8xf32>
    %c2_89 = arith.constant 2 : index
    %c0_90 = arith.constant 0 : index
    %c0_91 = arith.constant 0 : index
    %102 = vector.load %arg8[%c2_89, %c0_90, %c0_91] : memref<4x8x1xf32, #tpu.memory_space<vmem>>, vector<1x8x1xf32>
    %103 = vector.shape_cast %102 : vector<1x8x1xf32> to vector<8x1xf32>
    %104 = arith.mulf %98, %103 : vector<8x1xf32>
    %cst_92 = arith.constant dense<0.000000e+00> : vector<8xf32>
    %105 = vector.multi_reduction <add>, %101, %cst_92 [1] : vector<8x8xf32> to vector<8xf32>
    %106 = vector.shape_cast %105 : vector<8xf32> to vector<8x1xf32>
    %107 = arith.addf %104, %106 : vector<8x1xf32>
    %c2_93 = arith.constant 2 : index
    %c0_94 = arith.constant 0 : index
    %c0_95 = arith.constant 0 : index
    %108 = vector.load %arg8[%c2_93, %c0_94, %c0_95] : memref<4x8x1xf32, #tpu.memory_space<vmem>>, vector<1x8x1xf32>
    %109 = vector.shape_cast %108 : vector<1x8x1xf32> to vector<8x1xf32>
    %110 = vector.shape_cast %107 : vector<8x1xf32> to vector<1x8x1xf32>
    tpu.vector_store %arg8[%c2_93, %c0_94, %c0_95], %110 {strides = array<i32>} : memref<4x8x1xf32, #tpu.memory_space<vmem>>, vector<1x8x1xf32>,
    %c2_96 = arith.constant 2 : index
    %c0_97 = arith.constant 0 : index
    %c0_98 = arith.constant 0 : index
    %111 = vector.load %arg9[%c2_96, %c0_97, %c0_98] : memref<4x8x8xf32, #tpu.memory_space<vmem>>, vector<1x8x8xf32>
    %112 = vector.shape_cast %111 : vector<1x8x8xf32> to vector<8x8xf32>
    %113 = vector.broadcast %98 : vector<8x1xf32> to vector<8x8xf32>
    %114 = arith.mulf %113, %112 : vector<8x8xf32>
    %115 = arith.truncf %101 : vector<8x8xf32> to vector<8x8xbf16>
    %c0_99 = arith.constant 0 : index
    %c0_100 = arith.constant 0 : index
    %c0_101 = arith.constant 0 : index
    %c2_102 = arith.constant 2 : index
    %c0_103 = arith.constant 0 : index
    %116 = vector.load %arg5[%c0_99, %c0_100, %c0_101, %c2_102, %c0_103] : memref<1x8x1x4x8xbf16, #tpu.memory_space<vmem>>, vector<1x8x1x1x8xbf16>
    %117 = vector.shape_cast %116 : vector<1x8x1x1x8xbf16> to vector<8x8xbf16>
    %cst_104 = arith.constant dense<0.000000e+00> : vector<8x8xf32>
    %118 = tpu.matmul %115, %117, %cst_104 {dimension_numbers = #tpu.dot_dimension_numbers<[1], [0], [0], [1], [0, 0, 1, 1], [], []>} : vector<8x8xbf16>, vector<8x8xbf16>, vector<8x8xf32> -> vector<8x8xf32>
    %119 = arith.addf %114, %118 : vector<8x8xf32>
    %c2_105 = arith.constant 2 : index
    %c0_106 = arith.constant 0 : index
    %c0_107 = arith.constant 0 : index
    %120 = vector.load %arg9[%c2_105, %c0_106, %c0_107] : memref<4x8x8xf32, #tpu.memory_space<vmem>>, vector<1x8x8xf32>
    %121 = vector.shape_cast %120 : vector<1x8x8xf32> to vector<8x8xf32>
    %122 = vector.shape_cast %119 : vector<8x8xf32> to vector<1x8x8xf32>
    tpu.vector_store %arg9[%c2_105, %c0_106, %c0_107], %122 {strides = array<i32>} : memref<4x8x8xf32, #tpu.memory_space<vmem>>, vector<1x8x8xf32>,
    %c2_108 = arith.constant 2 : index
    %c0_109 = arith.constant 0 : index
    %c0_110 = arith.constant 0 : index
    %123 = vector.load %arg7[%c2_108, %c0_109, %c0_110] : memref<4x8x1xf32, #tpu.memory_space<vmem>>, vector<1x8x1xf32>
    %124 = vector.shape_cast %123 : vector<1x8x1xf32> to vector<8x1xf32>
    %125 = vector.shape_cast %96 : vector<8x1xf32> to vector<1x8x1xf32>
    tpu.vector_store %arg7[%c2_108, %c0_109, %c0_110], %125 {strides = array<i32>} : memref<4x8x1xf32, #tpu.memory_space<vmem>>, vector<1x8x1xf32>,
    %c0_111 = arith.constant 0 : index
    %c0_112 = arith.constant 0 : index
    %c0_113 = arith.constant 0 : index
    %c3 = arith.constant 3 : index
    %c0_114 = arith.constant 0 : index
    %126 = vector.load %arg3[%c0_111, %c0_112, %c0_113, %c3, %c0_114] : memref<1x8x1x4x8xbf16, #tpu.memory_space<vmem>>, vector<1x8x1x1x8xbf16>
    %127 = vector.shape_cast %126 : vector<1x8x1x1x8xbf16> to vector<8x8xbf16>
    %c0_115 = arith.constant 0 : index
    %c0_116 = arith.constant 0 : index
    %c0_117 = arith.constant 0 : index
    %c3_118 = arith.constant 3 : index
    %c0_119 = arith.constant 0 : index
    %128 = vector.load %arg4[%c0_115, %c0_116, %c0_117, %c3_118, %c0_119] : memref<1x8x1x4x8xbf16, #tpu.memory_space<vmem>>, vector<1x8x1x1x8xbf16>
    %129 = vector.shape_cast %128 : vector<1x8x1x1x8xbf16> to vector<8x8xbf16>
    %cst_120 = arith.constant dense<0.000000e+00> : vector<8x8xf32>
    %130 = tpu.matmul %127, %129, %cst_120 {dimension_numbers = #tpu.dot_dimension_numbers<[1], [1], [0], [0], [0, 0, 1, 0], [], []>} : vector<8x8xbf16>, vector<8x8xbf16>, vector<8x8xf32> -> vector<8x8xf32>
    %cst_121 = arith.constant 0.353553385 : f32
    %131 = vector.broadcast %cst_121 : f32 to vector<8x8xf32>
    %132 = arith.mulf %130, %131 : vector<8x8xf32>
    %c3_122 = arith.constant 3 : index
    %c0_123 = arith.constant 0 : index
    %c0_124 = arith.constant 0 : index
    %133 = vector.load %arg7[%c3_122, %c0_123, %c0_124] : memref<4x8x1xf32, #tpu.memory_space<vmem>>, vector<1x8x1xf32>
    %134 = vector.shape_cast %133 : vector<1x8x1xf32> to vector<8x1xf32>
    %cst_125 = arith.constant dense<0xFF800000> : vector<8xf32>
    %135 = vector.multi_reduction <maximumf>, %132, %cst_125 [1] : vector<8x8xf32> to vector<8xf32>
    %136 = vector.shape_cast %135 : vector<8xf32> to vector<8x1xf32>
    %137 = arith.maximumf %134, %136 : vector<8x1xf32>
    %138 = arith.subf %134, %137 : vector<8x1xf32>
    %139 = math.exp %138 : vector<8x1xf32>
    %140 = vector.broadcast %137 : vector<8x1xf32> to vector<8x8xf32>
    %141 = arith.subf %132, %140 : vector<8x8xf32>
    %142 = math.exp %141 : vector<8x8xf32>
    %c3_126 = arith.constant 3 : index
    %c0_127 = arith.constant 0 : index
    %c0_128 = arith.constant 0 : index
    %143 = vector.load %arg8[%c3_126, %c0_127, %c0_128] : memref<4x8x1xf32, #tpu.memory_space<vmem>>, vector<1x8x1xf32>
    %144 = vector.shape_cast %143 : vector<1x8x1xf32> to vector<8x1xf32>
    %145 = arith.mulf %139, %144 : vector<8x1xf32>
    %cst_129 = arith.constant dense<0.000000e+00> : vector<8xf32>
    %146 = vector.multi_reduction <add>, %142, %cst_129 [1] : vector<8x8xf32> to vector<8xf32>
    %147 = vector.shape_cast %146 : vector<8xf32> to vector<8x1xf32>
    %148 = arith.addf %145, %147 : vector<8x1xf32>
    %c3_130 = arith.constant 3 : index
    %c0_131 = arith.constant 0 : index
    %c0_132 = arith.constant 0 : index
    %149 = vector.load %arg8[%c3_130, %c0_131, %c0_132] : memref<4x8x1xf32, #tpu.memory_space<vmem>>, vector<1x8x1xf32>
    %150 = vector.shape_cast %149 : vector<1x8x1xf32> to vector<8x1xf32>
    %151 = vector.shape_cast %148 : vector<8x1xf32> to vector<1x8x1xf32>
    tpu.vector_store %arg8[%c3_130, %c0_131, %c0_132], %151 {strides = array<i32>} : memref<4x8x1xf32, #tpu.memory_space<vmem>>, vector<1x8x1xf32>,
    %c3_133 = arith.constant 3 : index
    %c0_134 = arith.constant 0 : index
    %c0_135 = arith.constant 0 : index
    %152 = vector.load %arg9[%c3_133, %c0_134, %c0_135] : memref<4x8x8xf32, #tpu.memory_space<vmem>>, vector<1x8x8xf32>
    %153 = vector.shape_cast %152 : vector<1x8x8xf32> to vector<8x8xf32>
    %154 = vector.broadcast %139 : vector<8x1xf32> to vector<8x8xf32>
    %155 = arith.mulf %154, %153 : vector<8x8xf32>
    %156 = arith.truncf %142 : vector<8x8xf32> to vector<8x8xbf16>
    %c0_136 = arith.constant 0 : index
    %c0_137 = arith.constant 0 : index
    %c0_138 = arith.constant 0 : index
    %c3_139 = arith.constant 3 : index
    %c0_140 = arith.constant 0 : index
    %157 = vector.load %arg5[%c0_136, %c0_137, %c0_138, %c3_139, %c0_140] : memref<1x8x1x4x8xbf16, #tpu.memory_space<vmem>>, vector<1x8x1x1x8xbf16>
    %158 = vector.shape_cast %157 : vector<1x8x1x1x8xbf16> to vector<8x8xbf16>
    %cst_141 = arith.constant dense<0.000000e+00> : vector<8x8xf32>
    %159 = tpu.matmul %156, %158, %cst_141 {dimension_numbers = #tpu.dot_dimension_numbers<[1], [0], [0], [1], [0, 0, 1, 1], [], []>} : vector<8x8xbf16>, vector<8x8xbf16>, vector<8x8xf32> -> vector<8x8xf32>
    %160 = arith.addf %155, %159 : vector<8x8xf32>
    %c3_142 = arith.constant 3 : index
    %c0_143 = arith.constant 0 : index
    %c0_144 = arith.constant 0 : index
    %161 = vector.load %arg9[%c3_142, %c0_143, %c0_144] : memref<4x8x8xf32, #tpu.memory_space<vmem>>, vector<1x8x8xf32>
    %162 = vector.shape_cast %161 : vector<1x8x8xf32> to vector<8x8xf32>
    %163 = vector.shape_cast %160 : vector<8x8xf32> to vector<1x8x8xf32>
    tpu.vector_store %arg9[%c3_142, %c0_143, %c0_144], %163 {strides = array<i32>} : memref<4x8x8xf32, #tpu.memory_space<vmem>>, vector<1x8x8xf32>,
    %c3_145 = arith.constant 3 : index
    %c0_146 = arith.constant 0 : index
    %c0_147 = arith.constant 0 : index
    %164 = vector.load %arg7[%c3_145, %c0_146, %c0_147] : memref<4x8x1xf32, #tpu.memory_space<vmem>>, vector<1x8x1xf32>
    %165 = vector.shape_cast %164 : vector<1x8x1xf32> to vector<8x1xf32>
    %166 = vector.shape_cast %137 : vector<8x1xf32> to vector<1x8x1xf32>
    tpu.vector_store %arg7[%c3_145, %c0_146, %c0_147], %166 {strides = array<i32>} : memref<4x8x1xf32, #tpu.memory_space<vmem>>, vector<1x8x1xf32>,
    %c0_i32_148 = arith.constant 0 : i32
    %167 = arith.cmpi eq, %arg2, %c0_i32_148 : i32
    %168 = arith.extui %167 : i1 to i32
    %c0_i32_149 = arith.constant 0 : i32
    %169 = arith.cmpi ne, %168, %c0_i32_149 : i32
    scf.if %169 {
      %c0_150 = arith.constant 0 : index
      %c0_151 = arith.constant 0 : index
      %c0_152 = arith.constant 0 : index
      %170 = vector.load %arg8[%c0_150, %c0_151, %c0_152] : memref<4x8x1xf32, #tpu.memory_space<vmem>>, vector<1x8x1xf32>
      %171 = vector.shape_cast %170 : vector<1x8x1xf32> to vector<8x1xf32>
      %172 = tpu.reciprocal %171 {approx = true} : vector<8x1xf32> -> vector<8x1xf32>
      %173 = arith.mulf %171, %172 : vector<8x1xf32>
      %cst_153 = arith.constant 2.000000e+00 : f32
      %174 = vector.broadcast %cst_153 : f32 to vector<8x1xf32>
      %175 = arith.subf %174, %173 : vector<8x1xf32>
      %176 = arith.mulf %172, %175 : vector<8x1xf32>
      %c0_154 = arith.constant 0 : index
      %c0_155 = arith.constant 0 : index
      %c0_156 = arith.constant 0 : index
      %177 = vector.load %arg9[%c0_154, %c0_155, %c0_156] : memref<4x8x8xf32, #tpu.memory_space<vmem>>, vector<1x8x8xf32>
      %178 = vector.shape_cast %177 : vector<1x8x8xf32> to vector<8x8xf32>
      %179 = vector.broadcast %176 : vector<8x1xf32> to vector<8x8xf32>
      %180 = arith.mulf %178, %179 : vector<8x8xf32>
      %181 = arith.truncf %180 : vector<8x8xf32> to vector<8x8xbf16>
      %c0_157 = arith.constant 0 : index
      %c0_158 = arith.constant 0 : index
      %c0_159 = arith.constant 0 : index
      %c0_160 = arith.constant 0 : index
      %182 = vector.load %arg6[%c0_157, %c0_158, %c0_159, %c0_160] : memref<1x8x4x8xbf16, #tpu.memory_space<vmem>>, vector<1x8x1x8xbf16>
      %183 = vector.shape_cast %182 : vector<1x8x1x8xbf16> to vector<8x8xbf16>
      %184 = vector.shape_cast %181 : vector<8x8xbf16> to vector<1x8x1x8xbf16>
      tpu.vector_store %arg6[%c0_157, %c0_158, %c0_159, %c0_160], %184 {strides = array<i32>} : memref<1x8x4x8xbf16, #tpu.memory_space<vmem>>, vector<1x8x1x8xbf16>,
      %c1_161 = arith.constant 1 : index
      %c0_162 = arith.constant 0 : index
      %c0_163 = arith.constant 0 : index
      %185 = vector.load %arg8[%c1_161, %c0_162, %c0_163] : memref<4x8x1xf32, #tpu.memory_space<vmem>>, vector<1x8x1xf32>
      %186 = vector.shape_cast %185 : vector<1x8x1xf32> to vector<8x1xf32>
      %187 = tpu.reciprocal %186 {approx = true} : vector<8x1xf32> -> vector<8x1xf32>
      %188 = arith.mulf %186, %187 : vector<8x1xf32>
      %cst_164 = arith.constant 2.000000e+00 : f32
      %189 = vector.broadcast %cst_164 : f32 to vector<8x1xf32>
      %190 = arith.subf %189, %188 : vector<8x1xf32>
      %191 = arith.mulf %187, %190 : vector<8x1xf32>
      %c1_165 = arith.constant 1 : index
      %c0_166 = arith.constant 0 : index
      %c0_167 = arith.constant 0 : index
      %192 = vector.load %arg9[%c1_165, %c0_166, %c0_167] : memref<4x8x8xf32, #tpu.memory_space<vmem>>, vector<1x8x8xf32>
      %193 = vector.shape_cast %192 : vector<1x8x8xf32> to vector<8x8xf32>
      %194 = vector.broadcast %191 : vector<8x1xf32> to vector<8x8xf32>
      %195 = arith.mulf %193, %194 : vector<8x8xf32>
      %196 = arith.truncf %195 : vector<8x8xf32> to vector<8x8xbf16>
      %c0_168 = arith.constant 0 : index
      %c0_169 = arith.constant 0 : index
      %c1_170 = arith.constant 1 : index
      %c0_171 = arith.constant 0 : index
      %197 = vector.load %arg6[%c0_168, %c0_169, %c1_170, %c0_171] : memref<1x8x4x8xbf16, #tpu.memory_space<vmem>>, vector<1x8x1x8xbf16>
      %198 = vector.shape_cast %197 : vector<1x8x1x8xbf16> to vector<8x8xbf16>
      %199 = vector.shape_cast %196 : vector<8x8xbf16> to vector<1x8x1x8xbf16>
      tpu.vector_store %arg6[%c0_168, %c0_169, %c1_170, %c0_171], %199 {strides = array<i32>} : memref<1x8x4x8xbf16, #tpu.memory_space<vmem>>, vector<1x8x1x8xbf16>,
      %c2_172 = arith.constant 2 : index
      %c0_173 = arith.constant 0 : index
      %c0_174 = arith.constant 0 : index
      %200 = vector.load %arg8[%c2_172, %c0_173, %c0_174] : memref<4x8x1xf32, #tpu.memory_space<vmem>>, vector<1x8x1xf32>
      %201 = vector.shape_cast %200 : vector<1x8x1xf32> to vector<8x1xf32>
      %202 = tpu.reciprocal %201 {approx = true} : vector<8x1xf32> -> vector<8x1xf32>
      %203 = arith.mulf %201, %202 : vector<8x1xf32>
      %cst_175 = arith.constant 2.000000e+00 : f32
      %204 = vector.broadcast %cst_175 : f32 to vector<8x1xf32>
      %205 = arith.subf %204, %203 : vector<8x1xf32>
      %206 = arith.mulf %202, %205 : vector<8x1xf32>
      %c2_176 = arith.constant 2 : index
      %c0_177 = arith.constant 0 : index
      %c0_178 = arith.constant 0 : index
      %207 = vector.load %arg9[%c2_176, %c0_177, %c0_178] : memref<4x8x8xf32, #tpu.memory_space<vmem>>, vector<1x8x8xf32>
      %208 = vector.shape_cast %207 : vector<1x8x8xf32> to vector<8x8xf32>
      %209 = vector.broadcast %206 : vector<8x1xf32> to vector<8x8xf32>
      %210 = arith.mulf %208, %209 : vector<8x8xf32>
      %211 = arith.truncf %210 : vector<8x8xf32> to vector<8x8xbf16>
      %c0_179 = arith.constant 0 : index
      %c0_180 = arith.constant 0 : index
      %c2_181 = arith.constant 2 : index
      %c0_182 = arith.constant 0 : index
      %212 = vector.load %arg6[%c0_179, %c0_180, %c2_181, %c0_182] : memref<1x8x4x8xbf16, #tpu.memory_space<vmem>>, vector<1x8x1x8xbf16>
      %213 = vector.shape_cast %212 : vector<1x8x1x8xbf16> to vector<8x8xbf16>
      %214 = vector.shape_cast %211 : vector<8x8xbf16> to vector<1x8x1x8xbf16>
      tpu.vector_store %arg6[%c0_179, %c0_180, %c2_181, %c0_182], %214 {strides = array<i32>} : memref<1x8x4x8xbf16, #tpu.memory_space<vmem>>, vector<1x8x1x8xbf16>,
      %c3_183 = arith.constant 3 : index
      %c0_184 = arith.constant 0 : index
      %c0_185 = arith.constant 0 : index
      %215 = vector.load %arg8[%c3_183, %c0_184, %c0_185] : memref<4x8x1xf32, #tpu.memory_space<vmem>>, vector<1x8x1xf32>
      %216 = vector.shape_cast %215 : vector<1x8x1xf32> to vector<8x1xf32>
      %217 = tpu.reciprocal %216 {approx = true} : vector<8x1xf32> -> vector<8x1xf32>
      %218 = arith.mulf %216, %217 : vector<8x1xf32>
      %cst_186 = arith.constant 2.000000e+00 : f32
      %219 = vector.broadcast %cst_186 : f32 to vector<8x1xf32>
      %220 = arith.subf %219, %218 : vector<8x1xf32>
      %221 = arith.mulf %217, %220 : vector<8x1xf32>
      %c3_187 = arith.constant 3 : index
      %c0_188 = arith.constant 0 : index
      %c0_189 = arith.constant 0 : index
      %222 = vector.load %arg9[%c3_187, %c0_188, %c0_189] : memref<4x8x8xf32, #tpu.memory_space<vmem>>, vector<1x8x8xf32>
      %223 = vector.shape_cast %222 : vector<1x8x8xf32> to vector<8x8xf32>
      %224 = vector.broadcast %221 : vector<8x1xf32> to vector<8x8xf32>
      %225 = arith.mulf %223, %224 : vector<8x8xf32>
      %226 = arith.truncf %225 : vector<8x8xf32> to vector<8x8xbf16>
      %c0_190 = arith.constant 0 : index
      %c0_191 = arith.constant 0 : index
      %c3_192 = arith.constant 3 : index
      %c0_193 = arith.constant 0 : index
      %227 = vector.load %arg6[%c0_190, %c0_191, %c3_192, %c0_193] : memref<1x8x4x8xbf16, #tpu.memory_space<vmem>>, vector<1x8x1x8xbf16>
      %228 = vector.shape_cast %227 : vector<1x8x1x8xbf16> to vector<8x8xbf16>
      %229 = vector.shape_cast %226 : vector<8x8xbf16> to vector<1x8x1x8xbf16>
      tpu.vector_store %arg6[%c0_190, %c0_191, %c3_192, %c0_193], %229 {strides = array<i32>} : memref<1x8x4x8xbf16, #tpu.memory_space<vmem>>, vector<1x8x1x8xbf16>,
    } else {
    }
    return
  }
  func.func @transform_0(%arg0: i32, %arg1: i32, %arg2: i32) -> (i32, i32, i32, i32, i32) {
    %c0_i32 = arith.constant 0 : i32
    %c0_i32_0 = arith.constant 0 : i32
    %c0_i32_1 = arith.constant 0 : i32
    %c0_i32_2 = arith.constant 0 : i32
    return %arg0, %arg1, %c0_i32, %c0_i32_0, %c0_i32_1 : i32, i32, i32, i32, i32
  }
  func.func @transform_1(%arg0: i32, %arg1: i32, %arg2: i32) -> (i32, i32, i32, i32, i32) {
    %c1_i32 = arith.constant 1 : i32
    %c0_i32 = arith.constant 0 : i32
    %c0_i32_0 = arith.constant 0 : i32
    %c0_i32_1 = arith.constant 0 : i32
    return %arg0, %arg2, %c1_i32, %c0_i32, %c0_i32_0 : i32, i32, i32, i32, i32
  }
  func.func @transform_2(%arg0: i32, %arg1: i32, %arg2: i32) -> (i32, i32, i32, i32, i32) {
    %c2_i32 = arith.constant 2 : i32
    %c0_i32 = arith.constant 0 : i32
    %c0_i32_0 = arith.constant 0 : i32
    %c0_i32_1 = arith.constant 0 : i32
    return %arg0, %arg2, %c2_i32, %c0_i32, %c0_i32_0 : i32, i32, i32, i32, i32
  }
  func.func @transform_3(%arg0: i32, %arg1: i32, %arg2: i32) -> (i32, i32, i32, i32) {
    %c0_i32 = arith.constant 0 : i32
    %c0_i32_0 = arith.constant 0 : i32
    %c0_i32_1 = arith.constant 0 : i32
    return %arg0, %arg1, %c0_i32, %c0_i32_0 : i32, i32, i32, i32
  }
}

module attributes {stable_mosaic.version = 11 : i64} {
  func.func @_linear_kernel(%arg0: i32, %arg1: i32, %arg2: i32, %arg3: memref<16x32xbf16, #tpu.memory_space<vmem>>, %arg4: memref<32x64xbf16, #tpu.memory_space<vmem>>, %arg5: memref<1x64xf32, #tpu.memory_space<vmem>>, %arg6: memref<16x64xbf16, #tpu.memory_space<vmem>>, %arg7: memref<16x64xf32, #tpu.memory_space<vmem>>) attributes {dimension_semantics = [#tpu.dimension_semantics<parallel>, #tpu.dimension_semantics<parallel>, #tpu.dimension_semantics<arbitrary>], iteration_bounds = array<i64: 1, 1, 1>, scalar_prefetch = 0 : i64, scratch_operands = 1 : i64, tpu.core_type = #tpu.core_type<tc>, window_params = [{transform_indices = @transform_0, window_bounds = array<i64: 16, 32>}, {transform_indices = @transform_1, window_bounds = array<i64: 32, 64>}, {transform_indices = @transform_2, window_bounds = array<i64: 1, 64>}, {transform_indices = @transform_3, window_bounds = array<i64: 16, 64>}]} {
    %c0_i32 = arith.constant 0 : i32
    %0 = arith.cmpi eq, %arg2, %c0_i32 : i32
    %1 = arith.extui %0 : i1 to i32
    %c0_i32_0 = arith.constant 0 : i32
    %2 = arith.cmpi ne, %1, %c0_i32_0 : i32
    scf.if %2 {
      %cst_10 = arith.constant 0.000000e+00 : f32
      %12 = vector.broadcast %cst_10 : f32 to vector<16x64xf32>
      %c0_11 = arith.constant 0 : index
      %c0_12 = arith.constant 0 : index
      %13 = vector.load %arg7[%c0_11, %c0_12] : memref<16x64xf32, #tpu.memory_space<vmem>>, vector<16x64xf32>
      tpu.vector_store %arg7[%c0_11, %c0_12], %12 {strides = array<i32>} : memref<16x64xf32, #tpu.memory_space<vmem>>, vector<16x64xf32>,
    } else {
    }
    %c0 = arith.constant 0 : index
    %c0_1 = arith.constant 0 : index
    %3 = vector.load %arg7[%c0, %c0_1] : memref<16x64xf32, #tpu.memory_space<vmem>>, vector<16x64xf32>
    %c0_2 = arith.constant 0 : index
    %c0_3 = arith.constant 0 : index
    %4 = vector.load %arg3[%c0_2, %c0_3] : memref<16x32xbf16, #tpu.memory_space<vmem>>, vector<16x32xbf16>
    %c0_4 = arith.constant 0 : index
    %c0_5 = arith.constant 0 : index
    %5 = vector.load %arg4[%c0_4, %c0_5] : memref<32x64xbf16, #tpu.memory_space<vmem>>, vector<32x64xbf16>
    %cst = arith.constant dense<0.000000e+00> : vector<16x64xf32>
    %6 = tpu.matmul %4, %5, %cst {dimension_numbers = #tpu.dot_dimension_numbers<[1], [0], [0], [1], [0, 0, 1, 1], [], []>} : vector<16x32xbf16>, vector<32x64xbf16>, vector<16x64xf32> -> vector<16x64xf32>
    %7 = arith.addf %3, %6 : vector<16x64xf32>
    %c0_6 = arith.constant 0 : index
    %c0_7 = arith.constant 0 : index
    %8 = vector.load %arg7[%c0_6, %c0_7] : memref<16x64xf32, #tpu.memory_space<vmem>>, vector<16x64xf32>
    tpu.vector_store %arg7[%c0_6, %c0_7], %7 {strides = array<i32>} : memref<16x64xf32, #tpu.memory_space<vmem>>, vector<16x64xf32>,
    %c0_i32_8 = arith.constant 0 : i32
    %9 = arith.cmpi eq, %arg2, %c0_i32_8 : i32
    %10 = arith.extui %9 : i1 to i32
    %c0_i32_9 = arith.constant 0 : i32
    %11 = arith.cmpi ne, %10, %c0_i32_9 : i32
    scf.if %11 {
      %c0_10 = arith.constant 0 : index
      %c0_11 = arith.constant 0 : index
      %12 = vector.load %arg7[%c0_10, %c0_11] : memref<16x64xf32, #tpu.memory_space<vmem>>, vector<16x64xf32>
      %c0_12 = arith.constant 0 : index
      %c0_13 = arith.constant 0 : index
      %13 = vector.load %arg5[%c0_12, %c0_13] : memref<1x64xf32, #tpu.memory_space<vmem>>, vector<1x64xf32>
      %14 = vector.broadcast %13 : vector<1x64xf32> to vector<16x64xf32>
      %15 = arith.addf %12, %14 : vector<16x64xf32>
      %16 = arith.truncf %15 : vector<16x64xf32> to vector<16x64xbf16>
      %c0_14 = arith.constant 0 : index
      %c0_15 = arith.constant 0 : index
      %17 = vector.load %arg6[%c0_14, %c0_15] : memref<16x64xbf16, #tpu.memory_space<vmem>>, vector<16x64xbf16>
      tpu.vector_store %arg6[%c0_14, %c0_15], %16 {strides = array<i32>} : memref<16x64xbf16, #tpu.memory_space<vmem>>, vector<16x64xbf16>,
    } else {
    }
    return
  }
  func.func @transform_0(%arg0: i32, %arg1: i32, %arg2: i32) -> (i32, i32) {
    %c0_i32 = arith.constant 0 : i32
    return %arg0, %arg2 : i32, i32
  }
  func.func @transform_1(%arg0: i32, %arg1: i32, %arg2: i32) -> (i32, i32) {
    %c0_i32 = arith.constant 0 : i32
    return %arg2, %arg1 : i32, i32
  }
  func.func @transform_2(%arg0: i32, %arg1: i32, %arg2: i32) -> (i32, i32) {
    %c0_i32 = arith.constant 0 : i32
    %c0_i32_0 = arith.constant 0 : i32
    return %c0_i32, %arg1 : i32, i32
  }
  func.func @transform_3(%arg0: i32, %arg1: i32, %arg2: i32) -> (i32, i32) {
    %c0_i32 = arith.constant 0 : i32
    return %arg0, %arg1 : i32, i32
  }
}

module attributes {stable_mosaic.version = 11 : i64} {
  func.func @_flash_attn_kernel(%arg0: i32, %arg1: i32, %arg2: i32, %arg3: memref<1x8x4x8xbf16, #tpu.memory_space<vmem>>, %arg4: memref<1x8x1x4x8xbf16, #tpu.memory_space<vmem>>, %arg5: memref<1x8x1x4x8xbf16, #tpu.memory_space<vmem>>, %arg6: memref<1x8x4x8xbf16, #tpu.memory_space<vmem>>, %arg7: memref<4x8x1xf32, #tpu.memory_space<vmem>>, %arg8: memref<4x8x1xf32, #tpu.memory_space<vmem>>, %arg9: memref<4x8x8xf32, #tpu.memory_space<vmem>>) attributes {dimension_semantics = [#tpu.dimension_semantics<parallel>, #tpu.dimension_semantics<parallel>, #tpu.dimension_semantics<arbitrary>], iteration_bounds = array<i64: 2, 1, 1>, scalar_prefetch = 0 : i64, scratch_operands = 3 : i64, tpu.core_type = #tpu.core_type<tc>, window_params = [{transform_indices = @transform_0, window_bounds = array<i64: 1, 8, 4, 8>}, {transform_indices = @transform_1, window_bounds = array<i64: 1, 8, 1, 4, 8>}, {transform_indices = @transform_2, window_bounds = array<i64: 1, 8, 1, 4, 8>}, {transform_indices = @transform_3, window_bounds = array<i64: 1, 8, 4, 8>}]} {
    %c0_i32 = arith.constant 0 : i32
    %0 = arith.cmpi eq, %arg2, %c0_i32 : i32
    %1 = arith.extui %0 : i1 to i32
    %c0_i32_0 = arith.constant 0 : i32
    %2 = arith.cmpi ne, %1, %c0_i32_0 : i32
    scf.if %2 {
      %cst_146 = arith.constant 0xFF800000 : f32
      %170 = vector.broadcast %cst_146 : f32 to vector<4x8x1xf32>
      %c0_147 = arith.constant 0 : index
      %c0_148 = arith.constant 0 : index
      %c0_149 = arith.constant 0 : index
      %171 = vector.load %arg7[%c0_147, %c0_148, %c0_149] : memref<4x8x1xf32, #tpu.memory_space<vmem>>, vector<4x8x1xf32>
      tpu.vector_store %arg7[%c0_147, %c0_148, %c0_149], %170 {strides = array<i32>} : memref<4x8x1xf32, #tpu.memory_space<vmem>>, vector<4x8x1xf32>,
      %cst_150 = arith.constant 0.000000e+00 : f32
      %172 = vector.broadcast %cst_150 : f32 to vector<4x8x1xf32>
      %c0_151 = arith.constant 0 : index
      %c0_152 = arith.constant 0 : index
      %c0_153 = arith.constant 0 : index
      %173 = vector.load %arg8[%c0_151, %c0_152, %c0_153] : memref<4x8x1xf32, #tpu.memory_space<vmem>>, vector<4x8x1xf32>
      tpu.vector_store %arg8[%c0_151, %c0_152, %c0_153], %172 {strides = array<i32>} : memref<4x8x1xf32, #tpu.memory_space<vmem>>, vector<4x8x1xf32>,
      %cst_154 = arith.constant 0.000000e+00 : f32
      %174 = vector.broadcast %cst_154 : f32 to vector<4x8x8xf32>
      %c0_155 = arith.constant 0 : index
      %c0_156 = arith.constant 0 : index
      %c0_157 = arith.constant 0 : index
      %175 = vector.load %arg9[%c0_155, %c0_156, %c0_157] : memref<4x8x8xf32, #tpu.memory_space<vmem>>, vector<4x8x8xf32>
      tpu.vector_store %arg9[%c0_155, %c0_156, %c0_157], %174 {strides = array<i32>} : memref<4x8x8xf32, #tpu.memory_space<vmem>>, vector<4x8x8xf32>,
    } else {
    }
    %c0 = arith.constant 0 : index
    %c0_1 = arith.constant 0 : index
    %c0_2 = arith.constant 0 : index
    %c0_3 = arith.constant 0 : index
    %3 = vector.load %arg3[%c0, %c0_1, %c0_2, %c0_3] : memref<1x8x4x8xbf16, #tpu.memory_space<vmem>>, vector<1x8x1x8xbf16>
    %4 = vector.shape_cast %3 : vector<1x8x1x8xbf16> to vector<8x8xbf16>
    %c0_4 = arith.constant 0 : index
    %c0_5 = arith.constant 0 : index
    %c0_6 = arith.constant 0 : index
    %c0_7 = arith.constant 0 : index
    %c0_8 = arith.constant 0 : index
    %5 = vector.load %arg4[%c0_4, %c0_5, %c0_6, %c0_7, %c0_8] : memref<1x8x1x4x8xbf16, #tpu.memory_space<vmem>>, vector<1x8x1x1x8xbf16>
    %6 = vector.shape_cast %5 : vector<1x8x1x1x8xbf16> to vector<8x8xbf16>
    %cst = arith.constant dense<0.000000e+00> : vector<8x8xf32>
    %7 = tpu.matmul %4, %6, %cst {dimension_numbers = #tpu.dot_dimension_numbers<[1], [1], [0], [0], [0, 0, 1, 0], [], []>} : vector<8x8xbf16>, vector<8x8xbf16>, vector<8x8xf32> -> vector<8x8xf32>
    %cst_9 = arith.constant 0.353553385 : f32
    %8 = vector.broadcast %cst_9 : f32 to vector<8x8xf32>
    %9 = arith.mulf %7, %8 : vector<8x8xf32>
    %c0_10 = arith.constant 0 : index
    %c0_11 = arith.constant 0 : index
    %c0_12 = arith.constant 0 : index
    %10 = vector.load %arg7[%c0_10, %c0_11, %c0_12] : memref<4x8x1xf32, #tpu.memory_space<vmem>>, vector<1x8x1xf32>
    %11 = vector.shape_cast %10 : vector<1x8x1xf32> to vector<8x1xf32>
    %cst_13 = arith.constant dense<0xFF800000> : vector<8xf32>
    %12 = vector.multi_reduction <maximumf>, %9, %cst_13 [1] : vector<8x8xf32> to vector<8xf32>
    %13 = vector.shape_cast %12 : vector<8xf32> to vector<8x1xf32>
    %14 = arith.maximumf %11, %13 : vector<8x1xf32>
    %15 = arith.subf %11, %14 : vector<8x1xf32>
    %16 = math.exp %15 : vector<8x1xf32>
    %17 = vector.broadcast %14 : vector<8x1xf32> to vector<8x8xf32>
    %18 = arith.subf %9, %17 : vector<8x8xf32>
    %19 = math.exp %18 : vector<8x8xf32>
    %c0_14 = arith.constant 0 : index
    %c0_15 = arith.constant 0 : index
    %c0_16 = arith.constant 0 : index
    %20 = vector.load %arg8[%c0_14, %c0_15, %c0_16] : memref<4x8x1xf32, #tpu.memory_space<vmem>>, vector<1x8x1xf32>
    %21 = vector.shape_cast %20 : vector<1x8x1xf32> to vector<8x1xf32>
    %22 = arith.mulf %16, %21 : vector<8x1xf32>
    %cst_17 = arith.constant dense<0.000000e+00> : vector<8xf32>
    %23 = vector.multi_reduction <add>, %19, %cst_17 [1] : vector<8x8xf32> to vector<8xf32>
    %24 = vector.shape_cast %23 : vector<8xf32> to vector<8x1xf32>
    %25 = arith.addf %22, %24 : vector<8x1xf32>
    %c0_18 = arith.constant 0 : index
    %c0_19 = arith.constant 0 : index
    %c0_20 = arith.constant 0 : index
    %26 = vector.load %arg8[%c0_18, %c0_19, %c0_20] : memref<4x8x1xf32, #tpu.memory_space<vmem>>, vector<1x8x1xf32>
    %27 = vector.shape_cast %26 : vector<1x8x1xf32> to vector<8x1xf32>
    %28 = vector.shape_cast %25 : vector<8x1xf32> to vector<1x8x1xf32>
    tpu.vector_store %arg8[%c0_18, %c0_19, %c0_20], %28 {strides = array<i32>} : memref<4x8x1xf32, #tpu.memory_space<vmem>>, vector<1x8x1xf32>,
    %c0_21 = arith.constant 0 : index
    %c0_22 = arith.constant 0 : index
    %c0_23 = arith.constant 0 : index
    %29 = vector.load %arg9[%c0_21, %c0_22, %c0_23] : memref<4x8x8xf32, #tpu.memory_space<vmem>>, vector<1x8x8xf32>
    %30 = vector.shape_cast %29 : vector<1x8x8xf32> to vector<8x8xf32>
    %31 = vector.broadcast %16 : vector<8x1xf32> to vector<8x8xf32>
    %32 = arith.mulf %31, %30 : vector<8x8xf32>
    %33 = arith.truncf %19 : vector<8x8xf32> to vector<8x8xbf16>
    %c0_24 = arith.constant 0 : index
    %c0_25 = arith.constant 0 : index
    %c0_26 = arith.constant 0 : index
    %c0_27 = arith.constant 0 : index
    %c0_28 = arith.constant 0 : index
    %34 = vector.load %arg5[%c0_24, %c0_25, %c0_26, %c0_27, %c0_28] : memref<1x8x1x4x8xbf16, #tpu.memory_space<vmem>>, vector<1x8x1x1x8xbf16>
    %35 = vector.shape_cast %34 : vector<1x8x1x1x8xbf16> to vector<8x8xbf16>
    %cst_29 = arith.constant dense<0.000000e+00> : vector<8x8xf32>
    %36 = tpu.matmul %33, %35, %cst_29 {dimension_numbers = #tpu.dot_dimension_numbers<[1], [0], [0], [1], [0, 0, 1, 1], [], []>} : vector<8x8xbf16>, vector<8x8xbf16>, vector<8x8xf32> -> vector<8x8xf32>
    %37 = arith.addf %32, %36 : vector<8x8xf32>
    %c0_30 = arith.constant 0 : index
    %c0_31 = arith.constant 0 : index
    %c0_32 = arith.constant 0 : index
    %38 = vector.load %arg9[%c0_30, %c0_31, %c0_32] : memref<4x8x8xf32, #tpu.memory_space<vmem>>, vector<1x8x8xf32>
    %39 = vector.shape_cast %38 : vector<1x8x8xf32> to vector<8x8xf32>
    %40 = vector.shape_cast %37 : vector<8x8xf32> to vector<1x8x8xf32>
    tpu.vector_store %arg9[%c0_30, %c0_31, %c0_32], %40 {strides = array<i32>} : memref<4x8x8xf32, #tpu.memory_space<vmem>>, vector<1x8x8xf32>,
    %c0_33 = arith.constant 0 : index
    %c0_34 = arith.constant 0 : index
    %c0_35 = arith.constant 0 : index
    %41 = vector.load %arg7[%c0_33, %c0_34, %c0_35] : memref<4x8x1xf32, #tpu.memory_space<vmem>>, vector<1x8x1xf32>
    %42 = vector.shape_cast %41 : vector<1x8x1xf32> to vector<8x1xf32>
    %43 = vector.shape_cast %14 : vector<8x1xf32> to vector<1x8x1xf32>
    tpu.vector_store %arg7[%c0_33, %c0_34, %c0_35], %43 {strides = array<i32>} : memref<4x8x1xf32, #tpu.memory_space<vmem>>, vector<1x8x1xf32>,
    %c0_36 = arith.constant 0 : index
    %c0_37 = arith.constant 0 : index
    %c1 = arith.constant 1 : index
    %c0_38 = arith.constant 0 : index
    %44 = vector.load %arg3[%c0_36, %c0_37, %c1, %c0_38] : memref<1x8x4x8xbf16, #tpu.memory_space<vmem>>, vector<1x8x1x8xbf16>
    %45 = vector.shape_cast %44 : vector<1x8x1x8xbf16> to vector<8x8xbf16>
    %c0_39 = arith.constant 0 : index
    %c0_40 = arith.constant 0 : index
    %c0_41 = arith.constant 0 : index
    %c1_42 = arith.constant 1 : index
    %c0_43 = arith.constant 0 : index
    %46 = vector.load %arg4[%c0_39, %c0_40, %c0_41, %c1_42, %c0_43] : memref<1x8x1x4x8xbf16, #tpu.memory_space<vmem>>, vector<1x8x1x1x8xbf16>
    %47 = vector.shape_cast %46 : vector<1x8x1x1x8xbf16> to vector<8x8xbf16>
    %cst_44 = arith.constant dense<0.000000e+00> : vector<8x8xf32>
    %48 = tpu.matmul %45, %47, %cst_44 {dimension_numbers = #tpu.dot_dimension_numbers<[1], [1], [0], [0], [0, 0, 1, 0], [], []>} : vector<8x8xbf16>, vector<8x8xbf16>, vector<8x8xf32> -> vector<8x8xf32>
    %cst_45 = arith.constant 0.353553385 : f32
    %49 = vector.broadcast %cst_45 : f32 to vector<8x8xf32>
    %50 = arith.mulf %48, %49 : vector<8x8xf32>
    %c1_46 = arith.constant 1 : index
    %c0_47 = arith.constant 0 : index
    %c0_48 = arith.constant 0 : index
    %51 = vector.load %arg7[%c1_46, %c0_47, %c0_48] : memref<4x8x1xf32, #tpu.memory_space<vmem>>, vector<1x8x1xf32>
    %52 = vector.shape_cast %51 : vector<1x8x1xf32> to vector<8x1xf32>
    %cst_49 = arith.constant dense<0xFF800000> : vector<8xf32>
    %53 = vector.multi_reduction <maximumf>, %50, %cst_49 [1] : vector<8x8xf32> to vector<8xf32>
    %54 = vector.shape_cast %53 : vector<8xf32> to vector<8x1xf32>
    %55 = arith.maximumf %52, %54 : vector<8x1xf32>
    %56 = arith.subf %52, %55 : vector<8x1xf32>
    %57 = math.exp %56 : vector<8x1xf32>
    %58 = vector.broadcast %55 : vector<8x1xf32> to vector<8x8xf32>
    %59 = arith.subf %50, %58 : vector<8x8xf32>
    %60 = math.exp %59 : vector<8x8xf32>
    %c1_50 = arith.constant 1 : index
    %c0_51 = arith.constant 0 : index
    %c0_52 = arith.constant 0 : index
    %61 = vector.load %arg8[%c1_50, %c0_51, %c0_52] : memref<4x8x1xf32, #tpu.memory_space<vmem>>, vector<1x8x1xf32>
    %62 = vector.shape_cast %61 : vector<1x8x1xf32> to vector<8x1xf32>
    %63 = arith.mulf %57, %62 : vector<8x1xf32>
    %cst_53 = arith.constant dense<0.000000e+00> : vector<8xf32>
    %64 = vector.multi_reduction <add>, %60, %cst_53 [1] : vector<8x8xf32> to vector<8xf32>
    %65 = vector.shape_cast %64 : vector<8xf32> to vector<8x1xf32>
    %66 = arith.addf %63, %65 : vector<8x1xf32>
    %c1_54 = arith.constant 1 : index
    %c0_55 = arith.constant 0 : index
    %c0_56 = arith.constant 0 : index
    %67 = vector.load %arg8[%c1_54, %c0_55, %c0_56] : memref<4x8x1xf32, #tpu.memory_space<vmem>>, vector<1x8x1xf32>
    %68 = vector.shape_cast %67 : vector<1x8x1xf32> to vector<8x1xf32>
    %69 = vector.shape_cast %66 : vector<8x1xf32> to vector<1x8x1xf32>
    tpu.vector_store %arg8[%c1_54, %c0_55, %c0_56], %69 {strides = array<i32>} : memref<4x8x1xf32, #tpu.memory_space<vmem>>, vector<1x8x1xf32>,
    %c1_57 = arith.constant 1 : index
    %c0_58 = arith.constant 0 : index
    %c0_59 = arith.constant 0 : index
    %70 = vector.load %arg9[%c1_57, %c0_58, %c0_59] : memref<4x8x8xf32, #tpu.memory_space<vmem>>, vector<1x8x8xf32>
    %71 = vector.shape_cast %70 : vector<1x8x8xf32> to vector<8x8xf32>
    %72 = vector.broadcast %57 : vector<8x1xf32> to vector<8x8xf32>
    %73 = arith.mulf %72, %71 : vector<8x8xf32>
    %74 = arith.truncf %60 : vector<8x8xf32> to vector<8x8xbf16>
    %c0_60 = arith.constant 0 : index
    %c0_61 = arith.constant 0 : index
    %c0_62 = arith.constant 0 : index
    %c1_63 = arith.constant 1 : index
    %c0_64 = arith.constant 0 : index
    %75 = vector.load %arg5[%c0_60, %c0_61, %c0_62, %c1_63, %c0_64] : memref<1x8x1x4x8xbf16, #tpu.memory_space<vmem>>, vector<1x8x1x1x8xbf16>
    %76 = vector.shape_cast %75 : vector<1x8x1x1x8xbf16> to vector<8x8xbf16>
    %cst_65 = arith.constant dense<0.000000e+00> : vector<8x8xf32>
    %77 = tpu.matmul %74, %76, %cst_65 {dimension_numbers = #tpu.dot_dimension_numbers<[1], [0], [0], [1], [0, 0, 1, 1], [], []>} : vector<8x8xbf16>, vector<8x8xbf16>, vector<8x8xf32> -> vector<8x8xf32>
    %78 = arith.addf %73, %77 : vector<8x8xf32>
    %c1_66 = arith.constant 1 : index
    %c0_67 = arith.constant 0 : index
    %c0_68 = arith.constant 0 : index
    %79 = vector.load %arg9[%c1_66, %c0_67, %c0_68] : memref<4x8x8xf32, #tpu.memory_space<vmem>>, vector<1x8x8xf32>
    %80 = vector.shape_cast %79 : vector<1x8x8xf32> to vector<8x8xf32>
    %81 = vector.shape_cast %78 : vector<8x8xf32> to vector<1x8x8xf32>
    tpu.vector_store %arg9[%c1_66, %c0_67, %c0_68], %81 {strides = array<i32>} : memref<4x8x8xf32, #tpu.memory_space<vmem>>, vector<1x8x8xf32>,
    %c1_69 = arith.constant 1 : index
    %c0_70 = arith.constant 0 : index
    %c0_71 = arith.constant 0 : index
    %82 = vector.load %arg7[%c1_69, %c0_70, %c0_71] : memref<4x8x1xf32, #tpu.memory_space<vmem>>, vector<1x8x1xf32>
    %83 = vector.shape_cast %82 : vector<1x8x1xf32> to vector<8x1xf32>
    %84 = vector.shape_cast %55 : vector<8x1xf32> to vector<1x8x1xf32>
    tpu.vector_store %arg7[%c1_69, %c0_70, %c0_71], %84 {strides = array<i32>} : memref<4x8x1xf32, #tpu.memory_space<vmem>>, vector<1x8x1xf32>,
    %c0_72 = arith.constant 0 : index
    %c0_73 = arith.constant 0 : index
    %c2 = arith.constant 2 : index
    %c0_74 = arith.constant 0 : index
    %85 = vector.load %arg3[%c0_72, %c0_73, %c2, %c0_74] : memref<1x8x4x8xbf16, #tpu.memory_space<vmem>>, vector<1x8x1x8xbf16>
    %86 = vector.shape_cast %85 : vector<1x8x1x8xbf16> to vector<8x8xbf16>
    %c0_75 = arith.constant 0 : index
    %c0_76 = arith.constant 0 : index
    %c0_77 = arith.constant 0 : index
    %c2_78 = arith.constant 2 : index
    %c0_79 = arith.constant 0 : index
    %87 = vector.load %arg4[%c0_75, %c0_76, %c0_77, %c2_78, %c0_79] : memref<1x8x1x4x8xbf16, #tpu.memory_space<vmem>>, vector<1x8x1x1x8xbf16>
    %88 = vector.shape_cast %87 : vector<1x8x1x1x8xbf16> to vector<8x8xbf16>
    %cst_80 = arith.constant dense<0.000000e+00> : vector<8x8xf32>
    %89 = tpu.matmul %86, %88, %cst_80 {dimension_numbers = #tpu.dot_dimension_numbers<[1], [1], [0], [0], [0, 0, 1, 0], [], []>} : vector<8x8xbf16>, vector<8x8xbf16>, vector<8x8xf32> -> vector<8x8xf32>
    %cst_81 = arith.constant 0.353553385 : f32
    %90 = vector.broadcast %cst_81 : f32 to vector<8x8xf32>
    %91 = arith.mulf %89, %90 : vector<8x8xf32>
    %c2_82 = arith.constant 2 : index
    %c0_83 = arith.constant 0 : index
    %c0_84 = arith.constant 0 : index
    %92 = vector.load %arg7[%c2_82, %c0_83, %c0_84] : memref<4x8x1xf32, #tpu.memory_space<vmem>>, vector<1x8x1xf32>
    %93 = vector.shape_cast %92 : vector<1x8x1xf32> to vector<8x1xf32>
    %cst_85 = arith.constant dense<0xFF800000> : vector<8xf32>
    %94 = vector.multi_reduction <maximumf>, %91, %cst_85 [1] : vector<8x8xf32> to vector<8xf32>
    %95 = vector.shape_cast %94 : vector<8xf32> to vector<8x1xf32>
    %96 = arith.maximumf %93, %95 : vector<8x1xf32>
    %97 = arith.subf %93, %96 : vector<8x1xf32>
    %98 = math.exp %97 : vector<8x1xf32>
    %99 = vector.broadcast %96 : vector<8x1xf32> to vector<8x8xf32>
    %100 = arith.subf %91, %99 : vector<8x8xf32>
    %101 = math.exp %100 : vector<8x8xf32>
    %c2_86 = arith.constant 2 : index
    %c0_87 = arith.constant 0 : index
    %c0_88 = arith.constant 0 : index
    %102 = vector.load %arg8[%c2_86, %c0_87, %c0_88] : memref<4x8x1xf32, #tpu.memory_space<vmem>>, vector<1x8x1xf32>
    %103 = vector.shape_cast %102 : vector<1x8x1xf32> to vector<8x1xf32>
    %104 = arith.mulf %98, %103 : vector<8x1xf32>
    %cst_89 = arith.constant dense<0.000000e+00> : vector<8xf32>
    %105 = vector.multi_reduction <add>, %101, %cst_89 [1] : vector<8x8xf32> to vector<8xf32>
    %106 = vector.shape_cast %105 : vector<8xf32> to vector<8x1xf32>
    %107 = arith.addf %104, %106 : vector<8x1xf32>
    %c2_90 = arith.constant 2 : index
    %c0_91 = arith.constant 0 : index
    %c0_92 = arith.constant 0 : index
    %108 = vector.load %arg8[%c2_90, %c0_91, %c0_92] : memref<4x8x1xf32, #tpu.memory_space<vmem>>, vector<1x8x1xf32>
    %109 = vector.shape_cast %108 : vector<1x8x1xf32> to vector<8x1xf32>
    %110 = vector.shape_cast %107 : vector<8x1xf32> to vector<1x8x1xf32>
    tpu.vector_store %arg8[%c2_90, %c0_91, %c0_92], %110 {strides = array<i32>} : memref<4x8x1xf32, #tpu.memory_space<vmem>>, vector<1x8x1xf32>,
    %c2_93 = arith.constant 2 : index
    %c0_94 = arith.constant 0 : index
    %c0_95 = arith.constant 0 : index
    %111 = vector.load %arg9[%c2_93, %c0_94, %c0_95] : memref<4x8x8xf32, #tpu.memory_space<vmem>>, vector<1x8x8xf32>
    %112 = vector.shape_cast %111 : vector<1x8x8xf32> to vector<8x8xf32>
    %113 = vector.broadcast %98 : vector<8x1xf32> to vector<8x8xf32>
    %114 = arith.mulf %113, %112 : vector<8x8xf32>
    %115 = arith.truncf %101 : vector<8x8xf32> to vector<8x8xbf16>
    %c0_96 = arith.constant 0 : index
    %c0_97 = arith.constant 0 : index
    %c0_98 = arith.constant 0 : index
    %c2_99 = arith.constant 2 : index
    %c0_100 = arith.constant 0 : index
    %116 = vector.load %arg5[%c0_96, %c0_97, %c0_98, %c2_99, %c0_100] : memref<1x8x1x4x8xbf16, #tpu.memory_space<vmem>>, vector<1x8x1x1x8xbf16>
    %117 = vector.shape_cast %116 : vector<1x8x1x1x8xbf16> to vector<8x8xbf16>
    %cst_101 = arith.constant dense<0.000000e+00> : vector<8x8xf32>
    %118 = tpu.matmul %115, %117, %cst_101 {dimension_numbers = #tpu.dot_dimension_numbers<[1], [0], [0], [1], [0, 0, 1, 1], [], []>} : vector<8x8xbf16>, vector<8x8xbf16>, vector<8x8xf32> -> vector<8x8xf32>
    %119 = arith.addf %114, %118 : vector<8x8xf32>
    %c2_102 = arith.constant 2 : index
    %c0_103 = arith.constant 0 : index
    %c0_104 = arith.constant 0 : index
    %120 = vector.load %arg9[%c2_102, %c0_103, %c0_104] : memref<4x8x8xf32, #tpu.memory_space<vmem>>, vector<1x8x8xf32>
    %121 = vector.shape_cast %120 : vector<1x8x8xf32> to vector<8x8xf32>
    %122 = vector.shape_cast %119 : vector<8x8xf32> to vector<1x8x8xf32>
    tpu.vector_store %arg9[%c2_102, %c0_103, %c0_104], %122 {strides = array<i32>} : memref<4x8x8xf32, #tpu.memory_space<vmem>>, vector<1x8x8xf32>,
    %c2_105 = arith.constant 2 : index
    %c0_106 = arith.constant 0 : index
    %c0_107 = arith.constant 0 : index
    %123 = vector.load %arg7[%c2_105, %c0_106, %c0_107] : memref<4x8x1xf32, #tpu.memory_space<vmem>>, vector<1x8x1xf32>
    %124 = vector.shape_cast %123 : vector<1x8x1xf32> to vector<8x1xf32>
    %125 = vector.shape_cast %96 : vector<8x1xf32> to vector<1x8x1xf32>
    tpu.vector_store %arg7[%c2_105, %c0_106, %c0_107], %125 {strides = array<i32>} : memref<4x8x1xf32, #tpu.memory_space<vmem>>, vector<1x8x1xf32>,
    %c0_108 = arith.constant 0 : index
    %c0_109 = arith.constant 0 : index
    %c3 = arith.constant 3 : index
    %c0_110 = arith.constant 0 : index
    %126 = vector.load %arg3[%c0_108, %c0_109, %c3, %c0_110] : memref<1x8x4x8xbf16, #tpu.memory_space<vmem>>, vector<1x8x1x8xbf16>
    %127 = vector.shape_cast %126 : vector<1x8x1x8xbf16> to vector<8x8xbf16>
    %c0_111 = arith.constant 0 : index
    %c0_112 = arith.constant 0 : index
    %c0_113 = arith.constant 0 : index
    %c3_114 = arith.constant 3 : index
    %c0_115 = arith.constant 0 : index
    %128 = vector.load %arg4[%c0_111, %c0_112, %c0_113, %c3_114, %c0_115] : memref<1x8x1x4x8xbf16, #tpu.memory_space<vmem>>, vector<1x8x1x1x8xbf16>
    %129 = vector.shape_cast %128 : vector<1x8x1x1x8xbf16> to vector<8x8xbf16>
    %cst_116 = arith.constant dense<0.000000e+00> : vector<8x8xf32>
    %130 = tpu.matmul %127, %129, %cst_116 {dimension_numbers = #tpu.dot_dimension_numbers<[1], [1], [0], [0], [0, 0, 1, 0], [], []>} : vector<8x8xbf16>, vector<8x8xbf16>, vector<8x8xf32> -> vector<8x8xf32>
    %cst_117 = arith.constant 0.353553385 : f32
    %131 = vector.broadcast %cst_117 : f32 to vector<8x8xf32>
    %132 = arith.mulf %130, %131 : vector<8x8xf32>
    %c3_118 = arith.constant 3 : index
    %c0_119 = arith.constant 0 : index
    %c0_120 = arith.constant 0 : index
    %133 = vector.load %arg7[%c3_118, %c0_119, %c0_120] : memref<4x8x1xf32, #tpu.memory_space<vmem>>, vector<1x8x1xf32>
    %134 = vector.shape_cast %133 : vector<1x8x1xf32> to vector<8x1xf32>
    %cst_121 = arith.constant dense<0xFF800000> : vector<8xf32>
    %135 = vector.multi_reduction <maximumf>, %132, %cst_121 [1] : vector<8x8xf32> to vector<8xf32>
    %136 = vector.shape_cast %135 : vector<8xf32> to vector<8x1xf32>
    %137 = arith.maximumf %134, %136 : vector<8x1xf32>
    %138 = arith.subf %134, %137 : vector<8x1xf32>
    %139 = math.exp %138 : vector<8x1xf32>
    %140 = vector.broadcast %137 : vector<8x1xf32> to vector<8x8xf32>
    %141 = arith.subf %132, %140 : vector<8x8xf32>
    %142 = math.exp %141 : vector<8x8xf32>
    %c3_122 = arith.constant 3 : index
    %c0_123 = arith.constant 0 : index
    %c0_124 = arith.constant 0 : index
    %143 = vector.load %arg8[%c3_122, %c0_123, %c0_124] : memref<4x8x1xf32, #tpu.memory_space<vmem>>, vector<1x8x1xf32>
    %144 = vector.shape_cast %143 : vector<1x8x1xf32> to vector<8x1xf32>
    %145 = arith.mulf %139, %144 : vector<8x1xf32>
    %cst_125 = arith.constant dense<0.000000e+00> : vector<8xf32>
    %146 = vector.multi_reduction <add>, %142, %cst_125 [1] : vector<8x8xf32> to vector<8xf32>
    %147 = vector.shape_cast %146 : vector<8xf32> to vector<8x1xf32>
    %148 = arith.addf %145, %147 : vector<8x1xf32>
    %c3_126 = arith.constant 3 : index
    %c0_127 = arith.constant 0 : index
    %c0_128 = arith.constant 0 : index
    %149 = vector.load %arg8[%c3_126, %c0_127, %c0_128] : memref<4x8x1xf32, #tpu.memory_space<vmem>>, vector<1x8x1xf32>
    %150 = vector.shape_cast %149 : vector<1x8x1xf32> to vector<8x1xf32>
    %151 = vector.shape_cast %148 : vector<8x1xf32> to vector<1x8x1xf32>
    tpu.vector_store %arg8[%c3_126, %c0_127, %c0_128], %151 {strides = array<i32>} : memref<4x8x1xf32, #tpu.memory_space<vmem>>, vector<1x8x1xf32>,
    %c3_129 = arith.constant 3 : index
    %c0_130 = arith.constant 0 : index
    %c0_131 = arith.constant 0 : index
    %152 = vector.load %arg9[%c3_129, %c0_130, %c0_131] : memref<4x8x8xf32, #tpu.memory_space<vmem>>, vector<1x8x8xf32>
    %153 = vector.shape_cast %152 : vector<1x8x8xf32> to vector<8x8xf32>
    %154 = vector.broadcast %139 : vector<8x1xf32> to vector<8x8xf32>
    %155 = arith.mulf %154, %153 : vector<8x8xf32>
    %156 = arith.truncf %142 : vector<8x8xf32> to vector<8x8xbf16>
    %c0_132 = arith.constant 0 : index
    %c0_133 = arith.constant 0 : index
    %c0_134 = arith.constant 0 : index
    %c3_135 = arith.constant 3 : index
    %c0_136 = arith.constant 0 : index
    %157 = vector.load %arg5[%c0_132, %c0_133, %c0_134, %c3_135, %c0_136] : memref<1x8x1x4x8xbf16, #tpu.memory_space<vmem>>, vector<1x8x1x1x8xbf16>
    %158 = vector.shape_cast %157 : vector<1x8x1x1x8xbf16> to vector<8x8xbf16>
    %cst_137 = arith.constant dense<0.000000e+00> : vector<8x8xf32>
    %159 = tpu.matmul %156, %158, %cst_137 {dimension_numbers = #tpu.dot_dimension_numbers<[1], [0], [0], [1], [0, 0, 1, 1], [], []>} : vector<8x8xbf16>, vector<8x8xbf16>, vector<8x8xf32> -> vector<8x8xf32>
    %160 = arith.addf %155, %159 : vector<8x8xf32>
    %c3_138 = arith.constant 3 : index
    %c0_139 = arith.constant 0 : index
    %c0_140 = arith.constant 0 : index
    %161 = vector.load %arg9[%c3_138, %c0_139, %c0_140] : memref<4x8x8xf32, #tpu.memory_space<vmem>>, vector<1x8x8xf32>
    %162 = vector.shape_cast %161 : vector<1x8x8xf32> to vector<8x8xf32>
    %163 = vector.shape_cast %160 : vector<8x8xf32> to vector<1x8x8xf32>
    tpu.vector_store %arg9[%c3_138, %c0_139, %c0_140], %163 {strides = array<i32>} : memref<4x8x8xf32, #tpu.memory_space<vmem>>, vector<1x8x8xf32>,
    %c3_141 = arith.constant 3 : index
    %c0_142 = arith.constant 0 : index
    %c0_143 = arith.constant 0 : index
    %164 = vector.load %arg7[%c3_141, %c0_142, %c0_143] : memref<4x8x1xf32, #tpu.memory_space<vmem>>, vector<1x8x1xf32>
    %165 = vector.shape_cast %164 : vector<1x8x1xf32> to vector<8x1xf32>
    %166 = vector.shape_cast %137 : vector<8x1xf32> to vector<1x8x1xf32>
    tpu.vector_store %arg7[%c3_141, %c0_142, %c0_143], %166 {strides = array<i32>} : memref<4x8x1xf32, #tpu.memory_space<vmem>>, vector<1x8x1xf32>,
    %c0_i32_144 = arith.constant 0 : i32
    %167 = arith.cmpi eq, %arg2, %c0_i32_144 : i32
    %168 = arith.extui %167 : i1 to i32
    %c0_i32_145 = arith.constant 0 : i32
    %169 = arith.cmpi ne, %168, %c0_i32_145 : i32
    scf.if %169 {
      %c0_146 = arith.constant 0 : index
      %c0_147 = arith.constant 0 : index
      %c0_148 = arith.constant 0 : index
      %170 = vector.load %arg8[%c0_146, %c0_147, %c0_148] : memref<4x8x1xf32, #tpu.memory_space<vmem>>, vector<1x8x1xf32>
      %171 = vector.shape_cast %170 : vector<1x8x1xf32> to vector<8x1xf32>
      %172 = tpu.reciprocal %171 {approx = true} : vector<8x1xf32> -> vector<8x1xf32>
      %173 = arith.mulf %171, %172 : vector<8x1xf32>
      %cst_149 = arith.constant 2.000000e+00 : f32
      %174 = vector.broadcast %cst_149 : f32 to vector<8x1xf32>
      %175 = arith.subf %174, %173 : vector<8x1xf32>
      %176 = arith.mulf %172, %175 : vector<8x1xf32>
      %c0_150 = arith.constant 0 : index
      %c0_151 = arith.constant 0 : index
      %c0_152 = arith.constant 0 : index
      %177 = vector.load %arg9[%c0_150, %c0_151, %c0_152] : memref<4x8x8xf32, #tpu.memory_space<vmem>>, vector<1x8x8xf32>
      %178 = vector.shape_cast %177 : vector<1x8x8xf32> to vector<8x8xf32>
      %179 = vector.broadcast %176 : vector<8x1xf32> to vector<8x8xf32>
      %180 = arith.mulf %178, %179 : vector<8x8xf32>
      %181 = arith.truncf %180 : vector<8x8xf32> to vector<8x8xbf16>
      %c0_153 = arith.constant 0 : index
      %c0_154 = arith.constant 0 : index
      %c0_155 = arith.constant 0 : index
      %c0_156 = arith.constant 0 : index
      %182 = vector.load %arg6[%c0_153, %c0_154, %c0_155, %c0_156] : memref<1x8x4x8xbf16, #tpu.memory_space<vmem>>, vector<1x8x1x8xbf16>
      %183 = vector.shape_cast %182 : vector<1x8x1x8xbf16> to vector<8x8xbf16>
      %184 = vector.shape_cast %181 : vector<8x8xbf16> to vector<1x8x1x8xbf16>
      tpu.vector_store %arg6[%c0_153, %c0_154, %c0_155, %c0_156], %184 {strides = array<i32>} : memref<1x8x4x8xbf16, #tpu.memory_space<vmem>>, vector<1x8x1x8xbf16>,
      %c1_157 = arith.constant 1 : index
      %c0_158 = arith.constant 0 : index
      %c0_159 = arith.constant 0 : index
      %185 = vector.load %arg8[%c1_157, %c0_158, %c0_159] : memref<4x8x1xf32, #tpu.memory_space<vmem>>, vector<1x8x1xf32>
      %186 = vector.shape_cast %185 : vector<1x8x1xf32> to vector<8x1xf32>
      %187 = tpu.reciprocal %186 {approx = true} : vector<8x1xf32> -> vector<8x1xf32>
      %188 = arith.mulf %186, %187 : vector<8x1xf32>
      %cst_160 = arith.constant 2.000000e+00 : f32
      %189 = vector.broadcast %cst_160 : f32 to vector<8x1xf32>
      %190 = arith.subf %189, %188 : vector<8x1xf32>
      %191 = arith.mulf %187, %190 : vector<8x1xf32>
      %c1_161 = arith.constant 1 : index
      %c0_162 = arith.constant 0 : index
      %c0_163 = arith.constant 0 : index
      %192 = vector.load %arg9[%c1_161, %c0_162, %c0_163] : memref<4x8x8xf32, #tpu.memory_space<vmem>>, vector<1x8x8xf32>
      %193 = vector.shape_cast %192 : vector<1x8x8xf32> to vector<8x8xf32>
      %194 = vector.broadcast %191 : vector<8x1xf32> to vector<8x8xf32>
      %195 = arith.mulf %193, %194 : vector<8x8xf32>
      %196 = arith.truncf %195 : vector<8x8xf32> to vector<8x8xbf16>
      %c0_164 = arith.constant 0 : index
      %c0_165 = arith.constant 0 : index
      %c1_166 = arith.constant 1 : index
      %c0_167 = arith.constant 0 : index
      %197 = vector.load %arg6[%c0_164, %c0_165, %c1_166, %c0_167] : memref<1x8x4x8xbf16, #tpu.memory_space<vmem>>, vector<1x8x1x8xbf16>
      %198 = vector.shape_cast %197 : vector<1x8x1x8xbf16> to vector<8x8xbf16>
      %199 = vector.shape_cast %196 : vector<8x8xbf16> to vector<1x8x1x8xbf16>
      tpu.vector_store %arg6[%c0_164, %c0_165, %c1_166, %c0_167], %199 {strides = array<i32>} : memref<1x8x4x8xbf16, #tpu.memory_space<vmem>>, vector<1x8x1x8xbf16>,
      %c2_168 = arith.constant 2 : index
      %c0_169 = arith.constant 0 : index
      %c0_170 = arith.constant 0 : index
      %200 = vector.load %arg8[%c2_168, %c0_169, %c0_170] : memref<4x8x1xf32, #tpu.memory_space<vmem>>, vector<1x8x1xf32>
      %201 = vector.shape_cast %200 : vector<1x8x1xf32> to vector<8x1xf32>
      %202 = tpu.reciprocal %201 {approx = true} : vector<8x1xf32> -> vector<8x1xf32>
      %203 = arith.mulf %201, %202 : vector<8x1xf32>
      %cst_171 = arith.constant 2.000000e+00 : f32
      %204 = vector.broadcast %cst_171 : f32 to vector<8x1xf32>
      %205 = arith.subf %204, %203 : vector<8x1xf32>
      %206 = arith.mulf %202, %205 : vector<8x1xf32>
      %c2_172 = arith.constant 2 : index
      %c0_173 = arith.constant 0 : index
      %c0_174 = arith.constant 0 : index
      %207 = vector.load %arg9[%c2_172, %c0_173, %c0_174] : memref<4x8x8xf32, #tpu.memory_space<vmem>>, vector<1x8x8xf32>
      %208 = vector.shape_cast %207 : vector<1x8x8xf32> to vector<8x8xf32>
      %209 = vector.broadcast %206 : vector<8x1xf32> to vector<8x8xf32>
      %210 = arith.mulf %208, %209 : vector<8x8xf32>
      %211 = arith.truncf %210 : vector<8x8xf32> to vector<8x8xbf16>
      %c0_175 = arith.constant 0 : index
      %c0_176 = arith.constant 0 : index
      %c2_177 = arith.constant 2 : index
      %c0_178 = arith.constant 0 : index
      %212 = vector.load %arg6[%c0_175, %c0_176, %c2_177, %c0_178] : memref<1x8x4x8xbf16, #tpu.memory_space<vmem>>, vector<1x8x1x8xbf16>
      %213 = vector.shape_cast %212 : vector<1x8x1x8xbf16> to vector<8x8xbf16>
      %214 = vector.shape_cast %211 : vector<8x8xbf16> to vector<1x8x1x8xbf16>
      tpu.vector_store %arg6[%c0_175, %c0_176, %c2_177, %c0_178], %214 {strides = array<i32>} : memref<1x8x4x8xbf16, #tpu.memory_space<vmem>>, vector<1x8x1x8xbf16>,
      %c3_179 = arith.constant 3 : index
      %c0_180 = arith.constant 0 : index
      %c0_181 = arith.constant 0 : index
      %215 = vector.load %arg8[%c3_179, %c0_180, %c0_181] : memref<4x8x1xf32, #tpu.memory_space<vmem>>, vector<1x8x1xf32>
      %216 = vector.shape_cast %215 : vector<1x8x1xf32> to vector<8x1xf32>
      %217 = tpu.reciprocal %216 {approx = true} : vector<8x1xf32> -> vector<8x1xf32>
      %218 = arith.mulf %216, %217 : vector<8x1xf32>
      %cst_182 = arith.constant 2.000000e+00 : f32
      %219 = vector.broadcast %cst_182 : f32 to vector<8x1xf32>
      %220 = arith.subf %219, %218 : vector<8x1xf32>
      %221 = arith.mulf %217, %220 : vector<8x1xf32>
      %c3_183 = arith.constant 3 : index
      %c0_184 = arith.constant 0 : index
      %c0_185 = arith.constant 0 : index
      %222 = vector.load %arg9[%c3_183, %c0_184, %c0_185] : memref<4x8x8xf32, #tpu.memory_space<vmem>>, vector<1x8x8xf32>
      %223 = vector.shape_cast %222 : vector<1x8x8xf32> to vector<8x8xf32>
      %224 = vector.broadcast %221 : vector<8x1xf32> to vector<8x8xf32>
      %225 = arith.mulf %223, %224 : vector<8x8xf32>
      %226 = arith.truncf %225 : vector<8x8xf32> to vector<8x8xbf16>
      %c0_186 = arith.constant 0 : index
      %c0_187 = arith.constant 0 : index
      %c3_188 = arith.constant 3 : index
      %c0_189 = arith.constant 0 : index
      %227 = vector.load %arg6[%c0_186, %c0_187, %c3_188, %c0_189] : memref<1x8x4x8xbf16, #tpu.memory_space<vmem>>, vector<1x8x1x8xbf16>
      %228 = vector.shape_cast %227 : vector<1x8x1x8xbf16> to vector<8x8xbf16>
      %229 = vector.shape_cast %226 : vector<8x8xbf16> to vector<1x8x1x8xbf16>
      tpu.vector_store %arg6[%c0_186, %c0_187, %c3_188, %c0_189], %229 {strides = array<i32>} : memref<1x8x4x8xbf16, #tpu.memory_space<vmem>>, vector<1x8x1x8xbf16>,
    } else {
    }
    return
  }
  func.func @transform_0(%arg0: i32, %arg1: i32, %arg2: i32) -> (i32, i32, i32, i32) {
    %c0_i32 = arith.constant 0 : i32
    %c0_i32_0 = arith.constant 0 : i32
    %c0_i32_1 = arith.constant 0 : i32
    return %arg0, %arg1, %c0_i32, %c0_i32_0 : i32, i32, i32, i32
  }
  func.func @transform_1(%arg0: i32, %arg1: i32, %arg2: i32) -> (i32, i32, i32, i32, i32) {
    %c0_i32 = arith.constant 0 : i32
    %c0_i32_0 = arith.constant 0 : i32
    %c0_i32_1 = arith.constant 0 : i32
    %c0_i32_2 = arith.constant 0 : i32
    return %arg0, %arg2, %c0_i32, %c0_i32_0, %c0_i32_1 : i32, i32, i32, i32, i32
  }
  func.func @transform_2(%arg0: i32, %arg1: i32, %arg2: i32) -> (i32, i32, i32, i32, i32) {
    %c1_i32 = arith.constant 1 : i32
    %c0_i32 = arith.constant 0 : i32
    %c0_i32_0 = arith.constant 0 : i32
    %c0_i32_1 = arith.constant 0 : i32
    return %arg0, %arg2, %c1_i32, %c0_i32, %c0_i32_0 : i32, i32, i32, i32, i32
  }
  func.func @transform_3(%arg0: i32, %arg1: i32, %arg2: i32) -> (i32, i32, i32, i32) {
    %c0_i32 = arith.constant 0 : i32
    %c0_i32_0 = arith.constant 0 : i32
    %c0_i32_1 = arith.constant 0 : i32
    return %arg0, %arg1, %c0_i32, %c0_i32_0 : i32, i32, i32, i32
  }
}

module attributes {stable_mosaic.version = 11 : i64} {
  func.func @_lm_stats_kernel(%arg0: i32, %arg1: i32, %arg2: memref<16x32xbf16, #tpu.memory_space<vmem>>, %arg3: memref<40x32xbf16, #tpu.memory_space<vmem>>, %arg4: memref<16x1xf32, #tpu.memory_space<vmem>>, %arg5: memref<16x1xf32, #tpu.memory_space<vmem>>) attributes {dimension_semantics = [#tpu.dimension_semantics<parallel>, #tpu.dimension_semantics<arbitrary>], iteration_bounds = array<i64: 1, 1>, scalar_prefetch = 0 : i64, scratch_operands = 0 : i64, tpu.core_type = #tpu.core_type<tc>, window_params = [{transform_indices = @transform_0, window_bounds = array<i64: 16, 32>}, {transform_indices = @transform_1, window_bounds = array<i64: 40, 32>}, {transform_indices = @transform_2, window_bounds = array<i64: 16, 1>}, {transform_indices = @transform_3, window_bounds = array<i64: 16, 1>}]} {
    %c0_i32 = arith.constant 0 : i32
    %0 = arith.cmpi eq, %arg1, %c0_i32 : i32
    %1 = arith.extui %0 : i1 to i32
    %c0_i32_0 = arith.constant 0 : i32
    %2 = arith.cmpi ne, %1, %c0_i32_0 : i32
    scf.if %2 {
      %cst_14 = arith.constant 0xFF800000 : f32
      %22 = vector.broadcast %cst_14 : f32 to vector<16x1xf32>
      %c0_15 = arith.constant 0 : index
      %c0_16 = arith.constant 0 : index
      %23 = vector.load %arg4[%c0_15, %c0_16] : memref<16x1xf32, #tpu.memory_space<vmem>>, vector<16x1xf32>
      tpu.vector_store %arg4[%c0_15, %c0_16], %22 {strides = array<i32>} : memref<16x1xf32, #tpu.memory_space<vmem>>, vector<16x1xf32>,
      %cst_17 = arith.constant 0.000000e+00 : f32
      %24 = vector.broadcast %cst_17 : f32 to vector<16x1xf32>
      %c0_18 = arith.constant 0 : index
      %c0_19 = arith.constant 0 : index
      %25 = vector.load %arg5[%c0_18, %c0_19] : memref<16x1xf32, #tpu.memory_space<vmem>>, vector<16x1xf32>
      tpu.vector_store %arg5[%c0_18, %c0_19], %24 {strides = array<i32>} : memref<16x1xf32, #tpu.memory_space<vmem>>, vector<16x1xf32>,
    } else {
    }
    %c0 = arith.constant 0 : index
    %c0_1 = arith.constant 0 : index
    %3 = vector.load %arg2[%c0, %c0_1] : memref<16x32xbf16, #tpu.memory_space<vmem>>, vector<16x32xbf16>
    %c0_2 = arith.constant 0 : index
    %c0_3 = arith.constant 0 : index
    %4 = vector.load %arg3[%c0_2, %c0_3] : memref<40x32xbf16, #tpu.memory_space<vmem>>, vector<40x32xbf16>
    %cst = arith.constant dense<0.000000e+00> : vector<16x40xf32>
    %5 = tpu.matmul %3, %4, %cst {dimension_numbers = #tpu.dot_dimension_numbers<[1], [1], [0], [0], [0, 0, 1, 0], [], []>} : vector<16x32xbf16>, vector<40x32xbf16>, vector<16x40xf32> -> vector<16x40xf32>
    %c0_4 = arith.constant 0 : index
    %c0_5 = arith.constant 0 : index
    %6 = vector.load %arg4[%c0_4, %c0_5] : memref<16x1xf32, #tpu.memory_space<vmem>>, vector<16x1xf32>
    %cst_6 = arith.constant dense<0xFF800000> : vector<16xf32>
    %7 = vector.multi_reduction <maximumf>, %5, %cst_6 [1] : vector<16x40xf32> to vector<16xf32>
    %8 = vector.shape_cast %7 : vector<16xf32> to vector<16x1xf32>
    %9 = arith.maximumf %6, %8 : vector<16x1xf32>
    %c0_7 = arith.constant 0 : index
    %c0_8 = arith.constant 0 : index
    %10 = vector.load %arg5[%c0_7, %c0_8] : memref<16x1xf32, #tpu.memory_space<vmem>>, vector<16x1xf32>
    %11 = arith.subf %6, %9 : vector<16x1xf32>
    %12 = math.exp %11 : vector<16x1xf32>
    %13 = arith.mulf %10, %12 : vector<16x1xf32>
    %14 = vector.broadcast %9 : vector<16x1xf32> to vector<16x40xf32>
    %15 = arith.subf %5, %14 : vector<16x40xf32>
    %16 = math.exp %15 : vector<16x40xf32>
    %cst_9 = arith.constant dense<0.000000e+00> : vector<16xf32>
    %17 = vector.multi_reduction <add>, %16, %cst_9 [1] : vector<16x40xf32> to vector<16xf32>
    %18 = vector.shape_cast %17 : vector<16xf32> to vector<16x1xf32>
    %19 = arith.addf %13, %18 : vector<16x1xf32>
    %c0_10 = arith.constant 0 : index
    %c0_11 = arith.constant 0 : index
    %20 = vector.load %arg5[%c0_10, %c0_11] : memref<16x1xf32, #tpu.memory_space<vmem>>, vector<16x1xf32>
    tpu.vector_store %arg5[%c0_10, %c0_11], %19 {strides = array<i32>} : memref<16x1xf32, #tpu.memory_space<vmem>>, vector<16x1xf32>,
    %c0_12 = arith.constant 0 : index
    %c0_13 = arith.constant 0 : index
    %21 = vector.load %arg4[%c0_12, %c0_13] : memref<16x1xf32, #tpu.memory_space<vmem>>, vector<16x1xf32>
    tpu.vector_store %arg4[%c0_12, %c0_13], %9 {strides = array<i32>} : memref<16x1xf32, #tpu.memory_space<vmem>>, vector<16x1xf32>,
    return
  }
  func.func @transform_0(%arg0: i32, %arg1: i32) -> (i32, i32) {
    %c0_i32 = arith.constant 0 : i32
    %c0_i32_0 = arith.constant 0 : i32
    return %arg0, %c0_i32 : i32, i32
  }
  func.func @transform_1(%arg0: i32, %arg1: i32) -> (i32, i32) {
    %c0_i32 = arith.constant 0 : i32
    %c0_i32_0 = arith.constant 0 : i32
    return %arg1, %c0_i32 : i32, i32
  }
  func.func @transform_2(%arg0: i32, %arg1: i32) -> (i32, i32) {
    %c0_i32 = arith.constant 0 : i32
    %c0_i32_0 = arith.constant 0 : i32
    return %arg0, %c0_i32 : i32, i32
  }
  func.func @transform_3(%arg0: i32, %arg1: i32) -> (i32, i32) {
    %c0_i32 = arith.constant 0 : i32
    %c0_i32_0 = arith.constant 0 : i32
    return %arg0, %c0_i32 : i32, i32
  }
}

module attributes {stable_mosaic.version = 11 : i64} {
  func.func @_lm_probs_kernel(%arg0: i32, %arg1: i32, %arg2: memref<16x32xbf16, #tpu.memory_space<vmem>>, %arg3: memref<40x32xbf16, #tpu.memory_space<vmem>>, %arg4: memref<16x1xf32, #tpu.memory_space<vmem>>, %arg5: memref<16x1xf32, #tpu.memory_space<vmem>>, %arg6: memref<16x40xf32, #tpu.memory_space<vmem>>) attributes {dimension_semantics = [#tpu.dimension_semantics<parallel>, #tpu.dimension_semantics<parallel>], iteration_bounds = array<i64: 1, 1>, scalar_prefetch = 0 : i64, scratch_operands = 0 : i64, tpu.core_type = #tpu.core_type<tc>, window_params = [{transform_indices = @transform_0, window_bounds = array<i64: 16, 32>}, {transform_indices = @transform_1, window_bounds = array<i64: 40, 32>}, {transform_indices = @transform_2, window_bounds = array<i64: 16, 1>}, {transform_indices = @transform_3, window_bounds = array<i64: 16, 1>}, {transform_indices = @transform_4, window_bounds = array<i64: 16, 40>}]} {
    %c0 = arith.constant 0 : index
    %c0_0 = arith.constant 0 : index
    %0 = vector.load %arg2[%c0, %c0_0] : memref<16x32xbf16, #tpu.memory_space<vmem>>, vector<16x32xbf16>
    %c0_1 = arith.constant 0 : index
    %c0_2 = arith.constant 0 : index
    %1 = vector.load %arg3[%c0_1, %c0_2] : memref<40x32xbf16, #tpu.memory_space<vmem>>, vector<40x32xbf16>
    %cst = arith.constant dense<0.000000e+00> : vector<16x40xf32>
    %2 = tpu.matmul %0, %1, %cst {dimension_numbers = #tpu.dot_dimension_numbers<[1], [1], [0], [0], [0, 0, 1, 0], [], []>} : vector<16x32xbf16>, vector<40x32xbf16>, vector<16x40xf32> -> vector<16x40xf32>
    %c0_3 = arith.constant 0 : index
    %c0_4 = arith.constant 0 : index
    %3 = vector.load %arg5[%c0_3, %c0_4] : memref<16x1xf32, #tpu.memory_space<vmem>>, vector<16x1xf32>
    %4 = tpu.reciprocal %3 {approx = true} : vector<16x1xf32> -> vector<16x1xf32>
    %5 = arith.mulf %3, %4 : vector<16x1xf32>
    %cst_5 = arith.constant 2.000000e+00 : f32
    %6 = vector.broadcast %cst_5 : f32 to vector<16x1xf32>
    %7 = arith.subf %6, %5 : vector<16x1xf32>
    %8 = arith.mulf %4, %7 : vector<16x1xf32>
    %c0_6 = arith.constant 0 : index
    %c0_7 = arith.constant 0 : index
    %9 = vector.load %arg4[%c0_6, %c0_7] : memref<16x1xf32, #tpu.memory_space<vmem>>, vector<16x1xf32>
    %10 = vector.broadcast %9 : vector<16x1xf32> to vector<16x40xf32>
    %11 = arith.subf %2, %10 : vector<16x40xf32>
    %12 = math.exp %11 : vector<16x40xf32>
    %13 = vector.broadcast %8 : vector<16x1xf32> to vector<16x40xf32>
    %14 = arith.mulf %12, %13 : vector<16x40xf32>
    %c0_8 = arith.constant 0 : index
    %c0_9 = arith.constant 0 : index
    %15 = vector.load %arg6[%c0_8, %c0_9] : memref<16x40xf32, #tpu.memory_space<vmem>>, vector<16x40xf32>
    tpu.vector_store %arg6[%c0_8, %c0_9], %14 {strides = array<i32>} : memref<16x40xf32, #tpu.memory_space<vmem>>, vector<16x40xf32>,
    return
  }
  func.func @transform_0(%arg0: i32, %arg1: i32) -> (i32, i32) {
    %c0_i32 = arith.constant 0 : i32
    %c0_i32_0 = arith.constant 0 : i32
    return %arg0, %c0_i32 : i32, i32
  }
  func.func @transform_1(%arg0: i32, %arg1: i32) -> (i32, i32) {
    %c0_i32 = arith.constant 0 : i32
    %c0_i32_0 = arith.constant 0 : i32
    return %arg1, %c0_i32 : i32, i32
  }
  func.func @transform_2(%arg0: i32, %arg1: i32) -> (i32, i32) {
    %c0_i32 = arith.constant 0 : i32
    %c0_i32_0 = arith.constant 0 : i32
    return %arg0, %c0_i32 : i32, i32
  }
  func.func @transform_3(%arg0: i32, %arg1: i32) -> (i32, i32) {
    %c0_i32 = arith.constant 0 : i32
    %c0_i32_0 = arith.constant 0 : i32
    return %arg0, %c0_i32 : i32, i32
  }
  func.func @transform_4(%arg0: i32, %arg1: i32) -> (i32, i32) {
    %c0_i32 = arith.constant 0 : i32
    return %arg0, %arg1 : i32, i32
  }
}

</mosaic_0001>

<bundles_post_ra>
// kernel: multimodal_transformer_forward.74
= control target key start
LH: loop header
LB: loop body
LE: loop exit
PB: predicated region body
PF: predicated region fallthrough
CT: control target
= control target key end

     0   :  { %vm19_vm0 = vcmask 785408   ;;  %v108_v1 = vmov 0.0   ;;  %vm47_vm1 = vcmask 261120   ;;  %vm83_vm2 = vcmask 781312   ;;  %s151_s1 = inlined_call_operand.vmem [shape: bf16[32,96], index: 1, kind: input, shape index: {}]   ;;  %s152_s2 = inlined_call_operand.vmem [shape: f32[1,96], index: 2, kind: input, shape index: {}]   ;;  %s153_s0 = inlined_call_operand.vmem [shape: bf16[16,32], index: 0, kind: input, shape index: {}]   ;;  %s154_s3 = inlined_call_operand.vmem [shape: bf16[16,96], index: 3, kind: output, shape index: {}]  }
   0x1   :  { %v105_v0 = vld [vmem:[%s151_s1 + $0x8] sm:$0xff]  ;;  %20 = vst.msk [vmem:[#allocation2] sm:$0xff] %vm19_vm0, %v108_v1  ;;  %v104_v2 = vld [vmem:[%s151_s1] sm:$0xff] }
   0x2   :  { %21 = vst.msk [vmem:[#allocation2 + $0x8] sm:$0xff] %vm19_vm0, %v108_v1  ;;  %57 = vmatpush.bf16.msra.mxu0 %v105_v0  ;;  %v103_v3 = vld [vmem:[%s153_s0] sm:$0xff] }
   0x3   :  { %v107_v8 = vld [vmem:[%s152_s2] ss:$0 sm:$0xff] }
   0x6   :  { %58 = vmatpush.bf16.msra.mxu0 %v104_v2 }
   0x8   :  { %v22_v4 = vld [vmem:[#allocation2] sm:$0xff] }
   0x9   :  { %102 = vmatmul.msk.bf16.vlgmr.msra.gmra.mxu0 %vm47_vm1, %v103_v3  ;;  %v23_v7 = vld [vmem:[#allocation2 + $0x8] sm:$0xff] }
  0x86   :  { %v60_v5 = vpop.f32.mrf.mxu0 }
  0x87   :  { %v65_v6 = vadd.f32 %v60_v5, %v22_v4 }
  0x89   :  { %68 = vst.msk [vmem:[#allocation2] sm:$0xff] %vm19_vm0, %v65_v6 }
  0x8e   :  { %v62_v9 = vpop.f32.mrf.mxu0 }
  0x8f   :  { %v66_v10 = vadd.f32 %v62_v9, %v23_v7 }
  0x90   :  { %v73_v11 = vld [vmem:[#allocation2] sm:$0xff] }
  0x91   :  { %v79_v12 = vadd.f32 %v107_v8, %v73_v11  ;;  %69 = vst.msk [vmem:[#allocation2 + $0x8] sm:$0xff] %vm19_vm0, %v66_v10 }
  0x93   :  { %v81_v13 = vpack.c.bf16 %v79_v12, %v79_v12 }
  0x95   :  { %84 = vst.msk [vmem:[%s154_s3] sm:$0xf] %vm83_vm2, %v81_v13 }
  0x98   :  { %v74_v14 = vld [vmem:[#allocation2 + $0x8] sm:$0xff] }
  0x99   :  { %v80_v15 = vadd.f32 %v107_v8, %v74_v14 }
  0x9b   :  { %v82_v16 = vpack.c.bf16 %v80_v15, %v80_v15 }
  0x9d   :  { %85 = vst.msk [vmem:[%s154_s3 + $0x4] sm:$0xf] %vm83_vm2, %v82_v16 }

// kernel: multimodal_transformer_forward.73
= control target key start
LH: loop header
LB: loop body
LE: loop exit
PB: predicated region body
PF: predicated region fallthrough
CT: control target
= control target key end

     0   :  { %vm18_vm0 = vcmask 261120   ;;  %v104_v5 = vmov 32.0   ;;  %vm84_vm6 = vcmask 257024   ;;  %s144_s0 = inlined_call_operand.vmem [shape: bf16[16,32], index: 0, kind: input, shape index: {}]   ;;  %s145_s1 = inlined_call_operand.vmem [shape: f32[1,32], index: 1, kind: input, shape index: {}]   ;;  %s146_s2 = inlined_call_operand.vmem [shape: f32[1,32], index: 2, kind: input, shape index: {}]   ;;  %s147_s3 = inlined_call_operand.vmem [shape: bf16[16,32], index: 3, kind: output, shape index: {}]  }
   0x1   :  { %v92_v0 = vld [vmem:[%s144_s0] sm:$0xff]   ;;  %98 = vrcp.f32 %v104_v5 }
   0x2   :  { %v93_v1 = vunpack.c.l.bf16 %v92_v0  ;;  %v94_v3 = vunpack.c.h.bf16 %v92_v0  ;;  %v96_v36 = vld [vmem:[%s145_s1] ss:$0 sm:$0xff] }
   0x3   :  { %v97_v39 = vld [vmem:[%s146_s2] ss:$0 sm:$0xff] }
   0x4   :  { %v19_v2 = vsel %vm18_vm0, %v93_v1, 0.0  ;;  %v22_v4 = vsel %vm18_vm0, %v94_v3, 0.0 }
   0x5   :  { %20 = vadd.xlane.f32.xlu0 %v19_v2 }
   0x7   :  { %v99_v6 = vpop.eup %98 }
   0x8   :  { %v26_v7 = vmul.f32 32.0, %v99_v6  ;;  %vm30_vm1 = vweird.f32 %v99_v6 }
   0xa   :  { %v27_v8 = vsub.f32 1.0, %v26_v7 }
   0xc   :  { %v28_v9 = vmul.f32 %v99_v6, %v27_v8 }
   0xd   :  { %23 = vadd.xlane.f32.xlu0 %v22_v4 }
   0xe   :  { %v29_v10 = vadd.f32 %v99_v6, %v28_v9 }
  0x10   :  { %v31_v11 = vsel %vm30_vm1, %v99_v6, %v29_v10 }
  0x78   :  { %v21_v12 = vpop.xlane.xlu0 %20 }
  0x79   :  { %v32_v13 = vmul.f32 %v31_v11, %v21_v12 }
  0x7b   :  { %v34_v14 = vsub.f32 %v93_v1, %v32_v13 }
  0x7d   :  { %v36_v15 = vmul.f32 %v34_v14, %v34_v14 }
  0x7f   :  { %v38_v16 = vsel %vm18_vm0, %v36_v15, 0.0 }
  0x80   :  { %39 = vadd.xlane.f32.xlu1 %v38_v16  ;;  %v24_v17 = vpop.xlane.xlu0 %23 }
  0x81   :  { %v33_v18 = vmul.f32 %v31_v11, %v24_v17 }
  0x83   :  { %v35_v19 = vsub.f32 %v94_v3, %v33_v18 }
  0x85   :  { %v37_v20 = vmul.f32 %v35_v19, %v35_v19 }
  0x87   :  { %v41_v21 = vsel %vm18_vm0, %v37_v20, 0.0 }
  0x88   :  { %42 = vadd.xlane.f32.xlu1 %v41_v21 }
  0xf3   :  { %v40_v22 = vpop.xlane.xlu1 %39 }
  0xf4   :  { %v44_v23 = vmul.f32 %v40_v22, %v31_v11 }
  0xf6   :  { %v46_v24 = vadd.f32 1e-12, %v44_v23 }
  0xf8   :  { %100 = vrsqrt.f32 %v46_v24  ;;  %vm54_vm3 = vweird.f32 %v46_v24 }
  0xfb   :  { %v43_v25 = vpop.xlane.xlu1 %42 }
  0xfc   :  { %v45_v26 = vmul.f32 %v43_v25, %v31_v11 }
  0xfe   :  { %v101_v27 = vpop.eup %100  ;;  %v47_v28 = vadd.f32 1e-12, %v45_v26 }
  0xff   :  { %v49_v29 = vmul.f32 %v101_v27, %v46_v24  ;;  %vm55_vm2 = vweird.f32 %v101_v27 }
 0x100   :  { %102 = vrsqrt.f32 %v47_v28  ;;  %vm56_vm4 = vmor %vm54_vm3, %vm55_vm2  ;;  %vm64_vm7 = vweird.f32 %v47_v28 }
 0x101   :  { %v50_v30 = vmul.f32 %v101_v27, %v49_v29 }
 0x103   :  { %v51_v31 = vmul.f32 0.5, %v50_v30 }
 0x105   :  { %v52_v32 = vsub.f32 1.5, %v51_v31 }
 0x106   :  { %v103_v33 = vpop.eup %102 }
 0x107   :  { %v53_v34 = vmul.f32 %v101_v27, %v52_v32  ;;  %v59_v35 = vmul.f32 %v103_v33, %v47_v28  ;;  %vm65_vm5 = vweird.f32 %v103_v33 }
 0x108   :  { %vm66_vm8 = vmor %vm64_vm7, %vm65_vm5 }
 0x109   :  { %v57_v37 = vsel %vm56_vm4, %v101_v27, %v53_v34  ;;  %v60_v38 = vmul.f32 %v103_v33, %v59_v35 }
 0x10a   :  { %v68_v40 = vmul.f32 %v57_v37, %v34_v14 }
 0x10b   :  { %v61_v41 = vmul.f32 0.5, %v60_v38 }
 0x10c   :  { %v74_v42 = vmul.f32 %v96_v36, %v68_v40 }
 0x10d   :  { %v62_v43 = vsub.f32 1.5, %v61_v41 }
 0x10e   :  { %v80_v44 = vadd.f32 %v97_v39, %v74_v42 }
 0x10f   :  { %v63_v45 = vmul.f32 %v103_v33, %v62_v43 }
 0x110   :  { %v82_v46 = vpack.c.bf16 %v80_v44, %v80_v44 }
 0x111   :  { %v67_v47 = vsel %vm66_vm8, %v103_v33, %v63_v45 }
 0x112   :  { %85 = vst.msk [vmem:[%s147_s3] sm:$0xf] %vm84_vm6, %v82_v46  ;;  %v69_v48 = vmul.f32 %v67_v47, %v35_v19 }
 0x114   :  { %v75_v49 = vmul.f32 %v96_v36, %v69_v48 }
 0x116   :  { %v81_v50 = vadd.f32 %v97_v39, %v75_v49 }
 0x118   :  { %v83_v51 = vpack.c.bf16 %v81_v50, %v81_v50 }
 0x11a   :  { %86 = vst.msk [vmem:[%s147_s3 + $0x4] sm:$0xf] %vm84_vm6, %v83_v51 }

// kernel: multimodal_transformer_forward.76
= control target key start
LH: loop header
LB: loop body
LE: loop exit
PB: predicated region body
PF: predicated region fallthrough
CT: control target
= control target key end

     0   :  { %vm28_vm0 = vcmask 261120   ;;  %v198_v1 = vmov 0.0   ;;  %v199_v22 = vmov 32.0   ;;  %vm160_vm6 = vcmask 257024   ;;  %s271_s1 = inlined_call_operand.vmem [shape: bf16[32,32], index: 1, kind: input, shape index: {}]   ;;  %s272_s0 = inlined_call_operand.vmem [shape: bf16[16,32], index: 0, kind: input, shape index: {}]   ;;  %s273_s2 = inlined_call_operand.vmem [shape: f32[1,32], index: 2, kind: input, shape index: {}]   ;;  %s274_s3 = inlined_call_operand.vmem [shape: bf16[16,32], index: 3, kind: input, shape index: {}]   ;;  %s275_s4 = inlined_call_operand.vmem [shape: f32[1,32], index: 4, kind: input, shape index: {}]   ;;  %s276_s5 = inlined_call_operand.vmem [shape: f32[1,32], index: 5, kind: input, shape index: {}]   ;;  %s277_s6 = inlined_call_operand.vmem [shape: bf16[16,32], index: 6, kind: output, shape index: {}]  }
   0x1   :  { %v182_v0 = vld [vmem:[%s271_s1 + $0x8] sm:$0xff]  ;;  %29 = vst.msk [vmem:[#allocation2] sm:$0xff] %vm28_vm0, %v198_v1  ;;  %v181_v2 = vld [vmem:[%s271_s1] sm:$0xff]  ;;  %192 = vrcp.f32 %v199_v22 }
   0x2   :  { %30 = vst.msk [vmem:[#allocation2 + $0x8] sm:$0xff] %vm28_vm0, %v198_v1  ;;  %66 = vmatpush.bf16.msra.mxu0 %v182_v0  ;;  %v180_v3 = vld [vmem:[%s272_s0] sm:$0xff] }
   0x3   :  { %v184_v8 = vld [vmem:[%s274_s3] sm:$0xff]  }
   0x4   :  { %v189_v9 = vld [vmem:[%s273_s2] ss:$0 sm:$0xff]  ;;  %v185_v12 = vunpack.c.l.bf16 %v184_v8  ;;  %v186_v17 = vunpack.c.h.bf16 %v184_v8 }
   0x5   :  { %v190_v53 = vld [vmem:[%s275_s4] ss:$0 sm:$0xff] }
   0x6   :  { %67 = vmatpush.bf16.msra.mxu0 %v181_v2  ;;  %v191_v56 = vld [vmem:[%s276_s5] ss:$0 sm:$0xff] }
   0x7   :  { %v193_v23 = vpop.eup %192 }
   0x8   :  { %v31_v4 = vld [vmem:[#allocation2] sm:$0xff]  ;;  %v102_v24 = vmul.f32 32.0, %v193_v23  ;;  %vm106_vm1 = vweird.f32 %v193_v23 }
   0x9   :  { %179 = vmatmul.msk.bf16.vlgmr.msra.gmra.mxu0 %vm28_vm0, %v180_v3  ;;  %v32_v7 = vld [vmem:[#allocation2 + $0x8] sm:$0xff] }
   0xa   :  { %v103_v25 = vsub.f32 1.0, %v102_v24 }
   0xc   :  { %v104_v26 = vmul.f32 %v193_v23, %v103_v25 }
   0xe   :  { %v105_v27 = vadd.f32 %v193_v23, %v104_v26 }
  0x10   :  { %v107_v28 = vsel %vm106_vm1, %v193_v23, %v105_v27 }
  0x86   :  { %v69_v5 = vpop.f32.mrf.mxu0 }
  0x87   :  { %v74_v6 = vadd.f32 %v69_v5, %v31_v4 }
  0x89   :  { %76 = vst.msk [vmem:[#allocation2] sm:$0xff] %vm28_vm0, %v74_v6 }
  0x8e   :  { %v71_v10 = vpop.f32.mrf.mxu0 }
  0x8f   :  { %v75_v11 = vadd.f32 %v71_v10, %v32_v7 }
  0x90   :  { %v81_v13 = vld [vmem:[#allocation2] sm:$0xff] }
  0x91   :  { %77 = vst.msk [vmem:[#allocation2 + $0x8] sm:$0xff] %vm28_vm0, %v75_v11  ;;  %v87_v14 = vadd.f32 %v189_v9, %v81_v13 }
  0x93   :  { %v93_v15 = vadd.f32 %v185_v12, %v87_v14 }
  0x95   :  { %v95_v16 = vsel %vm28_vm0, %v93_v15, 0.0 }
  0x96   :  { %96 = vadd.xlane.f32.xlu0 %v95_v16 }
  0x98   :  { %v82_v18 = vld [vmem:[#allocation2 + $0x8] sm:$0xff] }
  0x99   :  { %v88_v19 = vadd.f32 %v189_v9, %v82_v18 }
  0x9b   :  { %v94_v20 = vadd.f32 %v186_v17, %v88_v19 }
  0x9d   :  { %v98_v21 = vsel %vm28_vm0, %v94_v20, 0.0 }
  0x9e   :  { %99 = vadd.xlane.f32.xlu0 %v98_v21 }
 0x109   :  { %v97_v29 = vpop.xlane.xlu0 %96 }
 0x10a   :  { %v108_v30 = vmul.f32 %v107_v28, %v97_v29 }
 0x10c   :  { %v110_v31 = vsub.f32 %v93_v15, %v108_v30 }
 0x10e   :  { %v112_v32 = vmul.f32 %v110_v31, %v110_v31 }
 0x110   :  { %v114_v33 = vsel %vm28_vm0, %v112_v32, 0.0 }
 0x111   :  { %115 = vadd.xlane.f32.xlu1 %v114_v33  ;;  %v100_v34 = vpop.xlane.xlu0 %99 }
 0x112   :  { %v109_v35 = vmul.f32 %v107_v28, %v100_v34 }
 0x114   :  { %v111_v36 = vsub.f32 %v94_v20, %v109_v35 }
 0x116   :  { %v113_v37 = vmul.f32 %v111_v36, %v111_v36 }
 0x118   :  { %v117_v38 = vsel %vm28_vm0, %v113_v37, 0.0 }
 0x119   :  { %118 = vadd.xlane.f32.xlu1 %v117_v38 }
 0x184   :  { %v116_v39 = vpop.xlane.xlu1 %115 }
 0x185   :  { %v120_v40 = vmul.f32 %v116_v39, %v107_v28 }
 0x187   :  { %v122_v41 = vadd.f32 1e-12, %v120_v40 }
 0x189   :  { %194 = vrsqrt.f32 %v122_v41  ;;  %vm130_vm3 = vweird.f32 %v122_v41 }
 0x18c   :  { %v119_v42 = vpop.xlane.xlu1 %118 }
 0x18d   :  { %v121_v43 = vmul.f32 %v119_v42, %v107_v28 }
 0x18f   :  { %v195_v44 = vpop.eup %194  ;;  %v123_v45 = vadd.f32 1e-12, %v121_v43 }
 0x190   :  { %v125_v46 = vmul.f32 %v195_v44, %v122_v41  ;;  %vm131_vm2 = vweird.f32 %v195_v44 }
 0x191   :  { %196 = vrsqrt.f32 %v123_v45  ;;  %vm132_vm4 = vmor %vm130_vm3, %vm131_vm2  ;;  %vm140_vm7 = vweird.f32 %v123_v45 }
 0x192   :  { %v126_v47 = vmul.f32 %v195_v44, %v125_v46 }
 0x194   :  { %v127_v48 = vmul.f32 0.5, %v126_v47 }
 0x196   :  { %v128_v49 = vsub.f32 1.5, %v127_v48 }
 0x197   :  { %v197_v50 = vpop.eup %196 }
 0x198   :  { %v129_v51 = vmul.f32 %v195_v44, %v128_v49  ;;  %v135_v52 = vmul.f32 %v197_v50, %v123_v45  ;;  %vm141_vm5 = vweird.f32 %v197_v50 }
 0x199   :  { %vm142_vm8 = vmor %vm140_vm7, %vm141_vm5 }
 0x19a   :  { %v133_v54 = vsel %vm132_vm4, %v195_v44, %v129_v51  ;;  %v136_v55 = vmul.f32 %v197_v50, %v135_v52 }
 0x19b   :  { %v144_v57 = vmul.f32 %v133_v54, %v110_v31 }
 0x19c   :  { %v137_v58 = vmul.f32 0.5, %v136_v55 }
 0x19d   :  { %v150_v59 = vmul.f32 %v190_v53, %v144_v57 }
 0x19e   :  { %v138_v60 = vsub.f32 1.5, %v137_v58 }
 0x19f   :  { %v156_v61 = vadd.f32 %v191_v56, %v150_v59 }
 0x1a0   :  { %v139_v62 = vmul.f32 %v197_v50, %v138_v60 }
 0x1a1   :  { %v158_v63 = vpack.c.bf16 %v156_v61, %v156_v61 }
 0x1a2   :  { %v143_v0 = vsel %vm142_vm8, %v197_v50, %v139_v62 }
 0x1a3   :  { %161 = vst.msk [vmem:[%s277_s6] sm:$0xf] %vm160_vm6, %v158_v63  ;;  %v145_v1 = vmul.f32 %v143_v0, %v111_v36 }
 0x1a5   :  { %v151_v2 = vmul.f32 %v190_v53, %v145_v1 }
 0x1a7   :  { %v157_v3 = vadd.f32 %v191_v56, %v151_v2 }
 0x1a9   :  { %v159_v4 = vpack.c.bf16 %v157_v3, %v157_v3 }
 0x1ab   :  { %162 = vst.msk [vmem:[%s277_s6 + $0x4] sm:$0xf] %vm160_vm6, %v159_v4 }

// kernel: multimodal_transformer_forward.77
= control target key start
LH: loop header
LB: loop body
LE: loop exit
PB: predicated region body
PF: predicated region fallthrough
CT: control target
= control target key end

     0   :  { %vm19_vm0 = vcmask 261120   ;;  %v107_v1 = vmov 0.0   ;;  %vm82_vm1 = vcmask 257024   ;;  %s151_s1 = inlined_call_operand.vmem [shape: bf16[32,32], index: 1, kind: input, shape index: {}]   ;;  %s152_s2 = inlined_call_operand.vmem [shape: f32[1,32], index: 2, kind: input, shape index: {}]   ;;  %s153_s0 = inlined_call_operand.vmem [shape: bf16[16,32], index: 0, kind: input, shape index: {}]   ;;  %s154_s3 = inlined_call_operand.vmem [shape: bf16[16,32], index: 3, kind: output, shape index: {}]  }
   0x1   :  { %v104_v0 = vld [vmem:[%s151_s1 + $0x8] sm:$0xff]  ;;  %20 = vst.msk [vmem:[#allocation2] sm:$0xff] %vm19_vm0, %v107_v1  ;;  %v103_v2 = vld [vmem:[%s151_s1] sm:$0xff] }
   0x2   :  { %21 = vst.msk [vmem:[#allocation2 + $0x8] sm:$0xff] %vm19_vm0, %v107_v1  ;;  %57 = vmatpush.bf16.msra.mxu0 %v104_v0  ;;  %v102_v3 = vld [vmem:[%s153_s0] sm:$0xff] }
   0x3   :  { %v106_v8 = vld [vmem:[%s152_s2] ss:$0 sm:$0xff] }
   0x6   :  { %58 = vmatpush.bf16.msra.mxu0 %v103_v2 }
   0x8   :  { %v22_v4 = vld [vmem:[#allocation2] sm:$0xff] }
   0x9   :  { %101 = vmatmul.msk.bf16.vlgmr.msra.gmra.mxu0 %vm19_vm0, %v102_v3  ;;  %v23_v7 = vld [vmem:[#allocation2 + $0x8] sm:$0xff] }
  0x86   :  { %v60_v5 = vpop.f32.mrf.mxu0 }
  0x87   :  { %v65_v6 = vadd.f32 %v60_v5, %v22_v4 }
  0x89   :  { %67 = vst.msk [vmem:[#allocation2] sm:$0xff] %vm19_vm0, %v65_v6 }
  0x8e   :  { %v62_v9 = vpop.f32.mrf.mxu0 }
  0x8f   :  { %v66_v10 = vadd.f32 %v62_v9, %v23_v7 }
  0x90   :  { %v72_v11 = vld [vmem:[#allocation2] sm:$0xff] }
  0x91   :  { %v78_v12 = vadd.f32 %v106_v8, %v72_v11  ;;  %68 = vst.msk [vmem:[#allocation2 + $0x8] sm:$0xff] %vm19_vm0, %v66_v10 }
  0x93   :  { %v80_v13 = vpack.c.bf16 %v78_v12, %v78_v12 }
  0x95   :  { %83 = vst.msk [vmem:[%s154_s3] sm:$0xf] %vm82_vm1, %v80_v13 }
  0x98   :  { %v73_v14 = vld [vmem:[#allocation2 + $0x8] sm:$0xff] }
  0x99   :  { %v79_v15 = vadd.f32 %v106_v8, %v73_v14 }
  0x9b   :  { %v81_v16 = vpack.c.bf16 %v79_v15, %v79_v15 }
  0x9d   :  { %84 = vst.msk [vmem:[%s154_s3 + $0x4] sm:$0xf] %vm82_vm1, %v81_v16 }

// kernel: multimodal_transformer_forward.55
= control target key start
LH: loop header
LB: loop body
LE: loop exit
PB: predicated region body
PF: predicated region fallthrough
CT: control target
= control target key end

     0   :  { %vm19_vm0 = vcmask 523264   ;;  %v202_v1 = vmov 0.0   ;;  %vm47_vm1 = vcmask 261120   ;;  %vm171_vm9 = vcmask 519168   ;;  %s258_s1 = inlined_call_operand.vmem [shape: bf16[32,64], index: 1, kind: input, shape index: {}]   ;;  %s259_s2 = inlined_call_operand.vmem [shape: f32[1,64], index: 2, kind: input, shape index: {}]   ;;  %s260_s0 = inlined_call_operand.vmem [shape: bf16[16,32], index: 0, kind: input, shape index: {}]   ;;  %s261_s3 = inlined_call_operand.vmem [shape: bf16[16,64], index: 3, kind: output, shape index: {}]  }
   0x1   :  { %v195_v0 = vld [vmem:[%s258_s1 + $0x8] sm:$0xff]  ;;  %20 = vst.msk [vmem:[#allocation2] sm:$0xff] %vm19_vm0, %v202_v1  ;;  %v194_v2 = vld [vmem:[%s258_s1] sm:$0xff] }
   0x2   :  { %21 = vst.msk [vmem:[#allocation2 + $0x8] sm:$0xff] %vm19_vm0, %v202_v1  ;;  %57 = vmatpush.bf16.msra.mxu0 %v195_v0  ;;  %v193_v3 = vld [vmem:[%s260_s0] sm:$0xff] }
   0x3   :  { %v197_v8 = vld [vmem:[%s259_s2] ss:$0 sm:$0xff] }
   0x6   :  { %58 = vmatpush.bf16.msra.mxu0 %v194_v2 }
   0x8   :  { %v22_v4 = vld [vmem:[#allocation2] sm:$0xff] }
   0x9   :  { %190 = vmatmul.msk.bf16.vlgmr.msra.gmra.mxu0 %vm47_vm1, %v193_v3  ;;  %v23_v7 = vld [vmem:[#allocation2 + $0x8] sm:$0xff] }
  0x86   :  { %v60_v5 = vpop.f32.mrf.mxu0 }
  0x87   :  { %v65_v6 = vadd.f32 %v60_v5, %v22_v4 }
  0x89   :  { %68 = vst.msk [vmem:[#allocation2] sm:$0xff] %vm19_vm0, %v65_v6 }
  0x8e   :  { %v62_v9 = vpop.f32.mrf.mxu0 }
  0x8f   :  { %v66_v10 = vadd.f32 %v62_v9, %v23_v7 }
  0x90   :  { %v73_v11 = vld [vmem:[#allocation2] sm:$0xff] }
  0x91   :  { %v238_v12 = vadd.f32 %v197_v8, %v73_v11  ;;  %69 = vst.msk [vmem:[#allocation2 + $0x8] sm:$0xff] %vm19_vm0, %v66_v10 }
  0x93   :  { %v83_v13 = vmul.f32 0.70710677, %v238_v12 }
  0x95   :  { %v85_v14 = vmul.f32 %v83_v13, %v83_v13 }
  0x97   :  { %v86_v15 = vmin.f32 %v85_v14, 16.0 }
  0x98   :  { %v74_v16 = vld [vmem:[#allocation2 + $0x8] sm:$0xff] }
  0x99   :  { %v87_v17 = vmul.f32 2.1237322e-06, %v86_v15  ;;  %v98_v18 = vmul.f32 3.8918573e-05, %v86_v15  ;;  %v242_v19 = vadd.f32 %v197_v8, %v74_v16 }
  0x9b   :  { %v88_v20 = vadd.f32 0.00028619796, %v87_v17  ;;  %v99_v21 = vadd.f32 0.001143296, %v98_v18  ;;  %v245_v22 = vmul.f32 0.70710677, %v242_v19 }
  0x9c   :  { %v81_v18 = vmul.f32 0.5, %v238_v12  ;;  %v82_v12 = vmul.f32 0.5, %v242_v19 }
  0x9d   :  { %v89_v23 = vmul.f32 %v88_v20, %v86_v15  ;;  %v100_v24 = vmul.f32 %v99_v21, %v86_v15  ;;  %v125_v25 = vmul.f32 %v245_v22, %v245_v22 }
  0x9f   :  { %v101_v26 = vadd.f32 0.014752088, %v100_v24  ;;  %v90_v27 = vadd.f32 0.0036580483, %v89_v23  ;;  %v126_v28 = vmin.f32 %v125_v25, 16.0 }
  0xa1   :  { %v102_v29 = vmul.f32 %v101_v26, %v86_v15  ;;  %v127_v30 = vmul.f32 2.1237322e-06, %v126_v28  ;;  %v138_v31 = vmul.f32 3.8918573e-05, %v126_v28  ;;  %v91_v33 = vmul.f32 %v90_v27, %v86_v15 }
  0xa3   :  { %v103_v32 = vadd.f32 0.112945676, %v102_v29  ;;  %v128_v34 = vadd.f32 0.00028619796, %v127_v30  ;;  %v139_v35 = vadd.f32 0.001143296, %v138_v31 }
  0xa4   :  { %v92_v40 = vadd.f32 0.05243302, %v91_v33 }
  0xa5   :  { %v104_v36 = vmul.f32 %v103_v32, %v86_v15  ;;  %v129_v37 = vmul.f32 %v128_v34, %v126_v28  ;;  %v140_v38 = vmul.f32 %v139_v35, %v126_v28 }
  0xa6   :  { %v93_v46 = vmul.f32 %v92_v40, %v86_v15 }
  0xa7   :  { %v105_v39 = vadd.f32 0.4994258, %v104_v36  ;;  %v141_v41 = vadd.f32 0.014752088, %v140_v38  ;;  %v130_v43 = vadd.f32 0.0036580483, %v129_v37 }
  0xa8   :  { %v94_v50 = vadd.f32 0.18741608, %v93_v46 }
  0xa9   :  { %v106_v42 = vmul.f32 %v105_v39, %v86_v15  ;;  %v142_v44 = vmul.f32 %v141_v41, %v126_v28  ;;  %v131_v48 = vmul.f32 %v130_v43, %v126_v28 }
  0xaa   :  { %v95_v55 = vmul.f32 %v94_v50, %v86_v15 }
  0xab   :  { %v107_v45 = vadd.f32 1.0, %v106_v42  ;;  %v143_v47 = vadd.f32 0.112945676, %v142_v44  ;;  %v132_v52 = vadd.f32 0.05243302, %v131_v48 }
  0xac   :  { %v96_v61 = vadd.f32 1.1283791, %v95_v55 }
  0xad   :  { %198 = vrcp.f32 %v107_v45  ;;  %v144_v49 = vmul.f32 %v143_v47, %v126_v28  ;;  %v133_v58 = vmul.f32 %v132_v52, %v126_v28  ;;  %v119_v60 = vand.u32 2147483648, %v107_v45 }
  0xae   :  { %v117_v63 = vand.u32 2147483647, %v107_v45  ;;  %vm113_vm3 = vweird.f32 %v107_v45  ;;  %v97_v4 = vmul.f32 %v96_v61, %v83_v13 }
  0xaf   :  { %v145_v51 = vadd.f32 0.4994258, %v144_v49  ;;  %v134_v0 = vadd.f32 0.18741608, %v133_v58  ;;  %v120_v2 = vor.u32 1.1754944e-38, %v119_v60 }
  0xb0   :  { %vm118_vm5 = vcmp.eq.f32.partialorder %v117_v63, 8.507059e+37 }
  0xb1   :  { %v146_v53 = vmul.f32 %v145_v51, %v126_v28  ;;  %v135_v7 = vmul.f32 %v134_v0, %v126_v28 }
  0xb3   :  { %v199_v54 = vpop.eup %198  ;;  %v147_v57 = vadd.f32 1.0, %v146_v53  ;;  %v136_v15 = vadd.f32 1.1283791, %v135_v7 }
  0xb4   :  { %v109_v56 = vmul.f32 %v199_v54, %v107_v45  ;;  %vm114_vm2 = vweird.f32 %v199_v54 }
  0xb5   :  { %200 = vrcp.f32 %v147_v57  ;;  %vm115_vm4 = vmor %vm113_vm3, %vm114_vm2  ;;  %v159_v14 = vand.u32 2147483648, %v147_v57  ;;  %v157_v17 = vand.u32 2147483647, %v147_v57  ;;  %vm153_vm7 = vweird.f32 %v147_v57 }
  0xb6   :  { %v110_v59 = vsub.f32 1.0, %v109_v56  ;;  %v137_v24 = vmul.f32 %v136_v15, %v245_v22 }
  0xb7   :  { %v160_v13 = vor.u32 1.1754944e-38, %v159_v14  ;;  %vm158_vm10 = vcmp.eq.f32.partialorder %v157_v17, 8.507059e+37 }
  0xb8   :  { %v111_v62 = vmul.f32 %v199_v54, %v110_v59 }
  0xba   :  { %v112_v1 = vadd.f32 %v199_v54, %v111_v62 }
  0xbb   :  { %v201_v3 = vpop.eup %200 }
  0xbc   :  { %v116_v5 = vsel %vm115_vm4, %v199_v54, %v112_v1  ;;  %v149_v8 = vmul.f32 %v201_v3, %v147_v57  ;;  %vm154_vm6 = vweird.f32 %v201_v3 }
  0xbd   :  { %v121_v6 = vsel %vm118_vm5, %v120_v2, %v116_v5  ;;  %vm155_vm8 = vmor %vm153_vm7, %vm154_vm6 }
  0xbe   :  { %v122_v9 = vmul.f32 %v121_v6, %v97_v4  ;;  %v150_v10 = vsub.f32 1.0, %v149_v8 }
  0xc0   :  { %v191_v11 = vclamps-f32 %v122_v9, 1.0  ;;  %v151_v16 = vmul.f32 %v201_v3, %v150_v10 }
  0xc2   :  { %v165_v20 = vadd.f32 1.0, %v191_v11  ;;  %v152_v21 = vadd.f32 %v201_v3, %v151_v16 }
  0xc4   :  { %v167_v23 = vmul.f32 %v165_v20, %v81_v18  ;;  %v156_v25 = vsel %vm155_vm8, %v201_v3, %v152_v21 }
  0xc5   :  { %v161_v27 = vsel %vm158_vm10, %v160_v13, %v156_v25 }
  0xc6   :  { %v169_v26 = vpack.c.bf16 %v167_v23, %v167_v23  ;;  %v162_v28 = vmul.f32 %v161_v27, %v137_v24 }
  0xc8   :  { %172 = vst.msk [vmem:[%s261_s3] sm:$0xf] %vm171_vm9, %v169_v26  ;;  %v192_v29 = vclamps-f32 %v162_v28, 1.0 }
  0xca   :  { %v166_v30 = vadd.f32 1.0, %v192_v29 }
  0xcc   :  { %v168_v31 = vmul.f32 %v166_v30, %v82_v12 }
  0xce   :  { %v170_v32 = vpack.c.bf16 %v168_v31, %v168_v31 }
  0xd0   :  { %173 = vst.msk [vmem:[%s261_s3 + $0x4] sm:$0xf] %vm171_vm9, %v170_v32 }

// kernel: multimodal_transformer_forward.75
= control target key start
LH: loop header
LB: loop body
LE: loop exit
PB: predicated region body
PF: predicated region fallthrough
CT: control target
= control target key end

     0   :  { %s2383_s12 = smov 0   ;;  %s2385_s13 = smov 0   ;;  %s3173_s0 = inlined_call_operand.vmem [shape: bf16[2,8,3,4,8], index: 0, kind: input, shape index: {}, may-alias: {0,1,2}]   ;;  %s3174_s1 = inlined_call_operand.vmem [shape: bf16[2,8,3,4,8], index: 1, kind: input, shape index: {}, may-alias: {0,1,2}]   ;;  %s3175_s2 = inlined_call_operand.vmem [shape: bf16[2,8,3,4,8], index: 2, kind: input, shape index: {}, may-alias: {0,1,2}]   ;;  %s3176_s3 = inlined_call_operand.vmem [shape: bf16[2,8,4,8], index: 3, kind: output, shape index: {}]  }
   0x1   :  { %s2387_s14 = smov 0   ;;  %s2389_s15 = smov 0  }
   0x2   :  { %s2391_s16 = smov 0  }
   0x3 LB: > { %s32_s17 = sadd.s32 1, %s2353_s15  ;;  %p48_p1 = scmp.ne.s32.totalorder %s2345_s13, %s2341_s12  ;;  %s2357_s16 = sphi %s2391_s16, %s13_s16   ;;  %s2353_s15 = sphi %s2389_s15, %s3212_s15   ;;  %s2349_s14 = sphi %s2387_s14, %s3211_s14   ;;  %s2345_s13 = sphi %s2385_s13, %s3210_s13   ;;  %s2341_s12 = sphi %s2383_s12, %s3209_s12  }
   0x4   : > { %p34_p0 = scmp.ge.s32.totalorder %s32_s17, 2  ;;  %p49_p2 = scmp.eq.s32.totalorder %s2357_s16, 0 }
   0x5   : > { %s41_s20 = sadd.s32 1, %s2345_s13  ;;  %p2191_p5 = scmp.ge.s32.totalorder %s2357_s16, 2 }
   0x6   : > { %s3214_s17 = smov (%p34_p0, %s32_s17), 0  ;;  %p2414_p3 = por %p49_p2, %p48_p1 }
   0x7   : > { %s36_s19 = ssub.s32 %s2353_s15, %s3214_s17  ;;  %158 = sbr.rel (%p2191_p5) target bundleno = 51 (0x33), region = 16 }
   0x8   : > { %p39_p4 = scmp.eq.s32.totalorder %s36_s19, 0 }
   0xa   : > { %s2422_s21 = scalar_select %p39_p4, %s2345_s13, %s41_s20  }
   0xc   : > { %161 = sbr.rel (!%p2414_p3) target bundleno = 25 (0x19), region = 20  ;;  %s163_s22 = sand.u32 (%p2414_p3), 1, %s2345_s13  }
   0xd   : > { %s2247_s23 = smul.u32 (%p2414_p3), 48, %s2353_s15  ;;  %s2192_s24 = sshll.u32 (%p2414_p3), %s163_s22, 4 }
   0xe   : > { %s165_s28 = scalar_lea.vmem (%p2414_p3), [#allocation5], %s2192_s24 }
   0xf   : > { %s171_s27 = scalar_lea.vmem (%p2414_p3), %s3173_s0, %s2247_s23 }
  0x10   : > { %v188_v0 = vld [vmem:[%s171_s27] sm:$0x3] (%p2414_p3)  ;;  %v190_v1 = vld [vmem:[%s171_s27 + $0x6] sm:$0x3] (%p2414_p3)  ;;  %v192_v2 = vld [vmem:[%s171_s27 + $0xc] sm:$0x3] (%p2414_p3) }
  0x11   : > { %189 = vst [vmem:[%s165_s28] sm:$0x3] %v188_v0  ;;  %v194_v3 = vld [vmem:[%s171_s27 + $0x12] sm:$0x3]  ;;  %v196_v4 = vld [vmem:[%s171_s27 + $0x18] sm:$0x3] }
  0x12   : > { %191 = vst [vmem:[%s165_s28 + $0x2] sm:$0x3] %v190_v1  ;;  %v198_v5 = vld [vmem:[%s171_s27 + $0x1e] sm:$0x3]  ;;  %v200_v6 = vld [vmem:[%s171_s27 + $0x24] sm:$0x3] }
  0x13   : > { %193 = vst [vmem:[%s165_s28 + $0x4] sm:$0x3] %v192_v2  ;;  %v202_v7 = vld [vmem:[%s171_s27 + $0x2a] sm:$0x3] }
  0x14   : > { %195 = vst [vmem:[%s165_s28 + $0x6] sm:$0x3] %v194_v3 }
  0x15   : > { %197 = vst [vmem:[%s165_s28 + $0x8] sm:$0x3] %v196_v4 }
  0x16   : > { %199 = vst [vmem:[%s165_s28 + $0xa] sm:$0x3] %v198_v5 }
  0x17   : > { %201 = vst [vmem:[%s165_s28 + $0xc] sm:$0x3] %v200_v6 }
  0x18   : > { %203 = vst [vmem:[%s165_s28 + $0xe] sm:$0x3] %v202_v7 }
  0x19 PF: > { %243 = sbr.rel (!%p2414_p3) target bundleno = 38 (0x26), region = 61  ;;  %s245_s29 = sand.u32 (%p2414_p3), 1, %s2345_s13  }
  0x1a   : > { %s2195_s30 = smul.u32 (%p2414_p3), 48, %s2353_s15  ;;  %s2194_s4 = sshll.u32 (%p2414_p3), %s245_s29, 4 }
  0x1b   : > { %s247_s8 = scalar_lea.vmem (%p2414_p3), [#allocation6], %s2194_s4 }
  0x1c   : > { %s2094_s7 = scalar_lea.vmem (%p2414_p3), %s3174_s1, %s2195_s30 }
  0x1d   : > { %v2196_v8 = vld [vmem:[%s2094_s7 + $0x2] sm:$0x3] (%p2414_p3)  ;;  %v2197_v9 = vld [vmem:[%s2094_s7 + $0x8] sm:$0x3] (%p2414_p3)  ;;  %v2198_v10 = vld [vmem:[%s2094_s7 + $0xe] sm:$0x3] (%p2414_p3) }
  0x1e   : > { %272 = vst [vmem:[%s247_s8] sm:$0x3] %v2196_v8  ;;  %v2199_v11 = vld [vmem:[%s2094_s7 + $0x14] sm:$0x3]  ;;  %v2200_v12 = vld [vmem:[%s2094_s7 + $0x1a] sm:$0x3] }
  0x1f   : > { %274 = vst [vmem:[%s247_s8 + $0x2] sm:$0x3] %v2197_v9  ;;  %v2201_v13 = vld [vmem:[%s2094_s7 + $0x20] sm:$0x3]  ;;  %v2202_v14 = vld [vmem:[%s2094_s7 + $0x26] sm:$0x3] }
  0x20   : > { %276 = vst [vmem:[%s247_s8 + $0x4] sm:$0x3] %v2198_v10  ;;  %v2203_v15 = vld [vmem:[%s2094_s7 + $0x2c] sm:$0x3] }
  0x21   : > { %278 = vst [vmem:[%s247_s8 + $0x6] sm:$0x3] %v2199_v11 }
  0x22   : > { %280 = vst [vmem:[%s247_s8 + $0x8] sm:$0x3] %v2200_v12 }
  0x23   : > { %282 = vst [vmem:[%s247_s8 + $0xa] sm:$0x3] %v2201_v13 }
  0x24   : > { %284 = vst [vmem:[%s247_s8 + $0xc] sm:$0x3] %v2202_v14 }
  0x25   : > { %286 = vst [vmem:[%s247_s8 + $0xe] sm:$0x3] %v2203_v15 }
  0x26 PF: > { %326 = sbr.rel (!%p2414_p3) target bundleno = 51 (0x33), region = 102  ;;  %s328_s9 = sand.u32 (%p2414_p3), 1, %s2345_s13  }
  0x27   : > { %s2205_s10 = smul.u32 (%p2414_p3), 48, %s2353_s15  ;;  %s2204_s11 = sshll.u32 (%p2414_p3), %s328_s9, 4 }
  0x28   : > { %s330_s23 = scalar_lea.vmem (%p2414_p3), [#allocation7], %s2204_s11 }
  0x29   : > { %s2102_s22 = scalar_lea.vmem (%p2414_p3), %s3175_s2, %s2205_s10 }
  0x2a   : > { %v2206_v16 = vld [vmem:[%s2102_s22 + $0x4] sm:$0x3] (%p2414_p3)  ;;  %v2207_v17 = vld [vmem:[%s2102_s22 + $0xa] sm:$0x3] (%p2414_p3)  ;;  %v2208_v18 = vld [vmem:[%s2102_s22 + $0x10] sm:$0x3] (%p2414_p3) }
  0x2b   : > { %355 = vst [vmem:[%s330_s23] sm:$0x3] %v2206_v16  ;;  %v2209_v19 = vld [vmem:[%s2102_s22 + $0x16] sm:$0x3]  ;;  %v2210_v20 = vld [vmem:[%s2102_s22 + $0x1c] sm:$0x3] }
  0x2c   : > { %357 = vst [vmem:[%s330_s23 + $0x2] sm:$0x3] %v2207_v17  ;;  %v2211_v21 = vld [vmem:[%s2102_s22 + $0x22] sm:$0x3]  ;;  %v2212_v22 = vld [vmem:[%s2102_s22 + $0x28] sm:$0x3] }
  0x2d   : > { %359 = vst [vmem:[%s330_s23 + $0x4] sm:$0x3] %v2208_v18  ;;  %v2213_v23 = vld [vmem:[%s2102_s22 + $0x2e] sm:$0x3] }
  0x2e   : > { %361 = vst [vmem:[%s330_s23 + $0x6] sm:$0x3] %v2209_v19 }
  0x2f   : > { %363 = vst [vmem:[%s330_s23 + $0x8] sm:$0x3] %v2210_v20 }
  0x30   : > { %365 = vst [vmem:[%s330_s23 + $0xa] sm:$0x3] %v2211_v21 }
  0x31   : > { %367 = vst [vmem:[%s330_s23 + $0xc] sm:$0x3] %v2212_v22 }
  0x32   : > { %369 = vst [vmem:[%s330_s23 + $0xe] sm:$0x3] %v2213_v23 }
  0x33 PF: > { %p2214_p6 = scmp.ge.s32.totalorder %s2357_s16, 1  ;;  %p408_p7 = scmp.lt.s32.totalorder %s2357_s16, 3 }
  0x35   : > { %p409_p8 = pnand %p2214_p6, %p408_p7 }
  0x37   : > { %412 = sbr.rel (%p409_p8) target bundleno = 1171 (0x493), region = 143 }
  0x3c   : > { %s415_s18 = sand.u32 1, %s2341_s12   ;;  %vm571_vm0 = vcmask 1041409   ;;  %vm574_vm1 = vcmask 1042434   ;;  %vm577_vm2 = vcmask 1043459   ;;  %vm580_vm3 = vcmask 1044484   ;;  %p468_p9 = scmp.lt.s32.totalorder %s2349_s14, 1 }
  0x3d   : > { %s2449_s24 = sshll.u32 %s415_s18, 4  ;;  %vm583_vm4 = vcmask 1045509   ;;  %vm586_vm5 = vcmask 1046534   ;;  %vm589_vm6 = vcmask 1047559   ;;  %vm491_vm7 = vcmask 64512  }
  0x3e   : > { %s2452_s25 = scalar_lea.vmem [#allocation5], %s2449_s24  ;;  %s2465_s12 = scalar_lea.vmem [#allocation6], %s2449_s24  ;;  %vm482_vm9 = vcmask 7168   ;;  %vm769_vm10 = vcmask 1043456   ;;  %vm1614_vm11 = vcmask 1040384   ;;  %vm1687_vm12 = vcmask 57344  }
  0x3f   : > { %v513_v24 = vld [vmem:[%s2452_s25] sm:$0x1]  ;;  %v514_v25 = vld [vmem:[%s2452_s25 + $0x2] sm:$0x1]  ;;  %v515_v26 = vld [vmem:[%s2452_s25 + $0x4] sm:$0x1] }
  0x40   : > { %530 = vst [vmem:[#allocation1] ss:$4 sm:$0xff] %v513_v24  ;;  %v516_v27 = vld [vmem:[%s2452_s25 + $0x6] sm:$0x1]  ;;  %v517_v30 = vld [vmem:[%s2452_s25 + $0x8] sm:$0x1] }
  0x41   : > { %535 = vst [vmem:[#allocation1 + $0x20] ss:$4 sm:$0xff] %v514_v25  ;;  %v518_v31 = vld [vmem:[%s2452_s25 + $0xa] sm:$0x1]  ;;  %v519_v34 = vld [vmem:[%s2452_s25 + $0xc] sm:$0x1] }
  0x42   : > { %v520_v35 = vld [vmem:[%s2452_s25 + $0xe] sm:$0x1]  ;;  %v521_v38 = vld [vmem:[%s2465_s12] sm:$0x1]  ;;  %v522_v39 = vld [vmem:[%s2465_s12 + $0x2] sm:$0x1] }
  0x43   : > { %v523_v42 = vld [vmem:[%s2465_s12 + $0x4] sm:$0x1]  ;;  %v524_v43 = vld [vmem:[%s2465_s12 + $0x6] sm:$0x1]  ;;  %v525_v46 = vld [vmem:[%s2465_s12 + $0x8] sm:$0x1] }
  0x44   : > { %v526_v48 = vld [vmem:[%s2465_s12 + $0xa] sm:$0x1]  ;;  %v527_v60 = vld [vmem:[%s2465_s12 + $0xc] sm:$0x1]  ;;  %v528_v63 = vld [vmem:[%s2465_s12 + $0xe] sm:$0x1] }
  0x45   : > { %s2486_s26 = scalar_lea.vmem [#allocation7], %s2449_s24  ;;  %s3216_s14 = smov (!%p468_p9, %s2349_s14), 1  ;;  %vm1688_vm13 = vsmask.f32 256  ;;  %vm1800_vm15 = vsmask.f32 7938 }
  0x46   : > { %v702_v16 = vld [vmem:[%s2486_s26] sm:$0x1]  ;;  %v703_v19 = vld [vmem:[%s2486_s26 + $0x2] sm:$0x1]  ;;  %s2246_s27 = sshll.u32 %s3216_s14, 4  ;;  %vm2956_vm14 = vmand %vm1687_vm12, %vm1688_vm13 }
  0x47   : > { %v531_v28 = vld.sshfl [vmem:[#allocation1] sm:$0xff pattern:$0x73625140]  ;;  %s2947_s30 = scalar_lea.vmem %s3176_s3, %s2246_s27 }
  0x48   : > { %v536_v29 = vld.sshfl [vmem:[#allocation1 + $0x20] sm:$0xff pattern:$0x73625140]  ;;  %539 = vst [vmem:[#allocation1] ss:$4 sm:$0xff] %v515_v26  ;;  %v562_v57 = vunpack.c.l.b16 %v531_v28 }
  0x49   : > { %543 = vst [vmem:[#allocation1 + $0x20] ss:$4 sm:$0xff] %v516_v27  ;;  %v563_v50 = vunpack.c.l.b16 %v536_v29 }
  0x4b   : > { %v570_v58 = vrot.slane %v563_v50, 7  ;;  %v709_v50 = vld [vmem:[%s2486_s26 + $0xe] sm:$0x1] }
  0x4d   : > { %v572_v3 = vsel %vm571_vm0, %v570_v58, %v562_v57  ;;  %v791_v57 = vld [vmem:[%s2452_s25 + $0x4] sm:$0x1]  ;;  %v792_v58 = vld [vmem:[%s2452_s25 + $0x6] sm:$0x1] }
  0x4f   : > { %v540_v32 = vld.sshfl [vmem:[#allocation1] sm:$0xff pattern:$0x73625140] }
  0x50   : > { %v544_v33 = vld.sshfl [vmem:[#allocation1 + $0x20] sm:$0xff pattern:$0x73625140]  ;;  %547 = vst [vmem:[#allocation1] ss:$4 sm:$0xff] %v517_v30  ;;  %v564_v55 = vunpack.c.l.b16 %v540_v32 }
  0x51   : > { %551 = vst [vmem:[#allocation1 + $0x20] ss:$4 sm:$0xff] %v518_v31  ;;  %v565_v62 = vunpack.c.l.b16 %v544_v33 }
  0x52   : > { %v573_v0 = vrot.slane %v564_v55, 6  ;;  %v790_v55 = vld [vmem:[%s2452_s25 + $0x2] sm:$0x1] }
  0x53   : > { %v576_v9 = vrot.slane %v565_v62, 5  ;;  %v794_v62 = vld [vmem:[%s2452_s25 + $0xa] sm:$0x1] }
  0x54   : > { %v575_v11 = vsel %vm574_vm1, %v573_v0, %v572_v3 }
  0x55   : > { %v578_v17 = vsel %vm577_vm2, %v576_v9, %v575_v11  ;;  %v799_v9 = vld [vmem:[%s2465_s12 + $0x4] sm:$0x1] }
  0x57   : > { %v548_v36 = vld.sshfl [vmem:[#allocation1] sm:$0xff pattern:$0x73625140] }
  0x58   : > { %v2462_v37 = vld.sshfl [vmem:[#allocation1 + $0x20] sm:$0xff pattern:$0x73625140]  ;;  %555 = vst [vmem:[#allocation1] ss:$4 sm:$0xff] %v519_v34  ;;  %v566_v7 = vunpack.c.l.b16 %v548_v36 }
  0x59   : > { %559 = vst [vmem:[#allocation1 + $0x20] ss:$4 sm:$0xff] %v520_v35  ;;  %v567_v13 = vunpack.c.l.b16 %v2462_v37  ;;  %v704_v35 = vld [vmem:[%s2486_s26 + $0x4] sm:$0x1] }
  0x5a   : > { %v579_v14 = vrot.slane %v566_v7, 4 }
  0x5b   : > { %v582_v22 = vrot.slane %v567_v13, 3  ;;  %v801_v13 = vld [vmem:[%s2465_s12 + $0x8] sm:$0x1] }
  0x5c   : > { %v581_v25 = vsel %vm580_vm3, %v579_v14, %v578_v17  ;;  %v802_v14 = vld [vmem:[%s2465_s12 + $0xa] sm:$0x1]  ;;  %v803_v17 = vld [vmem:[%s2465_s12 + $0xc] sm:$0x1] }
  0x5d   : > { %v584_v32 = vsel %vm583_vm4, %v582_v22, %v581_v25  ;;  %v973_v22 = vld [vmem:[%s2486_s26 + $0x2] sm:$0x1]  ;;  %v974_v25 = vld [vmem:[%s2486_s26 + $0x4] sm:$0x1] }
  0x5f   : > { %v2469_v40 = vld.sshfl [vmem:[#allocation1] sm:$0xff pattern:$0x73625140] }
  0x60   : > { %v2471_v41 = vld.sshfl [vmem:[#allocation1 + $0x20] sm:$0xff pattern:$0x73625140]  ;;  %593 = vst [vmem:[#allocation1] ss:$4 sm:$0xff] %v521_v38  ;;  %v568_v20 = vunpack.c.l.b16 %v2469_v40 }
  0x61   : > { %598 = vst [vmem:[#allocation1 + $0x20] ss:$4 sm:$0xff] %v522_v39  ;;  %v569_v28 = vunpack.c.l.b16 %v2471_v41  ;;  %v705_v38 = vld [vmem:[%s2486_s26 + $0x6] sm:$0x1] }
  0x62   : > { %v585_v30 = vrot.slane %v568_v20, 2 }
  0x63   : > { %v588_v36 = vrot.slane %v569_v28, 1 }
  0x64   : > { %v587_v39 = vsel %vm586_vm5, %v585_v30, %v584_v32  ;;  %v977_v30 = vld [vmem:[%s2486_s26 + $0xa] sm:$0x1] }
  0x67   : > { %v594_v44 = vld.sshfl [vmem:[#allocation1] sm:$0xff pattern:$0x73625140] }
  0x68   : > { %v599_v45 = vld.sshfl [vmem:[#allocation1 + $0x20] sm:$0xff pattern:$0x73625140]  ;;  %602 = vst [vmem:[#allocation1] ss:$4 sm:$0xff] %v523_v42  ;;  %v625_v53 = vunpack.c.l.b16 %v594_v44 }
  0x69   : > { %606 = vst [vmem:[#allocation1 + $0x20] ss:$4 sm:$0xff] %v524_v43  ;;  %v626_v47 = vunpack.c.l.b16 %v599_v45  ;;  %v590_v43 = vsel %vm589_vm6, %v588_v36, %v587_v39  ;;  %v706_v45 = vld [vmem:[%s2486_s26 + $0x8] sm:$0x1] }
  0x6a   : > { %v591_v44 = vpack.c.b16 %v590_v43, %v590_v43 }
  0x6b   : > { %v633_v54 = vrot.slane %v626_v47, 7 }
  0x6d   : > { %v634_v61 = vsel %vm571_vm0, %v633_v54, %v625_v53  ;;  %v789_v53 = vld [vmem:[%s2452_s25] sm:$0x1] }
  0x6f   : > { %v603_v49 = vld.sshfl [vmem:[#allocation1] sm:$0xff pattern:$0x73625140] }
  0x70   : > { %v607_v51 = vld.sshfl [vmem:[#allocation1 + $0x20] sm:$0xff pattern:$0x73625140]  ;;  %610 = vst [vmem:[#allocation1] ss:$4 sm:$0xff] %v525_v46  ;;  %v627_v52 = vunpack.c.l.b16 %v603_v49 }
  0x71   : > { %614 = vst [vmem:[#allocation1 + $0x20] ss:$4 sm:$0xff] %v526_v48  ;;  %v628_v56 = vunpack.c.l.b16 %v607_v51  ;;  %v707_v46 = vld [vmem:[%s2486_s26 + $0xa] sm:$0x1]  ;;  %v708_v49 = vld [vmem:[%s2486_s26 + $0xc] sm:$0x1] }
  0x72   : > { %v635_v59 = vrot.slane %v627_v52, 6 }
  0x73   : > { %v637_v2 = vrot.slane %v628_v56, 5 }
  0x74   : > { %v636_v6 = vsel %vm574_vm1, %v635_v59, %v634_v61  ;;  %v793_v61 = vld [vmem:[%s2452_s25 + $0x8] sm:$0x1] }
  0x75   : > { %v638_v12 = vsel %vm577_vm2, %v637_v2, %v636_v6  ;;  %v796_v2 = vld [vmem:[%s2452_s25 + $0xe] sm:$0x1]  ;;  %v798_v6 = vld [vmem:[%s2465_s12 + $0x2] sm:$0x1] }
  0x77   : > { %v611_v1 = vld.sshfl [vmem:[#allocation1] sm:$0xff pattern:$0x73625140] }
  0x78   : > { %v615_v4 = vld.sshfl [vmem:[#allocation1 + $0x20] sm:$0xff pattern:$0x73625140]  ;;  %618 = vst [vmem:[#allocation1] ss:$4 sm:$0xff] %v527_v60  ;;  %v629_v5 = vunpack.c.l.b16 %v611_v1 }
  0x79   : > { %622 = vst [vmem:[#allocation1 + $0x20] ss:$4 sm:$0xff] %v528_v63  ;;  %v630_v8 = vunpack.c.l.b16 %v615_v4  ;;  %v795_v1 = vld [vmem:[%s2452_s25 + $0xc] sm:$0x1] }
  0x7a   : > { %v639_v10 = vrot.slane %v629_v5, 4  ;;  %v797_v5 = vld [vmem:[%s2465_s12] sm:$0x1] }
  0x7b   : > { %v641_v15 = vrot.slane %v630_v8, 3 }
  0x7c   : > { %v640_v18 = vsel %vm580_vm3, %v639_v10, %v638_v12  ;;  %v800_v10 = vld [vmem:[%s2465_s12 + $0x6] sm:$0x1] }
  0x7d   : > { %v642_v27 = vsel %vm583_vm4, %v641_v15, %v640_v18  ;;  %v804_v18 = vld [vmem:[%s2465_s12 + $0xe] sm:$0x1] }
  0x7f   : > { %v619_v21 = vld.sshfl [vmem:[#allocation1] sm:$0xff pattern:$0x73625140] }
  0x80   : > { %v623_v23 = vld.sshfl [vmem:[#allocation1 + $0x20] sm:$0xff pattern:$0x73625140]  ;;  %v631_v24 = vunpack.c.l.b16 %v619_v21  ;;  %711 = vst [vmem:[#allocation1] ss:$4 sm:$0xff] %v702_v16 }
  0x81   : > { %v632_v26 = vunpack.c.l.b16 %v623_v23  ;;  %716 = vst [vmem:[#allocation1 + $0x20] ss:$4 sm:$0xff] %v703_v19  ;;  %v972_v21 = vld [vmem:[%s2486_s26] sm:$0x1] }
  0x82   : > { %v643_v29 = vrot.slane %v631_v24, 2 }
  0x83   : > { %v645_v31 = vrot.slane %v632_v26, 1  ;;  %v975_v26 = vld [vmem:[%s2486_s26 + $0x6] sm:$0x1] }
  0x84   : > { %v644_v33 = vsel %vm586_vm5, %v643_v29, %v642_v27  ;;  %v976_v29 = vld [vmem:[%s2486_s26 + $0x8] sm:$0x1] }
  0x85   : > { %v646_v34 = vsel %vm589_vm6, %v645_v31, %v644_v33 }
  0x86   : > { %v647_v37 = vpack.c.b16 %v646_v34, %v646_v34 }
  0x87   : > { %v2502_v40 = vld.sshfl [vmem:[#allocation1] sm:$0xff pattern:$0x73625140] }
  0x88   : > { %v653_v41 = vsel %vm491_vm7, %v647_v37, 0  ;;  %v2505_v42 = vld.sshfl [vmem:[#allocation1 + $0x20] sm:$0xff pattern:$0x73625140]  ;;  %720 = vst [vmem:[#allocation1] ss:$4 sm:$0xff] %v704_v35 }
  0x89   : > { %662 = vmatpush.bf16.xpose.msra.mxu0 %v653_v41  ;;  %724 = vst [vmem:[#allocation1 + $0x20] ss:$4 sm:$0xff] %v705_v38 }
  0x8f   : > { %v2510_v47 = vld.sshfl [vmem:[#allocation1] sm:$0xff pattern:$0x73625140] }
  0x90   : > { %v2512_v48 = vld.sshfl [vmem:[#allocation1 + $0x20] sm:$0xff pattern:$0x73625140]  ;;  %728 = vst [vmem:[#allocation1] ss:$4 sm:$0xff] %v706_v45  ;;  %2220 = vmatmul.msk.bf16.vlgmr.msra.gmra.mxu0 %vm491_vm7, %v591_v44 }
  0x91   : > { %732 = vst [vmem:[#allocation1 + $0x20] ss:$4 sm:$0xff] %v707_v46  ;;  %v978_v46 = vld [vmem:[%s2486_s26 + $0xc] sm:$0x1] }
  0x97   : > { %v2517_v51 = vld.sshfl [vmem:[#allocation1] sm:$0xff pattern:$0x73625140] }
  0x98   : > { %v2519_v52 = vld.sshfl [vmem:[#allocation1 + $0x20] sm:$0xff pattern:$0x73625140]  ;;  %736 = vst [vmem:[#allocation1] ss:$4 sm:$0xff] %v708_v49 }
  0x99   : > { %740 = vst [vmem:[#allocation1 + $0x20] ss:$4 sm:$0xff] %v709_v50 }
  0x9f   : > { %v2522_v54 = vld.sshfl [vmem:[#allocation1] sm:$0xff pattern:$0x73625140] }
  0xa0   : > { %v2525_v56 = vld.sshfl [vmem:[#allocation1 + $0x20] sm:$0xff pattern:$0x73625140]  ;;  %806 = vst [vmem:[#allocation1] ss:$4 sm:$0xff] %v789_v53 }
  0xa1   : > { %811 = vst [vmem:[#allocation1 + $0x20] ss:$4 sm:$0xff] %v790_v55  ;;  %v979_v53 = vld [vmem:[%s2486_s26 + $0xe] sm:$0x1] }
  0xa7   : > { %v2529_v59 = vld.sshfl [vmem:[#allocation1] sm:$0xff pattern:$0x73625140] }
  0xa8   : > { %v2531_v60 = vld.sshfl [vmem:[#allocation1 + $0x20] sm:$0xff pattern:$0x73625140]  ;;  %815 = vst [vmem:[#allocation1] ss:$4 sm:$0xff] %v791_v57 }
  0xa9   : > { %819 = vst [vmem:[#allocation1 + $0x20] ss:$4 sm:$0xff] %v792_v58 }
  0xaf   : > { %v2535_v63 = vld.sshfl [vmem:[#allocation1] sm:$0xff pattern:$0x73625140] }
  0xb0   : > { %v2537_v0 = vld.sshfl [vmem:[#allocation1 + $0x20] sm:$0xff pattern:$0x73625140]  ;;  %823 = vst [vmem:[#allocation1] ss:$4 sm:$0xff] %v793_v61 }
  0xb1   : > { %827 = vst [vmem:[#allocation1 + $0x20] ss:$4 sm:$0xff] %v794_v62 }
  0xb7   : > { %v2541_v3 = vld.sshfl [vmem:[#allocation1] sm:$0xff pattern:$0x73625140] }
  0xb8   : > { %v2543_v4 = vld.sshfl [vmem:[#allocation1 + $0x20] sm:$0xff pattern:$0x73625140]  ;;  %831 = vst [vmem:[#allocation1] ss:$4 sm:$0xff] %v795_v1 }
  0xb9   : > { %835 = vst [vmem:[#allocation1 + $0x20] ss:$4 sm:$0xff] %v796_v2 }
  0xbf   : > { %v2547_v7 = vld.sshfl [vmem:[#allocation1] sm:$0xff pattern:$0x73625140] }
  0xc0   : > { %v2549_v8 = vld.sshfl [vmem:[#allocation1 + $0x20] sm:$0xff pattern:$0x73625140]  ;;  %862 = vst [vmem:[#allocation1] ss:$4 sm:$0xff] %v797_v5 }
  0xc1   : > { %867 = vst [vmem:[#allocation1 + $0x20] ss:$4 sm:$0xff] %v798_v6 }
  0xc7   : > { %v863_v11 = vld.sshfl [vmem:[#allocation1] sm:$0xff pattern:$0x73625140] }
  0xc8   : > { %v868_v12 = vld.sshfl [vmem:[#allocation1 + $0x20] sm:$0xff pattern:$0x73625140]  ;;  %871 = vst [vmem:[#allocation1] ss:$4 sm:$0xff] %v799_v9  ;;  %v894_v33 = vunpack.c.l.b16 %v863_v11 }
  0xc9   : > { %875 = vst [vmem:[#allocation1 + $0x20] ss:$4 sm:$0xff] %v800_v10  ;;  %v895_v34 = vunpack.c.l.b16 %v868_v12  ;;  %v1058_v11 = vld [vmem:[%s2452_s25] sm:$0x2] }
  0xca   : > { %v902_v43 = vrot.slane %v894_v33, 1 }
  0xcc   : > { %v903_v55 = vsel %vm571_vm0, %v895_v34, %v902_v43  ;;  %v1066_v43 = vld [vmem:[%s2465_s12] sm:$0x2] }
  0xcf   : > { %v872_v15 = vld.sshfl [vmem:[#allocation1] sm:$0xff pattern:$0x73625140] }
  0xd0   : > { %v876_v16 = vld.sshfl [vmem:[#allocation1 + $0x20] sm:$0xff pattern:$0x73625140]  ;;  %879 = vst [vmem:[#allocation1] ss:$4 sm:$0xff] %v801_v13  ;;  %v896_v35 = vunpack.c.l.b16 %v872_v15 }
  0xd1   : > { %883 = vst [vmem:[#allocation1 + $0x20] ss:$4 sm:$0xff] %v802_v14  ;;  %v897_v36 = vunpack.c.l.b16 %v876_v16  ;;  %v1059_v13 = vld [vmem:[%s2452_s25 + $0x2] sm:$0x2] }
  0xd2   : > { %v904_v44 = vrot.slane %v896_v35, 7 }
  0xd3   : > { %v906_v45 = vrot.slane %v897_v36, 6 }
  0xd4   : > { %v905_v61 = vsel %vm574_vm1, %v904_v44, %v903_v55  ;;  %v1067_v44 = vld [vmem:[%s2465_s12 + $0x2] sm:$0x2]  ;;  %v841_v55 = vunpack.c.l.b16 %v2537_v0 }
  0xd5   : > { %v907_v1 = vsel %vm577_vm2, %v906_v45, %v905_v61  ;;  %v842_v61 = vunpack.c.l.b16 %v2541_v3  ;;  %v2359_v3 = vmov -inf  }
  0xd6   : > { %483 = vst.msk [vmem:[#allocation2] sm:$0xff] %vm482_vm9, %v2359_v3 }
  0xd7   : > { %v880_v19 = vld.sshfl [vmem:[#allocation1] sm:$0xff pattern:$0x73625140]  ;;  %484 = vst.msk [vmem:[#allocation2 + $0x8] sm:$0xff] %vm482_vm9, %v2359_v3 }
  0xd8   : > { %v884_v20 = vld.sshfl [vmem:[#allocation1 + $0x20] sm:$0xff pattern:$0x73625140]  ;;  %887 = vst [vmem:[#allocation1] ss:$4 sm:$0xff] %v803_v17  ;;  %v898_v37 = vunpack.c.l.b16 %v880_v19  ;;  %v504_v17 = vlaneseq }
  0xd9   : > { %891 = vst [vmem:[#allocation1 + $0x20] ss:$4 sm:$0xff] %v804_v18  ;;  %v899_v38 = vunpack.c.l.b16 %v884_v20  ;;  %v1060_v18 = vld [vmem:[%s2452_s25 + $0x4] sm:$0x2]  ;;  %v1061_v19 = vld [vmem:[%s2452_s25 + $0x6] sm:$0x2] }
  0xda   : > { %v908_v49 = vrot.slane %v898_v37, 5  ;;  %v2593_v20 = vshrl.u32 %v504_v17, 7  ;;  %v1064_v37 = vld [vmem:[%s2452_s25 + $0xc] sm:$0x2]  ;;  %485 = vst.msk [vmem:[#allocation2 + $0x10] sm:$0xff] %vm482_vm9, %v2359_v3 }
  0xdb   : > { %v910_v50 = vrot.slane %v899_v38, 4  ;;  %v1065_v38 = vld [vmem:[%s2452_s25 + $0xe] sm:$0x2]  ;;  %486 = vst.msk [vmem:[#allocation2 + $0x18] sm:$0xff] %vm482_vm9, %v2359_v3 }
  0xdc   : > { %v909_v5 = vsel %vm580_vm3, %v908_v49, %v907_v1  ;;  %v838_v49 = vunpack.c.l.b16 %v2529_v59  ;;  %v844_v1 = vunpack.c.l.b16 %v2547_v7  ;;  %v852_v59 = vrot.slane %v842_v61, 5  ;;  %v1244_v61 = vld [vmem:[%s2486_s26 + $0x6] sm:$0x2] }
  0xdd   : > { %v911_v6 = vsel %vm583_vm4, %v910_v50, %v909_v5  ;;  %v839_v50 = vunpack.c.l.b16 %v2531_v60 }
  0xde   : > { %v846_v5 = vrot.slane %v838_v49, 1  ;;  %v1242_v49 = vld [vmem:[%s2486_s26 + $0x2] sm:$0x2] }
  0xdf   : > { %v888_v23 = vld.sshfl [vmem:[#allocation1] sm:$0xff pattern:$0x73625140] }
  0xe0   : > { %v892_v24 = vld.sshfl [vmem:[#allocation1 + $0x20] sm:$0xff pattern:$0x73625140]  ;;  %981 = vst [vmem:[#allocation1] ss:$4 sm:$0xff] %v972_v21  ;;  %v900_v39 = vunpack.c.l.b16 %v888_v23  ;;  %v2595_v21 = vand.u32 127, %v504_v17  ;;  %v847_v60 = vsel %vm571_vm0, %v839_v50, %v846_v5 }
  0xe1   : > { %986 = vst [vmem:[#allocation1 + $0x20] ss:$4 sm:$0xff] %v973_v22  ;;  %v901_v41 = vunpack.c.l.b16 %v892_v24  ;;  %v1246_v5 = vld [vmem:[%s2486_s26 + $0xa] sm:$0x2] }
  0xe2   : > { %v912_v62 = vrot.slane %v900_v39, 3  ;;  %vm512_vm8 = vcmp.ge.s32.totalorder %v2593_v20, %v2595_v21 }
  0xe3   : > { %v914_v2 = vrot.slane %v901_v41, 2 }
  0xe4   : > { %v913_v9 = vsel %vm586_vm5, %v912_v62, %v911_v6  ;;  %v843_v62 = vunpack.c.l.b16 %v2543_v4 }
  0xe5   : > { %v915_v10 = vsel %vm589_vm6, %v914_v2, %v913_v9  ;;  %v845_v2 = vunpack.c.l.b16 %v2549_v8  ;;  %v850_v9 = vrot.slane %v841_v55, 6  ;;  %v1243_v55 = vld [vmem:[%s2486_s26 + $0x4] sm:$0x2] }
  0xe6   : > { %v916_v12 = vpack.c.b16 %v915_v10, %v915_v10  ;;  %v1068_v10 = vld [vmem:[%s2465_s12 + $0x4] sm:$0x2] }
  0xe7   : > { %v2561_v27 = vld.sshfl [vmem:[#allocation1] sm:$0xff pattern:$0x73625140]  ;;  %v858_v8 = vrot.slane %v845_v2, 2 }
  0xe8   : > { %v2563_v28 = vld.sshfl [vmem:[#allocation1 + $0x20] sm:$0xff pattern:$0x73625140]  ;;  %990 = vst [vmem:[#allocation1] ss:$4 sm:$0xff] %v974_v25  ;;  %v921_v15 = vsel %vm491_vm7, %v916_v12, 0 }
  0xe9   : > { %994 = vst [vmem:[#allocation1 + $0x20] ss:$4 sm:$0xff] %v975_v26  ;;  %930 = vmatpush.bf16.xpose.msra.mxu2 %v921_v15  ;;  %v1062_v26 = vld [vmem:[%s2452_s25 + $0x8] sm:$0x2]  ;;  %v856_v12 = vrot.slane %v844_v1, 3 }
  0xea   : > { %v1245_v2 = vld [vmem:[%s2486_s26 + $0x8] sm:$0x2] }
  0xef   : > { %v2567_v31 = vld.sshfl [vmem:[#allocation1] sm:$0xff pattern:$0x73625140] }
  0xf0   : > { %v2569_v32 = vld.sshfl [vmem:[#allocation1 + $0x20] sm:$0xff pattern:$0x73625140]  ;;  %998 = vst [vmem:[#allocation1] ss:$4 sm:$0xff] %v976_v29 }
  0xf1   : > { %1002 = vst [vmem:[#allocation1 + $0x20] ss:$4 sm:$0xff] %v977_v30  ;;  %v1063_v30 = vld [vmem:[%s2452_s25 + $0xa] sm:$0x2] }
  0xf7   : > { %v2574_v57 = vld.sshfl [vmem:[#allocation1] sm:$0xff pattern:$0x73625140] }
  0xf8   : > { %v2576_v58 = vld.sshfl [vmem:[#allocation1 + $0x20] sm:$0xff pattern:$0x73625140]  ;;  %1006 = vst [vmem:[#allocation1] ss:$4 sm:$0xff] %v978_v46 }
  0xf9   : > { %1010 = vst [vmem:[#allocation1 + $0x20] ss:$4 sm:$0xff] %v979_v53  ;;  %v840_v53 = vunpack.c.l.b16 %v2535_v63  ;;  %v1069_v63 = vld [vmem:[%s2465_s12 + $0x6] sm:$0x2] }
  0xfb   : > { %v848_v6 = vrot.slane %v840_v53, 7 }
  0xfd   : > { %v849_v0 = vsel %vm574_vm1, %v848_v6, %v847_v60 }
  0xfe   : > { %v851_v7 = vsel %vm577_vm2, %v850_v9, %v849_v0 }
  0xff   : > { %v2586_v14 = vld.sshfl [vmem:[#allocation1] sm:$0xff pattern:$0x73625140]  ;;  %v853_v15 = vsel %vm580_vm3, %v852_v59, %v851_v7  ;;  %v1329_v7 = vld [vmem:[%s2452_s25 + $0x4] sm:$0x2] }
 0x100   : > { %v2589_v16 = vld.sshfl [vmem:[#allocation1 + $0x20] sm:$0xff pattern:$0x73625140]  ;;  %1075 = vst [vmem:[#allocation1] ss:$4 sm:$0xff] %v1058_v11  ;;  %v854_v11 = vrot.slane %v843_v62, 4 }
 0x101   : > { %1080 = vst [vmem:[#allocation1 + $0x20] ss:$4 sm:$0xff] %v1059_v13  ;;  %v1247_v59 = vld [vmem:[%s2486_s26 + $0xc] sm:$0x2] }
 0x102   : > { %v855_v17 = vsel %vm583_vm4, %v854_v11, %v853_v15  ;;  %v1330_v15 = vld [vmem:[%s2452_s25 + $0x6] sm:$0x2] }
 0x107   : > { %v2597_v22 = vld.sshfl [vmem:[#allocation1] sm:$0xff pattern:$0x73625140] }
 0x108   : > { %v2599_v23 = vld.sshfl [vmem:[#allocation1 + $0x20] sm:$0xff pattern:$0x73625140]  ;;  %1084 = vst [vmem:[#allocation1] ss:$4 sm:$0xff] %v1060_v18  ;;  %v857_v18 = vsel %vm586_vm5, %v856_v12, %v855_v17 }
 0x109   : > { %1088 = vst [vmem:[#allocation1 + $0x20] ss:$4 sm:$0xff] %v1061_v19  ;;  %v859_v19 = vsel %vm589_vm6, %v858_v8, %v857_v18  ;;  %v1328_v12 = vld [vmem:[%s2452_s25 + $0x2] sm:$0x2]  ;;  %v2360_v8 = vmov 0  }
 0x10a   : > { %2292 = vset.pattern.permute.xlu0 %v2360_v8  ;;  %2293 = vset.pattern.permute.xlu2 %v2360_v8 }
 0x10b   : > { %2294 = vset.pattern.permute.xlu1 %v2360_v8  ;;  %v1337_v8 = vld [vmem:[%s2465_s12 + $0x4] sm:$0x2] }
 0x10d   : > { %v664_v24 = vpop.f32.mrf.mxu0 }
 0x10e   : > { %v668_v25 = vmul.f32 0.35355338, %v664_v24  ;;  %v860_v24 = vpack.c.b16 %v859_v19, %v859_v19  ;;  %v2361_v19 = vmov 0.0  }
 0x10f   : > { %v2612_v34 = vld.sshfl [vmem:[#allocation1] sm:$0xff pattern:$0x73625140]  ;;  %488 = vst.msk [vmem:[#allocation3 + $0x8] sm:$0xff] %vm482_vm9, %v2361_v19 }
 0x110   : > { %v2607_v29 = vsel %vm512_vm8, %v668_v25, -1e+09  ;;  %v2614_v35 = vld.sshfl [vmem:[#allocation1 + $0x20] sm:$0xff pattern:$0x73625140]  ;;  %2222 = vmatmul.msk.bf16.vlgmr.msra.gmra.mxu2 %vm491_vm7, %v860_v24  ;;  %487 = vst.msk [vmem:[#allocation3] sm:$0xff] %vm482_vm9, %v2361_v19 }
 0x111   : > { %v671_v33 = vsel %vm491_vm7, %v2607_v29, -inf  ;;  %1092 = vst [vmem:[#allocation1] ss:$4 sm:$0xff] %v1062_v26  ;;  %v1070_v25 = vld [vmem:[%s2465_s12 + $0x8] sm:$0x2] }
 0x112   : > { %672 = vmax.xlane.f32.xlu0 %v671_v33  ;;  %1096 = vst [vmem:[#allocation1 + $0x20] ss:$4 sm:$0xff] %v1063_v30  ;;  %v1071_v26 = vld [vmem:[%s2465_s12 + $0xa] sm:$0x2]  ;;  %v1331_v24 = vld [vmem:[%s2452_s25 + $0x8] sm:$0x2] }
 0x113   : > { %489 = vst.msk [vmem:[#allocation3 + $0x10] sm:$0xff] %vm482_vm9, %v2361_v19 }
 0x114   : > { %490 = vst.msk [vmem:[#allocation3 + $0x18] sm:$0xff] %vm482_vm9, %v2361_v19 }
 0x115   : > { %v666_v36 = vpop.f32.mrf.mxu0  ;;  %492 = vst.msk [vmem:[#allocation4] sm:$0xff] %vm491_vm7, %v2361_v19 }
 0x116   : > { %v1072_v36 = vld [vmem:[%s2465_s12 + $0xc] sm:$0x2]  ;;  %493 = vst.msk [vmem:[#allocation4 + $0x8] sm:$0xff] %vm491_vm7, %v2361_v19 }
 0x117   : > { %494 = vst.msk [vmem:[#allocation4 + $0x10] sm:$0xff] %vm491_vm7, %v2361_v19 }
 0x118   : > { %v2618_v39 = vld.sshfl [vmem:[#allocation1] sm:$0xff pattern:$0x73625140]  ;;  %495 = vst.msk [vmem:[#allocation4 + $0x18] sm:$0xff] %vm491_vm7, %v2361_v19 }
 0x119   : > { %v2620_v41 = vld.sshfl [vmem:[#allocation1 + $0x20] sm:$0xff pattern:$0x73625140]  ;;  %1100 = vst [vmem:[#allocation1] ss:$4 sm:$0xff] %v1064_v37 }
 0x11a   : > { %1104 = vst [vmem:[#allocation1 + $0x20] ss:$4 sm:$0xff] %v1065_v38  ;;  %v1073_v37 = vld [vmem:[%s2465_s12 + $0xe] sm:$0x2] }
 0x120   : > { %v2624_v45 = vld.sshfl [vmem:[#allocation1] sm:$0xff pattern:$0x73625140] }
 0x121   : > { %v2626_v46 = vld.sshfl [vmem:[#allocation1 + $0x20] sm:$0xff pattern:$0x73625140]  ;;  %1131 = vst [vmem:[#allocation1] ss:$4 sm:$0xff] %v1066_v43 }
 0x122   : > { %1136 = vst [vmem:[#allocation1 + $0x20] ss:$4 sm:$0xff] %v1067_v44  ;;  %v1241_v44 = vld [vmem:[%s2486_s26] sm:$0x2] }
 0x128   : > { %v2641_v4 = vld.sshfl [vmem:[#allocation1] sm:$0xff pattern:$0x73625140] }
 0x129   : > { %v2645_v13 = vld.sshfl [vmem:[#allocation1 + $0x20] sm:$0xff pattern:$0x73625140]  ;;  %1140 = vst [vmem:[#allocation1] ss:$4 sm:$0xff] %v1068_v10 }
 0x12a   : > { %1144 = vst [vmem:[#allocation1 + $0x20] ss:$4 sm:$0xff] %v1069_v63  ;;  %v1248_v10 = vld [vmem:[%s2486_s26 + $0xe] sm:$0x2]  ;;  %v1327_v63 = vld [vmem:[%s2452_s25] sm:$0x2] }
 0x130   : > { %v2656_v30 = vld.sshfl [vmem:[#allocation1] sm:$0xff pattern:$0x73625140] }
 0x131   : > { %v2658_v33 = vld.sshfl [vmem:[#allocation1 + $0x20] sm:$0xff pattern:$0x73625140]  ;;  %1148 = vst [vmem:[#allocation1] ss:$4 sm:$0xff] %v1070_v25 }
 0x132   : > { %1152 = vst [vmem:[#allocation1 + $0x20] ss:$4 sm:$0xff] %v1071_v26  ;;  %v1332_v25 = vld [vmem:[%s2452_s25 + $0xa] sm:$0x2] }
 0x138   : > { %v2662_v38 = vld.sshfl [vmem:[#allocation1] sm:$0xff pattern:$0x73625140] }
 0x139   : > { %v2664_v43 = vld.sshfl [vmem:[#allocation1 + $0x20] sm:$0xff pattern:$0x73625140]  ;;  %1156 = vst [vmem:[#allocation1] ss:$4 sm:$0xff] %v1072_v36 }
 0x13a   : > { %1160 = vst [vmem:[#allocation1 + $0x20] ss:$4 sm:$0xff] %v1073_v37  ;;  %v1333_v37 = vld [vmem:[%s2452_s25 + $0xc] sm:$0x2] }
 0x140   : > { %v2668_v50 = vld.sshfl [vmem:[#allocation1] sm:$0xff pattern:$0x73625140] }
 0x141   : > { %v2670_v53 = vld.sshfl [vmem:[#allocation1 + $0x20] sm:$0xff pattern:$0x73625140]  ;;  %1250 = vst [vmem:[#allocation1] ss:$4 sm:$0xff] %v1241_v44 }
 0x142   : > { %1255 = vst [vmem:[#allocation1 + $0x20] ss:$4 sm:$0xff] %v1242_v49  ;;  %v1334_v44 = vld [vmem:[%s2452_s25 + $0xe] sm:$0x2] }
 0x148   : > { %v2674_v62 = vld.sshfl [vmem:[#allocation1] sm:$0xff pattern:$0x73625140] }
 0x149   : > { %3180 = vst [vmem:[#allocation8_spill] sm:$0xff] %v2674_v62  ;;  %v2676_v1 = vld.sshfl [vmem:[#allocation1 + $0x20] sm:$0xff pattern:$0x73625140] }
 0x14a   : > { %3181 = vst [vmem:[#allocation9_spill] sm:$0xff] %v2676_v1  ;;  %v1342_v62 = vld [vmem:[%s2465_s12 + $0xe] sm:$0x2] }
 0x14b   : > { %1259 = vst [vmem:[#allocation1] ss:$4 sm:$0xff] %v1243_v55 }
 0x14c   : > { %1263 = vst [vmem:[#allocation1 + $0x20] ss:$4 sm:$0xff] %v1244_v61  ;;  %v1335_v61 = vld [vmem:[%s2465_s12] sm:$0x2] }
 0x152   : > { %v2680_v6 = vld.sshfl [vmem:[#allocation1] sm:$0xff pattern:$0x73625140] }
 0x153   : > { %3182 = vst [vmem:[#allocation10_spill] sm:$0xff] %v2680_v6  ;;  %v2682_v9 = vld.sshfl [vmem:[#allocation1 + $0x20] sm:$0xff pattern:$0x73625140] }
 0x154   : > { %3183 = vst [vmem:[#allocation11_spill] sm:$0xff] %v2682_v9 }
 0x155   : > { %1267 = vst [vmem:[#allocation1] ss:$4 sm:$0xff] %v1245_v2  ;;  %v1336_v2 = vld [vmem:[%s2465_s12 + $0x2] sm:$0x2] }
 0x156   : > { %1271 = vst [vmem:[#allocation1 + $0x20] ss:$4 sm:$0xff] %v1246_v5 }
 0x15c   : > { %v2686_v60 = vld.sshfl [vmem:[#allocation1] sm:$0xff pattern:$0x73625140] }
 0x15d   : > { %3184 = vst [vmem:[#allocation12_spill] sm:$0xff] %v2686_v60  ;;  %v2688_v11 = vld.sshfl [vmem:[#allocation1 + $0x20] sm:$0xff pattern:$0x73625140] }
 0x15e   : > { %3185 = vst [vmem:[#allocation13_spill] sm:$0xff] %v2688_v11 }
 0x15f   : > { %1275 = vst [vmem:[#allocation1] ss:$4 sm:$0xff] %v1247_v59  ;;  %v2718_v59 = vld [vmem:[#allocation2] sm:$0xff] }
 0x160   : > { %1279 = vst [vmem:[#allocation1 + $0x20] ss:$4 sm:$0xff] %v1248_v10 }
 0x161   : > { %3188 = vst [vmem:[#allocation16_spill] sm:$0xff] %v2718_v59 }
 0x166   : > { %v2691_v0 = vld.sshfl [vmem:[#allocation1] sm:$0xff pattern:$0x73625140] }
 0x167   : > { %3186 = vst [vmem:[#allocation14_spill] sm:$0xff] %v2691_v0  ;;  %v2694_v3 = vld.sshfl [vmem:[#allocation1 + $0x20] sm:$0xff pattern:$0x73625140] }
 0x168   : > { %3187 = vst [vmem:[#allocation15_spill] sm:$0xff] %v2694_v3 }
 0x169   : > { %1344 = vst [vmem:[#allocation1] ss:$4 sm:$0xff] %v1327_v63 }
 0x16a   : > { %1349 = vst [vmem:[#allocation1 + $0x20] ss:$4 sm:$0xff] %v1328_v12 }
 0x170   : > { %v1345_v17 = vld.sshfl [vmem:[#allocation1] sm:$0xff pattern:$0x73625140] }
 0x171   : > { %v1350_v18 = vld.sshfl [vmem:[#allocation1 + $0x20] sm:$0xff pattern:$0x73625140]  ;;  %1353 = vst [vmem:[#allocation1] ss:$4 sm:$0xff] %v1329_v7  ;;  %v1376_v7 = vunpack.c.l.b16 %v1345_v17 }
 0x172   : > { %1357 = vst [vmem:[#allocation1 + $0x20] ss:$4 sm:$0xff] %v1330_v15  ;;  %v1338_v15 = vld [vmem:[%s2465_s12 + $0x6] sm:$0x2]  ;;  %v1377_v3 = vunpack.c.l.b16 %v1350_v18 }
 0x174   : > { %v1385_v1 = vrot.slane %v1377_v3, 2 }
 0x178   : > { %v1354_v26 = vld.sshfl [vmem:[#allocation1] sm:$0xff pattern:$0x73625140] }
 0x179   : > { %1361 = vst [vmem:[#allocation1] ss:$4 sm:$0xff] %v1331_v24  ;;  %v2704_v36 = vld.sshfl [vmem:[#allocation1 + $0x20] sm:$0xff pattern:$0x73625140]  ;;  %v1378_v6 = vunpack.c.l.b16 %v1354_v26 }
 0x17a   : > { %1365 = vst [vmem:[#allocation1 + $0x20] ss:$4 sm:$0xff] %v1332_v25  ;;  %v1339_v25 = vld [vmem:[%s2465_s12 + $0x8] sm:$0x2]  ;;  %v1379_v3 = vunpack.c.l.b16 %v2704_v36 }
 0x180   : > { %v1362_v49 = vld.sshfl [vmem:[#allocation1] sm:$0xff pattern:$0x73625140] }
 0x181   : > { %1369 = vst [vmem:[#allocation1] ss:$4 sm:$0xff] %v1333_v37  ;;  %v2712_v55 = vld.sshfl [vmem:[#allocation1 + $0x20] sm:$0xff pattern:$0x73625140] }
 0x182   : > { %1373 = vst [vmem:[#allocation1 + $0x20] ss:$4 sm:$0xff] %v1334_v44 }
 0x185   : > { %v673_v63 = vpop.xlane.xlu0 %672 }
 0x186   : > { %v2723_v12 = vmax.f32 %v2718_v59, %v673_v63  ;;  %v1387_v59 = vrot.slane %v1378_v6, 1 }
 0x188   : > { %v2716_v5 = vld.sshfl [vmem:[#allocation1] sm:$0xff pattern:$0x73625140]  ;;  %3189 = vst [vmem:[#allocation17_spill] sm:$0xff] %v2723_v12  ;;  %680 = vperm.xlu0 %2292, %v2723_v12  }
 0x189   : > { %1400 = vst [vmem:[#allocation1] ss:$4 sm:$0xff] %v1335_v61  ;;  %v2720_v10 = vld.sshfl [vmem:[#allocation1 + $0x20] sm:$0xff pattern:$0x73625140] }
 0x18a   : > { %1405 = vst [vmem:[#allocation1 + $0x20] ss:$4 sm:$0xff] %v1336_v2  ;;  %v1340_v61 = vld [vmem:[%s2465_s12 + $0xa] sm:$0x2] }
 0x18b   : > { %788 = vst.msk [vmem:[#allocation2] sm:$0xff] %vm482_vm9, %v2723_v12 }
 0x190   : > { %v1401_v19 = vld.sshfl [vmem:[#allocation1] sm:$0xff pattern:$0x73625140] }
 0x191   : > { %1409 = vst [vmem:[#allocation1] ss:$4 sm:$0xff] %v1337_v8  ;;  %v1406_v24 = vld.sshfl [vmem:[#allocation1 + $0x20] sm:$0xff pattern:$0x73625140]  ;;  %v1432_v37 = vunpack.c.l.b16 %v1401_v19  ;;  %v1384_v8 = vrot.slane %v1376_v7, 3 }
 0x192   : > { %1413 = vst [vmem:[#allocation1 + $0x20] ss:$4 sm:$0xff] %v1338_v15  ;;  %v1433_v44 = vunpack.c.l.b16 %v1406_v24  ;;  %v1341_v15 = vld [vmem:[%s2465_s12 + $0xc] sm:$0x2] }
 0x193   : > { %v1440_v11 = vrot.slane %v1432_v37, 3  ;;  %v1386_v18 = vsel %vm571_vm0, %v1385_v1, %v1384_v8 }
 0x194   : > { %v1441_v60 = vrot.slane %v1433_v44, 2  ;;  %v1380_v44 = vunpack.c.l.b16 %v1362_v49  ;;  %v1382_v49 = vunpack.c.l.b16 %v2716_v5 }
 0x196   : > { %v1442_v19 = vsel %vm571_vm0, %v1441_v60, %v1440_v11  ;;  %v1388_v60 = vsel %vm574_vm1, %v1387_v59, %v1386_v18  ;;  %v1381_v11 = vunpack.c.l.b16 %v2712_v55  ;;  %v1383_v55 = vunpack.c.l.b16 %v2720_v10 }
 0x198   : > { %v1410_v2 = vld.sshfl [vmem:[#allocation1] sm:$0xff pattern:$0x73625140]  ;;  %v1396_v5 = vrot.slane %v1383_v55, 4 }
 0x199   : > { %1417 = vst [vmem:[#allocation1] ss:$4 sm:$0xff] %v1339_v25  ;;  %v1434_v63 = vunpack.c.l.b16 %v1410_v2  ;;  %v1414_v0 = vld.sshfl [vmem:[#allocation1 + $0x20] sm:$0xff pattern:$0x73625140] }
 0x19a   : > { %1421 = vst [vmem:[#allocation1 + $0x20] ss:$4 sm:$0xff] %v1340_v61  ;;  %v1435_v12 = vunpack.c.l.b16 %v1414_v0  ;;  %v1390_v0 = vrot.slane %v1380_v44, 7 }
 0x19b   : > { %v1443_v9 = vrot.slane %v1434_v63, 1  ;;  %v1392_v63 = vrot.slane %v1381_v11, 6 }
 0x19d   : > { %v1444_v17 = vsel %vm574_vm1, %v1443_v9, %v1442_v19  ;;  %v1389_v9 = vsel %vm577_vm2, %v1379_v3, %v1388_v60  ;;  %v1394_v19 = vrot.slane %v1382_v49, 5 }
 0x19e   : > { %v1445_v7 = vsel %vm577_vm2, %v1435_v12, %v1444_v17  ;;  %v1391_v12 = vsel %vm580_vm3, %v1390_v0, %v1389_v9  ;;  %v744_v0 = vunpack.c.l.b16 %v2505_v42  ;;  %v743_v9 = vunpack.c.l.b16 %v2502_v40 }
 0x19f   : > { %v1393_v17 = vsel %vm583_vm4, %v1392_v63, %v1391_v12  ;;  %v750_v12 = vunpack.c.l.b16 %v2525_v56 }
 0x1a0   : > { %v1418_v24 = vld.sshfl [vmem:[#allocation1] sm:$0xff pattern:$0x73625140]  ;;  %v1395_v44 = vsel %vm586_vm5, %v1394_v19, %v1393_v17  ;;  %v751_v49 = vrot.slane %v744_v0, 7  ;;  %v1164_v17 = vunpack.c.l.b16 %v2645_v13 }
 0x1a1   : > { %1425 = vst [vmem:[#allocation1] ss:$4 sm:$0xff] %v1341_v15  ;;  %v1436_v25 = vunpack.c.l.b16 %v1418_v24  ;;  %v1422_v37 = vld.sshfl [vmem:[#allocation1 + $0x20] sm:$0xff pattern:$0x73625140]  ;;  %v763_v19 = vrot.slane %v750_v12, 1 }
 0x1a2   : > { %1429 = vst [vmem:[#allocation1 + $0x20] ss:$4 sm:$0xff] %v1342_v62  ;;  %v1437_v26 = vunpack.c.l.b16 %v1422_v37 }
 0x1a3   : > { %v1446_v61 = vrot.slane %v1436_v25, 7 }
 0x1a4   : > { %v1448_v6 = vrot.slane %v1437_v26, 6 }
 0x1a5   : > { %v1447_v2 = vsel %vm580_vm3, %v1446_v61, %v1445_v7  ;;  %v1397_v61 = vsel %vm589_vm6, %v1396_v5, %v1395_v44  ;;  %v932_v7 = vpop.f32.mrf.mxu2  ;;  %v1167_v5 = vunpack.c.l.b16 %v2662_v38 }
 0x1a6   : > { %v1449_v36 = vsel %vm583_vm4, %v1448_v6, %v1447_v2  ;;  %v1398_v3 = vpack.c.b16 %v1397_v61, %v1397_v61  ;;  %v936_v10 = vmul.f32 0.35355338, %v932_v7  ;;  %v745_v2 = vunpack.c.l.b16 %v2510_v47 }
 0x1a7   : > { %v1169_v61 = vunpack.c.l.b16 %v2668_v50  ;;  %v1170_v7 = vunpack.c.l.b16 %v2670_v53 }
 0x1a8   : > { %v1426_v1 = vld.sshfl [vmem:[#allocation1] sm:$0xff pattern:$0x73625140]  ;;  %v2759_v60 = vsel %vm512_vm8, %v936_v10, -1e+09  ;;  %v753_v63 = vrot.slane %v745_v2, 6 }
 0x1a9   : > { %v1438_v62 = vunpack.c.l.b16 %v1426_v1  ;;  %v1430_v8 = vld.sshfl [vmem:[#allocation1 + $0x20] sm:$0xff pattern:$0x73625140]  ;;  %v940_v11 = vsel %vm491_vm7, %v2759_v60, -inf  ;;  %v746_v1 = vunpack.c.l.b16 %v2512_v48  ;;  %v1172_v10 = vrot.slane %v1164_v17, 1 }
 0x1aa   : > { %v1439_v15 = vunpack.c.l.b16 %v1430_v8  ;;  %941 = vmax.xlane.f32.xlu1 %v940_v11  ;;  %v748_v8 = vunpack.c.l.b16 %v2519_v52  ;;  %v1177_v11 = vrot.slane %v1167_v5, 6  ;;  %v1183_v0 = vrot.slane %v1170_v7, 3 }
 0x1ab   : > { %v1450_v59 = vrot.slane %v1438_v62, 5  ;;  %v747_v62 = vunpack.c.l.b16 %v2517_v51 }
 0x1ac   : > { %v1452_v25 = vrot.slane %v1439_v15, 4  ;;  %v752_v15 = vsel %vm571_vm0, %v751_v49, %v743_v9  ;;  %v759_v55 = vrot.slane %v748_v8, 3  ;;  %v1107_v49 = vunpack.c.l.b16 %v2597_v22 }
 0x1ad   : > { %v1451_v24 = vsel %vm586_vm5, %v1450_v59, %v1449_v36  ;;  %v934_v6 = vpop.f32.mrf.mxu2  ;;  %v749_v36 = vunpack.c.l.b16 %v2522_v54  ;;  %v754_v42 = vsel %vm574_vm1, %v753_v63, %v752_v15  ;;  %v755_v59 = vrot.slane %v746_v1, 5 }
 0x1ae   : > { %v1453_v18 = vsel %vm589_vm6, %v1452_v25, %v1451_v24  ;;  %v757_v47 = vrot.slane %v747_v62, 4  ;;  %v1163_v25 = vunpack.c.l.b16 %v2641_v4  ;;  %v1181_v6 = vrot.slane %v1169_v61, 4 }
 0x1af   : > { %v1454_v37 = vpack.c.b16 %v1453_v18, %v1453_v18  ;;  %v761_v40 = vrot.slane %v749_v36, 2  ;;  %v756_v48 = vsel %vm577_vm2, %v755_v59, %v754_v42  ;;  %v1166_v18 = vunpack.c.l.b16 %v2658_v33 }
 0x1b0   : > { %v758_v51 = vsel %vm580_vm3, %v757_v47, %v756_v48  ;;  %v1108_v62 = vunpack.c.l.b16 %v2599_v23  ;;  %v1115_v36 = vrot.slane %v1107_v49, 2  ;;  %v1110_v42 = vunpack.c.l.b16 %v2614_v35 }
 0x1b1   : > { %v1459_v26 = vsel %vm491_vm7, %v1454_v37, 0  ;;  %v760_v24 = vsel %vm583_vm4, %v759_v55, %v758_v51  ;;  %v1168_v37 = vunpack.c.l.b16 %v2664_v43  ;;  %v1175_v4 = vrot.slane %v1166_v18, 7  ;;  %v2817_v18 = vld [vmem:[#allocation2 + $0x8] sm:$0xff] }
 0x1b2   : > { %1468 = vmatpush.bf16.xpose.msrb.mxu0 %v1459_v26  ;;  %v762_v52 = vsel %vm586_vm5, %v761_v40, %v760_v24  ;;  %v1165_v26 = vunpack.c.l.b16 %v2656_v30  ;;  %v1116_v12 = vrot.slane %v1108_v62, 1  ;;  %v1109_v59 = vunpack.c.l.b16 %v2612_v34 }
 0x1b3   : > { %v764_v54 = vsel %vm589_vm6, %v763_v19, %v762_v52  ;;  %v1179_v33 = vrot.slane %v1168_v37, 5  ;;  %v1111_v55 = vunpack.c.l.b16 %v2618_v39  ;;  %v1119_v40 = vrot.slane %v1110_v42, 7  ;;  %v1477_v42 = vld [vmem:[#allocation2 + $0x18] sm:$0xff] }
 0x1b4   : > { %v765_v56 = vpack.c.b16 %v764_v54, %v764_v54  ;;  %v1117_v47 = vsel %vm571_vm0, %v1116_v12, %v1115_v36  ;;  %v1112_v23 = vunpack.c.l.b16 %v2620_v41  ;;  %v1113_v34 = vunpack.c.l.b16 %v2624_v45 }
 0x1b5   : > { %v1118_v22 = vsel %vm574_vm1, %v1109_v59, %v1117_v47  ;;  %v1121_v48 = vrot.slane %v1111_v55, 6  ;;  %v1114_v24 = vunpack.c.l.b16 %v2626_v46 }
 0x1b6   : > { %v771_v44 = vsel %vm769_vm10, %v765_v56, 0  ;;  %v1123_v51 = vrot.slane %v1112_v23, 5  ;;  %v1125_v52 = vrot.slane %v1113_v34, 4  ;;  %v1511_v34 = vld [vmem:[%s2486_s26 + $0x2] sm:$0x2] }
 0x1b7   : > { %780 = vmatpush.bf16.msra.mxu1 %v771_v44  ;;  %v1127_v54 = vrot.slane %v1114_v24, 3  ;;  %1524 = vst [vmem:[#allocation1 + $0x20] ss:$4 sm:$0xff] %v1511_v34  ;;  %v1513_v24 = vld [vmem:[%s2486_s26 + $0x6] sm:$0x2] }
 0x1b8   : > { %v3190_v34 = vld [vmem:[#allocation16_spill] sm:$0xff] }
 0x1b9   : > { %2226 = vmatmul.msk.bf16.vlgmr.msrb.gmra.mxu0 %vm491_vm7, %v1398_v3  ;;  %v1171_v3 = vrot.slane %v1163_v25, 2 }
 0x1bb   : > { %v1173_v13 = vsel %vm571_vm0, %v1172_v10, %v1171_v3 }
 0x1bc   : > { %v1174_v38 = vsel %vm574_vm1, %v1165_v26, %v1173_v13  ;;  %v1014_v13 = vunpack.c.l.b16 %v2563_v28 }
 0x1bd   : > { %v1176_v43 = vsel %vm577_vm2, %v1175_v4, %v1174_v38  ;;  %v1013_v4 = vunpack.c.l.b16 %v2561_v27 }
 0x1be   : > { %v1178_v30 = vsel %vm580_vm3, %v1177_v11, %v1176_v43  ;;  %v1015_v11 = vunpack.c.l.b16 %v2567_v31  ;;  %v1020_v31 = vunpack.c.l.b16 %v2589_v16 }
 0x1bf   : > { %v1180_v50 = vsel %vm583_vm4, %v1179_v33, %v1178_v30  ;;  %v1016_v33 = vunpack.c.l.b16 %v2569_v32  ;;  %v1021_v38 = vrot.slane %v1013_v4, 1 }
 0x1c0   : > { %v1182_v2 = vsel %vm586_vm5, %v1181_v6, %v1180_v50  ;;  %v1017_v6 = vunpack.c.l.b16 %v2574_v57  ;;  %v1023_v43 = vrot.slane %v1015_v11, 7  ;;  %v1033_v62 = vrot.slane %v1020_v31, 2 }
 0x1c1   : > { %v1184_v53 = vsel %vm589_vm6, %v1183_v0, %v1182_v2  ;;  %v1018_v0 = vunpack.c.l.b16 %v2576_v58  ;;  %v1022_v30 = vsel %vm571_vm0, %v1014_v13, %v1021_v38  ;;  %v1025_v50 = vrot.slane %v1016_v33, 6 }
 0x1c2   : > { %v1185_v9 = vpack.c.b16 %v1184_v53, %v1184_v53  ;;  %v1019_v2 = vunpack.c.l.b16 %v2586_v14  ;;  %v1024_v53 = vsel %vm574_vm1, %v1023_v43, %v1022_v30  ;;  %v1027_v27 = vrot.slane %v1017_v6, 5 }
 0x1c3   : > { %v1026_v28 = vsel %vm577_vm2, %v1025_v50, %v1024_v53 }
 0x1c4   : > { %v1190_v1 = vsel %vm491_vm7, %v1185_v9, 0  ;;  %v1029_v9 = vrot.slane %v1018_v0, 4  ;;  %v1031_v57 = vrot.slane %v1019_v2, 3 }
 0x1c5   : > { %1199 = vmatpush.bf16.xpose.msrb.mxu1 %v1190_v1  ;;  %v1028_v1 = vsel %vm580_vm3, %v1027_v27, %v1026_v28 }
 0x1c6   : > { %v1030_v58 = vsel %vm583_vm4, %v1029_v9, %v1028_v1 }
 0x1fa   : > { %v681_v63 = vpop.permute.xlu0 %680 }
 0x1fb   : > { %v683_v8 = vsub.f32 %v2607_v29, %v681_v63  ;;  %v1120_v29 = vsel %vm577_vm2, %v1119_v40, %v1118_v22  ;;  %v1032_v63 = vsel %vm586_vm5, %v1031_v57, %v1030_v58 }
 0x1fc   : > { %v1122_v39 = vsel %vm580_vm3, %v1121_v48, %v1120_v29  ;;  %v1034_v16 = vsel %vm589_vm6, %v1033_v62, %v1032_v63 }
 0x1fd   : > { %v684_v15 = vmul.f32 1.442695, %v683_v8  ;;  %v1124_v41 = vsel %vm583_vm4, %v1123_v51, %v1122_v39  ;;  %v1035_v36 = vpack.c.b16 %v1034_v16, %v1034_v16  ;;  %v1512_v51 = vld [vmem:[%s2486_s26 + $0x4] sm:$0x2] }
 0x1fe   : > { %v1126_v56 = vsel %vm586_vm5, %v1125_v52, %v1124_v41  ;;  %v1525_v52 = vld.sshfl [vmem:[#allocation1 + $0x20] sm:$0xff pattern:$0x73625140] }
 0x1ff   : > { %2295 = vpow2.f32 %v684_v15  ;;  %v1128_v25 = vsel %vm589_vm6, %v1127_v54, %v1126_v56  ;;  %v1040_v12 = vsel %vm769_vm10, %v1035_v36, 0  ;;  %1532 = vst [vmem:[#allocation1 + $0x20] ss:$4 sm:$0xff] %v1513_v24  ;;  %v1514_v54 = vld [vmem:[%s2486_s26 + $0x8] sm:$0x2] }
 0x200   : > { %v1129_v17 = vpack.c.b16 %v1128_v25, %v1128_v25  ;;  %1049 = vmatpush.bf16.msra.mxu3 %v1040_v12  ;;  %v1515_v56 = vld [vmem:[%s2486_s26 + $0xa] sm:$0x2]  ;;  %v1208_v12 = vld [vmem:[#allocation2 + $0x10] sm:$0xff] }
 0x205   : > { %v2804_v19 = vpop.eup %2295 }
 0x206   : > { %v701_v35 = vpack.c.bf16 %v2804_v19, %v2804_v19  ;;  %v688_v41 = vsel %vm491_vm7, %v2804_v19, 0.0 }
 0x208   : > { %2221 = vmatmul.msk.bf16.vlgmr.msra.gmra.mxu1 %vm491_vm7, %v701_v35  ;;  %v1510_v35 = vld [vmem:[%s2486_s26] sm:$0x2] }
 0x209   : > { %1519 = vst [vmem:[#allocation1] ss:$4 sm:$0xff] %v1510_v35 }
 0x210   : > { %v1520_v39 = vld.sshfl [vmem:[#allocation1] sm:$0xff pattern:$0x73625140] }
 0x211   : > { %1528 = vst [vmem:[#allocation1] ss:$4 sm:$0xff] %v1512_v51  ;;  %v3191_v51 = vld [vmem:[#allocation17_spill] sm:$0xff] }
 0x218   : > { %2224 = vmatmul.msk.bf16.vlgmr.msrb.gmra.mxu1 %vm491_vm7, %v1129_v17  ;;  %v1529_v25 = vld.sshfl [vmem:[#allocation1] sm:$0xff pattern:$0x73625140] }
 0x219   : > { %v1533_v17 = vld.sshfl [vmem:[#allocation1 + $0x20] sm:$0xff pattern:$0x73625140]  ;;  %1536 = vst [vmem:[#allocation1] ss:$4 sm:$0xff] %v1514_v54  ;;  %v1553_v4 = vunpack.c.l.b16 %v1529_v25  ;;  %v686_v54 = vld [vmem:[#allocation3] sm:$0xff] }
 0x21a   : > { %1540 = vst [vmem:[#allocation1 + $0x20] ss:$4 sm:$0xff] %v1515_v56  ;;  %v1554_v38 = vunpack.c.l.b16 %v1533_v17 }
 0x21b   : > { %v1562_v19 = vrot.slane %v1553_v4, 1 }
 0x21d   : > { %v942_v45 = vpop.xlane.xlu1 %941 }
 0x21e   : > { %v2820_v5 = vmax.f32 %v2817_v18, %v942_v45  ;;  %v1516_v45 = vld [vmem:[%s2486_s26 + $0xc] sm:$0x2] }
 0x220   : > { %v944_v46 = vsub.f32 %v2817_v18, %v2820_v5  ;;  %1057 = vst.msk [vmem:[#allocation2 + $0x8] sm:$0xff] %vm482_vm9, %v2820_v5 }
 0x236   : > { %v1470_v37 = vpop.f32.mrf.mxu0 }
 0x237   : > { %v1474_v44 = vmul.f32 0.35355338, %v1470_v37  ;;  %v1517_v37 = vld [vmem:[%s2486_s26 + $0xe] sm:$0x2] }
 0x239   : > { %v2829_v26 = vsel %vm512_vm8, %v1474_v44, -1e+09  ;;  %v1537_v44 = vld.sshfl [vmem:[#allocation1] sm:$0xff pattern:$0x73625140] }
 0x23a   : > { %v1478_v61 = vsel %vm491_vm7, %v2829_v26, -inf  ;;  %1544 = vst [vmem:[#allocation1] ss:$4 sm:$0xff] %v1516_v45  ;;  %v1555_v33 = vunpack.c.l.b16 %v1537_v44 }
 0x23b   : > { %1479 = vmax.xlane.f32.xlu2 %v1478_v61  ;;  %v1541_v61 = vld.sshfl [vmem:[#allocation1 + $0x20] sm:$0xff pattern:$0x73625140] }
 0x23c   : > { %1548 = vst [vmem:[#allocation1 + $0x20] ss:$4 sm:$0xff] %v1517_v37  ;;  %v1556_v6 = vunpack.c.l.b16 %v1541_v61  ;;  %v1565_v50 = vrot.slane %v1555_v33, 7  ;;  %v3193_v61 = vld [vmem:[#allocation8_spill] sm:$0xff] }
 0x23e   : > { %v1472_v3 = vpop.f32.mrf.mxu0  ;;  %v1567_v31 = vrot.slane %v1556_v6, 6 }
 0x23f   : > { %v1551_v3 = vunpack.c.l.b16 %v1520_v39  ;;  %v3192_v39 = vsub.f32 %v3190_v34, %v3191_v51  ;;  %v1502_v34 = vld [vmem:[#allocation4 + $0x18] sm:$0xff] }
 0x241   : > { %v1559_v11 = vrot.slane %v1551_v3, 3  ;;  %v1545_v0 = vld.sshfl [vmem:[#allocation1] sm:$0xff pattern:$0x73625140]  ;;  %v676_v18 = vmul.f32 1.442695, %v3192_v39  ;;  %v1282_v3 = vunpack.c.l.b16 %v3193_v61 }
 0x242   : > { %v1557_v53 = vunpack.c.l.b16 %v1545_v0 }
 0x243   : > { %v1549_v2 = vld.sshfl [vmem:[#allocation1 + $0x20] sm:$0xff pattern:$0x73625140]  ;;  %v1290_v33 = vrot.slane %v1282_v3, 2 }
 0x244   : > { %v1558_v28 = vunpack.c.l.b16 %v1549_v2  ;;  %v1569_v1 = vrot.slane %v1557_v53, 5 }
 0x246   : > { %v1571_v57 = vrot.slane %v1558_v28, 4 }
 0x253   : > { %949 = vperm.xlu2 %2293, %v2820_v5  }
 0x285   : > { %v2834_v7 = vpop.f32.mrf.mxu1 }
 0x28d   : > { %v784_v10 = vpop.f32.mrf.mxu1 }
 0x28e   : > { %v1552_v10 = vunpack.c.l.b16 %v1525_v52 }
 0x290   : > { %v1560_v13 = vrot.slane %v1552_v10, 2  ;;  %v3194_v10 = vld [vmem:[#allocation9_spill] sm:$0xff] }
 0x291   : > { %v1283_v4 = vunpack.c.l.b16 %v3194_v10 }
 0x292   : > { %v1561_v43 = vsel %vm571_vm0, %v1560_v13, %v1559_v11  ;;  %v3195_v11 = vld [vmem:[#allocation11_spill] sm:$0xff] }
 0x293   : > { %v1563_v30 = vsel %vm574_vm1, %v1562_v19, %v1561_v43  ;;  %v1285_v13 = vunpack.c.l.b16 %v3195_v11  ;;  %v1291_v19 = vrot.slane %v1283_v4, 1  ;;  %v3197_v43 = vld [vmem:[#allocation12_spill] sm:$0xff]  ;;  %v1233_v11 = vld [vmem:[#allocation4 + $0x10] sm:$0xff] }
 0x294   : > { %v1564_v27 = vsel %vm577_vm2, %v1554_v38, %v1563_v30  ;;  %v3196_v38 = vld [vmem:[#allocation10_spill] sm:$0xff]  ;;  %v1286_v0 = vunpack.c.l.b16 %v3197_v43  ;;  %v3198_v30 = vld [vmem:[#allocation13_spill] sm:$0xff] }
 0x295   : > { %v1201_v32 = vpop.f32.mrf.mxu1  ;;  %v1566_v9 = vsel %vm580_vm3, %v1565_v50, %v1564_v27  ;;  %v1284_v6 = vunpack.c.l.b16 %v3196_v38  ;;  %v1287_v50 = vunpack.c.l.b16 %v3198_v30  ;;  %v1292_v2 = vsel %vm571_vm0, %v1291_v19, %v1290_v33  ;;  %v3199_v27 = vld [vmem:[#allocation14_spill] sm:$0xff] }
 0x296   : > { %v1205_v49 = vmul.f32 0.35355338, %v1201_v32  ;;  %v1568_v32 = vsel %vm583_vm4, %v1567_v31, %v1566_v9  ;;  %v1294_v53 = vrot.slane %v1285_v13, 7  ;;  %v1288_v31 = vunpack.c.l.b16 %v3199_v27 }
 0x297   : > { %v1293_v28 = vsel %vm574_vm1, %v1284_v6, %v1292_v2  ;;  %v1296_v9 = vrot.slane %v1286_v0, 6  ;;  %v694_v0 = vld [vmem:[#allocation4] sm:$0xff] }
 0x298   : > { %v2853_v14 = vsel %vm512_vm8, %v1205_v49, -1e+09  ;;  %v1570_v49 = vsel %vm586_vm5, %v1569_v1, %v1568_v32  ;;  %v3200_v32 = vld [vmem:[#allocation15_spill] sm:$0xff] }
 0x299   : > { %v1209_v8 = vsel %vm491_vm7, %v2853_v14, -inf  ;;  %v1572_v58 = vsel %vm589_vm6, %v1571_v57, %v1570_v49  ;;  %v1289_v1 = vunpack.c.l.b16 %v3200_v32  ;;  %v1295_v57 = vsel %vm577_vm2, %v1294_v53, %v1293_v28  ;;  %v964_v53 = vld [vmem:[#allocation4 + $0x8] sm:$0xff] }
 0x29a   : > { %1210 = vmax.xlane.f32.xlu1 %v1209_v8  ;;  %v1573_v62 = vpack.c.b16 %v1572_v58, %v1572_v58  ;;  %v1298_v49 = vrot.slane %v1287_v50, 5  ;;  %v1297_v58 = vsel %vm580_vm3, %v1296_v9, %v1295_v57  ;;  %vm2998_vm3 = vmand %vm1687_vm12, %vm1800_vm15 }
 0x29c   : > { %v1578_v63 = vsel %vm769_vm10, %v1573_v62, 0  ;;  %v1300_v62 = vrot.slane %v1288_v31, 4 }
 0x29d   : > { %v1203_v15 = vpop.f32.mrf.mxu1  ;;  %1587 = vmatpush.bf16.msrb.mxu2 %v1578_v63  ;;  %v1299_v63 = vsel %vm583_vm4, %v1298_v49, %v1297_v58  ;;  %vm1912_vm4 = vcmask 58369  }
 0x2ae   : > { %v1480_v59 = vpop.xlane.xlu2 %1479 }
 0x2af   : > { %v1481_v47 = vmax.f32 %v1477_v42, %v1480_v59 }
 0x2b1   : > { %1595 = vst.msk [vmem:[#allocation2 + $0x18] sm:$0xff] %vm482_vm9, %v1481_v47  ;;  %1487 = vperm.xlu2 %2293, %v1481_v47   ;;  %v1482_v48 = vsub.f32 %v1477_v42, %v1481_v47 }
 0x2b3   : > { %v1483_v29 = vmul.f32 1.442695, %v1482_v48 }
 0x2b6   : > { %v950_v20 = vpop.permute.xlu2 %949 }
 0x2b7   : > { %v952_v21 = vsub.f32 %v2759_v60, %v950_v20 }
 0x2b9   : > { %v953_v55 = vmul.f32 1.442695, %v952_v21 }
 0x2bb   : > { %2297 = vpow2.f32 %v953_v55 }
 0x2bc   : > { %2299 = vpow2.f32 %v1483_v29 }
 0x2c1   : > { %v2298_v40 = vpop.eup %2297 }
 0x2c2   : > { %v958_v22 = vsel %vm491_vm7, %v2298_v40, 0.0  ;;  %v971_v23 = vpack.c.bf16 %v2298_v40, %v2298_v40  ;;  %v2865_v60 = vpop.eup %2299 }
 0x2c3   : > { %959 = vadd.xlane.f32.xlu0 %v958_v22 }
 0x2c4   : > { %2223 = vmatmul.msk.bf16.vlgmr.msra.gmra.mxu3 %vm491_vm7, %v971_v23  ;;  %v956_v23 = vld [vmem:[#allocation3 + $0x8] sm:$0xff] }
 0x2d7   : > { %1505 = vperm.xlu0 %2292, %v2865_v60  }
 0x2da   : > { %689 = vadd.xlane.f32.xlu2 %v688_v41 }
 0x30b   : > { %v1488_v16 = vpop.permute.xlu2 %1487 }
 0x30c   : > { %v1490_v8 = vsub.f32 %v2829_v26, %v1488_v16  ;;  %v945_v26 = vmul.f32 1.442695, %v944_v46  ;;  %v1302_v16 = vrot.slane %v1289_v1, 3 }
 0x30d   : > { %v1211_v15 = vpop.xlane.xlu1 %1210 }
 0x30e   : > { %v1491_v36 = vmul.f32 1.442695, %v1490_v8  ;;  %v1212_v42 = vmax.f32 %v1208_v12, %v1211_v15  ;;  %v1301_v8 = vsel %vm586_vm5, %v1300_v62, %v1299_v63  ;;  %vm1913_vm5 = vsmask.f32 1280 }
 0x310   : > { %2301 = vpow2.f32 %v1491_v36  ;;  %1326 = vst.msk [vmem:[#allocation2 + $0x10] sm:$0xff] %vm482_vm9, %v1212_v42  ;;  %1218 = vperm.xlu1 %2294, %v1212_v42   ;;  %v1213_v21 = vsub.f32 %v1208_v12, %v1212_v42  ;;  %v1303_v36 = vsel %vm589_vm6, %v1302_v16, %v1301_v8 }
 0x311   : > { %v1304_v12 = vpack.c.b16 %v1303_v36, %v1303_v36 }
 0x312   : > { %v1214_v55 = vmul.f32 1.442695, %v1213_v21 }
 0x313   : > { %v1309_v15 = vsel %vm769_vm10, %v1304_v12, 0 }
 0x314   : > { %2303 = vpow2.f32 %v1214_v55  ;;  %1318 = vmatpush.bf16.msrb.mxu3 %v1309_v15 }
 0x315   : > { %2305 = vpow2.f32 %v945_v26 }
 0x316   : > { %v2302_v59 = vpop.eup %2301 }
 0x317   : > { %v1496_v47 = vsel %vm491_vm7, %v2302_v59, 0.0  ;;  %v1509_v20 = vpack.c.bf16 %v2302_v59, %v2302_v59  ;;  %v1494_v59 = vld [vmem:[#allocation3 + $0x18] sm:$0xff] }
 0x318   : > { %1497 = vadd.xlane.f32.xlu2 %v1496_v47  ;;  %v1495_v21 = vmul.f32 %v2865_v60, %v1494_v59 }
 0x319   : > { %2227 = vmatmul.msk.bf16.vlgmr.msrb.gmra.mxu2 %vm491_vm7, %v1509_v20 }
 0x31a   : > { %v2891_v40 = vpop.eup %2303 }
 0x31b   : > { %v2894_v22 = vpop.eup %2305 }
 0x31c   : > { %v957_v48 = vmul.f32 %v2894_v22, %v956_v23 }
 0x330   : > { %1236 = vperm.xlu2 %2293, %v2891_v40  }
 0x336   : > { %v960_v29 = vpop.xlane.xlu0 %959 }
 0x337   : > { %v961_v35 = vadd.f32 %v960_v29, %v957_v48 }
 0x339   : > { %962 = vst.msk [vmem:[#allocation3 + $0x8] sm:$0xff] %vm482_vm9, %v961_v35 }
 0x340   : > { %v1715_v5 = vld [vmem:[#allocation3 + $0x8] sm:$0xff] }
 0x341   : > { %2307 = vrcp.f32 %v1715_v5 }
 0x342   : > { %2309 = vpow2.f32 %v676_v18 }
 0x347   : > { %v2308_v46 = vpop.eup %2307  ;;  %v2901_v24 = vpop.f32.mrf.mxu3 }
 0x348   : > { %v1717_v52 = vmul.f32 %v2308_v46, %v1715_v5  ;;  %v2903_v41 = vpop.eup %2309 }
 0x349   : > { %v687_v25 = vmul.f32 %v2903_v41, %v686_v54  ;;  %v1506_v51 = vpop.permute.xlu0 %1505 }
 0x34a   : > { %v1718_v56 = vsub.f32 2.0, %v1717_v52 }
 0x34c   : > { %v1719_v17 = vmul.f32 %v2308_v46, %v1718_v56 }
 0x34d   : > { %v690_v45 = vpop.xlane.xlu2 %689 }
 0x34e   : > { %v691_v37 = vadd.f32 %v690_v45, %v687_v25  ;;  %1724 = vperm.xlu0 %2292, %v1719_v17  }
 0x34f   : > { %v1053_v44 = vpop.f32.mrf.mxu3 }
 0x350   : > { %693 = vst.msk [vmem:[#allocation3] sm:$0xff] %vm482_vm9, %v691_v37  ;;  %v1225_v44 = vld [vmem:[#allocation3 + $0x10] sm:$0xff] }
 0x351   : > { %v1226_v61 = vmul.f32 %v2891_v40, %v1225_v44  ;;  %v1699_v44 = vld [vmem:[%s2947_s30 + $0x6] sm:$0x1] }
 0x357   : > { %v1599_v56 = vld [vmem:[#allocation3] sm:$0xff] }
 0x382   : > { %v1219_v42 = vpop.permute.xlu1 %1218 }
 0x383   : > { %v1221_v47 = vsub.f32 %v2853_v14, %v1219_v42  ;;  %v1508_v14 = vmul.f32 %v1506_v51, %v1502_v34 }
 0x385   : > { %v1222_v20 = vmul.f32 1.442695, %v1221_v47 }
 0x387   : > { %2311 = vpow2.f32 %v1222_v20 }
 0x38b   : > { %v1498_v55 = vpop.xlane.xlu2 %1497 }
 0x38c   : > { %v1499_v26 = vadd.f32 %v1498_v55, %v1495_v21  ;;  %v2362_v21 = vmov 857870592  }
 0x38d   : > { %v2312_v23 = vpop.eup %2311  ;;  %v1648_v55 = vunpack.c.l.s4 %v2362_v21 }
 0x38e   : > { %1500 = vst.msk [vmem:[#allocation3 + $0x18] sm:$0xff] %vm482_vm9, %v1499_v26  ;;  %v1227_v48 = vsel %vm491_vm7, %v2312_v23, 0.0  ;;  %v1240_v29 = vpack.c.bf16 %v2312_v23, %v2312_v23 }
 0x38f   : > { %1228 = vadd.xlane.f32.xlu1 %v1227_v48 }
 0x390   : > { %2225 = vmatmul.msk.bf16.vlgmr.msrb.gmra.mxu3 %vm491_vm7, %v1240_v29 }
 0x393   : > { %v1237_v13 = vpop.permute.xlu2 %1236 }
 0x394   : > { %v1239_v33 = vmul.f32 %v1237_v13, %v1233_v11  ;;  %v1702_v11 = vld [vmem:[%s2947_s30 + $0x8] sm:$0x1] }
 0x395   : > { %v1940_v35 = vld [vmem:[#allocation3 + $0x18] sm:$0xff] }
 0x396   : > { %2313 = vrcp.f32 %v1940_v35 }
 0x397   : > { %2315 = vrcp.f32 %v1599_v56 }
 0x39c   : > { %v2314_v39 = vpop.eup %2313  ;;  %v1589_v18 = vpop.f32.mrf.mxu2 }
 0x39d   : > { %v1593_v60 = vadd.f32 %v1589_v18, %v1508_v14  ;;  %v1942_v5 = vmul.f32 %v2314_v39, %v1940_v35  ;;  %v2316_v25 = vpop.eup %2315  ;;  %v2951_v18 = vunpack.c.0.s8 %v1648_v55 }
 0x39e   : > { %v1601_v17 = vmul.f32 %v2316_v25, %v1599_v56  ;;  %v1696_v56 = vld [vmem:[%s2947_s30 + $0x4] sm:$0x1] }
 0x39f   : > { %1594 = vst.msk [vmem:[#allocation4 + $0x18] sm:$0xff] %vm491_vm7, %v1593_v60  ;;  %v1943_v46 = vsub.f32 2.0, %v1942_v5  ;;  %v1690_v60 = vld [vmem:[%s2947_s30] sm:$0x1] }
 0x3a0   : > { %v1602_v45 = vsub.f32 2.0, %v1601_v17 }
 0x3a1   : > { %v1944_v52 = vmul.f32 %v2314_v39, %v1943_v46 }
 0x3a2   : > { %v1603_v37 = vmul.f32 %v2316_v25, %v1602_v45 }
 0x3a3   : > { %1949 = vperm.xlu0 %2292, %v1944_v52  }
 0x3a4   : > { %v1591_v54 = vpop.f32.mrf.mxu2 }
 0x3a5   : > { %v1693_v54 = vld [vmem:[%s2947_s30 + $0x2] sm:$0x1] }
 0x3a8   : > { %697 = vperm.xlu1 %2294, %v2903_v41  }
 0x3b0   : > { %967 = vperm.xlu1 %2294, %v2894_v22  }
 0x3b8   : > { %1607 = vperm.xlu1 %2294, %v1603_v37  }
 0x3c0   : > { %v1725_v49 = vpop.permute.xlu0 %1724 }
 0x402   : > { %v1229_v3 = vpop.xlane.xlu1 %1228 }
 0x403   : > { %v1230_v10 = vadd.f32 %v1229_v3, %v1226_v61 }
 0x405   : > { %1231 = vst.msk [vmem:[#allocation3 + $0x10] sm:$0xff] %vm482_vm9, %v1230_v10 }
 0x40c   : > { %v1827_v4 = vld [vmem:[#allocation3 + $0x10] sm:$0xff] }
 0x40d   : > { %2317 = vrcp.f32 %v1827_v4 }
 0x413   : > { %v2318_v41 = vpop.eup %2317  ;;  %v1320_v19 = vpop.f32.mrf.mxu3 }
 0x414   : > { %v1324_v38 = vadd.f32 %v1320_v19, %v1239_v33  ;;  %v1829_v6 = vmul.f32 %v2318_v41, %v1827_v4 }
 0x416   : > { %1325 = vst.msk [vmem:[#allocation4 + $0x10] sm:$0xff] %vm491_vm7, %v1324_v38  ;;  %v1830_v22 = vsub.f32 2.0, %v1829_v6  ;;  %v1705_v38 = vld [vmem:[%s2947_s30 + $0xa] sm:$0x1] }
 0x418   : > { %v1831_v43 = vmul.f32 %v2318_v41, %v1830_v22 }
 0x41a   : > { %v698_v40 = vpop.permute.xlu1 %697  ;;  %1836 = vperm.xlu2 %2293, %v1831_v43  }
 0x41b   : > { %v1322_v30 = vpop.f32.mrf.mxu3  ;;  %v700_v50 = vmul.f32 %v698_v40, %v694_v0  ;;  %v1708_v40 = vld [vmem:[%s2947_s30 + $0xc] sm:$0x1] }
 0x41d   : > { %v786_v2 = vadd.f32 %v2834_v7, %v700_v50 }
 0x41f   : > { %787 = vst.msk [vmem:[#allocation4] sm:$0xff] %vm491_vm7, %v786_v2  ;;  %v1711_v2 = vld [vmem:[%s2947_s30 + $0xe] sm:$0x1] }
 0x422   : > { %v968_v27 = vpop.permute.xlu1 %967 }
 0x423   : > { %v970_v31 = vmul.f32 %v968_v27, %v964_v53 }
 0x425   : > { %v1055_v28 = vadd.f32 %v2901_v24, %v970_v31 }
 0x426   : > { %v1604_v9 = vld [vmem:[#allocation4] sm:$0xff] }
 0x427   : > { %1056 = vst.msk [vmem:[#allocation4 + $0x8] sm:$0xff] %vm491_vm7, %v1055_v28 }
 0x42a   : > { %v1608_v32 = vpop.permute.xlu1 %1607 }
 0x42b   : > { %v1610_v1 = vmul.f32 %v1608_v32, %v1604_v9 }
 0x42d   : > { %v1611_v57 = vpack.c.bf16 %v1610_v1, %v1610_v1 }
 0x42e   : > { %v1721_v58 = vld [vmem:[#allocation4 + $0x8] sm:$0xff] }
 0x42f   : > { %v1727_v62 = vmul.f32 %v1725_v49, %v1721_v58  ;;  %v1613_v63 = vrot.slane %v1611_v57, 3 }
 0x431   : > { %v1728_v7 = vpack.c.bf16 %v1727_v62, %v1727_v62  ;;  %v1617_v16 = vsel %vm1614_vm11, %v1611_v57, %v1613_v63  ;;  %v1620_v8 = vsel %vm571_vm0, %v1611_v57, %v1613_v63  ;;  %v1624_v24 = vsel %vm574_vm1, %v1611_v57, %v1613_v63 }
 0x432   : > { %v1622_v36 = vrot.slane %v1620_v8, 1  ;;  %v1628_v12 = vsel %vm577_vm2, %v1611_v57, %v1613_v63  ;;  %v1626_v15 = vrot.slane %v1624_v24, 2  ;;  %v1632_v42 = vunpack.i.h.s16 %v1617_v16 }
 0x433   : > { %v1730_v59 = vrot.slane %v1728_v7, 3  ;;  %v1630_v47 = vrot.slane %v1628_v12, 3  ;;  %v2228_v23 = vpack.i.b16 %v1617_v16, %v1617_v16 }
 0x434   : > { %v1634_v20 = vunpack.i.h.s16 %v1622_v36  ;;  %v1636_v26 = vunpack.i.h.s16 %v1626_v15  ;;  %v1640_v48 = vpack.i.b16 %v1632_v42, %v1632_v42  ;;  %v2229_v51 = vpack.i.b16 %v1622_v36, %v1622_v36 }
 0x435   : > { %v1735_v29 = vsel %vm571_vm0, %v1728_v7, %v1730_v59  ;;  %v1738_v35 = vsel %vm574_vm1, %v1728_v7, %v1730_v59  ;;  %v1638_v34 = vunpack.i.h.s16 %v1630_v47  ;;  %v2230_v39 = vpack.i.b16 %v1626_v15, %v1626_v15 }
 0x436   : > { %v1642_v14 = vpack.i.b16 %v1634_v20, %v1634_v20  ;;  %v1733_v5 = vsel %vm1614_vm11, %v1728_v7, %v1730_v59  ;;  %v1644_v46 = vpack.i.b16 %v1636_v26, %v1636_v26  ;;  %v1737_v25 = vrot.slane %v1735_v29, 1 }
 0x437   : > { %v1740_v17 = vrot.slane %v1738_v35, 2  ;;  %v1741_v45 = vsel %vm577_vm2, %v1728_v7, %v1730_v59  ;;  %v2231_v37 = vpack.i.b16 %v1630_v47, %v1630_v47  ;;  %v1646_v61 = vpack.i.b16 %v1638_v34, %v1638_v34 }
 0x438   : > { %v1650_v3 = vperm.slane %v2228_v23, %v2951_v18  ;;  %v1654_v10 = vperm.slane %v1640_v48, %v2951_v18  ;;  %v1658_v4 = vperm.slane %v2229_v51, %v2951_v18  ;;  %v1745_v13 = vunpack.i.h.s16 %v1733_v5 }
 0x439   : > { %v1662_v33 = vperm.slane %v1642_v14, %v2951_v18  ;;  %v1666_v41 = vperm.slane %v2230_v39, %v2951_v18  ;;  %v1670_v19 = vperm.slane %v1644_v46, %v2951_v18  ;;  %v1674_v6 = vperm.slane %v2231_v37, %v2951_v18 }
 0x43a   : > { %v1691_v22 = vsel %vm2956_vm14, %v1650_v3, %v1690_v60  ;;  %v1694_v43 = vsel %vm2956_vm14, %v1654_v10, %v1693_v54  ;;  %v1697_v0 = vsel %vm2956_vm14, %v1658_v4, %v1696_v56  ;;  %v1678_v30 = vperm.slane %v1646_v61, %v2951_v18  ;;  %v1833_v61 = vld [vmem:[#allocation4 + $0x10] sm:$0xff] }
 0x43b   : > { %1692 = vst [vmem:[%s2947_s30] sm:$0x1] %v1691_v22  ;;  %v1700_v50 = vsel %vm2956_vm14, %v1662_v33, %v1699_v44  ;;  %v1743_v53 = vrot.slane %v1741_v45, 3  ;;  %v1747_v27 = vunpack.i.h.s16 %v1737_v25  ;;  %v1703_v31 = vsel %vm2956_vm14, %v1666_v41, %v1702_v11  ;;  %v1946_v45 = vld [vmem:[#allocation4 + $0x18] sm:$0xff] }
 0x43c   : > { %1695 = vst [vmem:[%s2947_s30 + $0x2] sm:$0x1] %v1694_v43  ;;  %v2232_v28 = vpack.i.b16 %v1733_v5, %v1733_v5  ;;  %v1706_v9 = vsel %vm2956_vm14, %v1670_v19, %v1705_v38  ;;  %v1749_v32 = vunpack.i.h.s16 %v1740_v17  ;;  %v1753_v1 = vpack.i.b16 %v1745_v13, %v1745_v13 }
 0x43d   : > { %1698 = vst [vmem:[%s2947_s30 + $0x4] sm:$0x1] %v1697_v0  ;;  %v1709_v57 = vsel %vm2956_vm14, %v1674_v6, %v1708_v40  ;;  %v2233_v49 = vpack.i.b16 %v1737_v25, %v1737_v25  ;;  %v1712_v58 = vsel %vm2956_vm14, %v1678_v30, %v1711_v2  ;;  %v1751_v62 = vunpack.i.h.s16 %v1743_v53 }
 0x43e   : > { %1701 = vst [vmem:[%s2947_s30 + $0x6] sm:$0x1] %v1700_v50  ;;  %v1755_v63 = vpack.i.b16 %v1747_v27, %v1747_v27  ;;  %v2234_v16 = vpack.i.b16 %v1740_v17, %v1740_v17  ;;  %v1763_v8 = vperm.slane %v2232_v28, %v2951_v18  ;;  %v1757_v24 = vpack.i.b16 %v1749_v32, %v1749_v32  ;;  %v1950_v17 = vpop.permute.xlu0 %1949  ;;  %v1915_v32 = vld [vmem:[%s2947_s30] sm:$0x2] }
 0x43f   : > { %1704 = vst [vmem:[%s2947_s30 + $0x8] sm:$0x1] %v1703_v31  ;;  %v1767_v36 = vperm.slane %v1753_v1, %v2951_v18  ;;  %v2235_v15 = vpack.i.b16 %v1743_v53, %v1743_v53  ;;  %v1771_v42 = vperm.slane %v2233_v49, %v2951_v18  ;;  %v1759_v20 = vpack.i.b16 %v1751_v62, %v1751_v62  ;;  %v1918_v62 = vld [vmem:[%s2947_s30 + $0x2] sm:$0x2] }
 0x440   : > { %1707 = vst [vmem:[%s2947_s30 + $0xa] sm:$0x1] %v1706_v9  ;;  %v1775_v21 = vperm.slane %v1755_v63, %v2951_v18  ;;  %v1779_v23 = vperm.slane %v2234_v16, %v2951_v18  ;;  %v1783_v35 = vperm.slane %v1757_v24, %v2951_v18  ;;  %v1952_v37 = vmul.f32 %v1950_v17, %v1946_v45  ;;  %v1921_v24 = vld [vmem:[%s2947_s30 + $0x4] sm:$0x2] }
 0x441   : > { %1710 = vst [vmem:[%s2947_s30 + $0xc] sm:$0x1] %v1709_v57  ;;  %v1787_v14 = vperm.slane %v2235_v15, %v2951_v18  ;;  %v1791_v5 = vperm.slane %v1759_v20, %v2951_v18  ;;  %v1930_v20 = vld [vmem:[%s2947_s30 + $0xa] sm:$0x2] }
 0x442   : > { %1713 = vst [vmem:[%s2947_s30 + $0xe] sm:$0x1] %v1712_v58  ;;  %v1802_v12 = vld [vmem:[%s2947_s30] sm:$0x1]  ;;  %v1953_v44 = vpack.c.bf16 %v1952_v37, %v1952_v37 }
 0x443   : > { %v1803_v59 = vsel %vm2998_vm3, %v1763_v8, %v1802_v12  ;;  %v1805_v47 = vld [vmem:[%s2947_s30 + $0x2] sm:$0x1] }
 0x444   : > { %1804 = vst [vmem:[%s2947_s30] sm:$0x1] %v1803_v59  ;;  %v1806_v55 = vsel %vm2998_vm3, %v1767_v36, %v1805_v47  ;;  %v1808_v26 = vld [vmem:[%s2947_s30 + $0x4] sm:$0x1]  ;;  %v1955_v10 = vrot.slane %v1953_v44, 3  ;;  %v1927_v36 = vld [vmem:[%s2947_s30 + $0x8] sm:$0x2] }
 0x445   : > { %1807 = vst [vmem:[%s2947_s30 + $0x2] sm:$0x1] %v1806_v55  ;;  %v1809_v48 = vsel %vm2998_vm3, %v1771_v42, %v1808_v26  ;;  %v1811_v29 = vld [vmem:[%s2947_s30 + $0x6] sm:$0x1]  ;;  %v1924_v47 = vld [vmem:[%s2947_s30 + $0x6] sm:$0x2] }
 0x446   : > { %1810 = vst [vmem:[%s2947_s30 + $0x4] sm:$0x1] %v1809_v48  ;;  %v1812_v34 = vsel %vm2998_vm3, %v1775_v21, %v1811_v29  ;;  %v1814_v51 = vld [vmem:[%s2947_s30 + $0x8] sm:$0x1]  ;;  %v3046_v13 = vsel %vm1614_vm11, %v1953_v44, %v1955_v10  ;;  %v1960_v33 = vsel %vm571_vm0, %v1953_v44, %v1955_v10  ;;  %v1963_v19 = vsel %vm574_vm1, %v1953_v44, %v1955_v10  ;;  %v1933_v48 = vld [vmem:[%s2947_s30 + $0xc] sm:$0x2] }
 0x447   : > { %1813 = vst [vmem:[%s2947_s30 + $0x6] sm:$0x1] %v1812_v34  ;;  %v1815_v39 = vsel %vm2998_vm3, %v1779_v23, %v1814_v51  ;;  %v1817_v60 = vld [vmem:[%s2947_s30 + $0xa] sm:$0x1]  ;;  %v1966_v38 = vsel %vm577_vm2, %v1953_v44, %v1955_v10  ;;  %v3055_v53 = vrot.slane %v1960_v33, 1  ;;  %v3057_v27 = vrot.slane %v1963_v19, 2 }
 0x448   : > { %1816 = vst [vmem:[%s2947_s30 + $0x8] sm:$0x1] %v1815_v39  ;;  %v1818_v46 = vsel %vm2998_vm3, %v1783_v35, %v1817_v60  ;;  %v1820_v52 = vld [vmem:[%s2947_s30 + $0xc] sm:$0x1]  ;;  %v1970_v31 = vunpack.i.h.s16 %v3046_v13  ;;  %v1936_v60 = vld [vmem:[%s2947_s30 + $0xe] sm:$0x2] }
 0x449   : > { %1819 = vst [vmem:[%s2947_s30 + $0xa] sm:$0x1] %v1818_v46  ;;  %v1821_v54 = vsel %vm2998_vm3, %v1787_v14, %v1820_v52  ;;  %v1823_v56 = vld [vmem:[%s2947_s30 + $0xe] sm:$0x1]  ;;  %v1968_v14 = vrot.slane %v1966_v38, 3  ;;  %v1972_v39 = vunpack.i.h.s16 %v3055_v53  ;;  %v2240_v52 = vpack.i.b16 %v3046_v13, %v3046_v13 }
 0x44a   : > { %1822 = vst [vmem:[%s2947_s30 + $0xc] sm:$0x1] %v1821_v54  ;;  %v1824_v25 = vsel %vm2998_vm3, %v1791_v5, %v1823_v56  ;;  %v1978_v17 = vpack.i.b16 %v1970_v31, %v1970_v31  ;;  %v2241_v37 = vpack.i.b16 %v3055_v53, %v3055_v53 }
 0x44b   : > { %1825 = vst [vmem:[%s2947_s30 + $0xe] sm:$0x1] %v1824_v25  ;;  %v1974_v25 = vunpack.i.h.s16 %v3057_v27  ;;  %v2243_v19 = vpack.i.b16 %v1968_v14, %v1968_v14 }
 0x44c   : > { %v1992_v33 = vperm.slane %v1978_v17, %v2951_v18  ;;  %v1996_v38 = vperm.slane %v2241_v37, %v2951_v18 }
 0x44d   : > { %v1982_v13 = vpack.i.b16 %v1974_v25, %v1974_v25  ;;  %v2012_v9 = vperm.slane %v2243_v19, %v2951_v18 }
 0x474   : > { %v1837_v3 = vpop.permute.xlu2 %1836 }
 0x475   : > { %v1839_v4 = vmul.f32 %v1837_v3, %v1833_v61  ;;  %v1976_v61 = vunpack.i.h.s16 %v1968_v14  ;;  %v1980_v3 = vpack.i.b16 %v1972_v39, %v1972_v39 }
 0x477   : > { %v1840_v11 = vpack.c.bf16 %v1839_v4, %v1839_v4  ;;  %v2242_v4 = vpack.i.b16 %v3057_v27, %v3057_v27  ;;  %v2008_v27 = vperm.slane %v1982_v13, %v2951_v18 }
 0x479   : > { %v1842_v41 = vrot.slane %v1840_v11, 3 }
 0x47b   : > { %v1845_v6 = vsel %vm1614_vm11, %v1840_v11, %v1842_v41  ;;  %v1847_v22 = vsel %vm571_vm0, %v1840_v11, %v1842_v41  ;;  %v1850_v43 = vsel %vm574_vm1, %v1840_v11, %v1842_v41  ;;  %v1853_v0 = vsel %vm577_vm2, %v1840_v11, %v1842_v41  ;;  %vm3061_vm0 = vmand %vm1912_vm4, %vm1913_vm5 }
 0x47c   : > { %v1849_v40 = vrot.slane %v1847_v22, 1  ;;  %v1852_v30 = vrot.slane %v1850_v43, 2  ;;  %v1855_v50 = vrot.slane %v1853_v0, 3  ;;  %v1857_v2 = vunpack.i.h.s16 %v1845_v6 }
 0x47d   : > { %v2236_v28 = vpack.i.b16 %v1845_v6, %v1845_v6  ;;  %vm2025_vm1 = vsmask.f32 7942  ;;  %v1988_v11 = vperm.slane %v2240_v52, %v2951_v18  ;;  %v1984_v43 = vpack.i.b16 %v1976_v61, %v1976_v61 }
 0x47e   : > { %v1859_v1 = vunpack.i.h.s16 %v1849_v40  ;;  %v1861_v57 = vunpack.i.h.s16 %v1852_v30  ;;  %v1863_v49 = vunpack.i.h.s16 %v1855_v50  ;;  %v1865_v58 = vpack.i.b16 %v1857_v2, %v1857_v2  ;;  %vm3109_vm2 = vmand %vm1912_vm4, %vm2025_vm1 }
 0x47f   : > { %v2237_v63 = vpack.i.b16 %v1849_v40, %v1849_v40  ;;  %v2238_v7 = vpack.i.b16 %v1852_v30, %v1852_v30  ;;  %v2239_v16 = vpack.i.b16 %v1855_v50, %v1855_v50  ;;  %v1875_v8 = vperm.slane %v2236_v28, %v2951_v18 }
 0x480   : > { %v1867_v12 = vpack.i.b16 %v1859_v1, %v1859_v1  ;;  %v1869_v15 = vpack.i.b16 %v1861_v57, %v1861_v57  ;;  %v1871_v42 = vpack.i.b16 %v1863_v49, %v1863_v49  ;;  %v1879_v59 = vperm.slane %v1865_v58, %v2951_v18 }
 0x481   : > { %v1883_v21 = vperm.slane %v2237_v63, %v2951_v18  ;;  %v1891_v55 = vperm.slane %v2238_v7, %v2951_v18  ;;  %v1899_v26 = vperm.slane %v2239_v16, %v2951_v18  ;;  %v1916_v23 = vsel %vm3061_vm0, %v1875_v8, %v1915_v32 }
 0x482   : > { %v1887_v29 = vperm.slane %v1867_v12, %v2951_v18  ;;  %v1895_v35 = vperm.slane %v1869_v15, %v2951_v18  ;;  %v1903_v34 = vperm.slane %v1871_v42, %v2951_v18  ;;  %1917 = vst [vmem:[%s2947_s30] sm:$0x2] %v1916_v23  ;;  %v1919_v51 = vsel %vm3061_vm0, %v1879_v59, %v1918_v62 }
 0x483   : > { %1920 = vst [vmem:[%s2947_s30 + $0x2] sm:$0x2] %v1919_v51  ;;  %v1922_v5 = vsel %vm3061_vm0, %v1883_v21, %v1921_v24  ;;  %v1928_v46 = vsel %vm3061_vm0, %v1891_v55, %v1927_v36  ;;  %v1934_v45 = vsel %vm3061_vm0, %v1899_v26, %v1933_v48  ;;  %v2000_v0 = vperm.slane %v1980_v3, %v2951_v18 }
 0x484   : > { %1923 = vst [vmem:[%s2947_s30 + $0x4] sm:$0x2] %v1922_v5  ;;  %v1925_v54 = vsel %vm3061_vm0, %v1887_v29, %v1924_v47  ;;  %v1931_v56 = vsel %vm3061_vm0, %v1895_v35, %v1930_v20  ;;  %v1937_v44 = vsel %vm3061_vm0, %v1903_v34, %v1936_v60  ;;  %v2004_v50 = vperm.slane %v2242_v4, %v2951_v18 }
 0x485   : > { %1926 = vst [vmem:[%s2947_s30 + $0x6] sm:$0x2] %v1925_v54  ;;  %v2016_v57 = vperm.slane %v1984_v43, %v2951_v18 }
 0x486   : > { %1929 = vst [vmem:[%s2947_s30 + $0x8] sm:$0x2] %v1928_v46 }
 0x487   : > { %1932 = vst [vmem:[%s2947_s30 + $0xa] sm:$0x2] %v1931_v56 }
 0x488   : > { %1935 = vst [vmem:[%s2947_s30 + $0xc] sm:$0x2] %v1934_v45 }
 0x489   : > { %1938 = vst [vmem:[%s2947_s30 + $0xe] sm:$0x2] %v1937_v44  ;;  %v2027_v41 = vld [vmem:[%s2947_s30] sm:$0x2] }
 0x48a   : > { %v2028_v6 = vsel %vm3109_vm2, %v1988_v11, %v2027_v41  ;;  %v2030_v22 = vld [vmem:[%s2947_s30 + $0x2] sm:$0x2] }
 0x48b   : > { %2029 = vst [vmem:[%s2947_s30] sm:$0x2] %v2028_v6  ;;  %v2031_v40 = vsel %vm3109_vm2, %v1992_v33, %v2030_v22  ;;  %v2033_v30 = vld [vmem:[%s2947_s30 + $0x4] sm:$0x2] }
 0x48c   : > { %2032 = vst [vmem:[%s2947_s30 + $0x2] sm:$0x2] %v2031_v40  ;;  %v2034_v2 = vsel %vm3109_vm2, %v1996_v38, %v2033_v30  ;;  %v2036_v53 = vld [vmem:[%s2947_s30 + $0x6] sm:$0x2] }
 0x48d   : > { %2035 = vst [vmem:[%s2947_s30 + $0x4] sm:$0x2] %v2034_v2  ;;  %v2037_v31 = vsel %vm3109_vm2, %v2000_v0, %v2036_v53  ;;  %v2039_v28 = vld [vmem:[%s2947_s30 + $0x8] sm:$0x2] }
 0x48e   : > { %2038 = vst [vmem:[%s2947_s30 + $0x6] sm:$0x2] %v2037_v31  ;;  %v2040_v32 = vsel %vm3109_vm2, %v2004_v50, %v2039_v28  ;;  %v2042_v1 = vld [vmem:[%s2947_s30 + $0xa] sm:$0x2] }
 0x48f   : > { %2041 = vst [vmem:[%s2947_s30 + $0x8] sm:$0x2] %v2040_v32  ;;  %v2043_v49 = vsel %vm3109_vm2, %v2008_v27, %v2042_v1  ;;  %v2045_v58 = vld [vmem:[%s2947_s30 + $0xc] sm:$0x2] }
 0x490   : > { %2044 = vst [vmem:[%s2947_s30 + $0xa] sm:$0x2] %v2043_v49  ;;  %v2046_v62 = vsel %vm3109_vm2, %v2012_v9, %v2045_v58  ;;  %v2048_v63 = vld [vmem:[%s2947_s30 + $0xe] sm:$0x2] }
 0x491   : > { %2047 = vst [vmem:[%s2947_s30 + $0xc] sm:$0x2] %v2046_v62  ;;  %v2049_v7 = vsel %vm3109_vm2, %v2016_v57, %v2048_v63 }
 0x492   : > { %2050 = vst [vmem:[%s2947_s30 + $0xe] sm:$0x2] %v2049_v7 }
 0x493 PF: > { %s13_s16 = sadd.s32 1, %s2357_s16   ;;  %s3209_s12 = smov %s2345_s13 }
 0x494   : > { %p10_p10 = scmp.ge.s32.totalorder %s13_s16, 4   ;;  %s3210_s13 = smov %s2422_s21 }
 0x495   : > { %s3211_s14 = smov %s2353_s15  ;;  %s3212_s15 = smov %s3214_s17 }
 0x496   :  { %12 = sbr.rel (!%p10_p10) target bundleno = 3 (0x3), region = 245 }

// kernel: multimodal_transformer_forward.56
= control target key start
LH: loop header
LB: loop body
LE: loop exit
PB: predicated region body
PF: predicated region fallthrough
CT: control target
= control target key end

     0   :  { %vm28_vm0 = vcmask 261120   ;;  %v225_v1 = vmov 0.0   ;;  %vm72_vm1 = vcmask 523264   ;;  %v226_v24 = vmov 32.0   ;;  %s303_s1 = inlined_call_operand.vmem [shape: bf16[64,32], index: 1, kind: input, shape index: {}]   ;;  %s304_s0 = inlined_call_operand.vmem [shape: bf16[16,64], index: 0, kind: input, shape index: {}]   ;;  %s305_s2 = inlined_call_operand.vmem [shape: f32[1,32], index: 2, kind: input, shape index: {}]   ;;  %s306_s3 = inlined_call_operand.vmem [shape: bf16[16,32], index: 3, kind: input, shape index: {}]   ;;  %s307_s4 = inlined_call_operand.vmem [shape: f32[1,32], index: 4, kind: input, shape index: {}]   ;;  %s308_s5 = inlined_call_operand.vmem [shape: f32[1,32], index: 5, kind: input, shape index: {}]   ;;  %s309_s6 = inlined_call_operand.vmem [shape: bf16[16,32], index: 6, kind: output, shape index: {}]  }
   0x1   :  { %v209_v0 = vld [vmem:[%s303_s1 + $0x18] sm:$0xff]  ;;  %29 = vst.msk [vmem:[#allocation2] sm:$0xff] %vm28_vm0, %v225_v1  ;;  %v208_v2 = vld [vmem:[%s303_s1 + $0x10] sm:$0xff]  ;;  %v207_v3 = vld [vmem:[%s303_s1 + $0x8] sm:$0xff]  ;;  %219 = vrcp.f32 %v226_v24  ;;  %vm177_vm7 = vcmask 257024  }
   0x2   :  { %30 = vst.msk [vmem:[#allocation2 + $0x8] sm:$0xff] %vm28_vm0, %v225_v1  ;;  %80 = vmatpush.bf16.msra.mxu0 %v209_v0  ;;  %v206_v4 = vld [vmem:[%s303_s1] sm:$0xff] }
   0x3   :  { %v205_v5 = vld [vmem:[%s304_s0] sm:$0xff] }
   0x4   :  { %v211_v10 = vld [vmem:[%s306_s3] sm:$0xff]  }
   0x5   :  { %v216_v11 = vld [vmem:[%s305_s2] ss:$0 sm:$0xff]  ;;  %v212_v14 = vunpack.c.l.bf16 %v211_v10  ;;  %v213_v19 = vunpack.c.h.bf16 %v211_v10 }
   0x6   :  { %81 = vmatpush.bf16.msra.mxu0 %v208_v2  ;;  %v217_v55 = vld [vmem:[%s307_s4] ss:$0 sm:$0xff] }
   0x7   :  { %v220_v25 = vpop.eup %219  ;;  %v218_v58 = vld [vmem:[%s308_s5] ss:$0 sm:$0xff] }
   0x8   :  { %v31_v6 = vld [vmem:[#allocation2] sm:$0xff]  ;;  %v119_v26 = vmul.f32 32.0, %v220_v25  ;;  %vm123_vm2 = vweird.f32 %v220_v25 }
   0x9   :  { %v32_v9 = vld [vmem:[#allocation2 + $0x8] sm:$0xff] }
   0xa   :  { %82 = vmatpush.bf16.msra.mxu0 %v207_v3  ;;  %v120_v27 = vsub.f32 1.0, %v119_v26 }
   0xc   :  { %v121_v28 = vmul.f32 %v220_v25, %v120_v27 }
   0xe   :  { %83 = vmatpush.bf16.msra.mxu0 %v206_v4  ;;  %v122_v29 = vadd.f32 %v220_v25, %v121_v28 }
  0x10   :  { %v124_v30 = vsel %vm123_vm2, %v220_v25, %v122_v29 }
  0x11   :  { %204 = vmatmul.msk.bf16.vlgmr.msra.gmra.mxu0 %vm72_vm1, %v205_v5 }
  0x8e   :  { %v85_v7 = vpop.f32.mrf.mxu0 }
  0x8f   :  { %v90_v8 = vadd.f32 %v85_v7, %v31_v6 }
  0x91   :  { %93 = vst.msk [vmem:[#allocation2] sm:$0xff] %vm28_vm0, %v90_v8 }
  0x96   :  { %v87_v12 = vpop.f32.mrf.mxu0 }
  0x97   :  { %v91_v13 = vadd.f32 %v87_v12, %v32_v9 }
  0x98   :  { %v98_v15 = vld [vmem:[#allocation2] sm:$0xff] }
  0x99   :  { %94 = vst.msk [vmem:[#allocation2 + $0x8] sm:$0xff] %vm28_vm0, %v91_v13  ;;  %v104_v16 = vadd.f32 %v216_v11, %v98_v15 }
  0x9b   :  { %v110_v17 = vadd.f32 %v212_v14, %v104_v16 }
  0x9d   :  { %v112_v18 = vsel %vm28_vm0, %v110_v17, 0.0 }
  0x9e   :  { %113 = vadd.xlane.f32.xlu0 %v112_v18 }
  0xa0   :  { %v99_v20 = vld [vmem:[#allocation2 + $0x8] sm:$0xff] }
  0xa1   :  { %v105_v21 = vadd.f32 %v216_v11, %v99_v20 }
  0xa3   :  { %v111_v22 = vadd.f32 %v213_v19, %v105_v21 }
  0xa5   :  { %v115_v23 = vsel %vm28_vm0, %v111_v22, 0.0 }
  0xa6   :  { %116 = vadd.xlane.f32.xlu0 %v115_v23 }
 0x111   :  { %v114_v31 = vpop.xlane.xlu0 %113 }
 0x112   :  { %v125_v32 = vmul.f32 %v124_v30, %v114_v31 }
 0x114   :  { %v127_v33 = vsub.f32 %v110_v17, %v125_v32 }
 0x116   :  { %v129_v34 = vmul.f32 %v127_v33, %v127_v33 }
 0x118   :  { %v131_v35 = vsel %vm28_vm0, %v129_v34, 0.0 }
 0x119   :  { %132 = vadd.xlane.f32.xlu1 %v131_v35  ;;  %v117_v36 = vpop.xlane.xlu0 %116 }
 0x11a   :  { %v126_v37 = vmul.f32 %v124_v30, %v117_v36 }
 0x11c   :  { %v128_v38 = vsub.f32 %v111_v22, %v126_v37 }
 0x11e   :  { %v130_v39 = vmul.f32 %v128_v38, %v128_v38 }
 0x120   :  { %v134_v40 = vsel %vm28_vm0, %v130_v39, 0.0 }
 0x121   :  { %135 = vadd.xlane.f32.xlu1 %v134_v40 }
 0x18c   :  { %v133_v41 = vpop.xlane.xlu1 %132 }
 0x18d   :  { %v137_v42 = vmul.f32 %v133_v41, %v124_v30 }
 0x18f   :  { %v139_v43 = vadd.f32 1e-12, %v137_v42 }
 0x191   :  { %221 = vrsqrt.f32 %v139_v43  ;;  %vm147_vm4 = vweird.f32 %v139_v43 }
 0x194   :  { %v136_v44 = vpop.xlane.xlu1 %135 }
 0x195   :  { %v138_v45 = vmul.f32 %v136_v44, %v124_v30 }
 0x197   :  { %v222_v46 = vpop.eup %221  ;;  %v140_v47 = vadd.f32 1e-12, %v138_v45 }
 0x198   :  { %v142_v48 = vmul.f32 %v222_v46, %v139_v43  ;;  %vm148_vm3 = vweird.f32 %v222_v46 }
 0x199   :  { %223 = vrsqrt.f32 %v140_v47  ;;  %vm149_vm5 = vmor %vm147_vm4, %vm148_vm3  ;;  %vm157_vm8 = vweird.f32 %v140_v47 }
 0x19a   :  { %v143_v49 = vmul.f32 %v222_v46, %v142_v48 }
 0x19c   :  { %v144_v50 = vmul.f32 0.5, %v143_v49 }
 0x19e   :  { %v145_v51 = vsub.f32 1.5, %v144_v50 }
 0x19f   :  { %v224_v52 = vpop.eup %223 }
 0x1a0   :  { %v146_v53 = vmul.f32 %v222_v46, %v145_v51  ;;  %v152_v54 = vmul.f32 %v224_v52, %v140_v47  ;;  %vm158_vm6 = vweird.f32 %v224_v52 }
 0x1a1   :  { %vm159_vm9 = vmor %vm157_vm8, %vm158_vm6 }
 0x1a2   :  { %v150_v56 = vsel %vm149_vm5, %v222_v46, %v146_v53  ;;  %v153_v57 = vmul.f32 %v224_v52, %v152_v54 }
 0x1a3   :  { %v161_v59 = vmul.f32 %v150_v56, %v127_v33 }
 0x1a4   :  { %v154_v60 = vmul.f32 0.5, %v153_v57 }
 0x1a5   :  { %v167_v61 = vmul.f32 %v217_v55, %v161_v59 }
 0x1a6   :  { %v155_v62 = vsub.f32 1.5, %v154_v60 }
 0x1a7   :  { %v173_v63 = vadd.f32 %v218_v58, %v167_v61 }
 0x1a8   :  { %v156_v0 = vmul.f32 %v224_v52, %v155_v62 }
 0x1a9   :  { %v175_v1 = vpack.c.bf16 %v173_v63, %v173_v63 }
 0x1aa   :  { %v160_v2 = vsel %vm159_vm9, %v224_v52, %v156_v0 }
 0x1ab   :  { %178 = vst.msk [vmem:[%s309_s6] sm:$0xf] %vm177_vm7, %v175_v1  ;;  %v162_v3 = vmul.f32 %v160_v2, %v128_v38 }
 0x1ad   :  { %v168_v4 = vmul.f32 %v217_v55, %v162_v3 }
 0x1af   :  { %v174_v5 = vadd.f32 %v218_v58, %v168_v4 }
 0x1b1   :  { %v176_v6 = vpack.c.bf16 %v174_v5, %v174_v5 }
 0x1b3   :  { %179 = vst.msk [vmem:[%s309_s6 + $0x4] sm:$0xf] %vm177_vm7, %v176_v6 }

// kernel: multimodal_transformer_forward.78
= control target key start
LH: loop header
LB: loop body
LE: loop exit
PB: predicated region body
PF: predicated region fallthrough
CT: control target
= control target key end

     0   :  { %vm19_vm0 = vcmask 523264   ;;  %v108_v1 = vmov 0.0   ;;  %vm47_vm1 = vcmask 261120   ;;  %vm83_vm2 = vcmask 519168   ;;  %s151_s1 = inlined_call_operand.vmem [shape: bf16[32,64], index: 1, kind: input, shape index: {}]   ;;  %s152_s2 = inlined_call_operand.vmem [shape: f32[1,64], index: 2, kind: input, shape index: {}]   ;;  %s153_s0 = inlined_call_operand.vmem [shape: bf16[16,32], index: 0, kind: input, shape index: {}]   ;;  %s154_s3 = inlined_call_operand.vmem [shape: bf16[16,64], index: 3, kind: output, shape index: {}]  }
   0x1   :  { %v105_v0 = vld [vmem:[%s151_s1 + $0x8] sm:$0xff]  ;;  %20 = vst.msk [vmem:[#allocation2] sm:$0xff] %vm19_vm0, %v108_v1  ;;  %v104_v2 = vld [vmem:[%s151_s1] sm:$0xff] }
   0x2   :  { %21 = vst.msk [vmem:[#allocation2 + $0x8] sm:$0xff] %vm19_vm0, %v108_v1  ;;  %57 = vmatpush.bf16.msra.mxu0 %v105_v0  ;;  %v103_v3 = vld [vmem:[%s153_s0] sm:$0xff] }
   0x3   :  { %v107_v8 = vld [vmem:[%s152_s2] ss:$0 sm:$0xff] }
   0x6   :  { %58 = vmatpush.bf16.msra.mxu0 %v104_v2 }
   0x8   :  { %v22_v4 = vld [vmem:[#allocation2] sm:$0xff] }
   0x9   :  { %102 = vmatmul.msk.bf16.vlgmr.msra.gmra.mxu0 %vm47_vm1, %v103_v3  ;;  %v23_v7 = vld [vmem:[#allocation2 + $0x8] sm:$0xff] }
  0x86   :  { %v60_v5 = vpop.f32.mrf.mxu0 }
  0x87   :  { %v65_v6 = vadd.f32 %v60_v5, %v22_v4 }
  0x89   :  { %68 = vst.msk [vmem:[#allocation2] sm:$0xff] %vm19_vm0, %v65_v6 }
  0x8e   :  { %v62_v9 = vpop.f32.mrf.mxu0 }
  0x8f   :  { %v66_v10 = vadd.f32 %v62_v9, %v23_v7 }
  0x90   :  { %v73_v11 = vld [vmem:[#allocation2] sm:$0xff] }
  0x91   :  { %v79_v12 = vadd.f32 %v107_v8, %v73_v11  ;;  %69 = vst.msk [vmem:[#allocation2 + $0x8] sm:$0xff] %vm19_vm0, %v66_v10 }
  0x93   :  { %v81_v13 = vpack.c.bf16 %v79_v12, %v79_v12 }
  0x95   :  { %84 = vst.msk [vmem:[%s154_s3] sm:$0xf] %vm83_vm2, %v81_v13 }
  0x98   :  { %v74_v14 = vld [vmem:[#allocation2 + $0x8] sm:$0xff] }
  0x99   :  { %v80_v15 = vadd.f32 %v107_v8, %v74_v14 }
  0x9b   :  { %v82_v16 = vpack.c.bf16 %v80_v15, %v80_v15 }
  0x9d   :  { %85 = vst.msk [vmem:[%s154_s3 + $0x4] sm:$0xf] %vm83_vm2, %v82_v16 }

// kernel: multimodal_transformer_forward.100
= control target key start
LH: loop header
LB: loop body
LE: loop exit
PB: predicated region body
PF: predicated region fallthrough
CT: control target
= control target key end

     0   :  { %vm48_vm0 = vcmask 261120   ;;  %vm18_vm1 = vcmask 7168   ;;  %v162_v9 = vmov -inf   ;;  %vm77_vm2 = vcmask 326656   ;;  %s245_s1 = inlined_call_operand.vmem [shape: bf16[40,32], index: 1, kind: input, shape index: {}]   ;;  %s246_s0 = inlined_call_operand.vmem [shape: bf16[16,32], index: 0, kind: input, shape index: {}]   ;;  %s247_s2 = inlined_call_operand.vmem [shape: f32[16,1], index: 2, kind: output, shape index: {0}]   ;;  %s248_s3 = inlined_call_operand.vmem [shape: f32[16,1], index: 3, kind: output, shape index: {1}]  }
   0x1   :  { %v29_v0 = vld [vmem:[%s245_s1 + $0x10] sm:$0xf]  ;;  %v148_v4 = vld [vmem:[%s245_s1 + $0x8] sm:$0xff]  ;;  %v147_v6 = vld [vmem:[%s245_s1] sm:$0xff]  ;;  %19 = vst.msk [vmem:[%s247_s2] sm:$0xff] %vm18_vm1, %v162_v9  ;;  %v163_v14 = vmov 0  }
   0x2   :  { %v44_v1 = vunpack.c.l.b16 %v29_v0  ;;  %v56_v5 = vsel %vm48_vm0, %v148_v4, 0  ;;  %v53_v7 = vsel %vm48_vm0, %v147_v6, 0  ;;  %v146_v8 = vld [vmem:[%s246_s0] sm:$0xff]  ;;  %20 = vst.msk [vmem:[%s247_s2 + $0x8] sm:$0xff] %vm18_vm1, %v162_v9  ;;  %152 = vset.pattern.permute.xlu1 %v163_v14  ;;  %153 = vset.pattern.permute.xlu0 %v163_v14  ;;  %v164_v15 = vmov 0.0  }
   0x3   :  { %21 = vst.msk [vmem:[%s248_s3] sm:$0xff] %vm18_vm1, %v164_v15 }
   0x4   :  { %v47_v2 = vpack.c.b16 %v44_v1, %v44_v1  ;;  %22 = vst.msk [vmem:[%s248_s3 + $0x8] sm:$0xff] %vm18_vm1, %v164_v15 }
   0x6   :  { %v59_v3 = vsel %vm48_vm0, %v47_v2, 0 }
   0x7   :  { %66 = vmatpush.bf16.xpose.msra.mxu0 %v59_v3 }
   0x8   :  { %v75_v16 = vld [vmem:[%s247_s2] sm:$0xff] }
   0x9   :  { %v76_v20 = vld [vmem:[%s247_s2 + $0x8] sm:$0xff] }
   0xa   :  { %v86_v37 = vld [vmem:[%s248_s3] sm:$0xff] }
   0xb   :  { %v87_v42 = vld [vmem:[%s248_s3 + $0x8] sm:$0xff] }
   0xf   :  { %67 = vmatpush.bf16.xpose.msra.mxu0 %v56_v5 }
  0x17   :  { %68 = vmatpush.bf16.xpose.msra.mxu0 %v53_v7 }
  0x1e   :  { %145 = vmatmul.msk.bf16.vlgmr.msra.gmra.mxu0 %vm48_vm0, %v146_v8 }
  0x9b   :  { %v70_v10 = vpop.f32.mrf.mxu0 }
  0x9c   :  { %v78_v11 = vsel %vm77_vm2, %v70_v10, -inf }
  0x9d   :  { %79 = vmax.xlane.f32.xlu0 %v78_v11 }
  0xa3   :  { %v72_v12 = vpop.f32.mrf.mxu0 }
  0xa4   :  { %v81_v13 = vsel %vm77_vm2, %v72_v12, -inf }
  0xa5   :  { %82 = vmax.xlane.f32.xlu0 %v81_v13 }
 0x110   :  { %v80_v17 = vpop.xlane.xlu0 %79 }
 0x111   :  { %v84_v18 = vmax.f32 %v75_v16, %v80_v17 }
 0x113   :  { %v88_v19 = vsub.f32 %v75_v16, %v84_v18  ;;  %123 = vst.msk [vmem:[%s247_s2] sm:$0xff] %vm18_vm1, %v84_v18  ;;  %98 = vperm.xlu1 %152, %v84_v18  }
 0x115   :  { %v90_v34 = vmul.f32 1.442695, %v88_v19 }
 0x118   :  { %v83_v21 = vpop.xlane.xlu0 %82 }
 0x119   :  { %v85_v22 = vmax.f32 %v76_v20, %v83_v21 }
 0x11b   :  { %v89_v23 = vsub.f32 %v76_v20, %v85_v22  ;;  %124 = vst.msk [vmem:[%s247_s2 + $0x8] sm:$0xff] %vm18_vm1, %v85_v22  ;;  %103 = vperm.xlu1 %152, %v85_v22  }
 0x11d   :  { %v92_v35 = vmul.f32 1.442695, %v89_v23 }
 0x185   :  { %v99_v24 = vpop.permute.xlu1 %98 }
 0x186   :  { %v106_v25 = vsub.f32 %v70_v10, %v99_v24 }
 0x188   :  { %v108_v26 = vmul.f32 1.442695, %v106_v25 }
 0x18a   :  { %154 = vpow2.f32 %v108_v26 }
 0x18d   :  { %v104_v27 = vpop.permute.xlu1 %103 }
 0x18e   :  { %v107_v28 = vsub.f32 %v72_v12, %v104_v27 }
 0x190   :  { %v155_v29 = vpop.eup %154  ;;  %v110_v30 = vmul.f32 1.442695, %v107_v28 }
 0x191   :  { %v112_v31 = vsel %vm77_vm2, %v155_v29, 0.0 }
 0x192   :  { %156 = vpow2.f32 %v110_v30  ;;  %113 = vadd.xlane.f32.xlu2 %v112_v31 }
 0x193   :  { %158 = vpow2.f32 %v90_v34 }
 0x194   :  { %160 = vpow2.f32 %v92_v35 }
 0x198   :  { %v157_v32 = vpop.eup %156 }
 0x199   :  { %v115_v33 = vsel %vm77_vm2, %v157_v32, 0.0  ;;  %v159_v36 = vpop.eup %158 }
 0x19a   :  { %116 = vadd.xlane.f32.xlu2 %v115_v33  ;;  %v94_v38 = vmul.f32 %v159_v36, %v86_v37  ;;  %v161_v41 = vpop.eup %160 }
 0x19b   :  { %v95_v43 = vmul.f32 %v161_v41, %v87_v42 }
 0x205   :  { %v114_v39 = vpop.xlane.xlu2 %113 }
 0x206   :  { %v118_v40 = vadd.f32 %v114_v39, %v94_v38 }
 0x208   :  { %121 = vst.msk [vmem:[%s248_s3] sm:$0xff] %vm18_vm1, %v118_v40 }
 0x20d   :  { %v117_v44 = vpop.xlane.xlu2 %116 }
 0x20e   :  { %v119_v45 = vadd.f32 %v117_v44, %v95_v43 }
 0x210   :  { %122 = vst.msk [vmem:[%s248_s3 + $0x8] sm:$0xff] %vm18_vm1, %v119_v45 }

// kernel: multimodal_transformer_forward.53
= control target key start
LH: loop header
LB: loop body
LE: loop exit
PB: predicated region body
PF: predicated region fallthrough
CT: control target
= control target key end

     0   :  { %s2353_s12 = smov 0   ;;  %s2355_s13 = smov 0   ;;  %s3125_s0 = inlined_call_operand.vmem [shape: bf16[2,8,3,4,8], index: 0, kind: input, shape index: {}, may-alias: {0,1,2}]   ;;  %s3126_s1 = inlined_call_operand.vmem [shape: bf16[2,8,3,4,8], index: 1, kind: input, shape index: {}, may-alias: {0,1,2}]   ;;  %s3127_s2 = inlined_call_operand.vmem [shape: bf16[2,8,3,4,8], index: 2, kind: input, shape index: {}, may-alias: {0,1,2}]   ;;  %s3128_s3 = inlined_call_operand.vmem [shape: bf16[2,8,4,8], index: 3, kind: output, shape index: {}]  }
   0x1   :  { %s2357_s14 = smov 0   ;;  %s2359_s15 = smov 0  }
   0x2   :  { %s2361_s16 = smov 0  }
   0x3 LB: > { %s32_s17 = sadd.s32 1, %s2323_s15  ;;  %p48_p1 = scmp.ne.s32.totalorder %s2315_s13, %s2311_s12  ;;  %s2327_s16 = sphi %s2361_s16, %s13_s16   ;;  %s2323_s15 = sphi %s2359_s15, %s3158_s15   ;;  %s2319_s14 = sphi %s2357_s14, %s3157_s14   ;;  %s2315_s13 = sphi %s2355_s13, %s3156_s13   ;;  %s2311_s12 = sphi %s2353_s12, %s3155_s12  }
   0x4   : > { %p34_p0 = scmp.ge.s32.totalorder %s32_s17, 2  ;;  %p49_p2 = scmp.eq.s32.totalorder %s2327_s16, 0 }
   0x5   : > { %s41_s20 = sadd.s32 1, %s2315_s13  ;;  %p2161_p5 = scmp.ge.s32.totalorder %s2327_s16, 2 }
   0x6   : > { %s3160_s17 = smov (%p34_p0, %s32_s17), 0  ;;  %p2384_p3 = por %p49_p2, %p48_p1 }
   0x7   : > { %s36_s19 = ssub.s32 %s2323_s15, %s3160_s17  ;;  %158 = sbr.rel (%p2161_p5) target bundleno = 51 (0x33), region = 16 }
   0x8   : > { %p39_p4 = scmp.eq.s32.totalorder %s36_s19, 0 }
   0xa   : > { %s2392_s21 = scalar_select %p39_p4, %s2315_s13, %s41_s20  }
   0xc   : > { %161 = sbr.rel (!%p2384_p3) target bundleno = 25 (0x19), region = 20  ;;  %s163_s22 = sand.u32 (%p2384_p3), 1, %s2315_s13  }
   0xd   : > { %s2217_s23 = smul.u32 (%p2384_p3), 48, %s2323_s15  ;;  %s2162_s24 = sshll.u32 (%p2384_p3), %s163_s22, 4 }
   0xe   : > { %s165_s28 = scalar_lea.vmem (%p2384_p3), [#allocation5], %s2162_s24 }
   0xf   : > { %s171_s27 = scalar_lea.vmem (%p2384_p3), %s3125_s0, %s2217_s23 }
  0x10   : > { %v188_v0 = vld [vmem:[%s171_s27] sm:$0x3] (%p2384_p3)  ;;  %v190_v1 = vld [vmem:[%s171_s27 + $0x6] sm:$0x3] (%p2384_p3)  ;;  %v192_v2 = vld [vmem:[%s171_s27 + $0xc] sm:$0x3] (%p2384_p3) }
  0x11   : > { %189 = vst [vmem:[%s165_s28] sm:$0x3] %v188_v0  ;;  %v194_v3 = vld [vmem:[%s171_s27 + $0x12] sm:$0x3]  ;;  %v196_v4 = vld [vmem:[%s171_s27 + $0x18] sm:$0x3] }
  0x12   : > { %191 = vst [vmem:[%s165_s28 + $0x2] sm:$0x3] %v190_v1  ;;  %v198_v5 = vld [vmem:[%s171_s27 + $0x1e] sm:$0x3]  ;;  %v200_v6 = vld [vmem:[%s171_s27 + $0x24] sm:$0x3] }
  0x13   : > { %193 = vst [vmem:[%s165_s28 + $0x4] sm:$0x3] %v192_v2  ;;  %v202_v7 = vld [vmem:[%s171_s27 + $0x2a] sm:$0x3] }
  0x14   : > { %195 = vst [vmem:[%s165_s28 + $0x6] sm:$0x3] %v194_v3 }
  0x15   : > { %197 = vst [vmem:[%s165_s28 + $0x8] sm:$0x3] %v196_v4 }
  0x16   : > { %199 = vst [vmem:[%s165_s28 + $0xa] sm:$0x3] %v198_v5 }
  0x17   : > { %201 = vst [vmem:[%s165_s28 + $0xc] sm:$0x3] %v200_v6 }
  0x18   : > { %203 = vst [vmem:[%s165_s28 + $0xe] sm:$0x3] %v202_v7 }
  0x19 PF: > { %243 = sbr.rel (!%p2384_p3) target bundleno = 38 (0x26), region = 61  ;;  %s245_s29 = sand.u32 (%p2384_p3), 1, %s2315_s13  }
  0x1a   : > { %s2165_s30 = smul.u32 (%p2384_p3), 48, %s2323_s15  ;;  %s2164_s4 = sshll.u32 (%p2384_p3), %s245_s29, 4 }
  0x1b   : > { %s247_s8 = scalar_lea.vmem (%p2384_p3), [#allocation6], %s2164_s4 }
  0x1c   : > { %s2064_s7 = scalar_lea.vmem (%p2384_p3), %s3126_s1, %s2165_s30 }
  0x1d   : > { %v2166_v8 = vld [vmem:[%s2064_s7 + $0x2] sm:$0x3] (%p2384_p3)  ;;  %v2167_v9 = vld [vmem:[%s2064_s7 + $0x8] sm:$0x3] (%p2384_p3)  ;;  %v2168_v10 = vld [vmem:[%s2064_s7 + $0xe] sm:$0x3] (%p2384_p3) }
  0x1e   : > { %272 = vst [vmem:[%s247_s8] sm:$0x3] %v2166_v8  ;;  %v2169_v11 = vld [vmem:[%s2064_s7 + $0x14] sm:$0x3]  ;;  %v2170_v12 = vld [vmem:[%s2064_s7 + $0x1a] sm:$0x3] }
  0x1f   : > { %274 = vst [vmem:[%s247_s8 + $0x2] sm:$0x3] %v2167_v9  ;;  %v2171_v13 = vld [vmem:[%s2064_s7 + $0x20] sm:$0x3]  ;;  %v2172_v14 = vld [vmem:[%s2064_s7 + $0x26] sm:$0x3] }
  0x20   : > { %276 = vst [vmem:[%s247_s8 + $0x4] sm:$0x3] %v2168_v10  ;;  %v2173_v15 = vld [vmem:[%s2064_s7 + $0x2c] sm:$0x3] }
  0x21   : > { %278 = vst [vmem:[%s247_s8 + $0x6] sm:$0x3] %v2169_v11 }
  0x22   : > { %280 = vst [vmem:[%s247_s8 + $0x8] sm:$0x3] %v2170_v12 }
  0x23   : > { %282 = vst [vmem:[%s247_s8 + $0xa] sm:$0x3] %v2171_v13 }
  0x24   : > { %284 = vst [vmem:[%s247_s8 + $0xc] sm:$0x3] %v2172_v14 }
  0x25   : > { %286 = vst [vmem:[%s247_s8 + $0xe] sm:$0x3] %v2173_v15 }
  0x26 PF: > { %326 = sbr.rel (!%p2384_p3) target bundleno = 51 (0x33), region = 102  ;;  %s328_s9 = sand.u32 (%p2384_p3), 1, %s2315_s13  }
  0x27   : > { %s2175_s10 = smul.u32 (%p2384_p3), 48, %s2323_s15  ;;  %s2174_s11 = sshll.u32 (%p2384_p3), %s328_s9, 4 }
  0x28   : > { %s330_s23 = scalar_lea.vmem (%p2384_p3), [#allocation7], %s2174_s11 }
  0x29   : > { %s2072_s22 = scalar_lea.vmem (%p2384_p3), %s3127_s2, %s2175_s10 }
  0x2a   : > { %v2176_v16 = vld [vmem:[%s2072_s22 + $0x4] sm:$0x3] (%p2384_p3)  ;;  %v2177_v17 = vld [vmem:[%s2072_s22 + $0xa] sm:$0x3] (%p2384_p3)  ;;  %v2178_v18 = vld [vmem:[%s2072_s22 + $0x10] sm:$0x3] (%p2384_p3) }
  0x2b   : > { %355 = vst [vmem:[%s330_s23] sm:$0x3] %v2176_v16  ;;  %v2179_v19 = vld [vmem:[%s2072_s22 + $0x16] sm:$0x3]  ;;  %v2180_v20 = vld [vmem:[%s2072_s22 + $0x1c] sm:$0x3] }
  0x2c   : > { %357 = vst [vmem:[%s330_s23 + $0x2] sm:$0x3] %v2177_v17  ;;  %v2181_v21 = vld [vmem:[%s2072_s22 + $0x22] sm:$0x3]  ;;  %v2182_v22 = vld [vmem:[%s2072_s22 + $0x28] sm:$0x3] }
  0x2d   : > { %359 = vst [vmem:[%s330_s23 + $0x4] sm:$0x3] %v2178_v18  ;;  %v2183_v23 = vld [vmem:[%s2072_s22 + $0x2e] sm:$0x3] }
  0x2e   : > { %361 = vst [vmem:[%s330_s23 + $0x6] sm:$0x3] %v2179_v19 }
  0x2f   : > { %363 = vst [vmem:[%s330_s23 + $0x8] sm:$0x3] %v2180_v20 }
  0x30   : > { %365 = vst [vmem:[%s330_s23 + $0xa] sm:$0x3] %v2181_v21 }
  0x31   : > { %367 = vst [vmem:[%s330_s23 + $0xc] sm:$0x3] %v2182_v22 }
  0x32   : > { %369 = vst [vmem:[%s330_s23 + $0xe] sm:$0x3] %v2183_v23 }
  0x33 PF: > { %p2184_p6 = scmp.ge.s32.totalorder %s2327_s16, 1  ;;  %p408_p7 = scmp.lt.s32.totalorder %s2327_s16, 3 }
  0x35   : > { %p409_p8 = pnand %p2184_p6, %p408_p7 }
  0x37   : > { %412 = sbr.rel (%p409_p8) target bundleno = 1169 (0x491), region = 143 }
  0x3c   : > { %s415_s18 = sand.u32 1, %s2311_s12   ;;  %vm554_vm0 = vcmask 1041409   ;;  %vm557_vm1 = vcmask 1042434   ;;  %vm560_vm2 = vcmask 1043459   ;;  %vm563_vm3 = vcmask 1044484   ;;  %p468_p9 = scmp.lt.s32.totalorder %s2319_s14, 1 }
  0x3d   : > { %s2419_s24 = sshll.u32 %s415_s18, 4  ;;  %vm566_vm4 = vcmask 1045509   ;;  %vm569_vm5 = vcmask 1046534   ;;  %vm572_vm6 = vcmask 1047559   ;;  %vm491_vm7 = vcmask 64512  }
  0x3e   : > { %s2422_s25 = scalar_lea.vmem [#allocation5], %s2419_s24  ;;  %s2435_s12 = scalar_lea.vmem [#allocation6], %s2419_s24  ;;  %vm482_vm8 = vcmask 7168   ;;  %vm751_vm9 = vcmask 1043456   ;;  %vm1593_vm10 = vcmask 1040384   ;;  %vm1663_vm11 = vcmask 57344  }
  0x3f   : > { %v496_v24 = vld [vmem:[%s2422_s25] sm:$0x1]  ;;  %v497_v25 = vld [vmem:[%s2422_s25 + $0x2] sm:$0x1]  ;;  %v498_v26 = vld [vmem:[%s2422_s25 + $0x4] sm:$0x1] }
  0x40   : > { %513 = vst [vmem:[#allocation1] ss:$4 sm:$0xff] %v496_v24  ;;  %v499_v27 = vld [vmem:[%s2422_s25 + $0x6] sm:$0x1]  ;;  %v500_v30 = vld [vmem:[%s2422_s25 + $0x8] sm:$0x1] }
  0x41   : > { %518 = vst [vmem:[#allocation1 + $0x20] ss:$4 sm:$0xff] %v497_v25  ;;  %v501_v31 = vld [vmem:[%s2422_s25 + $0xa] sm:$0x1]  ;;  %v502_v34 = vld [vmem:[%s2422_s25 + $0xc] sm:$0x1] }
  0x42   : > { %v503_v35 = vld [vmem:[%s2422_s25 + $0xe] sm:$0x1]  ;;  %v504_v38 = vld [vmem:[%s2435_s12] sm:$0x1]  ;;  %v505_v39 = vld [vmem:[%s2435_s12 + $0x2] sm:$0x1] }
  0x43   : > { %v506_v42 = vld [vmem:[%s2435_s12 + $0x4] sm:$0x1]  ;;  %v507_v43 = vld [vmem:[%s2435_s12 + $0x6] sm:$0x1]  ;;  %v508_v46 = vld [vmem:[%s2435_s12 + $0x8] sm:$0x1] }
  0x44   : > { %v509_v48 = vld [vmem:[%s2435_s12 + $0xa] sm:$0x1]  ;;  %v510_v60 = vld [vmem:[%s2435_s12 + $0xc] sm:$0x1]  ;;  %v511_v63 = vld [vmem:[%s2435_s12 + $0xe] sm:$0x1] }
  0x45   : > { %s2456_s26 = scalar_lea.vmem [#allocation7], %s2419_s24  ;;  %s3162_s14 = smov (!%p468_p9, %s2319_s14), 1  ;;  %vm1664_vm12 = vsmask.f32 256  ;;  %vm1774_vm14 = vsmask.f32 7938 }
  0x46   : > { %v684_v16 = vld [vmem:[%s2456_s26] sm:$0x1]  ;;  %v685_v19 = vld [vmem:[%s2456_s26 + $0x2] sm:$0x1]  ;;  %s2216_s27 = sshll.u32 %s3162_s14, 4  ;;  %vm2908_vm13 = vmand %vm1663_vm11, %vm1664_vm12 }
  0x47   : > { %v514_v28 = vld.sshfl [vmem:[#allocation1] sm:$0xff pattern:$0x73625140]  ;;  %s2899_s30 = scalar_lea.vmem %s3128_s3, %s2216_s27  ;;  %vm2950_vm15 = vmand %vm1663_vm11, %vm1774_vm14 }
  0x48   : > { %v519_v29 = vld.sshfl [vmem:[#allocation1 + $0x20] sm:$0xff pattern:$0x73625140]  ;;  %522 = vst [vmem:[#allocation1] ss:$4 sm:$0xff] %v498_v26  ;;  %v545_v57 = vunpack.c.l.b16 %v514_v28 }
  0x49   : > { %526 = vst [vmem:[#allocation1 + $0x20] ss:$4 sm:$0xff] %v499_v27  ;;  %v546_v50 = vunpack.c.l.b16 %v519_v29 }
  0x4b   : > { %v553_v58 = vrot.slane %v546_v50, 7  ;;  %v691_v50 = vld [vmem:[%s2456_s26 + $0xe] sm:$0x1] }
  0x4d   : > { %v555_v3 = vsel %vm554_vm0, %v553_v58, %v545_v57  ;;  %v773_v57 = vld [vmem:[%s2422_s25 + $0x4] sm:$0x1]  ;;  %v774_v58 = vld [vmem:[%s2422_s25 + $0x6] sm:$0x1] }
  0x4f   : > { %v523_v32 = vld.sshfl [vmem:[#allocation1] sm:$0xff pattern:$0x73625140] }
  0x50   : > { %v527_v33 = vld.sshfl [vmem:[#allocation1 + $0x20] sm:$0xff pattern:$0x73625140]  ;;  %530 = vst [vmem:[#allocation1] ss:$4 sm:$0xff] %v500_v30  ;;  %v547_v55 = vunpack.c.l.b16 %v523_v32 }
  0x51   : > { %534 = vst [vmem:[#allocation1 + $0x20] ss:$4 sm:$0xff] %v501_v31  ;;  %v548_v62 = vunpack.c.l.b16 %v527_v33 }
  0x52   : > { %v556_v0 = vrot.slane %v547_v55, 6  ;;  %v772_v55 = vld [vmem:[%s2422_s25 + $0x2] sm:$0x1] }
  0x53   : > { %v559_v9 = vrot.slane %v548_v62, 5  ;;  %v776_v62 = vld [vmem:[%s2422_s25 + $0xa] sm:$0x1] }
  0x54   : > { %v558_v11 = vsel %vm557_vm1, %v556_v0, %v555_v3 }
  0x55   : > { %v561_v17 = vsel %vm560_vm2, %v559_v9, %v558_v11  ;;  %v781_v9 = vld [vmem:[%s2435_s12 + $0x4] sm:$0x1] }
  0x57   : > { %v531_v36 = vld.sshfl [vmem:[#allocation1] sm:$0xff pattern:$0x73625140] }
  0x58   : > { %v2432_v37 = vld.sshfl [vmem:[#allocation1 + $0x20] sm:$0xff pattern:$0x73625140]  ;;  %538 = vst [vmem:[#allocation1] ss:$4 sm:$0xff] %v502_v34  ;;  %v549_v7 = vunpack.c.l.b16 %v531_v36 }
  0x59   : > { %542 = vst [vmem:[#allocation1 + $0x20] ss:$4 sm:$0xff] %v503_v35  ;;  %v550_v13 = vunpack.c.l.b16 %v2432_v37  ;;  %v686_v35 = vld [vmem:[%s2456_s26 + $0x4] sm:$0x1] }
  0x5a   : > { %v562_v14 = vrot.slane %v549_v7, 4 }
  0x5b   : > { %v565_v22 = vrot.slane %v550_v13, 3  ;;  %v783_v13 = vld [vmem:[%s2435_s12 + $0x8] sm:$0x1] }
  0x5c   : > { %v564_v25 = vsel %vm563_vm3, %v562_v14, %v561_v17  ;;  %v784_v14 = vld [vmem:[%s2435_s12 + $0xa] sm:$0x1]  ;;  %v785_v17 = vld [vmem:[%s2435_s12 + $0xc] sm:$0x1] }
  0x5d   : > { %v567_v32 = vsel %vm566_vm4, %v565_v22, %v564_v25  ;;  %v954_v22 = vld [vmem:[%s2456_s26 + $0x2] sm:$0x1]  ;;  %v955_v25 = vld [vmem:[%s2456_s26 + $0x4] sm:$0x1] }
  0x5f   : > { %v2439_v40 = vld.sshfl [vmem:[#allocation1] sm:$0xff pattern:$0x73625140] }
  0x60   : > { %v2441_v41 = vld.sshfl [vmem:[#allocation1 + $0x20] sm:$0xff pattern:$0x73625140]  ;;  %576 = vst [vmem:[#allocation1] ss:$4 sm:$0xff] %v504_v38  ;;  %v551_v20 = vunpack.c.l.b16 %v2439_v40 }
  0x61   : > { %581 = vst [vmem:[#allocation1 + $0x20] ss:$4 sm:$0xff] %v505_v39  ;;  %v552_v28 = vunpack.c.l.b16 %v2441_v41  ;;  %v687_v38 = vld [vmem:[%s2456_s26 + $0x6] sm:$0x1] }
  0x62   : > { %v568_v30 = vrot.slane %v551_v20, 2 }
  0x63   : > { %v571_v36 = vrot.slane %v552_v28, 1 }
  0x64   : > { %v570_v39 = vsel %vm569_vm5, %v568_v30, %v567_v32  ;;  %v958_v30 = vld [vmem:[%s2456_s26 + $0xa] sm:$0x1] }
  0x67   : > { %v577_v44 = vld.sshfl [vmem:[#allocation1] sm:$0xff pattern:$0x73625140] }
  0x68   : > { %v582_v45 = vld.sshfl [vmem:[#allocation1 + $0x20] sm:$0xff pattern:$0x73625140]  ;;  %585 = vst [vmem:[#allocation1] ss:$4 sm:$0xff] %v506_v42  ;;  %v608_v53 = vunpack.c.l.b16 %v577_v44 }
  0x69   : > { %589 = vst [vmem:[#allocation1 + $0x20] ss:$4 sm:$0xff] %v507_v43  ;;  %v609_v47 = vunpack.c.l.b16 %v582_v45  ;;  %v573_v43 = vsel %vm572_vm6, %v571_v36, %v570_v39  ;;  %v688_v45 = vld [vmem:[%s2456_s26 + $0x8] sm:$0x1] }
  0x6a   : > { %v574_v44 = vpack.c.b16 %v573_v43, %v573_v43 }
  0x6b   : > { %v616_v54 = vrot.slane %v609_v47, 7 }
  0x6d   : > { %v617_v61 = vsel %vm554_vm0, %v616_v54, %v608_v53  ;;  %v771_v53 = vld [vmem:[%s2422_s25] sm:$0x1] }
  0x6f   : > { %v586_v49 = vld.sshfl [vmem:[#allocation1] sm:$0xff pattern:$0x73625140] }
  0x70   : > { %v590_v51 = vld.sshfl [vmem:[#allocation1 + $0x20] sm:$0xff pattern:$0x73625140]  ;;  %593 = vst [vmem:[#allocation1] ss:$4 sm:$0xff] %v508_v46  ;;  %v610_v52 = vunpack.c.l.b16 %v586_v49 }
  0x71   : > { %597 = vst [vmem:[#allocation1 + $0x20] ss:$4 sm:$0xff] %v509_v48  ;;  %v611_v56 = vunpack.c.l.b16 %v590_v51  ;;  %v689_v46 = vld [vmem:[%s2456_s26 + $0xa] sm:$0x1]  ;;  %v690_v49 = vld [vmem:[%s2456_s26 + $0xc] sm:$0x1] }
  0x72   : > { %v618_v59 = vrot.slane %v610_v52, 6 }
  0x73   : > { %v620_v2 = vrot.slane %v611_v56, 5 }
  0x74   : > { %v619_v6 = vsel %vm557_vm1, %v618_v59, %v617_v61  ;;  %v775_v61 = vld [vmem:[%s2422_s25 + $0x8] sm:$0x1] }
  0x75   : > { %v621_v12 = vsel %vm560_vm2, %v620_v2, %v619_v6  ;;  %v778_v2 = vld [vmem:[%s2422_s25 + $0xe] sm:$0x1]  ;;  %v780_v6 = vld [vmem:[%s2435_s12 + $0x2] sm:$0x1] }
  0x77   : > { %v594_v1 = vld.sshfl [vmem:[#allocation1] sm:$0xff pattern:$0x73625140] }
  0x78   : > { %v598_v4 = vld.sshfl [vmem:[#allocation1 + $0x20] sm:$0xff pattern:$0x73625140]  ;;  %601 = vst [vmem:[#allocation1] ss:$4 sm:$0xff] %v510_v60  ;;  %v612_v5 = vunpack.c.l.b16 %v594_v1 }
  0x79   : > { %605 = vst [vmem:[#allocation1 + $0x20] ss:$4 sm:$0xff] %v511_v63  ;;  %v613_v8 = vunpack.c.l.b16 %v598_v4  ;;  %v777_v1 = vld [vmem:[%s2422_s25 + $0xc] sm:$0x1] }
  0x7a   : > { %v622_v10 = vrot.slane %v612_v5, 4  ;;  %v779_v5 = vld [vmem:[%s2435_s12] sm:$0x1] }
  0x7b   : > { %v624_v15 = vrot.slane %v613_v8, 3 }
  0x7c   : > { %v623_v18 = vsel %vm563_vm3, %v622_v10, %v621_v12  ;;  %v782_v10 = vld [vmem:[%s2435_s12 + $0x6] sm:$0x1] }
  0x7d   : > { %v625_v27 = vsel %vm566_vm4, %v624_v15, %v623_v18  ;;  %v786_v18 = vld [vmem:[%s2435_s12 + $0xe] sm:$0x1] }
  0x7f   : > { %v602_v21 = vld.sshfl [vmem:[#allocation1] sm:$0xff pattern:$0x73625140] }
  0x80   : > { %v606_v23 = vld.sshfl [vmem:[#allocation1 + $0x20] sm:$0xff pattern:$0x73625140]  ;;  %v614_v24 = vunpack.c.l.b16 %v602_v21  ;;  %693 = vst [vmem:[#allocation1] ss:$4 sm:$0xff] %v684_v16 }
  0x81   : > { %v615_v26 = vunpack.c.l.b16 %v606_v23  ;;  %698 = vst [vmem:[#allocation1 + $0x20] ss:$4 sm:$0xff] %v685_v19  ;;  %v953_v21 = vld [vmem:[%s2456_s26] sm:$0x1] }
  0x82   : > { %v626_v29 = vrot.slane %v614_v24, 2 }
  0x83   : > { %v628_v31 = vrot.slane %v615_v26, 1  ;;  %v956_v26 = vld [vmem:[%s2456_s26 + $0x6] sm:$0x1] }
  0x84   : > { %v627_v33 = vsel %vm569_vm5, %v626_v29, %v625_v27  ;;  %v957_v29 = vld [vmem:[%s2456_s26 + $0x8] sm:$0x1] }
  0x85   : > { %v629_v34 = vsel %vm572_vm6, %v628_v31, %v627_v33 }
  0x86   : > { %v630_v37 = vpack.c.b16 %v629_v34, %v629_v34 }
  0x87   : > { %v2472_v40 = vld.sshfl [vmem:[#allocation1] sm:$0xff pattern:$0x73625140] }
  0x88   : > { %v636_v41 = vsel %vm491_vm7, %v630_v37, 0  ;;  %v2475_v42 = vld.sshfl [vmem:[#allocation1 + $0x20] sm:$0xff pattern:$0x73625140]  ;;  %702 = vst [vmem:[#allocation1] ss:$4 sm:$0xff] %v686_v35 }
  0x89   : > { %645 = vmatpush.bf16.xpose.msra.mxu0 %v636_v41  ;;  %706 = vst [vmem:[#allocation1 + $0x20] ss:$4 sm:$0xff] %v687_v38 }
  0x8f   : > { %v2480_v47 = vld.sshfl [vmem:[#allocation1] sm:$0xff pattern:$0x73625140] }
  0x90   : > { %v2482_v48 = vld.sshfl [vmem:[#allocation1 + $0x20] sm:$0xff pattern:$0x73625140]  ;;  %710 = vst [vmem:[#allocation1] ss:$4 sm:$0xff] %v688_v45  ;;  %2190 = vmatmul.msk.bf16.vlgmr.msra.gmra.mxu0 %vm491_vm7, %v574_v44 }
  0x91   : > { %714 = vst [vmem:[#allocation1 + $0x20] ss:$4 sm:$0xff] %v689_v46  ;;  %v959_v46 = vld [vmem:[%s2456_s26 + $0xc] sm:$0x1] }
  0x97   : > { %v2487_v51 = vld.sshfl [vmem:[#allocation1] sm:$0xff pattern:$0x73625140] }
  0x98   : > { %v2489_v52 = vld.sshfl [vmem:[#allocation1 + $0x20] sm:$0xff pattern:$0x73625140]  ;;  %718 = vst [vmem:[#allocation1] ss:$4 sm:$0xff] %v690_v49 }
  0x99   : > { %722 = vst [vmem:[#allocation1 + $0x20] ss:$4 sm:$0xff] %v691_v50 }
  0x9f   : > { %v2492_v54 = vld.sshfl [vmem:[#allocation1] sm:$0xff pattern:$0x73625140] }
  0xa0   : > { %v2495_v56 = vld.sshfl [vmem:[#allocation1 + $0x20] sm:$0xff pattern:$0x73625140]  ;;  %788 = vst [vmem:[#allocation1] ss:$4 sm:$0xff] %v771_v53 }
  0xa1   : > { %793 = vst [vmem:[#allocation1 + $0x20] ss:$4 sm:$0xff] %v772_v55  ;;  %v960_v53 = vld [vmem:[%s2456_s26 + $0xe] sm:$0x1] }
  0xa7   : > { %v2499_v59 = vld.sshfl [vmem:[#allocation1] sm:$0xff pattern:$0x73625140] }
  0xa8   : > { %v2501_v60 = vld.sshfl [vmem:[#allocation1 + $0x20] sm:$0xff pattern:$0x73625140]  ;;  %797 = vst [vmem:[#allocation1] ss:$4 sm:$0xff] %v773_v57 }
  0xa9   : > { %801 = vst [vmem:[#allocation1 + $0x20] ss:$4 sm:$0xff] %v774_v58 }
  0xaf   : > { %v2505_v63 = vld.sshfl [vmem:[#allocation1] sm:$0xff pattern:$0x73625140] }
  0xb0   : > { %v2507_v0 = vld.sshfl [vmem:[#allocation1 + $0x20] sm:$0xff pattern:$0x73625140]  ;;  %805 = vst [vmem:[#allocation1] ss:$4 sm:$0xff] %v775_v61 }
  0xb1   : > { %809 = vst [vmem:[#allocation1 + $0x20] ss:$4 sm:$0xff] %v776_v62 }
  0xb7   : > { %v2511_v3 = vld.sshfl [vmem:[#allocation1] sm:$0xff pattern:$0x73625140] }
  0xb8   : > { %v2513_v4 = vld.sshfl [vmem:[#allocation1 + $0x20] sm:$0xff pattern:$0x73625140]  ;;  %813 = vst [vmem:[#allocation1] ss:$4 sm:$0xff] %v777_v1 }
  0xb9   : > { %817 = vst [vmem:[#allocation1 + $0x20] ss:$4 sm:$0xff] %v778_v2 }
  0xbf   : > { %v2517_v7 = vld.sshfl [vmem:[#allocation1] sm:$0xff pattern:$0x73625140] }
  0xc0   : > { %v2519_v8 = vld.sshfl [vmem:[#allocation1 + $0x20] sm:$0xff pattern:$0x73625140]  ;;  %844 = vst [vmem:[#allocation1] ss:$4 sm:$0xff] %v779_v5 }
  0xc1   : > { %849 = vst [vmem:[#allocation1 + $0x20] ss:$4 sm:$0xff] %v780_v6 }
  0xc7   : > { %v845_v11 = vld.sshfl [vmem:[#allocation1] sm:$0xff pattern:$0x73625140] }
  0xc8   : > { %v850_v12 = vld.sshfl [vmem:[#allocation1 + $0x20] sm:$0xff pattern:$0x73625140]  ;;  %853 = vst [vmem:[#allocation1] ss:$4 sm:$0xff] %v781_v9  ;;  %v876_v33 = vunpack.c.l.b16 %v845_v11 }
  0xc9   : > { %857 = vst [vmem:[#allocation1 + $0x20] ss:$4 sm:$0xff] %v782_v10  ;;  %v877_v34 = vunpack.c.l.b16 %v850_v12  ;;  %v1039_v11 = vld [vmem:[%s2422_s25] sm:$0x2] }
  0xca   : > { %v884_v43 = vrot.slane %v876_v33, 1  ;;  %v1045_v33 = vld [vmem:[%s2422_s25 + $0xc] sm:$0x2] }
  0xcc   : > { %v885_v55 = vsel %vm554_vm0, %v877_v34, %v884_v43  ;;  %v1046_v34 = vld [vmem:[%s2422_s25 + $0xe] sm:$0x2]  ;;  %v820_v43 = vunpack.c.l.b16 %v2499_v59 }
  0xcf   : > { %v854_v15 = vld.sshfl [vmem:[#allocation1] sm:$0xff pattern:$0x73625140] }
  0xd0   : > { %v858_v16 = vld.sshfl [vmem:[#allocation1 + $0x20] sm:$0xff pattern:$0x73625140]  ;;  %861 = vst [vmem:[#allocation1] ss:$4 sm:$0xff] %v783_v13  ;;  %v878_v35 = vunpack.c.l.b16 %v854_v15 }
  0xd1   : > { %865 = vst [vmem:[#allocation1 + $0x20] ss:$4 sm:$0xff] %v784_v14  ;;  %v879_v36 = vunpack.c.l.b16 %v858_v16  ;;  %v1040_v13 = vld [vmem:[%s2422_s25 + $0x2] sm:$0x2] }
  0xd2   : > { %v886_v44 = vrot.slane %v878_v35, 7 }
  0xd3   : > { %v888_v45 = vrot.slane %v879_v36, 6 }
  0xd4   : > { %v887_v61 = vsel %vm557_vm1, %v886_v44, %v885_v55  ;;  %v821_v44 = vunpack.c.l.b16 %v2501_v60  ;;  %v827_v55 = vunpack.c.l.b16 %v2519_v8 }
  0xd5   : > { %v889_v1 = vsel %vm560_vm2, %v888_v45, %v887_v61  ;;  %v822_v45 = vunpack.c.l.b16 %v2505_v63  ;;  %v828_v61 = vrot.slane %v820_v43, 1  ;;  %v1050_v63 = vld [vmem:[%s2435_s12 + $0x6] sm:$0x2] }
  0xd6   : > { %v840_v8 = vrot.slane %v827_v55, 2 }
  0xd7   : > { %v862_v19 = vld.sshfl [vmem:[#allocation1] sm:$0xff pattern:$0x73625140]  ;;  %v829_v60 = vsel %vm554_vm0, %v821_v44, %v828_v61  ;;  %v1223_v44 = vld [vmem:[%s2456_s26 + $0x4] sm:$0x2] }
  0xd8   : > { %v866_v20 = vld.sshfl [vmem:[#allocation1 + $0x20] sm:$0xff pattern:$0x73625140]  ;;  %869 = vst [vmem:[#allocation1] ss:$4 sm:$0xff] %v785_v17  ;;  %v880_v37 = vunpack.c.l.b16 %v862_v19 }
  0xd9   : > { %873 = vst [vmem:[#allocation1 + $0x20] ss:$4 sm:$0xff] %v786_v18  ;;  %v881_v38 = vunpack.c.l.b16 %v866_v20  ;;  %v1041_v17 = vld [vmem:[%s2422_s25 + $0x4] sm:$0x2]  ;;  %v1042_v18 = vld [vmem:[%s2422_s25 + $0x6] sm:$0x2] }
  0xda   : > { %v890_v49 = vrot.slane %v880_v37, 5  ;;  %v1047_v37 = vld [vmem:[%s2435_s12] sm:$0x2] }
  0xdb   : > { %v892_v50 = vrot.slane %v881_v38, 4  ;;  %v1048_v38 = vld [vmem:[%s2435_s12 + $0x2] sm:$0x2] }
  0xdc   : > { %v891_v5 = vsel %vm563_vm3, %v890_v49, %v889_v1  ;;  %v824_v49 = vunpack.c.l.b16 %v2511_v3  ;;  %v2329_v3 = vmov -inf  }
  0xdd   : > { %v893_v6 = vsel %vm566_vm4, %v892_v50, %v891_v5  ;;  %v825_v50 = vunpack.c.l.b16 %v2513_v4  ;;  %483 = vst.msk [vmem:[#allocation2] sm:$0xff] %vm482_vm8, %v2329_v3 }
  0xde   : > { %v834_v59 = vrot.slane %v824_v49, 5  ;;  %484 = vst.msk [vmem:[#allocation2 + $0x8] sm:$0xff] %vm482_vm8, %v2329_v3 }
  0xdf   : > { %v870_v23 = vld.sshfl [vmem:[#allocation1] sm:$0xff pattern:$0x73625140]  ;;  %v836_v5 = vrot.slane %v825_v50, 4  ;;  %485 = vst.msk [vmem:[#allocation2 + $0x10] sm:$0xff] %vm482_vm8, %v2329_v3 }
  0xe0   : > { %v874_v24 = vld.sshfl [vmem:[#allocation1 + $0x20] sm:$0xff pattern:$0x73625140]  ;;  %962 = vst [vmem:[#allocation1] ss:$4 sm:$0xff] %v953_v21  ;;  %v882_v39 = vunpack.c.l.b16 %v870_v23 }
  0xe1   : > { %967 = vst [vmem:[#allocation1 + $0x20] ss:$4 sm:$0xff] %v954_v22  ;;  %v883_v41 = vunpack.c.l.b16 %v874_v24  ;;  %v1043_v23 = vld [vmem:[%s2422_s25 + $0x8] sm:$0x2] }
  0xe2   : > { %v894_v62 = vrot.slane %v882_v39, 3  ;;  %486 = vst.msk [vmem:[#allocation2 + $0x18] sm:$0xff] %vm482_vm8, %v2329_v3  ;;  %v1225_v50 = vld [vmem:[%s2456_s26 + $0x8] sm:$0x2]  ;;  %v1309_v3 = vld [vmem:[%s2422_s25 + $0x4] sm:$0x2] }
  0xe3   : > { %v896_v2 = vrot.slane %v883_v41, 2 }
  0xe4   : > { %v895_v9 = vsel %vm569_vm5, %v894_v62, %v893_v6  ;;  %v830_v62 = vrot.slane %v822_v45, 7  ;;  %v1224_v45 = vld [vmem:[%s2456_s26 + $0x6] sm:$0x2] }
  0xe5   : > { %v897_v10 = vsel %vm572_vm6, %v896_v2, %v895_v9  ;;  %v1049_v2 = vld [vmem:[%s2435_s12 + $0x4] sm:$0x2] }
  0xe6   : > { %v898_v12 = vpack.c.b16 %v897_v10, %v897_v10 }
  0xe7   : > { %v2531_v27 = vld.sshfl [vmem:[#allocation1] sm:$0xff pattern:$0x73625140] }
  0xe8   : > { %v2533_v28 = vld.sshfl [vmem:[#allocation1 + $0x20] sm:$0xff pattern:$0x73625140]  ;;  %971 = vst [vmem:[#allocation1] ss:$4 sm:$0xff] %v955_v25  ;;  %v903_v15 = vsel %vm491_vm7, %v898_v12, 0 }
  0xe9   : > { %975 = vst [vmem:[#allocation1 + $0x20] ss:$4 sm:$0xff] %v956_v26  ;;  %912 = vmatpush.bf16.xpose.msra.mxu2 %v903_v15  ;;  %v1044_v25 = vld [vmem:[%s2422_s25 + $0xa] sm:$0x2] }
  0xef   : > { %v2537_v31 = vld.sshfl [vmem:[#allocation1] sm:$0xff pattern:$0x73625140] }
  0xf0   : > { %v2539_v32 = vld.sshfl [vmem:[#allocation1 + $0x20] sm:$0xff pattern:$0x73625140]  ;;  %979 = vst [vmem:[#allocation1] ss:$4 sm:$0xff] %v957_v29 }
  0xf1   : > { %983 = vst [vmem:[#allocation1 + $0x20] ss:$4 sm:$0xff] %v958_v30 }
  0xf7   : > { %v2544_v57 = vld.sshfl [vmem:[#allocation1] sm:$0xff pattern:$0x73625140] }
  0xf8   : > { %v2546_v58 = vld.sshfl [vmem:[#allocation1 + $0x20] sm:$0xff pattern:$0x73625140]  ;;  %987 = vst [vmem:[#allocation1] ss:$4 sm:$0xff] %v959_v46  ;;  %v823_v46 = vunpack.c.l.b16 %v2507_v0  ;;  %v831_v0 = vsel %vm557_vm1, %v830_v62, %v829_v60 }
  0xf9   : > { %991 = vst [vmem:[#allocation1 + $0x20] ss:$4 sm:$0xff] %v960_v53  ;;  %v826_v53 = vunpack.c.l.b16 %v2517_v7  ;;  %v1227_v62 = vld [vmem:[%s2456_s26 + $0xc] sm:$0x2]  ;;  %v1307_v60 = vld [vmem:[%s2422_s25] sm:$0x2] }
  0xfa   : > { %v832_v1 = vrot.slane %v823_v46, 6 }
  0xfb   : > { %v838_v6 = vrot.slane %v826_v53, 3  ;;  %v1226_v53 = vld [vmem:[%s2456_s26 + $0xa] sm:$0x2] }
  0xfc   : > { %v833_v7 = vsel %vm560_vm2, %v832_v1, %v831_v0  ;;  %v1228_v1 = vld [vmem:[%s2456_s26 + $0xe] sm:$0x2] }
  0xfd   : > { %v835_v10 = vsel %vm563_vm3, %v834_v59, %v833_v7 }
  0xff   : > { %v2556_v14 = vld.sshfl [vmem:[#allocation1] sm:$0xff pattern:$0x73625140] }
 0x100   : > { %v2559_v16 = vld.sshfl [vmem:[#allocation1 + $0x20] sm:$0xff pattern:$0x73625140]  ;;  %1056 = vst [vmem:[#allocation1] ss:$4 sm:$0xff] %v1039_v11  ;;  %v837_v11 = vsel %vm566_vm4, %v836_v5, %v835_v10 }
 0x101   : > { %1061 = vst [vmem:[#allocation1 + $0x20] ss:$4 sm:$0xff] %v1040_v13  ;;  %v839_v12 = vsel %vm569_vm5, %v838_v6, %v837_v11  ;;  %v2330_v6 = vmov 0   ;;  %v2331_v11 = vmov 0.0  }
 0x102   : > { %v841_v13 = vsel %vm572_vm6, %v840_v8, %v839_v12  ;;  %2262 = vset.pattern.permute.xlu0 %v2330_v6  ;;  %2263 = vset.pattern.permute.xlu2 %v2330_v6  ;;  %v1310_v8 = vld [vmem:[%s2422_s25 + $0x6] sm:$0x2]  ;;  %488 = vst.msk [vmem:[#allocation3 + $0x8] sm:$0xff] %vm482_vm8, %v2331_v11  ;;  %v1311_v12 = vld [vmem:[%s2422_s25 + $0x8] sm:$0x2] }
 0x103   : > { %v842_v15 = vpack.c.b16 %v841_v13, %v841_v13  ;;  %2264 = vset.pattern.permute.xlu1 %v2330_v6  ;;  %487 = vst.msk [vmem:[#allocation3] sm:$0xff] %vm482_vm8, %v2331_v11  ;;  %v1312_v13 = vld [vmem:[%s2422_s25 + $0xa] sm:$0x2]  ;;  %v1318_v6 = vld [vmem:[%s2435_s12 + $0x6] sm:$0x2] }
 0x104   : > { %489 = vst.msk [vmem:[#allocation3 + $0x10] sm:$0xff] %vm482_vm8, %v2331_v11 }
 0x105   : > { %2192 = vmatmul.msk.bf16.vlgmr.msra.gmra.mxu2 %vm491_vm7, %v842_v15  ;;  %490 = vst.msk [vmem:[#allocation3 + $0x18] sm:$0xff] %vm482_vm8, %v2331_v11 }
 0x106   : > { %492 = vst.msk [vmem:[#allocation4] sm:$0xff] %vm491_vm7, %v2331_v11 }
 0x107   : > { %v2563_v19 = vld.sshfl [vmem:[#allocation1] sm:$0xff pattern:$0x73625140]  ;;  %493 = vst.msk [vmem:[#allocation4 + $0x8] sm:$0xff] %vm491_vm7, %v2331_v11 }
 0x108   : > { %v2565_v20 = vld.sshfl [vmem:[#allocation1 + $0x20] sm:$0xff pattern:$0x73625140]  ;;  %1065 = vst [vmem:[#allocation1] ss:$4 sm:$0xff] %v1041_v17 }
 0x109   : > { %1069 = vst [vmem:[#allocation1 + $0x20] ss:$4 sm:$0xff] %v1042_v18  ;;  %v1051_v17 = vld [vmem:[%s2435_s12 + $0x8] sm:$0x2]  ;;  %v1052_v18 = vld [vmem:[%s2435_s12 + $0xa] sm:$0x2] }
 0x10a   : > { %494 = vst.msk [vmem:[#allocation4 + $0x10] sm:$0xff] %vm491_vm7, %v2331_v11 }
 0x10b   : > { %495 = vst.msk [vmem:[#allocation4 + $0x18] sm:$0xff] %vm491_vm7, %v2331_v11  ;;  %v1319_v11 = vld [vmem:[%s2435_s12 + $0x8] sm:$0x2] }
 0x10d   : > { %v647_v21 = vpop.f32.mrf.mxu0 }
 0x10e   : > { %v2567_v22 = vmul.f32 0.35355338, %v647_v21 }
 0x10f   : > { %v2573_v26 = vld.sshfl [vmem:[#allocation1] sm:$0xff pattern:$0x73625140] }
 0x110   : > { %v653_v24 = vsel %vm491_vm7, %v2567_v22, -inf  ;;  %v2575_v29 = vld.sshfl [vmem:[#allocation1 + $0x20] sm:$0xff pattern:$0x73625140]  ;;  %1073 = vst [vmem:[#allocation1] ss:$4 sm:$0xff] %v1043_v23 }
 0x111   : > { %654 = vmax.xlane.f32.xlu0 %v653_v24  ;;  %1077 = vst [vmem:[#allocation1 + $0x20] ss:$4 sm:$0xff] %v1044_v25  ;;  %v1053_v24 = vld [vmem:[%s2435_s12 + $0xc] sm:$0x2]  ;;  %v1054_v25 = vld [vmem:[%s2435_s12 + $0xe] sm:$0x2] }
 0x115   : > { %v649_v30 = vpop.f32.mrf.mxu0 }
 0x117   : > { %v2579_v35 = vld.sshfl [vmem:[#allocation1] sm:$0xff pattern:$0x73625140] }
 0x118   : > { %v2581_v36 = vld.sshfl [vmem:[#allocation1 + $0x20] sm:$0xff pattern:$0x73625140]  ;;  %1081 = vst [vmem:[#allocation1] ss:$4 sm:$0xff] %v1045_v33 }
 0x119   : > { %1085 = vst [vmem:[#allocation1 + $0x20] ss:$4 sm:$0xff] %v1046_v34  ;;  %v1221_v34 = vld [vmem:[%s2456_s26] sm:$0x2] }
 0x11f   : > { %v2585_v39 = vld.sshfl [vmem:[#allocation1] sm:$0xff pattern:$0x73625140] }
 0x120   : > { %v2587_v41 = vld.sshfl [vmem:[#allocation1 + $0x20] sm:$0xff pattern:$0x73625140]  ;;  %1112 = vst [vmem:[#allocation1] ss:$4 sm:$0xff] %v1047_v37 }
 0x121   : > { %1117 = vst [vmem:[#allocation1 + $0x20] ss:$4 sm:$0xff] %v1048_v38  ;;  %v1222_v37 = vld [vmem:[%s2456_s26 + $0x2] sm:$0x2] }
 0x127   : > { %v2602_v4 = vld.sshfl [vmem:[#allocation1] sm:$0xff pattern:$0x73625140] }
 0x128   : > { %v2606_v9 = vld.sshfl [vmem:[#allocation1 + $0x20] sm:$0xff pattern:$0x73625140]  ;;  %1121 = vst [vmem:[#allocation1] ss:$4 sm:$0xff] %v1049_v2 }
 0x129   : > { %1125 = vst [vmem:[#allocation1 + $0x20] ss:$4 sm:$0xff] %v1050_v63  ;;  %v1308_v63 = vld [vmem:[%s2422_s25 + $0x2] sm:$0x2] }
 0x12f   : > { %v2617_v21 = vld.sshfl [vmem:[#allocation1] sm:$0xff pattern:$0x73625140] }
 0x130   : > { %v2619_v23 = vld.sshfl [vmem:[#allocation1 + $0x20] sm:$0xff pattern:$0x73625140]  ;;  %1129 = vst [vmem:[#allocation1] ss:$4 sm:$0xff] %v1051_v17 }
 0x131   : > { %1133 = vst [vmem:[#allocation1 + $0x20] ss:$4 sm:$0xff] %v1052_v18  ;;  %v1313_v18 = vld [vmem:[%s2422_s25 + $0xc] sm:$0x2] }
 0x137   : > { %v2623_v30 = vld.sshfl [vmem:[#allocation1] sm:$0xff pattern:$0x73625140] }
 0x138   : > { %v2625_v33 = vld.sshfl [vmem:[#allocation1 + $0x20] sm:$0xff pattern:$0x73625140]  ;;  %1137 = vst [vmem:[#allocation1] ss:$4 sm:$0xff] %v1053_v24 }
 0x139   : > { %1141 = vst [vmem:[#allocation1 + $0x20] ss:$4 sm:$0xff] %v1054_v25  ;;  %v1314_v24 = vld [vmem:[%s2422_s25 + $0xe] sm:$0x2] }
 0x13f   : > { %v2629_v38 = vld.sshfl [vmem:[#allocation1] sm:$0xff pattern:$0x73625140] }
 0x140   : > { %v2631_v43 = vld.sshfl [vmem:[#allocation1 + $0x20] sm:$0xff pattern:$0x73625140]  ;;  %1230 = vst [vmem:[#allocation1] ss:$4 sm:$0xff] %v1221_v34 }
 0x141   : > { %1235 = vst [vmem:[#allocation1 + $0x20] ss:$4 sm:$0xff] %v1222_v37  ;;  %v2675_v37 = vld [vmem:[#allocation2] sm:$0xff] }
 0x147   : > { %v2635_v46 = vld.sshfl [vmem:[#allocation1] sm:$0xff pattern:$0x73625140] }
 0x148   : > { %3130 = vst [vmem:[#allocation8_spill] sm:$0xff] %v2635_v46  ;;  %v2637_v49 = vld.sshfl [vmem:[#allocation1 + $0x20] sm:$0xff pattern:$0x73625140] }
 0x149   : > { %3131 = vst [vmem:[#allocation9_spill] sm:$0xff] %v2637_v49 }
 0x14a   : > { %1239 = vst [vmem:[#allocation1] ss:$4 sm:$0xff] %v1223_v44  ;;  %v1315_v44 = vld [vmem:[%s2435_s12] sm:$0x2] }
 0x14b   : > { %1243 = vst [vmem:[#allocation1 + $0x20] ss:$4 sm:$0xff] %v1224_v45  ;;  %v1316_v45 = vld [vmem:[%s2435_s12 + $0x2] sm:$0x2] }
 0x151   : > { %v2641_v55 = vld.sshfl [vmem:[#allocation1] sm:$0xff pattern:$0x73625140] }
 0x152   : > { %3132 = vst [vmem:[#allocation10_spill] sm:$0xff] %v2641_v55  ;;  %v2643_v61 = vld.sshfl [vmem:[#allocation1 + $0x20] sm:$0xff pattern:$0x73625140] }
 0x153   : > { %3133 = vst [vmem:[#allocation11_spill] sm:$0xff] %v2643_v61  ;;  %v1322_v61 = vld [vmem:[%s2435_s12 + $0xe] sm:$0x2] }
 0x154   : > { %1247 = vst [vmem:[#allocation1] ss:$4 sm:$0xff] %v1225_v50 }
 0x155   : > { %1251 = vst [vmem:[#allocation1 + $0x20] ss:$4 sm:$0xff] %v1226_v53 }
 0x15b   : > { %v2647_v59 = vld.sshfl [vmem:[#allocation1] sm:$0xff pattern:$0x73625140] }
 0x15c   : > { %3134 = vst [vmem:[#allocation12_spill] sm:$0xff] %v2647_v59  ;;  %v2649_v2 = vld.sshfl [vmem:[#allocation1 + $0x20] sm:$0xff pattern:$0x73625140] }
 0x15d   : > { %3135 = vst [vmem:[#allocation13_spill] sm:$0xff] %v2649_v2 }
 0x15e   : > { %1255 = vst [vmem:[#allocation1] ss:$4 sm:$0xff] %v1227_v62 }
 0x15f   : > { %1259 = vst [vmem:[#allocation1 + $0x20] ss:$4 sm:$0xff] %v1228_v1 }
 0x165   : > { %v2652_v5 = vld.sshfl [vmem:[#allocation1] sm:$0xff pattern:$0x73625140] }
 0x166   : > { %3136 = vst [vmem:[#allocation14_spill] sm:$0xff] %v2652_v5  ;;  %v2655_v0 = vld.sshfl [vmem:[#allocation1 + $0x20] sm:$0xff pattern:$0x73625140] }
 0x167   : > { %3137 = vst [vmem:[#allocation15_spill] sm:$0xff] %v2655_v0 }
 0x168   : > { %1324 = vst [vmem:[#allocation1] ss:$4 sm:$0xff] %v1307_v60 }
 0x169   : > { %1329 = vst [vmem:[#allocation1 + $0x20] ss:$4 sm:$0xff] %v1308_v63  ;;  %v1317_v63 = vld [vmem:[%s2435_s12 + $0x4] sm:$0x2] }
 0x16f   : > { %v1325_v7 = vld.sshfl [vmem:[#allocation1] sm:$0xff pattern:$0x73625140] }
 0x170   : > { %v1330_v10 = vld.sshfl [vmem:[#allocation1 + $0x20] sm:$0xff pattern:$0x73625140]  ;;  %1333 = vst [vmem:[#allocation1] ss:$4 sm:$0xff] %v1309_v3 }
 0x171   : > { %1337 = vst [vmem:[#allocation1 + $0x20] ss:$4 sm:$0xff] %v1310_v8 }
 0x177   : > { %v1334_v15 = vld.sshfl [vmem:[#allocation1] sm:$0xff pattern:$0x73625140] }
 0x178   : > { %v2667_v17 = vld.sshfl [vmem:[#allocation1 + $0x20] sm:$0xff pattern:$0x73625140]  ;;  %1341 = vst [vmem:[#allocation1] ss:$4 sm:$0xff] %v1311_v12  ;;  %v1358_v2 = vunpack.c.l.b16 %v1334_v15 }
 0x179   : > { %1345 = vst [vmem:[#allocation1 + $0x20] ss:$4 sm:$0xff] %v1312_v13 }
 0x17f   : > { %v1342_v25 = vld.sshfl [vmem:[#allocation1] sm:$0xff pattern:$0x73625140] }
 0x180   : > { %v2673_v34 = vld.sshfl [vmem:[#allocation1 + $0x20] sm:$0xff pattern:$0x73625140]  ;;  %1349 = vst [vmem:[#allocation1] ss:$4 sm:$0xff] %v1313_v18 }
 0x181   : > { %1353 = vst [vmem:[#allocation1 + $0x20] ss:$4 sm:$0xff] %v1314_v24  ;;  %v1320_v18 = vld [vmem:[%s2435_s12 + $0xa] sm:$0x2] }
 0x184   : > { %v655_v50 = vpop.xlane.xlu0 %654 }
 0x185   : > { %v2682_v62 = vmax.f32 %v2675_v37, %v655_v50 }
 0x187   : > { %v2679_v53 = vld.sshfl [vmem:[#allocation1] sm:$0xff pattern:$0x73625140]  ;;  %770 = vst.msk [vmem:[#allocation2] sm:$0xff] %vm482_vm8, %v2682_v62  ;;  %662 = vperm.xlu0 %2262, %v2682_v62  }
 0x188   : > { %v2684_v1 = vld.sshfl [vmem:[#allocation1 + $0x20] sm:$0xff pattern:$0x73625140]  ;;  %1380 = vst [vmem:[#allocation1] ss:$4 sm:$0xff] %v1315_v44  ;;  %v1356_v44 = vunpack.c.l.b16 %v1325_v7 }
 0x189   : > { %1385 = vst [vmem:[#allocation1 + $0x20] ss:$4 sm:$0xff] %v1316_v45  ;;  %v1357_v45 = vunpack.c.l.b16 %v1330_v10 }
 0x18a   : > { %v1364_v59 = vrot.slane %v1356_v44, 3 }
 0x18b   : > { %v1365_v55 = vrot.slane %v1357_v45, 2 }
 0x18d   : > { %v1366_v7 = vsel %vm554_vm0, %v1365_v55, %v1364_v59  ;;  %v1362_v59 = vunpack.c.l.b16 %v2679_v53 }
 0x18f   : > { %v1381_v3 = vld.sshfl [vmem:[#allocation1] sm:$0xff pattern:$0x73625140] }
 0x190   : > { %v1386_v8 = vld.sshfl [vmem:[#allocation1 + $0x20] sm:$0xff pattern:$0x73625140]  ;;  %1389 = vst [vmem:[#allocation1] ss:$4 sm:$0xff] %v1317_v63  ;;  %v1412_v12 = vunpack.c.l.b16 %v1381_v3 }
 0x191   : > { %1393 = vst [vmem:[#allocation1 + $0x20] ss:$4 sm:$0xff] %v1318_v6  ;;  %v1413_v13 = vunpack.c.l.b16 %v1386_v8  ;;  %v1321_v6 = vld [vmem:[%s2435_s12 + $0xc] sm:$0x2]  ;;  %v1367_v8 = vrot.slane %v1358_v2, 1  ;;  %v1361_v2 = vunpack.c.l.b16 %v2673_v34 }
 0x192   : > { %v1420_v0 = vrot.slane %v1412_v12, 3  ;;  %v1360_v12 = vunpack.c.l.b16 %v1342_v25 }
 0x193   : > { %v1421_v5 = vrot.slane %v1413_v13, 2  ;;  %v1359_v13 = vunpack.c.l.b16 %v2667_v17 }
 0x195   : > { %v1422_v3 = vsel %vm554_vm0, %v1421_v5, %v1420_v0  ;;  %v1370_v0 = vrot.slane %v1360_v12, 7 }
 0x197   : > { %v1390_v24 = vld.sshfl [vmem:[#allocation1] sm:$0xff pattern:$0x73625140] }
 0x198   : > { %v1394_v50 = vld.sshfl [vmem:[#allocation1 + $0x20] sm:$0xff pattern:$0x73625140]  ;;  %1397 = vst [vmem:[#allocation1] ss:$4 sm:$0xff] %v1319_v11  ;;  %v1414_v60 = vunpack.c.l.b16 %v1390_v24  ;;  %v1368_v24 = vsel %vm557_vm1, %v1367_v8, %v1366_v7 }
 0x199   : > { %1401 = vst [vmem:[#allocation1 + $0x20] ss:$4 sm:$0xff] %v1320_v18  ;;  %v1415_v46 = vunpack.c.l.b16 %v1394_v50  ;;  %v1369_v55 = vsel %vm560_vm2, %v1359_v13, %v1368_v24 }
 0x19a   : > { %v1423_v63 = vrot.slane %v1414_v60, 1  ;;  %v1371_v17 = vsel %vm563_vm3, %v1370_v0, %v1369_v55  ;;  %v726_v0 = vunpack.c.l.b16 %v2475_v42  ;;  %v725_v55 = vunpack.c.l.b16 %v2472_v40 }
 0x19c   : > { %v1424_v18 = vsel %vm557_vm1, %v1423_v63, %v1422_v3  ;;  %v1374_v3 = vrot.slane %v1362_v59, 5  ;;  %v733_v59 = vrot.slane %v726_v0, 7 }
 0x19d   : > { %v1425_v5 = vsel %vm560_vm2, %v1415_v46, %v1424_v18  ;;  %v1363_v46 = vunpack.c.l.b16 %v2684_v1  ;;  %v914_v1 = vpop.f32.mrf.mxu2 }
 0x19e   : > { %v2716_v24 = vmul.f32 0.35355338, %v914_v1 }
 0x19f   : > { %v1398_v49 = vld.sshfl [vmem:[#allocation1] sm:$0xff pattern:$0x73625140] }
 0x1a0   : > { %v1402_v10 = vld.sshfl [vmem:[#allocation1 + $0x20] sm:$0xff pattern:$0x73625140]  ;;  %1405 = vst [vmem:[#allocation1] ss:$4 sm:$0xff] %v1321_v6  ;;  %v1416_v11 = vunpack.c.l.b16 %v1398_v49 }
 0x1a1   : > { %1409 = vst [vmem:[#allocation1 + $0x20] ss:$4 sm:$0xff] %v1322_v61  ;;  %v1417_v15 = vunpack.c.l.b16 %v1402_v10  ;;  %v1372_v61 = vrot.slane %v1361_v2, 6 }
 0x1a2   : > { %v1426_v60 = vrot.slane %v1416_v11, 7  ;;  %v1376_v11 = vrot.slane %v1363_v46, 4 }
 0x1a3   : > { %v1428_v44 = vrot.slane %v1417_v15, 6  ;;  %v1373_v7 = vsel %vm566_vm4, %v1372_v61, %v1371_v17  ;;  %v730_v61 = vunpack.c.l.b16 %v2489_v52  ;;  %v734_v17 = vsel %vm554_vm0, %v733_v59, %v725_v55 }
 0x1a4   : > { %v1427_v49 = vsel %vm563_vm3, %v1426_v60, %v1425_v5  ;;  %v1375_v12 = vsel %vm569_vm5, %v1374_v3, %v1373_v7  ;;  %v921_v5 = vsel %vm491_vm7, %v2716_v24, -inf  ;;  %v1145_v7 = vunpack.c.l.b16 %v2606_v9 }
 0x1a5   : > { %v1429_v6 = vsel %vm566_vm4, %v1428_v44, %v1427_v49  ;;  %v1377_v13 = vsel %vm572_vm6, %v1376_v11, %v1375_v12  ;;  %922 = vmax.xlane.f32.xlu1 %v921_v5  ;;  %v916_v2 = vpop.f32.mrf.mxu2  ;;  %v727_v44 = vunpack.c.l.b16 %v2480_v47  ;;  %v728_v49 = vunpack.c.l.b16 %v2482_v48 }
 0x1a6   : > { %v1378_v60 = vpack.c.b16 %v1377_v13, %v1377_v13  ;;  %v741_v46 = vrot.slane %v730_v61, 3  ;;  %v1148_v11 = vunpack.c.l.b16 %v2623_v30  ;;  %v1150_v12 = vunpack.c.l.b16 %v2629_v38 }
 0x1a7   : > { %v1406_v25 = vld.sshfl [vmem:[#allocation1] sm:$0xff pattern:$0x73625140]  ;;  %v1151_v13 = vunpack.c.l.b16 %v2631_v43  ;;  %v1153_v1 = vrot.slane %v1145_v7, 1  ;;  %v1088_v59 = vunpack.c.l.b16 %v2563_v19 }
 0x1a8   : > { %v1410_v45 = vld.sshfl [vmem:[#allocation1 + $0x20] sm:$0xff pattern:$0x73625140]  ;;  %v1418_v50 = vunpack.c.l.b16 %v1406_v25  ;;  %v729_v25 = vunpack.c.l.b16 %v2487_v51  ;;  %v1158_v5 = vrot.slane %v1148_v11, 6  ;;  %v1162_v2 = vrot.slane %v1150_v12, 4 }
 0x1a9   : > { %v1419_v63 = vunpack.c.l.b16 %v1410_v45  ;;  %v731_v45 = vunpack.c.l.b16 %v2492_v54 }
 0x1aa   : > { %v1430_v34 = vrot.slane %v1418_v50, 5  ;;  %v732_v50 = vunpack.c.l.b16 %v2495_v56  ;;  %v739_v42 = vrot.slane %v729_v25, 4  ;;  %v1089_v25 = vunpack.c.l.b16 %v2565_v20 }
 0x1ab   : > { %v1432_v8 = vrot.slane %v1419_v63, 4  ;;  %v735_v63 = vrot.slane %v727_v44, 6  ;;  %v743_v40 = vrot.slane %v731_v45, 2  ;;  %v1093_v20 = vunpack.c.l.b16 %v2581_v36 }
 0x1ac   : > { %v1431_v10 = vsel %vm569_vm5, %v1430_v34, %v1429_v6  ;;  %v737_v6 = vrot.slane %v728_v49, 5  ;;  %v745_v34 = vrot.slane %v732_v50, 1  ;;  %v1096_v50 = vrot.slane %v1088_v59, 2 }
 0x1ad   : > { %v1433_v53 = vsel %vm572_vm6, %v1432_v8, %v1431_v10  ;;  %v736_v47 = vsel %vm557_vm1, %v735_v63, %v734_v17  ;;  %v1144_v8 = vunpack.c.l.b16 %v2602_v4  ;;  %v1146_v10 = vunpack.c.l.b16 %v2617_v21 }
 0x1ae   : > { %v1434_v18 = vpack.c.b16 %v1433_v53, %v1433_v53  ;;  %v738_v48 = vsel %vm560_vm2, %v737_v6, %v736_v47  ;;  %v1147_v53 = vunpack.c.l.b16 %v2619_v23  ;;  %v1097_v17 = vrot.slane %v1089_v25, 1 }
 0x1af   : > { %v740_v51 = vsel %vm563_vm3, %v739_v42, %v738_v48  ;;  %v1091_v6 = vunpack.c.l.b16 %v2575_v29  ;;  %v1090_v42 = vunpack.c.l.b16 %v2573_v26  ;;  %v1092_v47 = vunpack.c.l.b16 %v2579_v35 }
 0x1b0   : > { %v1439_v15 = vsel %vm491_vm7, %v1434_v18, 0  ;;  %v742_v52 = vsel %vm566_vm4, %v741_v46, %v740_v51  ;;  %v1149_v18 = vunpack.c.l.b16 %v2625_v33  ;;  %v1156_v4 = vrot.slane %v1147_v53, 7 }
 0x1b1   : > { %1448 = vmatpush.bf16.xpose.msrb.mxu0 %v1439_v15  ;;  %v744_v54 = vsel %vm569_vm5, %v743_v40, %v742_v52  ;;  %v1164_v33 = vrot.slane %v1151_v13, 3  ;;  %v1098_v46 = vsel %vm554_vm0, %v1097_v17, %v1096_v50  ;;  %v1100_v40 = vrot.slane %v1091_v6, 7  ;;  %v1456_v17 = vld [vmem:[#allocation2 + $0x18] sm:$0xff] }
 0x1b2   : > { %v746_v56 = vsel %vm572_vm6, %v745_v34, %v744_v54  ;;  %v1160_v21 = vrot.slane %v1149_v18, 5  ;;  %v1099_v19 = vsel %vm557_vm1, %v1090_v42, %v1098_v46  ;;  %v1102_v48 = vrot.slane %v1092_v47, 6 }
 0x1b3   : > { %v747_v3 = vpack.c.b16 %v746_v56, %v746_v56  ;;  %v1094_v26 = vunpack.c.l.b16 %v2585_v39  ;;  %v1104_v51 = vrot.slane %v1093_v20, 5  ;;  %v1095_v52 = vunpack.c.l.b16 %v2587_v41 }
 0x1b5   : > { %v753_v15 = vsel %vm751_vm9, %v747_v3, 0  ;;  %v1106_v54 = vrot.slane %v1094_v26, 4  ;;  %v1108_v56 = vrot.slane %v1095_v52, 3  ;;  %v1490_v26 = vld [vmem:[%s2456_s26 + $0x2] sm:$0x2] }
 0x1b6   : > { %762 = vmatpush.bf16.msra.mxu1 %v753_v15  ;;  %1503 = vst [vmem:[#allocation1 + $0x20] ss:$4 sm:$0xff] %v1490_v26  ;;  %v1492_v52 = vld [vmem:[%s2456_s26 + $0x6] sm:$0x2] }
 0x1b8   : > { %2196 = vmatmul.msk.bf16.vlgmr.msrb.gmra.mxu0 %vm491_vm7, %v1378_v60  ;;  %v1152_v60 = vrot.slane %v1144_v8, 2 }
 0x1ba   : > { %v1154_v9 = vsel %vm554_vm0, %v1153_v1, %v1152_v60  ;;  %v994_v1 = vunpack.c.l.b16 %v2531_v27 }
 0x1bb   : > { %v1155_v23 = vsel %vm557_vm1, %v1146_v10, %v1154_v9  ;;  %v2775_v10 = vld [vmem:[#allocation2 + $0x8] sm:$0xff]  ;;  %v997_v9 = vunpack.c.l.b16 %v2539_v32 }
 0x1bc   : > { %v1157_v30 = vsel %vm560_vm2, %v1156_v4, %v1155_v23  ;;  %v996_v4 = vunpack.c.l.b16 %v2537_v31  ;;  %v998_v23 = vunpack.c.l.b16 %v2544_v57  ;;  %v1001_v31 = vunpack.c.l.b16 %v2559_v16 }
 0x1bd   : > { %v1159_v38 = vsel %vm563_vm3, %v1158_v5, %v1157_v30  ;;  %v995_v5 = vunpack.c.l.b16 %v2533_v28  ;;  %v999_v30 = vunpack.c.l.b16 %v2546_v58 }
 0x1be   : > { %v1161_v0 = vsel %vm566_vm4, %v1160_v21, %v1159_v38  ;;  %v1002_v21 = vrot.slane %v994_v1, 1  ;;  %v1006_v38 = vrot.slane %v997_v9, 6  ;;  %v1008_v27 = vrot.slane %v998_v23, 5 }
 0x1bf   : > { %v1163_v43 = vsel %vm569_vm5, %v1162_v2, %v1161_v0  ;;  %v1004_v2 = vrot.slane %v996_v4, 7  ;;  %v1000_v0 = vunpack.c.l.b16 %v2556_v14  ;;  %v1010_v32 = vrot.slane %v999_v30, 4 }
 0x1c0   : > { %v1165_v44 = vsel %vm572_vm6, %v1164_v33, %v1163_v43  ;;  %v1003_v33 = vsel %vm554_vm0, %v995_v5, %v1002_v21  ;;  %v1014_v59 = vrot.slane %v1001_v31, 2 }
 0x1c1   : > { %v1166_v55 = vpack.c.b16 %v1165_v44, %v1165_v44  ;;  %v1005_v43 = vsel %vm557_vm1, %v1004_v2, %v1003_v33 }
 0x1c2   : > { %v1007_v28 = vsel %vm560_vm2, %v1006_v38, %v1005_v43 }
 0x1c3   : > { %v1171_v49 = vsel %vm491_vm7, %v1166_v55, 0  ;;  %v1009_v57 = vsel %vm563_vm3, %v1008_v27, %v1007_v28 }
 0x1c4   : > { %1180 = vmatpush.bf16.xpose.msrb.mxu1 %v1171_v49  ;;  %v1012_v49 = vrot.slane %v1000_v0, 3  ;;  %v1011_v58 = vsel %vm566_vm4, %v1010_v32, %v1009_v57 }
 0x1c6   : > { %v1013_v25 = vsel %vm569_vm5, %v1012_v49, %v1011_v58 }
 0x1f9   : > { %v663_v61 = vpop.permute.xlu0 %662 }
 0x1fa   : > { %v665_v45 = vsub.f32 %v2567_v22, %v663_v61  ;;  %v1101_v22 = vsel %vm560_vm2, %v1100_v40, %v1099_v19  ;;  %v1015_v61 = vsel %vm572_vm6, %v1014_v59, %v1013_v25 }
 0x1fb   : > { %v1103_v35 = vsel %vm563_vm3, %v1102_v48, %v1101_v22  ;;  %v1016_v16 = vpack.c.b16 %v1015_v61, %v1015_v61 }
 0x1fc   : > { %v666_v63 = vmul.f32 1.442695, %v665_v45  ;;  %v1105_v36 = vsel %vm566_vm4, %v1104_v51, %v1103_v35  ;;  %v1491_v51 = vld [vmem:[%s2456_s26 + $0x4] sm:$0x2] }
 0x1fd   : > { %v1107_v3 = vsel %vm569_vm5, %v1106_v54, %v1105_v36  ;;  %v1021_v45 = vsel %vm751_vm9, %v1016_v16, 0  ;;  %v1504_v54 = vld.sshfl [vmem:[#allocation1 + $0x20] sm:$0xff pattern:$0x73625140] }
 0x1fe   : > { %2265 = vpow2.f32 %v666_v63  ;;  %v1109_v8 = vsel %vm572_vm6, %v1108_v56, %v1107_v3  ;;  %1030 = vmatpush.bf16.msra.mxu3 %v1021_v45  ;;  %1511 = vst [vmem:[#allocation1 + $0x20] ss:$4 sm:$0xff] %v1492_v52  ;;  %v1493_v56 = vld [vmem:[%s2456_s26 + $0x8] sm:$0x2]  ;;  %v1494_v3 = vld [vmem:[%s2456_s26 + $0xa] sm:$0x2]  ;;  %v1531_v1 = vunpack.c.l.b16 %v1504_v54 }
 0x1ff   : > { %v1110_v7 = vpack.c.b16 %v1109_v8, %v1109_v8 }
 0x200   : > { %v1539_v9 = vrot.slane %v1531_v1, 2  ;;  %v3141_v1 = vld [vmem:[#allocation11_spill] sm:$0xff] }
 0x204   : > { %v2762_v34 = vpop.eup %2265 }
 0x205   : > { %v683_v29 = vpack.c.bf16 %v2762_v34, %v2762_v34  ;;  %v670_v36 = vsel %vm491_vm7, %v2762_v34, 0.0 }
 0x207   : > { %2191 = vmatmul.msk.bf16.vlgmr.msra.gmra.mxu1 %vm491_vm7, %v683_v29  ;;  %v1489_v29 = vld [vmem:[%s2456_s26] sm:$0x2] }
 0x208   : > { %1498 = vst [vmem:[#allocation1] ss:$4 sm:$0xff] %v1489_v29 }
 0x20f   : > { %v1499_v35 = vld.sshfl [vmem:[#allocation1] sm:$0xff pattern:$0x73625140] }
 0x210   : > { %1507 = vst [vmem:[#allocation1] ss:$4 sm:$0xff] %v1491_v51 }
 0x217   : > { %2194 = vmatmul.msk.bf16.vlgmr.msrb.gmra.mxu1 %vm491_vm7, %v1110_v7  ;;  %v1508_v8 = vld.sshfl [vmem:[#allocation1] sm:$0xff pattern:$0x73625140] }
 0x218   : > { %v923_v39 = vpop.xlane.xlu1 %922  ;;  %v1512_v7 = vld.sshfl [vmem:[#allocation1 + $0x20] sm:$0xff pattern:$0x73625140]  ;;  %1515 = vst [vmem:[#allocation1] ss:$4 sm:$0xff] %v1493_v56  ;;  %v1532_v4 = vunpack.c.l.b16 %v1508_v8  ;;  %v668_v56 = vld [vmem:[#allocation3] sm:$0xff] }
 0x219   : > { %v2778_v53 = vmax.f32 %v2775_v10, %v923_v39  ;;  %1519 = vst [vmem:[#allocation1 + $0x20] ss:$4 sm:$0xff] %v1494_v3  ;;  %v1495_v39 = vld [vmem:[%s2456_s26 + $0xc] sm:$0x2]  ;;  %v1533_v23 = vunpack.c.l.b16 %v1512_v7 }
 0x21a   : > { %v1541_v34 = vrot.slane %v1532_v4, 1  ;;  %v1265_v4 = vunpack.c.l.b16 %v3141_v1  ;;  %v1213_v1 = vld [vmem:[#allocation4 + $0x10] sm:$0xff] }
 0x21b   : > { %v925_v41 = vsub.f32 %v2775_v10, %v2778_v53  ;;  %1038 = vst.msk [vmem:[#allocation2 + $0x8] sm:$0xff] %vm482_vm8, %v2778_v53 }
 0x235   : > { %v1450_v11 = vpop.f32.mrf.mxu0 }
 0x236   : > { %v2784_v18 = vmul.f32 0.35355338, %v1450_v11  ;;  %v1496_v11 = vld [vmem:[%s2456_s26 + $0xe] sm:$0x2] }
 0x238   : > { %v1457_v12 = vsel %vm491_vm7, %v2784_v18, -inf }
 0x239   : > { %1458 = vmax.xlane.f32.xlu2 %v1457_v12  ;;  %v1516_v12 = vld.sshfl [vmem:[#allocation1] sm:$0xff pattern:$0x73625140] }
 0x23a   : > { %1523 = vst [vmem:[#allocation1] ss:$4 sm:$0xff] %v1495_v39  ;;  %v1534_v21 = vunpack.c.l.b16 %v1516_v12 }
 0x23c   : > { %v1544_v0 = vrot.slane %v1534_v21, 7  ;;  %v3142_v21 = vld [vmem:[#allocation10_spill] sm:$0xff] }
 0x23d   : > { %v1452_v15 = vpop.f32.mrf.mxu0 }
 0x23e   : > { %v1520_v15 = vld.sshfl [vmem:[#allocation1 + $0x20] sm:$0xff pattern:$0x73625140] }
 0x23f   : > { %1527 = vst [vmem:[#allocation1 + $0x20] ss:$4 sm:$0xff] %v1496_v11  ;;  %v1535_v2 = vunpack.c.l.b16 %v1520_v15  ;;  %v3140_v15 = vld [vmem:[#allocation9_spill] sm:$0xff] }
 0x241   : > { %v1524_v33 = vld.sshfl [vmem:[#allocation1] sm:$0xff pattern:$0x73625140]  ;;  %v1546_v31 = vrot.slane %v1535_v2, 6 }
 0x242   : > { %v1536_v27 = vunpack.c.l.b16 %v1524_v33 }
 0x244   : > { %v1548_v49 = vrot.slane %v1536_v27, 5 }
 0x246   : > { %v1528_v43 = vld.sshfl [vmem:[#allocation1 + $0x20] sm:$0xff pattern:$0x73625140] }
 0x247   : > { %v1537_v28 = vunpack.c.l.b16 %v1528_v43  ;;  %v3145_v43 = vld [vmem:[#allocation14_spill] sm:$0xff] }
 0x248   : > { %v1268_v27 = vunpack.c.l.b16 %v3145_v43 }
 0x249   : > { %v1550_v58 = vrot.slane %v1537_v28, 4  ;;  %v3146_v28 = vld [vmem:[#allocation15_spill] sm:$0xff] }
 0x251   : > { %930 = vperm.xlu2 %2263, %v2778_v53  }
 0x284   : > { %v2789_v13 = vpop.f32.mrf.mxu1 }
 0x28c   : > { %v766_v60 = vpop.f32.mrf.mxu1 }
 0x28d   : > { %v1530_v60 = vunpack.c.l.b16 %v1499_v35  ;;  %v3138_v35 = vsub.f32 %v2675_v37, %v2682_v62  ;;  %v3139_v37 = vld [vmem:[#allocation8_spill] sm:$0xff] }
 0x28e   : > { %v1262_v62 = vunpack.c.l.b16 %v3139_v37 }
 0x28f   : > { %v1538_v5 = vrot.slane %v1530_v60, 3  ;;  %v658_v10 = vmul.f32 1.442695, %v3138_v35  ;;  %v1263_v60 = vunpack.c.l.b16 %v3140_v15 }
 0x291   : > { %v1540_v30 = vsel %vm554_vm0, %v1539_v9, %v1538_v5  ;;  %v1270_v5 = vrot.slane %v1262_v62, 2  ;;  %v1271_v9 = vrot.slane %v1263_v60, 1 }
 0x292   : > { %v1542_v38 = vsel %vm557_vm1, %v1541_v34, %v1540_v30  ;;  %v1264_v34 = vunpack.c.l.b16 %v3142_v21  ;;  %v3144_v30 = vld [vmem:[#allocation13_spill] sm:$0xff] }
 0x293   : > { %v1267_v33 = vunpack.c.l.b16 %v3144_v30 }
 0x294   : > { %v1182_v44 = vpop.f32.mrf.mxu1 }
 0x295   : > { %v2802_v55 = vmul.f32 0.35355338, %v1182_v44  ;;  %v1543_v44 = vsel %vm560_vm2, %v1533_v23, %v1542_v38  ;;  %v3143_v23 = vld [vmem:[#allocation12_spill] sm:$0xff]  ;;  %v1272_v38 = vsel %vm554_vm0, %v1271_v9, %v1270_v5 }
 0x296   : > { %v1545_v32 = vsel %vm563_vm3, %v1544_v0, %v1543_v44  ;;  %v1266_v2 = vunpack.c.l.b16 %v3143_v23  ;;  %v1274_v0 = vrot.slane %v1265_v4, 7  ;;  %v1273_v44 = vsel %vm557_vm1, %v1264_v34, %v1272_v38  ;;  %v676_v23 = vld [vmem:[#allocation4] sm:$0xff] }
 0x297   : > { %v1189_v14 = vsel %vm491_vm7, %v2802_v55, -inf  ;;  %v1547_v57 = vsel %vm566_vm4, %v1546_v31, %v1545_v32  ;;  %v1269_v32 = vunpack.c.l.b16 %v3146_v28 }
 0x298   : > { %1190 = vmax.xlane.f32.xlu1 %v1189_v14  ;;  %v1549_v59 = vsel %vm569_vm5, %v1548_v49, %v1547_v57  ;;  %v1276_v31 = vrot.slane %v1266_v2, 6  ;;  %v1275_v57 = vsel %vm560_vm2, %v1274_v0, %v1273_v44  ;;  %v1278_v49 = vrot.slane %v1267_v33, 5  ;;  %v945_v0 = vld [vmem:[#allocation4 + $0x8] sm:$0xff] }
 0x299   : > { %v1551_v14 = vsel %vm572_vm6, %v1550_v58, %v1549_v59  ;;  %v1280_v59 = vrot.slane %v1268_v27, 4 }
 0x29a   : > { %v1552_v25 = vpack.c.b16 %v1551_v14, %v1551_v14  ;;  %v1277_v58 = vsel %vm563_vm3, %v1276_v31, %v1275_v57  ;;  %vm1884_vm3 = vcmask 58369  }
 0x29b   : > { %v1279_v14 = vsel %vm566_vm4, %v1278_v49, %v1277_v58  ;;  %vm1885_vm4 = vsmask.f32 1280 }
 0x29c   : > { %v1184_v50 = vpop.f32.mrf.mxu1  ;;  %v1557_v61 = vsel %vm751_vm9, %v1552_v25, 0  ;;  %v1282_v25 = vrot.slane %v1269_v32, 3 }
 0x29d   : > { %1566 = vmatpush.bf16.msrb.mxu2 %v1557_v61  ;;  %v1281_v61 = vsel %vm569_vm5, %v1280_v59, %v1279_v14 }
 0x2ac   : > { %v1459_v63 = vpop.xlane.xlu2 %1458 }
 0x2ad   : > { %v1460_v6 = vmax.f32 %v1456_v17, %v1459_v63 }
 0x2af   : > { %1574 = vst.msk [vmem:[#allocation2 + $0x18] sm:$0xff] %vm482_vm8, %v1460_v6  ;;  %1466 = vperm.xlu2 %2263, %v1460_v6   ;;  %v1461_v48 = vsub.f32 %v1456_v17, %v1460_v6  ;;  %v1188_v17 = vld [vmem:[#allocation2 + $0x10] sm:$0xff] }
 0x2b1   : > { %v1462_v22 = vmul.f32 1.442695, %v1461_v48 }
 0x2b4   : > { %v931_v42 = vpop.permute.xlu2 %930 }
 0x2b5   : > { %v933_v46 = vsub.f32 %v2716_v24, %v931_v42 }
 0x2b7   : > { %v934_v47 = vmul.f32 1.442695, %v933_v46 }
 0x2b9   : > { %2267 = vpow2.f32 %v934_v47 }
 0x2ba   : > { %2269 = vpow2.f32 %v1462_v22  ;;  %v937_v22 = vld [vmem:[#allocation3 + $0x8] sm:$0xff] }
 0x2bf   : > { %v2268_v40 = vpop.eup %2267 }
 0x2c0   : > { %v939_v19 = vsel %vm491_vm7, %v2268_v40, 0.0  ;;  %v952_v20 = vpack.c.bf16 %v2268_v40, %v2268_v40  ;;  %v2817_v24 = vpop.eup %2269 }
 0x2c1   : > { %940 = vadd.xlane.f32.xlu0 %v939_v19 }
 0x2c2   : > { %2193 = vmatmul.msk.bf16.vlgmr.msra.gmra.mxu3 %vm491_vm7, %v952_v20 }
 0x2d5   : > { %1484 = vperm.xlu0 %2262, %v2817_v24  }
 0x2d8   : > { %671 = vadd.xlane.f32.xlu2 %v670_v36 }
 0x309   : > { %v1467_v16 = vpop.permute.xlu2 %1466 }
 0x30a   : > { %v1469_v45 = vsub.f32 %v2784_v18, %v1467_v16  ;;  %v926_v18 = vmul.f32 1.442695, %v925_v41  ;;  %v1283_v16 = vsel %vm572_vm6, %v1282_v25, %v1281_v61 }
 0x30b   : > { %v1191_v63 = vpop.xlane.xlu1 %1190 }
 0x30c   : > { %v1470_v50 = vmul.f32 1.442695, %v1469_v45  ;;  %v1192_v6 = vmax.f32 %v1188_v17, %v1191_v63  ;;  %v1284_v45 = vpack.c.b16 %v1283_v16, %v1283_v16 }
 0x30e   : > { %2271 = vpow2.f32 %v1470_v50  ;;  %1306 = vst.msk [vmem:[#allocation2 + $0x10] sm:$0xff] %vm482_vm8, %v1192_v6  ;;  %1198 = vperm.xlu1 %2264, %v1192_v6   ;;  %v1193_v40 = vsub.f32 %v1188_v17, %v1192_v6  ;;  %v1289_v50 = vsel %vm751_vm9, %v1284_v45, 0  ;;  %v1473_v6 = vld [vmem:[#allocation3 + $0x18] sm:$0xff] }
 0x30f   : > { %1298 = vmatpush.bf16.msrb.mxu3 %v1289_v50 }
 0x310   : > { %v1194_v19 = vmul.f32 1.442695, %v1193_v40 }
 0x312   : > { %2273 = vpow2.f32 %v1194_v19 }
 0x313   : > { %2275 = vpow2.f32 %v926_v18 }
 0x314   : > { %v2272_v42 = vpop.eup %2271 }
 0x315   : > { %v1475_v46 = vsel %vm491_vm7, %v2272_v42, 0.0  ;;  %v1488_v47 = vpack.c.bf16 %v2272_v42, %v2272_v42 }
 0x316   : > { %1476 = vadd.xlane.f32.xlu2 %v1475_v46  ;;  %v1474_v46 = vmul.f32 %v2817_v24, %v1473_v6 }
 0x317   : > { %2197 = vmatmul.msk.bf16.vlgmr.msrb.gmra.mxu2 %vm491_vm7, %v1488_v47 }
 0x318   : > { %v2843_v20 = vpop.eup %2273 }
 0x319   : > { %v2846_v48 = vpop.eup %2275 }
 0x31a   : > { %v938_v29 = vmul.f32 %v2846_v48, %v937_v22 }
 0x32e   : > { %1216 = vperm.xlu2 %2263, %v2843_v20  }
 0x334   : > { %v941_v26 = vpop.xlane.xlu0 %940 }
 0x335   : > { %v942_v51 = vadd.f32 %v941_v26, %v938_v29  ;;  %v1481_v26 = vld [vmem:[#allocation4 + $0x18] sm:$0xff] }
 0x337   : > { %943 = vst.msk [vmem:[#allocation3 + $0x8] sm:$0xff] %vm482_vm8, %v942_v51 }
 0x33e   : > { %v1690_v53 = vld [vmem:[#allocation3 + $0x8] sm:$0xff] }
 0x33f   : > { %2277 = vrcp.f32 %v1690_v53 }
 0x340   : > { %2279 = vpow2.f32 %v658_v10 }
 0x345   : > { %v2278_v41 = vpop.eup %2277  ;;  %v2853_v52 = vpop.f32.mrf.mxu3 }
 0x346   : > { %v1692_v54 = vmul.f32 %v2278_v41, %v1690_v53  ;;  %v2855_v36 = vpop.eup %2279 }
 0x347   : > { %v669_v8 = vmul.f32 %v2855_v36, %v668_v56 }
 0x348   : > { %v1693_v3 = vsub.f32 2.0, %v1692_v54 }
 0x34a   : > { %v1694_v7 = vmul.f32 %v2278_v41, %v1693_v3 }
 0x34b   : > { %v672_v39 = vpop.xlane.xlu2 %671 }
 0x34c   : > { %v673_v11 = vadd.f32 %v672_v39, %v669_v8  ;;  %1698 = vperm.xlu0 %2262, %v1694_v7  }
 0x34d   : > { %v1034_v12 = vpop.f32.mrf.mxu3 }
 0x34e   : > { %675 = vst.msk [vmem:[#allocation3] sm:$0xff] %vm482_vm8, %v673_v11  ;;  %v1205_v12 = vld [vmem:[#allocation3 + $0x10] sm:$0xff] }
 0x34f   : > { %v1206_v37 = vmul.f32 %v2843_v20, %v1205_v12  ;;  %v1675_v12 = vld [vmem:[%s2899_s30 + $0x6] sm:$0x1] }
 0x355   : > { %v1578_v3 = vld [vmem:[#allocation3] sm:$0xff] }
 0x380   : > { %v1199_v17 = vpop.permute.xlu1 %1198 }
 0x381   : > { %v1201_v63 = vsub.f32 %v2802_v55, %v1199_v17  ;;  %v1485_v55 = vpop.permute.xlu0 %1484 }
 0x382   : > { %v1487_v51 = vmul.f32 %v1485_v55, %v1481_v26 }
 0x383   : > { %v1202_v42 = vmul.f32 1.442695, %v1201_v63 }
 0x385   : > { %2281 = vpow2.f32 %v1202_v42 }
 0x389   : > { %v1477_v47 = vpop.xlane.xlu2 %1476 }
 0x38a   : > { %v1478_v40 = vadd.f32 %v1477_v47, %v1474_v46  ;;  %v2332_v46 = vmov 857870592  }
 0x38b   : > { %v2282_v19 = vpop.eup %2281  ;;  %v1624_v47 = vunpack.c.l.s4 %v2332_v46 }
 0x38c   : > { %1479 = vst.msk [vmem:[#allocation3 + $0x18] sm:$0xff] %vm482_vm8, %v1478_v40  ;;  %v1207_v18 = vsel %vm491_vm7, %v2282_v19, 0.0  ;;  %v1220_v22 = vpack.c.bf16 %v2282_v19, %v2282_v19 }
 0x38d   : > { %1208 = vadd.xlane.f32.xlu1 %v1207_v18 }
 0x38e   : > { %2195 = vmatmul.msk.bf16.vlgmr.msrb.gmra.mxu3 %vm491_vm7, %v1220_v22 }
 0x391   : > { %v1217_v4 = vpop.permute.xlu2 %1216 }
 0x392   : > { %v1219_v5 = vmul.f32 %v1217_v4, %v1213_v1  ;;  %v1678_v1 = vld [vmem:[%s2899_s30 + $0x8] sm:$0x1] }
 0x393   : > { %v1911_v29 = vld [vmem:[#allocation3 + $0x18] sm:$0xff] }
 0x394   : > { %2283 = vrcp.f32 %v1911_v29 }
 0x395   : > { %2285 = vrcp.f32 %v1578_v3 }
 0x39a   : > { %v2284_v35 = vpop.eup %2283  ;;  %v1568_v10 = vpop.f32.mrf.mxu2 }
 0x39b   : > { %v1572_v53 = vadd.f32 %v1568_v10, %v1487_v51  ;;  %v1913_v24 = vmul.f32 %v2284_v35, %v1911_v29  ;;  %v2286_v8 = vpop.eup %2285  ;;  %v2903_v10 = vunpack.c.0.s8 %v1624_v47 }
 0x39c   : > { %v1580_v7 = vmul.f32 %v2286_v8, %v1578_v3  ;;  %v1672_v3 = vld [vmem:[%s2899_s30 + $0x4] sm:$0x1] }
 0x39d   : > { %1573 = vst.msk [vmem:[#allocation4 + $0x18] sm:$0xff] %vm491_vm7, %v1572_v53  ;;  %v1914_v41 = vsub.f32 2.0, %v1913_v24  ;;  %v1666_v53 = vld [vmem:[%s2899_s30] sm:$0x1] }
 0x39e   : > { %v1581_v39 = vsub.f32 2.0, %v1580_v7 }
 0x39f   : > { %v1915_v54 = vmul.f32 %v2284_v35, %v1914_v41 }
 0x3a0   : > { %v1582_v11 = vmul.f32 %v2286_v8, %v1581_v39 }
 0x3a1   : > { %1919 = vperm.xlu0 %2262, %v1915_v54  }
 0x3a2   : > { %v1570_v56 = vpop.f32.mrf.mxu2 }
 0x3a3   : > { %v1669_v56 = vld [vmem:[%s2899_s30 + $0x2] sm:$0x1] }
 0x3a6   : > { %679 = vperm.xlu1 %2264, %v2855_v36  }
 0x3ae   : > { %948 = vperm.xlu1 %2264, %v2846_v48  }
 0x3b6   : > { %1586 = vperm.xlu1 %2264, %v1582_v11  }
 0x3be   : > { %v1699_v49 = vpop.permute.xlu0 %1698 }
 0x400   : > { %v1209_v62 = vpop.xlane.xlu1 %1208 }
 0x401   : > { %v1210_v15 = vadd.f32 %v1209_v62, %v1206_v37 }
 0x403   : > { %1211 = vst.msk [vmem:[#allocation3 + $0x10] sm:$0xff] %vm482_vm8, %v1210_v15 }
 0x40a   : > { %v1800_v60 = vld [vmem:[#allocation3 + $0x10] sm:$0xff] }
 0x40b   : > { %2287 = vrcp.f32 %v1800_v60 }
 0x411   : > { %v2288_v36 = vpop.eup %2287  ;;  %v1300_v9 = vpop.f32.mrf.mxu3 }
 0x412   : > { %v1304_v21 = vadd.f32 %v1300_v9, %v1219_v5  ;;  %v1802_v34 = vmul.f32 %v2288_v36, %v1800_v60 }
 0x414   : > { %1305 = vst.msk [vmem:[#allocation4 + $0x10] sm:$0xff] %vm491_vm7, %v1304_v21  ;;  %v1803_v48 = vsub.f32 2.0, %v1802_v34  ;;  %v1681_v21 = vld [vmem:[%s2899_s30 + $0xa] sm:$0x1] }
 0x416   : > { %v1804_v2 = vmul.f32 %v2288_v36, %v1803_v48 }
 0x418   : > { %v680_v20 = vpop.permute.xlu1 %679  ;;  %1808 = vperm.xlu2 %2263, %v1804_v2  }
 0x419   : > { %v682_v30 = vmul.f32 %v680_v20, %v676_v23  ;;  %v1302_v33 = vpop.f32.mrf.mxu3  ;;  %v1684_v20 = vld [vmem:[%s2899_s30 + $0xc] sm:$0x1] }
 0x41b   : > { %v768_v38 = vadd.f32 %v2789_v13, %v682_v30 }
 0x41d   : > { %769 = vst.msk [vmem:[#allocation4] sm:$0xff] %vm491_vm7, %v768_v38  ;;  %v1687_v38 = vld [vmem:[%s2899_s30 + $0xe] sm:$0x1] }
 0x420   : > { %v949_v43 = vpop.permute.xlu1 %948 }
 0x421   : > { %v951_v27 = vmul.f32 %v949_v43, %v945_v0 }
 0x423   : > { %v1036_v44 = vadd.f32 %v2853_v52, %v951_v27 }
 0x424   : > { %v1583_v31 = vld [vmem:[#allocation4] sm:$0xff] }
 0x425   : > { %1037 = vst.msk [vmem:[#allocation4 + $0x8] sm:$0xff] %vm491_vm7, %v1036_v44 }
 0x428   : > { %v1587_v28 = vpop.permute.xlu1 %1586 }
 0x429   : > { %v1589_v32 = vmul.f32 %v1587_v28, %v1583_v31 }
 0x42b   : > { %v1590_v57 = vpack.c.bf16 %v1589_v32, %v1589_v32 }
 0x42c   : > { %v1695_v58 = vld [vmem:[#allocation4 + $0x8] sm:$0xff] }
 0x42d   : > { %v1701_v59 = vmul.f32 %v1699_v49, %v1695_v58  ;;  %v1592_v14 = vrot.slane %v1590_v57, 3 }
 0x42f   : > { %v1702_v13 = vpack.c.bf16 %v1701_v59, %v1701_v59  ;;  %v1596_v25 = vsel %vm1593_vm10, %v1590_v57, %v1592_v14  ;;  %v1598_v61 = vsel %vm554_vm0, %v1590_v57, %v1592_v14  ;;  %v1601_v52 = vsel %vm557_vm1, %v1590_v57, %v1592_v14 }
 0x430   : > { %v1600_v16 = vrot.slane %v1598_v61, 1  ;;  %v1604_v45 = vsel %vm560_vm2, %v1590_v57, %v1592_v14  ;;  %v1603_v50 = vrot.slane %v1601_v52, 2  ;;  %v1608_v17 = vunpack.i.h.s16 %v1596_v25 }
 0x431   : > { %v1704_v63 = vrot.slane %v1702_v13, 3  ;;  %v1606_v6 = vrot.slane %v1604_v45, 3  ;;  %v2198_v19 = vpack.i.b16 %v1596_v25, %v1596_v25 }
 0x432   : > { %v1610_v42 = vunpack.i.h.s16 %v1600_v16  ;;  %v1612_v40 = vunpack.i.h.s16 %v1603_v50  ;;  %v1616_v18 = vpack.i.b16 %v1608_v17, %v1608_v17  ;;  %v2199_v55 = vpack.i.b16 %v1600_v16, %v1600_v16 }
 0x433   : > { %v1709_v22 = vsel %vm554_vm0, %v1702_v13, %v1704_v63  ;;  %v1712_v29 = vsel %vm557_vm1, %v1702_v13, %v1704_v63  ;;  %v1614_v26 = vunpack.i.h.s16 %v1606_v6  ;;  %v2200_v35 = vpack.i.b16 %v1603_v50, %v1603_v50 }
 0x434   : > { %v1618_v51 = vpack.i.b16 %v1610_v42, %v1610_v42  ;;  %v1707_v24 = vsel %vm1593_vm10, %v1702_v13, %v1704_v63  ;;  %v1620_v41 = vpack.i.b16 %v1612_v40, %v1612_v40  ;;  %v1711_v8 = vrot.slane %v1709_v22, 1 }
 0x435   : > { %v1714_v7 = vrot.slane %v1712_v29, 2  ;;  %v1715_v39 = vsel %vm560_vm2, %v1702_v13, %v1704_v63  ;;  %v2201_v11 = vpack.i.b16 %v1606_v6, %v1606_v6  ;;  %v1622_v37 = vpack.i.b16 %v1614_v26, %v1614_v26 }
 0x436   : > { %v1626_v62 = vperm.slane %v2198_v19, %v2903_v10  ;;  %v1630_v15 = vperm.slane %v1616_v18, %v2903_v10  ;;  %v1634_v60 = vperm.slane %v2199_v55, %v2903_v10  ;;  %v1719_v4 = vunpack.i.h.s16 %v1707_v24 }
 0x437   : > { %v1638_v5 = vperm.slane %v1618_v51, %v2903_v10  ;;  %v1642_v36 = vperm.slane %v2200_v35, %v2903_v10  ;;  %v1646_v9 = vperm.slane %v1620_v41, %v2903_v10  ;;  %v1650_v34 = vperm.slane %v2201_v11, %v2903_v10 }
 0x438   : > { %v1667_v48 = vsel %vm2908_vm13, %v1626_v62, %v1666_v53  ;;  %v1670_v23 = vsel %vm2908_vm13, %v1630_v15, %v1669_v56  ;;  %v1673_v2 = vsel %vm2908_vm13, %v1634_v60, %v1672_v3  ;;  %v1654_v30 = vperm.slane %v1622_v37, %v2903_v10  ;;  %v1805_v37 = vld [vmem:[#allocation4 + $0x10] sm:$0xff] }
 0x439   : > { %1668 = vst [vmem:[%s2899_s30] sm:$0x1] %v1667_v48  ;;  %v1676_v33 = vsel %vm2908_vm13, %v1638_v5, %v1675_v12  ;;  %v1717_v0 = vrot.slane %v1715_v39, 3  ;;  %v1721_v43 = vunpack.i.h.s16 %v1711_v8  ;;  %v1679_v27 = vsel %vm2908_vm13, %v1642_v36, %v1678_v1  ;;  %v1916_v39 = vld [vmem:[#allocation4 + $0x18] sm:$0xff] }
 0x43a   : > { %1671 = vst [vmem:[%s2899_s30 + $0x2] sm:$0x1] %v1670_v23  ;;  %v2202_v44 = vpack.i.b16 %v1707_v24, %v1707_v24  ;;  %v1682_v31 = vsel %vm2908_vm13, %v1646_v9, %v1681_v21  ;;  %v1723_v28 = vunpack.i.h.s16 %v1714_v7  ;;  %v1727_v32 = vpack.i.b16 %v1719_v4, %v1719_v4 }
 0x43b   : > { %1674 = vst [vmem:[%s2899_s30 + $0x4] sm:$0x1] %v1673_v2  ;;  %v1685_v57 = vsel %vm2908_vm13, %v1650_v34, %v1684_v20  ;;  %v2203_v49 = vpack.i.b16 %v1711_v8, %v1711_v8  ;;  %v1688_v58 = vsel %vm2908_vm13, %v1654_v30, %v1687_v38  ;;  %v1725_v59 = vunpack.i.h.s16 %v1717_v0 }
 0x43c   : > { %1677 = vst [vmem:[%s2899_s30 + $0x6] sm:$0x1] %v1676_v33  ;;  %v1729_v14 = vpack.i.b16 %v1721_v43, %v1721_v43  ;;  %v2204_v25 = vpack.i.b16 %v1714_v7, %v1714_v7  ;;  %v1737_v61 = vperm.slane %v2202_v44, %v2903_v10  ;;  %v1731_v52 = vpack.i.b16 %v1723_v28, %v1723_v28  ;;  %v1920_v7 = vpop.permute.xlu0 %1919  ;;  %v1887_v28 = vld [vmem:[%s2899_s30] sm:$0x2] }
 0x43d   : > { %1680 = vst [vmem:[%s2899_s30 + $0x8] sm:$0x1] %v1679_v27  ;;  %v1741_v16 = vperm.slane %v1727_v32, %v2903_v10  ;;  %v2205_v50 = vpack.i.b16 %v1717_v0, %v1717_v0  ;;  %v1745_v17 = vperm.slane %v2203_v49, %v2903_v10  ;;  %v1733_v42 = vpack.i.b16 %v1725_v59, %v1725_v59  ;;  %v1890_v59 = vld [vmem:[%s2899_s30 + $0x2] sm:$0x2] }
 0x43e   : > { %1683 = vst [vmem:[%s2899_s30 + $0xa] sm:$0x1] %v1682_v31  ;;  %v1749_v46 = vperm.slane %v1729_v14, %v2903_v10  ;;  %v1753_v19 = vperm.slane %v2204_v25, %v2903_v10  ;;  %v1757_v29 = vperm.slane %v1731_v52, %v2903_v10  ;;  %v1922_v11 = vmul.f32 %v1920_v7, %v1916_v39  ;;  %v1893_v52 = vld [vmem:[%s2899_s30 + $0x4] sm:$0x2] }
 0x43f   : > { %1686 = vst [vmem:[%s2899_s30 + $0xc] sm:$0x1] %v1685_v57  ;;  %v1761_v51 = vperm.slane %v2205_v50, %v2903_v10  ;;  %v1765_v24 = vperm.slane %v1733_v42, %v2903_v10  ;;  %v1902_v42 = vld [vmem:[%s2899_s30 + $0xa] sm:$0x2] }
 0x440   : > { %1689 = vst [vmem:[%s2899_s30 + $0xe] sm:$0x1] %v1688_v58  ;;  %v1776_v45 = vld [vmem:[%s2899_s30] sm:$0x1]  ;;  %v1923_v12 = vpack.c.bf16 %v1922_v11, %v1922_v11 }
 0x441   : > { %v1777_v63 = vsel %vm2950_vm15, %v1737_v61, %v1776_v45  ;;  %v1779_v6 = vld [vmem:[%s2899_s30 + $0x2] sm:$0x1] }
 0x442   : > { %1778 = vst [vmem:[%s2899_s30] sm:$0x1] %v1777_v63  ;;  %v1780_v47 = vsel %vm2950_vm15, %v1741_v16, %v1779_v6  ;;  %v1782_v40 = vld [vmem:[%s2899_s30 + $0x4] sm:$0x1]  ;;  %v1925_v15 = vrot.slane %v1923_v12, 3  ;;  %v1899_v16 = vld [vmem:[%s2899_s30 + $0x8] sm:$0x2] }
 0x443   : > { %1781 = vst [vmem:[%s2899_s30 + $0x2] sm:$0x1] %v1780_v47  ;;  %v1783_v18 = vsel %vm2950_vm15, %v1745_v17, %v1782_v40  ;;  %v1785_v22 = vld [vmem:[%s2899_s30 + $0x6] sm:$0x1]  ;;  %v1896_v6 = vld [vmem:[%s2899_s30 + $0x6] sm:$0x2] }
 0x444   : > { %1784 = vst [vmem:[%s2899_s30 + $0x4] sm:$0x1] %v1783_v18  ;;  %v1786_v26 = vsel %vm2950_vm15, %v1749_v46, %v1785_v22  ;;  %v1788_v55 = vld [vmem:[%s2899_s30 + $0x8] sm:$0x1]  ;;  %v2998_v4 = vsel %vm1593_vm10, %v1923_v12, %v1925_v15  ;;  %v1930_v5 = vsel %vm554_vm0, %v1923_v12, %v1925_v15  ;;  %v1933_v9 = vsel %vm557_vm1, %v1923_v12, %v1925_v15  ;;  %v1905_v18 = vld [vmem:[%s2899_s30 + $0xc] sm:$0x2] }
 0x445   : > { %1787 = vst [vmem:[%s2899_s30 + $0x6] sm:$0x1] %v1786_v26  ;;  %v1789_v35 = vsel %vm2950_vm15, %v1753_v19, %v1788_v55  ;;  %v1791_v53 = vld [vmem:[%s2899_s30 + $0xa] sm:$0x1]  ;;  %v1936_v21 = vsel %vm560_vm2, %v1923_v12, %v1925_v15  ;;  %v3007_v0 = vrot.slane %v1930_v5, 1  ;;  %v3009_v43 = vrot.slane %v1933_v9, 2 }
 0x446   : > { %1790 = vst [vmem:[%s2899_s30 + $0x8] sm:$0x1] %v1789_v35  ;;  %v1792_v41 = vsel %vm2950_vm15, %v1757_v29, %v1791_v53  ;;  %v1794_v54 = vld [vmem:[%s2899_s30 + $0xc] sm:$0x1]  ;;  %v1940_v27 = vunpack.i.h.s16 %v2998_v4  ;;  %v1908_v53 = vld [vmem:[%s2899_s30 + $0xe] sm:$0x2] }
 0x447   : > { %1793 = vst [vmem:[%s2899_s30 + $0xa] sm:$0x1] %v1792_v41  ;;  %v1795_v56 = vsel %vm2950_vm15, %v1761_v51, %v1794_v54  ;;  %v1797_v3 = vld [vmem:[%s2899_s30 + $0xe] sm:$0x1]  ;;  %v1938_v51 = vrot.slane %v1936_v21, 3  ;;  %v1942_v35 = vunpack.i.h.s16 %v3007_v0  ;;  %v2210_v54 = vpack.i.b16 %v2998_v4, %v2998_v4 }
 0x448   : > { %1796 = vst [vmem:[%s2899_s30 + $0xc] sm:$0x1] %v1795_v56  ;;  %v1798_v8 = vsel %vm2950_vm15, %v1765_v24, %v1797_v3  ;;  %v1948_v7 = vpack.i.b16 %v1940_v27, %v1940_v27  ;;  %v2211_v11 = vpack.i.b16 %v3007_v0, %v3007_v0 }
 0x449   : > { %1799 = vst [vmem:[%s2899_s30 + $0xe] sm:$0x1] %v1798_v8  ;;  %v1944_v8 = vunpack.i.h.s16 %v3009_v43  ;;  %v2213_v9 = vpack.i.b16 %v1938_v51, %v1938_v51 }
 0x44a   : > { %v1962_v5 = vperm.slane %v1948_v7, %v2903_v10  ;;  %v1966_v21 = vperm.slane %v2211_v11, %v2903_v10 }
 0x44b   : > { %v1952_v4 = vpack.i.b16 %v1944_v8, %v1944_v8  ;;  %v1982_v31 = vperm.slane %v2213_v9, %v2903_v10 }
 0x472   : > { %v1809_v62 = vpop.permute.xlu2 %1808 }
 0x473   : > { %v1811_v60 = vmul.f32 %v1809_v62, %v1805_v37  ;;  %v1946_v37 = vunpack.i.h.s16 %v1938_v51  ;;  %v1950_v62 = vpack.i.b16 %v1942_v35, %v1942_v35 }
 0x475   : > { %v1812_v1 = vpack.c.bf16 %v1811_v60, %v1811_v60  ;;  %v2212_v60 = vpack.i.b16 %v3009_v43, %v3009_v43  ;;  %v1978_v43 = vperm.slane %v1952_v4, %v2903_v10 }
 0x477   : > { %v1814_v36 = vrot.slane %v1812_v1, 3 }
 0x479   : > { %v1817_v34 = vsel %vm1593_vm10, %v1812_v1, %v1814_v36  ;;  %v1819_v48 = vsel %vm554_vm0, %v1812_v1, %v1814_v36  ;;  %v1822_v23 = vsel %vm557_vm1, %v1812_v1, %v1814_v36  ;;  %v1825_v2 = vsel %vm560_vm2, %v1812_v1, %v1814_v36  ;;  %vm3013_vm0 = vmand %vm1884_vm3, %vm1885_vm4 }
 0x47a   : > { %v1821_v20 = vrot.slane %v1819_v48, 1  ;;  %v1824_v30 = vrot.slane %v1822_v23, 2  ;;  %v1827_v33 = vrot.slane %v1825_v2, 3  ;;  %v1829_v38 = vunpack.i.h.s16 %v1817_v34 }
 0x47b   : > { %v2206_v44 = vpack.i.b16 %v1817_v34, %v1817_v34  ;;  %vm1995_vm1 = vsmask.f32 7942  ;;  %v1958_v1 = vperm.slane %v2210_v54, %v2903_v10  ;;  %v1954_v23 = vpack.i.b16 %v1946_v37, %v1946_v37 }
 0x47c   : > { %v1831_v32 = vunpack.i.h.s16 %v1821_v20  ;;  %v1833_v57 = vunpack.i.h.s16 %v1824_v30  ;;  %v1835_v49 = vunpack.i.h.s16 %v1827_v33  ;;  %v1837_v58 = vpack.i.b16 %v1829_v38, %v1829_v38  ;;  %vm3061_vm2 = vmand %vm1884_vm3, %vm1995_vm1 }
 0x47d   : > { %v2207_v14 = vpack.i.b16 %v1821_v20, %v1821_v20  ;;  %v2208_v13 = vpack.i.b16 %v1824_v30, %v1824_v30  ;;  %v2209_v25 = vpack.i.b16 %v1827_v33, %v1827_v33  ;;  %v1847_v61 = vperm.slane %v2206_v44, %v2903_v10 }
 0x47e   : > { %v1839_v45 = vpack.i.b16 %v1831_v32, %v1831_v32  ;;  %v1841_v50 = vpack.i.b16 %v1833_v57, %v1833_v57  ;;  %v1843_v17 = vpack.i.b16 %v1835_v49, %v1835_v49  ;;  %v1851_v63 = vperm.slane %v1837_v58, %v2903_v10 }
 0x47f   : > { %v1855_v46 = vperm.slane %v2207_v14, %v2903_v10  ;;  %v1863_v47 = vperm.slane %v2208_v13, %v2903_v10  ;;  %v1871_v40 = vperm.slane %v2209_v25, %v2903_v10  ;;  %v1888_v19 = vsel %vm3013_vm0, %v1847_v61, %v1887_v28 }
 0x480   : > { %v1859_v22 = vperm.slane %v1839_v45, %v2903_v10  ;;  %v1867_v29 = vperm.slane %v1841_v50, %v2903_v10  ;;  %v1875_v26 = vperm.slane %v1843_v17, %v2903_v10  ;;  %1889 = vst [vmem:[%s2899_s30] sm:$0x2] %v1888_v19  ;;  %v1891_v55 = vsel %vm3013_vm0, %v1851_v63, %v1890_v59 }
 0x481   : > { %1892 = vst [vmem:[%s2899_s30 + $0x2] sm:$0x2] %v1891_v55  ;;  %v1894_v24 = vsel %vm3013_vm0, %v1855_v46, %v1893_v52  ;;  %v1900_v41 = vsel %vm3013_vm0, %v1863_v47, %v1899_v16  ;;  %v1906_v39 = vsel %vm3013_vm0, %v1871_v40, %v1905_v18  ;;  %v1970_v2 = vperm.slane %v1950_v62, %v2903_v10 }
 0x482   : > { %1895 = vst [vmem:[%s2899_s30 + $0x4] sm:$0x2] %v1894_v24  ;;  %v1897_v56 = vsel %vm3013_vm0, %v1859_v22, %v1896_v6  ;;  %v1903_v3 = vsel %vm3013_vm0, %v1867_v29, %v1902_v42  ;;  %v1909_v12 = vsel %vm3013_vm0, %v1875_v26, %v1908_v53  ;;  %v1974_v33 = vperm.slane %v2212_v60, %v2903_v10 }
 0x483   : > { %1898 = vst [vmem:[%s2899_s30 + $0x6] sm:$0x2] %v1897_v56  ;;  %v1986_v57 = vperm.slane %v1954_v23, %v2903_v10 }
 0x484   : > { %1901 = vst [vmem:[%s2899_s30 + $0x8] sm:$0x2] %v1900_v41 }
 0x485   : > { %1904 = vst [vmem:[%s2899_s30 + $0xa] sm:$0x2] %v1903_v3 }
 0x486   : > { %1907 = vst [vmem:[%s2899_s30 + $0xc] sm:$0x2] %v1906_v39 }
 0x487   : > { %1910 = vst [vmem:[%s2899_s30 + $0xe] sm:$0x2] %v1909_v12  ;;  %v1997_v36 = vld [vmem:[%s2899_s30] sm:$0x2] }
 0x488   : > { %v1998_v34 = vsel %vm3061_vm2, %v1958_v1, %v1997_v36  ;;  %v2000_v48 = vld [vmem:[%s2899_s30 + $0x2] sm:$0x2] }
 0x489   : > { %1999 = vst [vmem:[%s2899_s30] sm:$0x2] %v1998_v34  ;;  %v2001_v20 = vsel %vm3061_vm2, %v1962_v5, %v2000_v48  ;;  %v2003_v30 = vld [vmem:[%s2899_s30 + $0x4] sm:$0x2] }
 0x48a   : > { %2002 = vst [vmem:[%s2899_s30 + $0x2] sm:$0x2] %v2001_v20  ;;  %v2004_v38 = vsel %vm3061_vm2, %v1966_v21, %v2003_v30  ;;  %v2006_v0 = vld [vmem:[%s2899_s30 + $0x6] sm:$0x2] }
 0x48b   : > { %2005 = vst [vmem:[%s2899_s30 + $0x4] sm:$0x2] %v2004_v38  ;;  %v2007_v27 = vsel %vm3061_vm2, %v1970_v2, %v2006_v0  ;;  %v2009_v44 = vld [vmem:[%s2899_s30 + $0x8] sm:$0x2] }
 0x48c   : > { %2008 = vst [vmem:[%s2899_s30 + $0x6] sm:$0x2] %v2007_v27  ;;  %v2010_v28 = vsel %vm3061_vm2, %v1974_v33, %v2009_v44  ;;  %v2012_v32 = vld [vmem:[%s2899_s30 + $0xa] sm:$0x2] }
 0x48d   : > { %2011 = vst [vmem:[%s2899_s30 + $0x8] sm:$0x2] %v2010_v28  ;;  %v2013_v49 = vsel %vm3061_vm2, %v1978_v43, %v2012_v32  ;;  %v2015_v58 = vld [vmem:[%s2899_s30 + $0xc] sm:$0x2] }
 0x48e   : > { %2014 = vst [vmem:[%s2899_s30 + $0xa] sm:$0x2] %v2013_v49  ;;  %v2016_v59 = vsel %vm3061_vm2, %v1982_v31, %v2015_v58  ;;  %v2018_v14 = vld [vmem:[%s2899_s30 + $0xe] sm:$0x2] }
 0x48f   : > { %2017 = vst [vmem:[%s2899_s30 + $0xc] sm:$0x2] %v2016_v59  ;;  %v2019_v13 = vsel %vm3061_vm2, %v1986_v57, %v2018_v14 }
 0x490   : > { %2020 = vst [vmem:[%s2899_s30 + $0xe] sm:$0x2] %v2019_v13 }
 0x491 PF: > { %s13_s16 = sadd.s32 1, %s2327_s16   ;;  %s3155_s12 = smov %s2315_s13 }
 0x492   : > { %p10_p10 = scmp.ge.s32.totalorder %s13_s16, 4   ;;  %s3156_s13 = smov %s2392_s21 }
 0x493   : > { %s3157_s14 = smov %s2323_s15  ;;  %s3158_s15 = smov %s3160_s17 }
 0x494   :  { %12 = sbr.rel (!%p10_p10) target bundleno = 3 (0x3), region = 235 }

// kernel: multimodal_transformer_forward.101
= control target key start
LH: loop header
LB: loop body
LE: loop exit
PB: predicated region body
PF: predicated region fallthrough
CT: control target
= control target key end

     0   :  { %v188_v2 = vmov 0   ;;  %vm44_vm0 = vcmask 261120   ;;  %s248_s0 = inlined_call_operand.vmem [shape: bf16[16,32], index: 0, kind: input, shape index: {}]   ;;  %s249_s1 = inlined_call_operand.vmem [shape: bf16[40,32], index: 1, kind: input, shape index: {}]   ;;  %s250_s2 = inlined_call_operand.vmem [shape: f32[16,1], index: 2, kind: input, shape index: {}]   ;;  %s251_s3 = inlined_call_operand.vmem [shape: f32[16,1], index: 3, kind: input, shape index: {}]   ;;  %s252_s4 = inlined_call_operand.hbm [shape: f32[16,40], index: 4, kind: output, shape index: {}]  }
   0x1   :  { %v25_v0 = vld [vmem:[%s249_s1 + $0x10] sm:$0xf]  ;;  %152 = vset.pattern.permute.xlu0 %v188_v2  ;;  %v81_v3 = vld [vmem:[%s250_s2] sm:$0xff]  ;;  %153 = vset.pattern.permute.xlu1 %v188_v2  ;;  %v72_v5 = vld [vmem:[%s251_s3 + $0x8] sm:$0xff] }
   0x2   :  { %v40_v1 = vunpack.c.l.b16 %v25_v0  ;;  %85 = vperm.xlu0 %152, %v81_v3   ;;  %v71_v4 = vld [vmem:[%s251_s3] sm:$0xff] }
   0x3   :  { %9 = vsyncpa [#allocation3], 0  ;;  %154 = vrcp.f32 %v71_v4  ;;  %v147_v8 = vld [vmem:[%s249_s1 + $0x8] sm:$0xff]  ;;  %v146_v17 = vld [vmem:[%s249_s1] sm:$0xff]  ;;  %vm111_vm1 = vcmask 326656   ;;  %s189_s1 = smov [#allocation2]  }
   0x4   :  { %v43_v6 = vpack.c.b16 %v40_v1, %v40_v1  ;;  %156 = vrcp.f32 %v72_v5  ;;  %v82_v9 = vld [vmem:[%s250_s2 + $0x8] sm:$0xff]  ;;  %v52_v13 = vsel %vm44_vm0, %v147_v8, 0  ;;  %v49_v19 = vsel %vm44_vm0, %v146_v17, 0  ;;  %v145_v21 = vld [vmem:[%s248_s0] sm:$0xff]  ;;  %s118_s29 = sshll.u32 %s189_s1, 4  ;;  %s120_s5 = sshll.u32 %s252_s4, 4  ;;  %s119_s29 = int_to_ptr.vmem [resolvable:$true] %s118_s29  ;;  %s121_s5 = int_to_ptr.hbm [resolvable:$true] %s120_s5 }
   0x5   :  { %s190_s6 = smov 128   ;;  %s191_s7 = smov 8  }
   0x6   :  { %v55_v7 = vsel %vm44_vm0, %v43_v6, 0 }
   0x7   :  { %62 = vmatpush.bf16.xpose.msra.mxu0 %v55_v7 }
   0x9   :  { %v155_v10 = vpop.eup %154 }
   0xa   :  { %v157_v11 = vpop.eup %156  ;;  %90 = vperm.xlu0 %152, %v82_v9   ;;  %v75_v12 = vmul.f32 %v155_v10, %v71_v4 }
   0xb   :  { %v76_v15 = vmul.f32 %v157_v11, %v72_v5 }
   0xc   :  { %v77_v14 = vsub.f32 2.0, %v75_v12 }
   0xd   :  { %v78_v18 = vsub.f32 2.0, %v76_v15 }
   0xe   :  { %v79_v16 = vmul.f32 %v155_v10, %v77_v14 }
   0xf   :  { %63 = vmatpush.bf16.xpose.msra.mxu0 %v52_v13  ;;  %v80_v20 = vmul.f32 %v157_v11, %v78_v18 }
  0x10   :  { %101 = vperm.xlu1 %153, %v79_v16  }
  0x17   :  { %64 = vmatpush.bf16.xpose.msra.mxu0 %v49_v19 }
  0x18   :  { %106 = vperm.xlu1 %153, %v80_v20  }
  0x1e   :  { %144 = vmatmul.msk.bf16.vlgmr.msra.gmra.mxu0 %vm44_vm0, %v145_v21 }
  0x74   :  { %v86_v22 = vpop.permute.xlu0 %85 }
  0x7c   :  { %v91_v26 = vpop.permute.xlu0 %90 }
  0x82   :  { %v102_v28 = vpop.permute.xlu1 %101 }
  0x8a   :  { %v107_v34 = vpop.permute.xlu1 %106 }
  0x9b   :  { %v66_v23 = vpop.f32.mrf.mxu0 }
  0x9c   :  { %v93_v24 = vsub.f32 %v66_v23, %v86_v22 }
  0x9e   :  { %v95_v25 = vmul.f32 1.442695, %v93_v24 }
  0xa0   :  { %158 = vpow2.f32 %v95_v25 }
  0xa3   :  { %v68_v27 = vpop.f32.mrf.mxu0 }
  0xa4   :  { %v94_v29 = vsub.f32 %v68_v27, %v91_v26 }
  0xa6   :  { %v159_v30 = vpop.eup %158  ;;  %v97_v31 = vmul.f32 1.442695, %v94_v29 }
  0xa7   :  { %v109_v32 = vmul.f32 %v159_v30, %v102_v28 }
  0xa8   :  { %160 = vpow2.f32 %v97_v31 }
  0xa9   :  { %112 = vst.msk [vmem:[#allocation2] sm:$0xff] %vm111_vm1, %v109_v32 }
  0xae   :  { %v161_v33 = vpop.eup %160 }
  0xaf   :  { %v110_v35 = vmul.f32 %v161_v33, %v107_v34 }
  0xb1   :  { %113 = vst.msk [vmem:[#allocation2 + $0x8] sm:$0xff] %vm111_vm1, %v110_v35 }
  0xb2   :  { %126 = dma.vmem_to_hbm [thread:$0]  %s119_s29, 256, %s121_s5, [#allocation3], %s190_s6, %s190_s6, %s191_s7  }
  0xb3   :  { %186 = dma.done.wait [#allocation3], 256  }
  0xb4   :  { %187 = vsyncadd [#allocation3], 4294967040 }
  0xb5   :  { %131 = vsyncpa [#allocation3], 1 }

// kernel: multimodal_transformer_forward.79
= control target key start
LH: loop header
LB: loop body
LE: loop exit
PB: predicated region body
PF: predicated region fallthrough
CT: control target
= control target key end

     0   :  { %s2281_s12 = smov 0   ;;  %s2283_s13 = smov 0   ;;  %s3055_s0 = inlined_call_operand.vmem [shape: bf16[2,8,4,8], index: 0, kind: input, shape index: {}]   ;;  %s3056_s1 = inlined_call_operand.vmem [shape: bf16[2,8,2,4,8], index: 1, kind: input, shape index: {}, may-alias: {1,2}]   ;;  %s3057_s2 = inlined_call_operand.vmem [shape: bf16[2,8,2,4,8], index: 2, kind: input, shape index: {}, may-alias: {1,2}]   ;;  %s3058_s3 = inlined_call_operand.vmem [shape: bf16[2,8,4,8], index: 3, kind: output, shape index: {}]  }
   0x1   :  { %s2285_s14 = smov 0   ;;  %s2287_s15 = smov 0  }
   0x2   :  { %s2289_s16 = smov 0  }
   0x3 LB: > { %s32_s17 = sadd.s32 1, %s2251_s15  ;;  %p76_p1 = scmp.ne.s32.totalorder %s2243_s13, %s2239_s12  ;;  %s2255_s16 = sphi %s2289_s16, %s13_s16   ;;  %s2251_s15 = sphi %s2287_s15, %s3088_s15   ;;  %s2247_s14 = sphi %s2285_s14, %s3087_s14   ;;  %s2243_s13 = sphi %s2283_s13, %s3086_s13   ;;  %s2239_s12 = sphi %s2281_s12, %s3085_s12  }
   0x4   : > { %p34_p0 = scmp.ge.s32.totalorder %s32_s17, 2  ;;  %p77_p2 = scmp.eq.s32.totalorder %s2255_s16, 0 }
   0x5   : > { %s69_s20 = sadd.s32 1, %s2243_s13  ;;  %p2094_p5 = scmp.ge.s32.totalorder %s2255_s16, 2 }
   0x6   : > { %s3090_s17 = smov (%p34_p0, %s32_s17), 0  ;;  %p2312_p3 = por %p77_p2, %p76_p1 }
   0x7   : > { %s64_s19 = ssub.s32 %s2251_s15, %s3090_s17  ;;  %158 = sbr.rel (%p2094_p5) target bundleno = 36 (0x24), region = 16 }
   0x8   : > { %p67_p4 = scmp.eq.s32.totalorder %s64_s19, 0 }
   0xa   : > { %s2320_s21 = scalar_select %p67_p4, %s2243_s13, %s69_s20  }
   0xc   : > { %174 = sbr.rel (!%p2312_p3) target bundleno = 24 (0x18), region = 24  ;;  %s176_s22 = sand.u32 (%p2312_p3), 1, %s2243_s13  }
   0xd   : > { %s2142_s23 = sshll.u32 (%p2312_p3), %s2251_s15, 5  ;;  %s2095_s24 = sshll.u32 (%p2312_p3), %s176_s22, 4 }
   0xe   : > { %s184_s27 = scalar_lea.vmem (%p2312_p3), %s3056_s1, %s2142_s23  ;;  %s178_s28 = scalar_lea.vmem (%p2312_p3), [#allocation5], %s2095_s24 }
   0xf   : > { %v201_v0 = vld [vmem:[%s184_s27] sm:$0x3] (%p2312_p3)  ;;  %v203_v1 = vld [vmem:[%s184_s27 + $0x4] sm:$0x3] (%p2312_p3)  ;;  %v205_v2 = vld [vmem:[%s184_s27 + $0x8] sm:$0x3] (%p2312_p3) }
  0x10   : > { %202 = vst [vmem:[%s178_s28] sm:$0x3] (%p2312_p3), %v201_v0  ;;  %v207_v3 = vld [vmem:[%s184_s27 + $0xc] sm:$0x3] (%p2312_p3)  ;;  %v209_v4 = vld [vmem:[%s184_s27 + $0x10] sm:$0x3] (%p2312_p3) }
  0x11   : > { %204 = vst [vmem:[%s178_s28 + $0x2] sm:$0x3] %v203_v1  ;;  %v211_v5 = vld [vmem:[%s184_s27 + $0x14] sm:$0x3]  ;;  %v213_v6 = vld [vmem:[%s184_s27 + $0x18] sm:$0x3] }
  0x12   : > { %206 = vst [vmem:[%s178_s28 + $0x4] sm:$0x3] %v205_v2  ;;  %v215_v7 = vld [vmem:[%s184_s27 + $0x1c] sm:$0x3] }
  0x13   : > { %208 = vst [vmem:[%s178_s28 + $0x6] sm:$0x3] %v207_v3 }
  0x14   : > { %210 = vst [vmem:[%s178_s28 + $0x8] sm:$0x3] %v209_v4 }
  0x15   : > { %212 = vst [vmem:[%s178_s28 + $0xa] sm:$0x3] %v211_v5 }
  0x16   : > { %214 = vst [vmem:[%s178_s28 + $0xc] sm:$0x3] %v213_v6 }
  0x17   : > { %216 = vst [vmem:[%s178_s28 + $0xe] sm:$0x3] %v215_v7 }
  0x18 PF: > { %256 = sbr.rel (!%p2312_p3) target bundleno = 36 (0x24), region = 65  ;;  %s258_s29 = sand.u32 (%p2312_p3), 1, %s2243_s13  }
  0x19   : > { %s2143_s30 = sshll.u32 (%p2312_p3), %s2251_s15, 5  ;;  %s2098_s4 = sshll.u32 (%p2312_p3), %s258_s29, 4 }
  0x1a   : > { %s2005_s7 = scalar_lea.vmem (%p2312_p3), %s3057_s2, %s2143_s30  ;;  %s260_s8 = scalar_lea.vmem (%p2312_p3), [#allocation6], %s2098_s4 }
  0x1b   : > { %v2101_v8 = vld [vmem:[%s2005_s7 + $0x2] sm:$0x3] (%p2312_p3)  ;;  %v2102_v9 = vld [vmem:[%s2005_s7 + $0x6] sm:$0x3] (%p2312_p3)  ;;  %v2103_v10 = vld [vmem:[%s2005_s7 + $0xa] sm:$0x3] (%p2312_p3) }
  0x1c   : > { %285 = vst [vmem:[%s260_s8] sm:$0x3] (%p2312_p3), %v2101_v8  ;;  %v2104_v11 = vld [vmem:[%s2005_s7 + $0xe] sm:$0x3] (%p2312_p3)  ;;  %v2105_v12 = vld [vmem:[%s2005_s7 + $0x12] sm:$0x3] (%p2312_p3) }
  0x1d   : > { %287 = vst [vmem:[%s260_s8 + $0x2] sm:$0x3] %v2102_v9  ;;  %v2106_v13 = vld [vmem:[%s2005_s7 + $0x16] sm:$0x3]  ;;  %v2107_v14 = vld [vmem:[%s2005_s7 + $0x1a] sm:$0x3] }
  0x1e   : > { %289 = vst [vmem:[%s260_s8 + $0x4] sm:$0x3] %v2103_v10  ;;  %v2108_v15 = vld [vmem:[%s2005_s7 + $0x1e] sm:$0x3] }
  0x1f   : > { %291 = vst [vmem:[%s260_s8 + $0x6] sm:$0x3] %v2104_v11 }
  0x20   : > { %293 = vst [vmem:[%s260_s8 + $0x8] sm:$0x3] %v2105_v12 }
  0x21   : > { %295 = vst [vmem:[%s260_s8 + $0xa] sm:$0x3] %v2106_v13 }
  0x22   : > { %297 = vst [vmem:[%s260_s8 + $0xc] sm:$0x3] %v2107_v14 }
  0x23   : > { %299 = vst [vmem:[%s260_s8 + $0xe] sm:$0x3] %v2108_v15 }
  0x24 PF: > { %p2109_p6 = scmp.ge.s32.totalorder %s2255_s16, 1  ;;  %p338_p7 = scmp.lt.s32.totalorder %s2255_s16, 3 }
  0x26   : > { %p339_p8 = pnand %p2109_p6, %p338_p7 }
  0x28   : > { %342 = sbr.rel (%p339_p8) target bundleno = 1156 (0x484), region = 106 }
  0x2d   : > { %p393_p9 = scmp.lt.s32.totalorder %s2247_s14, 1  ;;  %s345_s19 = sand.u32 1, %s2239_s12   ;;  %vm491_vm0 = vcmask 1041409   ;;  %vm494_vm1 = vcmask 1042434   ;;  %vm497_vm2 = vcmask 1043459   ;;  %vm500_vm3 = vcmask 1044484  }
  0x2e   : > { %s2360_s20 = sshll.u32 %s345_s19, 4  ;;  %vm503_vm4 = vcmask 1045509   ;;  %vm506_vm5 = vcmask 1046534   ;;  %vm509_vm6 = vcmask 1047559   ;;  %vm428_vm7 = vcmask 64512  }
  0x2f   : > { %s3092_s14 = smov (!%p393_p9, %s2247_s14), 1  ;;  %s2365_s22 = scalar_lea.vmem [#allocation5], %s2360_s20  ;;  %vm419_vm8 = vcmask 7168   ;;  %vm688_vm9 = vcmask 1043456   ;;  %vm1530_vm10 = vcmask 1040384   ;;  %vm1600_vm11 = vcmask 57344  }
  0x30   : > { %s2144_s9 = sshll.u32 %s3092_s14, 4  ;;  %v441_v30 = vld [vmem:[%s2365_s22] sm:$0x1]  ;;  %v442_v31 = vld [vmem:[%s2365_s22 + $0x2] sm:$0x1]  ;;  %s2386_s12 = scalar_lea.vmem [#allocation6], %s2360_s20 }
  0x31   : > { %s2349_s18 = scalar_lea.vmem %s3055_s0, %s2144_s9  ;;  %v443_v34 = vld [vmem:[%s2365_s22 + $0x4] sm:$0x1]  ;;  %v444_v35 = vld [vmem:[%s2365_s22 + $0x6] sm:$0x1]  ;;  %v445_v38 = vld [vmem:[%s2365_s22 + $0x8] sm:$0x1]  ;;  %s2829_s25 = scalar_lea.vmem %s3058_s3, %s2144_s9 }
  0x32   : > { %v433_v16 = vld [vmem:[%s2349_s18] sm:$0x1]  ;;  %v434_v17 = vld [vmem:[%s2349_s18 + $0x2] sm:$0x1]  ;;  %v435_v18 = vld [vmem:[%s2349_s18 + $0x4] sm:$0x1] }
  0x33   : > { %450 = vst [vmem:[#allocation1] ss:$4 sm:$0xff] %v433_v16  ;;  %v436_v19 = vld [vmem:[%s2349_s18 + $0x6] sm:$0x1]  ;;  %v437_v22 = vld [vmem:[%s2349_s18 + $0x8] sm:$0x1] }
  0x34   : > { %455 = vst [vmem:[#allocation1 + $0x20] ss:$4 sm:$0xff] %v434_v17  ;;  %v438_v23 = vld [vmem:[%s2349_s18 + $0xa] sm:$0x1]  ;;  %v439_v26 = vld [vmem:[%s2349_s18 + $0xc] sm:$0x1] }
  0x35   : > { %v440_v27 = vld [vmem:[%s2349_s18 + $0xe] sm:$0x1]  ;;  %v446_v40 = vld [vmem:[%s2365_s22 + $0xa] sm:$0x1]  ;;  %v447_v52 = vld [vmem:[%s2365_s22 + $0xc] sm:$0x1] }
  0x36   : > { %v448_v55 = vld [vmem:[%s2365_s22 + $0xe] sm:$0x1]  ;;  %v621_v8 = vld [vmem:[%s2386_s12] sm:$0x1]  ;;  %v622_v11 = vld [vmem:[%s2386_s12 + $0x2] sm:$0x1] }
  0x37   : > { %vm1601_vm12 = vsmask.f32 256  ;;  %vm1711_vm14 = vsmask.f32 7938 }
  0x38   : > { %vm2838_vm13 = vmand %vm1600_vm11, %vm1601_vm12 }
  0x39   : > { %vm2880_vm15 = vmand %vm1600_vm11, %vm1711_vm14 }
  0x3a   : > { %v451_v20 = vld.sshfl [vmem:[#allocation1] sm:$0xff pattern:$0x73625140] }
  0x3b   : > { %v456_v21 = vld.sshfl [vmem:[#allocation1 + $0x20] sm:$0xff pattern:$0x73625140]  ;;  %459 = vst [vmem:[#allocation1] ss:$4 sm:$0xff] %v435_v18  ;;  %v482_v49 = vunpack.c.l.b16 %v451_v20 }
  0x3c   : > { %463 = vst [vmem:[#allocation1 + $0x20] ss:$4 sm:$0xff] %v436_v19  ;;  %v483_v42 = vunpack.c.l.b16 %v456_v21 }
  0x3e   : > { %v490_v50 = vrot.slane %v483_v42, 7  ;;  %v628_v42 = vld [vmem:[%s2386_s12 + $0xe] sm:$0x1] }
  0x40   : > { %v492_v59 = vsel %vm491_vm0, %v490_v50, %v482_v49  ;;  %v710_v49 = vld [vmem:[%s2349_s18 + $0x4] sm:$0x1]  ;;  %v711_v50 = vld [vmem:[%s2349_s18 + $0x6] sm:$0x1] }
  0x42   : > { %v460_v24 = vld.sshfl [vmem:[#allocation1] sm:$0xff pattern:$0x73625140] }
  0x43   : > { %v464_v25 = vld.sshfl [vmem:[#allocation1 + $0x20] sm:$0xff pattern:$0x73625140]  ;;  %467 = vst [vmem:[#allocation1] ss:$4 sm:$0xff] %v437_v22  ;;  %v484_v47 = vunpack.c.l.b16 %v460_v24 }
  0x44   : > { %471 = vst [vmem:[#allocation1 + $0x20] ss:$4 sm:$0xff] %v438_v23  ;;  %v485_v54 = vunpack.c.l.b16 %v464_v25 }
  0x45   : > { %v493_v56 = vrot.slane %v484_v47, 6  ;;  %v709_v47 = vld [vmem:[%s2349_s18 + $0x2] sm:$0x1] }
  0x46   : > { %v496_v1 = vrot.slane %v485_v54, 5  ;;  %v713_v54 = vld [vmem:[%s2349_s18 + $0xa] sm:$0x1] }
  0x47   : > { %v495_v3 = vsel %vm494_vm1, %v493_v56, %v492_v59 }
  0x48   : > { %v498_v9 = vsel %vm497_vm2, %v496_v1, %v495_v3  ;;  %v718_v1 = vld [vmem:[%s2365_s22 + $0x4] sm:$0x1] }
  0x4a   : > { %v468_v28 = vld.sshfl [vmem:[#allocation1] sm:$0xff pattern:$0x73625140] }
  0x4b   : > { %v2362_v29 = vld.sshfl [vmem:[#allocation1 + $0x20] sm:$0xff pattern:$0x73625140]  ;;  %475 = vst [vmem:[#allocation1] ss:$4 sm:$0xff] %v439_v26  ;;  %v486_v63 = vunpack.c.l.b16 %v468_v28 }
  0x4c   : > { %479 = vst [vmem:[#allocation1 + $0x20] ss:$4 sm:$0xff] %v440_v27  ;;  %v487_v5 = vunpack.c.l.b16 %v2362_v29  ;;  %v623_v27 = vld [vmem:[%s2386_s12 + $0x4] sm:$0x1] }
  0x4d   : > { %v499_v6 = vrot.slane %v486_v63, 4 }
  0x4e   : > { %v502_v14 = vrot.slane %v487_v5, 3  ;;  %v720_v5 = vld [vmem:[%s2365_s22 + $0x8] sm:$0x1] }
  0x4f   : > { %v501_v17 = vsel %vm500_vm3, %v499_v6, %v498_v9  ;;  %v721_v6 = vld [vmem:[%s2365_s22 + $0xa] sm:$0x1]  ;;  %v722_v9 = vld [vmem:[%s2365_s22 + $0xc] sm:$0x1] }
  0x50   : > { %v504_v24 = vsel %vm503_vm4, %v502_v14, %v501_v17  ;;  %v891_v14 = vld [vmem:[%s2386_s12 + $0x2] sm:$0x1]  ;;  %v892_v17 = vld [vmem:[%s2386_s12 + $0x4] sm:$0x1] }
  0x52   : > { %v2369_v32 = vld.sshfl [vmem:[#allocation1] sm:$0xff pattern:$0x73625140] }
  0x53   : > { %v2371_v33 = vld.sshfl [vmem:[#allocation1 + $0x20] sm:$0xff pattern:$0x73625140]  ;;  %513 = vst [vmem:[#allocation1] ss:$4 sm:$0xff] %v441_v30  ;;  %v488_v12 = vunpack.c.l.b16 %v2369_v32 }
  0x54   : > { %518 = vst [vmem:[#allocation1 + $0x20] ss:$4 sm:$0xff] %v442_v31  ;;  %v489_v20 = vunpack.c.l.b16 %v2371_v33  ;;  %v624_v30 = vld [vmem:[%s2386_s12 + $0x6] sm:$0x1] }
  0x55   : > { %v505_v22 = vrot.slane %v488_v12, 2 }
  0x56   : > { %v508_v28 = vrot.slane %v489_v20, 1 }
  0x57   : > { %v507_v31 = vsel %vm506_vm5, %v505_v22, %v504_v24  ;;  %v895_v22 = vld [vmem:[%s2386_s12 + $0xa] sm:$0x1] }
  0x5a   : > { %v514_v36 = vld.sshfl [vmem:[#allocation1] sm:$0xff pattern:$0x73625140] }
  0x5b   : > { %v519_v37 = vld.sshfl [vmem:[#allocation1 + $0x20] sm:$0xff pattern:$0x73625140]  ;;  %522 = vst [vmem:[#allocation1] ss:$4 sm:$0xff] %v443_v34  ;;  %v545_v45 = vunpack.c.l.b16 %v514_v36 }
  0x5c   : > { %526 = vst [vmem:[#allocation1 + $0x20] ss:$4 sm:$0xff] %v444_v35  ;;  %v546_v39 = vunpack.c.l.b16 %v519_v37  ;;  %v510_v35 = vsel %vm509_vm6, %v508_v28, %v507_v31  ;;  %v625_v37 = vld [vmem:[%s2386_s12 + $0x8] sm:$0x1] }
  0x5d   : > { %v511_v36 = vpack.c.b16 %v510_v35, %v510_v35 }
  0x5e   : > { %v553_v46 = vrot.slane %v546_v39, 7 }
  0x60   : > { %v554_v53 = vsel %vm491_vm0, %v553_v46, %v545_v45  ;;  %v708_v45 = vld [vmem:[%s2349_s18] sm:$0x1] }
  0x62   : > { %v523_v41 = vld.sshfl [vmem:[#allocation1] sm:$0xff pattern:$0x73625140] }
  0x63   : > { %v527_v43 = vld.sshfl [vmem:[#allocation1 + $0x20] sm:$0xff pattern:$0x73625140]  ;;  %530 = vst [vmem:[#allocation1] ss:$4 sm:$0xff] %v445_v38  ;;  %v547_v44 = vunpack.c.l.b16 %v523_v41 }
  0x64   : > { %534 = vst [vmem:[#allocation1 + $0x20] ss:$4 sm:$0xff] %v446_v40  ;;  %v548_v48 = vunpack.c.l.b16 %v527_v43  ;;  %v626_v38 = vld [vmem:[%s2386_s12 + $0xa] sm:$0x1]  ;;  %v627_v41 = vld [vmem:[%s2386_s12 + $0xc] sm:$0x1] }
  0x65   : > { %v555_v51 = vrot.slane %v547_v44, 6 }
  0x66   : > { %v557_v58 = vrot.slane %v548_v48, 5 }
  0x67   : > { %v556_v62 = vsel %vm494_vm1, %v555_v51, %v554_v53  ;;  %v712_v53 = vld [vmem:[%s2349_s18 + $0x8] sm:$0x1] }
  0x68   : > { %v558_v4 = vsel %vm497_vm2, %v557_v58, %v556_v62  ;;  %v715_v58 = vld [vmem:[%s2349_s18 + $0xe] sm:$0x1]  ;;  %v717_v62 = vld [vmem:[%s2365_s22 + $0x2] sm:$0x1] }
  0x6a   : > { %v531_v57 = vld.sshfl [vmem:[#allocation1] sm:$0xff pattern:$0x73625140] }
  0x6b   : > { %v535_v60 = vld.sshfl [vmem:[#allocation1 + $0x20] sm:$0xff pattern:$0x73625140]  ;;  %538 = vst [vmem:[#allocation1] ss:$4 sm:$0xff] %v447_v52  ;;  %v549_v61 = vunpack.c.l.b16 %v531_v57 }
  0x6c   : > { %542 = vst [vmem:[#allocation1 + $0x20] ss:$4 sm:$0xff] %v448_v55  ;;  %v550_v0 = vunpack.c.l.b16 %v535_v60  ;;  %v714_v57 = vld [vmem:[%s2349_s18 + $0xc] sm:$0x1] }
  0x6d   : > { %v559_v2 = vrot.slane %v549_v61, 4  ;;  %v716_v61 = vld [vmem:[%s2365_s22] sm:$0x1] }
  0x6e   : > { %v561_v7 = vrot.slane %v550_v0, 3 }
  0x6f   : > { %v560_v10 = vsel %vm500_vm3, %v559_v2, %v558_v4  ;;  %v719_v2 = vld [vmem:[%s2365_s22 + $0x6] sm:$0x1] }
  0x70   : > { %v562_v19 = vsel %vm503_vm4, %v561_v7, %v560_v10  ;;  %v723_v10 = vld [vmem:[%s2365_s22 + $0xe] sm:$0x1] }
  0x72   : > { %v539_v13 = vld.sshfl [vmem:[#allocation1] sm:$0xff pattern:$0x73625140] }
  0x73   : > { %v543_v15 = vld.sshfl [vmem:[#allocation1 + $0x20] sm:$0xff pattern:$0x73625140]  ;;  %v551_v16 = vunpack.c.l.b16 %v539_v13  ;;  %630 = vst [vmem:[#allocation1] ss:$4 sm:$0xff] %v621_v8 }
  0x74   : > { %v552_v18 = vunpack.c.l.b16 %v543_v15  ;;  %635 = vst [vmem:[#allocation1 + $0x20] ss:$4 sm:$0xff] %v622_v11  ;;  %v890_v13 = vld [vmem:[%s2386_s12] sm:$0x1] }
  0x75   : > { %v563_v21 = vrot.slane %v551_v16, 2 }
  0x76   : > { %v565_v23 = vrot.slane %v552_v18, 1  ;;  %v893_v18 = vld [vmem:[%s2386_s12 + $0x6] sm:$0x1] }
  0x77   : > { %v564_v25 = vsel %vm506_vm5, %v563_v21, %v562_v19  ;;  %v894_v21 = vld [vmem:[%s2386_s12 + $0x8] sm:$0x1] }
  0x78   : > { %v566_v26 = vsel %vm509_vm6, %v565_v23, %v564_v25 }
  0x79   : > { %v567_v29 = vpack.c.b16 %v566_v26, %v566_v26 }
  0x7a   : > { %v2402_v32 = vld.sshfl [vmem:[#allocation1] sm:$0xff pattern:$0x73625140] }
  0x7b   : > { %v573_v33 = vsel %vm428_vm7, %v567_v29, 0  ;;  %v2405_v34 = vld.sshfl [vmem:[#allocation1 + $0x20] sm:$0xff pattern:$0x73625140]  ;;  %639 = vst [vmem:[#allocation1] ss:$4 sm:$0xff] %v623_v27 }
  0x7c   : > { %582 = vmatpush.bf16.xpose.msra.mxu0 %v573_v33  ;;  %643 = vst [vmem:[#allocation1 + $0x20] ss:$4 sm:$0xff] %v624_v30 }
  0x82   : > { %v2410_v39 = vld.sshfl [vmem:[#allocation1] sm:$0xff pattern:$0x73625140] }
  0x83   : > { %v2412_v40 = vld.sshfl [vmem:[#allocation1 + $0x20] sm:$0xff pattern:$0x73625140]  ;;  %647 = vst [vmem:[#allocation1] ss:$4 sm:$0xff] %v625_v37  ;;  %2116 = vmatmul.msk.bf16.vlgmr.msra.gmra.mxu0 %vm428_vm7, %v511_v36 }
  0x84   : > { %651 = vst [vmem:[#allocation1 + $0x20] ss:$4 sm:$0xff] %v626_v38  ;;  %v896_v38 = vld [vmem:[%s2386_s12 + $0xc] sm:$0x1] }
  0x8a   : > { %v2417_v43 = vld.sshfl [vmem:[#allocation1] sm:$0xff pattern:$0x73625140] }
  0x8b   : > { %v2419_v44 = vld.sshfl [vmem:[#allocation1 + $0x20] sm:$0xff pattern:$0x73625140]  ;;  %655 = vst [vmem:[#allocation1] ss:$4 sm:$0xff] %v627_v41 }
  0x8c   : > { %659 = vst [vmem:[#allocation1 + $0x20] ss:$4 sm:$0xff] %v628_v42 }
  0x92   : > { %v2422_v46 = vld.sshfl [vmem:[#allocation1] sm:$0xff pattern:$0x73625140] }
  0x93   : > { %v2425_v48 = vld.sshfl [vmem:[#allocation1 + $0x20] sm:$0xff pattern:$0x73625140]  ;;  %725 = vst [vmem:[#allocation1] ss:$4 sm:$0xff] %v708_v45 }
  0x94   : > { %730 = vst [vmem:[#allocation1 + $0x20] ss:$4 sm:$0xff] %v709_v47  ;;  %v897_v45 = vld [vmem:[%s2386_s12 + $0xe] sm:$0x1] }
  0x9a   : > { %v2429_v51 = vld.sshfl [vmem:[#allocation1] sm:$0xff pattern:$0x73625140] }
  0x9b   : > { %v2431_v52 = vld.sshfl [vmem:[#allocation1 + $0x20] sm:$0xff pattern:$0x73625140]  ;;  %734 = vst [vmem:[#allocation1] ss:$4 sm:$0xff] %v710_v49 }
  0x9c   : > { %738 = vst [vmem:[#allocation1 + $0x20] ss:$4 sm:$0xff] %v711_v50 }
  0xa2   : > { %v2435_v55 = vld.sshfl [vmem:[#allocation1] sm:$0xff pattern:$0x73625140] }
  0xa3   : > { %v2437_v56 = vld.sshfl [vmem:[#allocation1 + $0x20] sm:$0xff pattern:$0x73625140]  ;;  %742 = vst [vmem:[#allocation1] ss:$4 sm:$0xff] %v712_v53 }
  0xa4   : > { %746 = vst [vmem:[#allocation1 + $0x20] ss:$4 sm:$0xff] %v713_v54 }
  0xaa   : > { %v2441_v59 = vld.sshfl [vmem:[#allocation1] sm:$0xff pattern:$0x73625140] }
  0xab   : > { %v2443_v60 = vld.sshfl [vmem:[#allocation1 + $0x20] sm:$0xff pattern:$0x73625140]  ;;  %750 = vst [vmem:[#allocation1] ss:$4 sm:$0xff] %v714_v57 }
  0xac   : > { %754 = vst [vmem:[#allocation1 + $0x20] ss:$4 sm:$0xff] %v715_v58 }
  0xb2   : > { %v2447_v63 = vld.sshfl [vmem:[#allocation1] sm:$0xff pattern:$0x73625140] }
  0xb3   : > { %v2449_v0 = vld.sshfl [vmem:[#allocation1 + $0x20] sm:$0xff pattern:$0x73625140]  ;;  %781 = vst [vmem:[#allocation1] ss:$4 sm:$0xff] %v716_v61 }
  0xb4   : > { %786 = vst [vmem:[#allocation1 + $0x20] ss:$4 sm:$0xff] %v717_v62 }
  0xba   : > { %v782_v3 = vld.sshfl [vmem:[#allocation1] sm:$0xff pattern:$0x73625140] }
  0xbb   : > { %v787_v4 = vld.sshfl [vmem:[#allocation1 + $0x20] sm:$0xff pattern:$0x73625140]  ;;  %790 = vst [vmem:[#allocation1] ss:$4 sm:$0xff] %v718_v1  ;;  %v813_v25 = vunpack.c.l.b16 %v782_v3 }
  0xbc   : > { %794 = vst [vmem:[#allocation1 + $0x20] ss:$4 sm:$0xff] %v719_v2  ;;  %v814_v26 = vunpack.c.l.b16 %v787_v4  ;;  %v976_v3 = vld [vmem:[%s2349_s18] sm:$0x2] }
  0xbd   : > { %v821_v35 = vrot.slane %v813_v25, 1  ;;  %v982_v25 = vld [vmem:[%s2349_s18 + $0xc] sm:$0x2] }
  0xbf   : > { %v822_v47 = vsel %vm491_vm0, %v814_v26, %v821_v35  ;;  %v983_v26 = vld [vmem:[%s2349_s18 + $0xe] sm:$0x2]  ;;  %v757_v35 = vunpack.c.l.b16 %v2429_v51 }
  0xc2   : > { %v791_v7 = vld.sshfl [vmem:[#allocation1] sm:$0xff pattern:$0x73625140] }
  0xc3   : > { %v795_v8 = vld.sshfl [vmem:[#allocation1 + $0x20] sm:$0xff pattern:$0x73625140]  ;;  %798 = vst [vmem:[#allocation1] ss:$4 sm:$0xff] %v720_v5  ;;  %v815_v27 = vunpack.c.l.b16 %v791_v7 }
  0xc4   : > { %802 = vst [vmem:[#allocation1 + $0x20] ss:$4 sm:$0xff] %v721_v6  ;;  %v816_v28 = vunpack.c.l.b16 %v795_v8  ;;  %v977_v5 = vld [vmem:[%s2349_s18 + $0x2] sm:$0x2] }
  0xc5   : > { %v823_v36 = vrot.slane %v815_v27, 7 }
  0xc6   : > { %v825_v37 = vrot.slane %v816_v28, 6 }
  0xc7   : > { %v824_v53 = vsel %vm494_vm1, %v823_v36, %v822_v47  ;;  %v758_v36 = vunpack.c.l.b16 %v2431_v52  ;;  %v764_v47 = vunpack.c.l.b16 %v2449_v0 }
  0xc8   : > { %v826_v57 = vsel %vm497_vm2, %v825_v37, %v824_v53  ;;  %v759_v37 = vunpack.c.l.b16 %v2435_v55  ;;  %v765_v53 = vrot.slane %v757_v35, 1  ;;  %v987_v55 = vld [vmem:[%s2365_s22 + $0x6] sm:$0x2] }
  0xc9   : > { %v777_v0 = vrot.slane %v764_v47, 2 }
  0xca   : > { %v799_v11 = vld.sshfl [vmem:[#allocation1] sm:$0xff pattern:$0x73625140]  ;;  %v766_v52 = vsel %vm491_vm0, %v758_v36, %v765_v53  ;;  %v1160_v36 = vld [vmem:[%s2386_s12 + $0x4] sm:$0x2] }
  0xcb   : > { %v803_v12 = vld.sshfl [vmem:[#allocation1 + $0x20] sm:$0xff pattern:$0x73625140]  ;;  %806 = vst [vmem:[#allocation1] ss:$4 sm:$0xff] %v722_v9  ;;  %v817_v29 = vunpack.c.l.b16 %v799_v11 }
  0xcc   : > { %810 = vst [vmem:[#allocation1 + $0x20] ss:$4 sm:$0xff] %v723_v10  ;;  %v818_v30 = vunpack.c.l.b16 %v803_v12  ;;  %v978_v9 = vld [vmem:[%s2349_s18 + $0x4] sm:$0x2]  ;;  %v979_v10 = vld [vmem:[%s2349_s18 + $0x6] sm:$0x2] }
  0xcd   : > { %v827_v41 = vrot.slane %v817_v29, 5  ;;  %v984_v29 = vld [vmem:[%s2365_s22] sm:$0x2] }
  0xce   : > { %v829_v42 = vrot.slane %v818_v30, 4  ;;  %v985_v30 = vld [vmem:[%s2365_s22 + $0x2] sm:$0x2] }
  0xcf   : > { %v828_v61 = vsel %vm500_vm3, %v827_v41, %v826_v57  ;;  %v761_v41 = vunpack.c.l.b16 %v2441_v59  ;;  %v2257_v59 = vmov -inf  }
  0xd0   : > { %v830_v62 = vsel %vm503_vm4, %v829_v42, %v828_v61  ;;  %v762_v42 = vunpack.c.l.b16 %v2443_v60  ;;  %420 = vst.msk [vmem:[#allocation2] sm:$0xff] %vm419_vm8, %v2257_v59 }
  0xd1   : > { %v771_v51 = vrot.slane %v761_v41, 5  ;;  %421 = vst.msk [vmem:[#allocation2 + $0x8] sm:$0xff] %vm419_vm8, %v2257_v59 }
  0xd2   : > { %v807_v15 = vld.sshfl [vmem:[#allocation1] sm:$0xff pattern:$0x73625140]  ;;  %v773_v61 = vrot.slane %v762_v42, 4  ;;  %422 = vst.msk [vmem:[#allocation2 + $0x10] sm:$0xff] %vm419_vm8, %v2257_v59 }
  0xd3   : > { %v811_v16 = vld.sshfl [vmem:[#allocation1 + $0x20] sm:$0xff pattern:$0x73625140]  ;;  %899 = vst [vmem:[#allocation1] ss:$4 sm:$0xff] %v890_v13  ;;  %v819_v31 = vunpack.c.l.b16 %v807_v15 }
  0xd4   : > { %904 = vst [vmem:[#allocation1 + $0x20] ss:$4 sm:$0xff] %v891_v14  ;;  %v820_v33 = vunpack.c.l.b16 %v811_v16  ;;  %v980_v15 = vld [vmem:[%s2349_s18 + $0x8] sm:$0x2]  ;;  %v1162_v42 = vld [vmem:[%s2386_s12 + $0x8] sm:$0x2] }
  0xd5   : > { %v831_v54 = vrot.slane %v819_v31, 3  ;;  %423 = vst.msk [vmem:[#allocation2 + $0x18] sm:$0xff] %vm419_vm8, %v2257_v59  ;;  %v1246_v59 = vld [vmem:[%s2349_s18 + $0x4] sm:$0x2] }
  0xd6   : > { %v833_v58 = vrot.slane %v820_v33, 2 }
  0xd7   : > { %v832_v1 = vsel %vm506_vm5, %v831_v54, %v830_v62  ;;  %v767_v54 = vrot.slane %v759_v37, 7  ;;  %v1161_v37 = vld [vmem:[%s2386_s12 + $0x6] sm:$0x2] }
  0xd8   : > { %v834_v2 = vsel %vm509_vm6, %v833_v58, %v832_v1  ;;  %v986_v58 = vld [vmem:[%s2365_s22 + $0x4] sm:$0x2] }
  0xd9   : > { %v835_v4 = vpack.c.b16 %v834_v2, %v834_v2 }
  0xda   : > { %v2461_v19 = vld.sshfl [vmem:[#allocation1] sm:$0xff pattern:$0x73625140] }
  0xdb   : > { %v2463_v20 = vld.sshfl [vmem:[#allocation1 + $0x20] sm:$0xff pattern:$0x73625140]  ;;  %908 = vst [vmem:[#allocation1] ss:$4 sm:$0xff] %v892_v17  ;;  %v840_v7 = vsel %vm428_vm7, %v835_v4, 0 }
  0xdc   : > { %912 = vst [vmem:[#allocation1 + $0x20] ss:$4 sm:$0xff] %v893_v18  ;;  %849 = vmatpush.bf16.xpose.msra.mxu2 %v840_v7  ;;  %v981_v17 = vld [vmem:[%s2349_s18 + $0xa] sm:$0x2] }
  0xe2   : > { %v2467_v23 = vld.sshfl [vmem:[#allocation1] sm:$0xff pattern:$0x73625140] }
  0xe3   : > { %v2469_v24 = vld.sshfl [vmem:[#allocation1 + $0x20] sm:$0xff pattern:$0x73625140]  ;;  %916 = vst [vmem:[#allocation1] ss:$4 sm:$0xff] %v894_v21 }
  0xe4   : > { %920 = vst [vmem:[#allocation1 + $0x20] ss:$4 sm:$0xff] %v895_v22 }
  0xea   : > { %v2474_v49 = vld.sshfl [vmem:[#allocation1] sm:$0xff pattern:$0x73625140] }
  0xeb   : > { %v2476_v50 = vld.sshfl [vmem:[#allocation1 + $0x20] sm:$0xff pattern:$0x73625140]  ;;  %924 = vst [vmem:[#allocation1] ss:$4 sm:$0xff] %v896_v38  ;;  %v760_v38 = vunpack.c.l.b16 %v2437_v56  ;;  %v768_v56 = vsel %vm494_vm1, %v767_v54, %v766_v52 }
  0xec   : > { %928 = vst [vmem:[#allocation1 + $0x20] ss:$4 sm:$0xff] %v897_v45  ;;  %v763_v45 = vunpack.c.l.b16 %v2447_v63  ;;  %v1164_v54 = vld [vmem:[%s2386_s12 + $0xc] sm:$0x2]  ;;  %v1244_v52 = vld [vmem:[%s2349_s18] sm:$0x2] }
  0xed   : > { %v769_v57 = vrot.slane %v760_v38, 6 }
  0xee   : > { %v775_v62 = vrot.slane %v763_v45, 3  ;;  %v1163_v45 = vld [vmem:[%s2386_s12 + $0xa] sm:$0x2] }
  0xef   : > { %v770_v63 = vsel %vm497_vm2, %v769_v57, %v768_v56  ;;  %v1165_v57 = vld [vmem:[%s2386_s12 + $0xe] sm:$0x2] }
  0xf0   : > { %v772_v2 = vsel %vm500_vm3, %v771_v51, %v770_v63 }
  0xf2   : > { %v2486_v6 = vld.sshfl [vmem:[#allocation1] sm:$0xff pattern:$0x73625140] }
  0xf3   : > { %v2489_v8 = vld.sshfl [vmem:[#allocation1 + $0x20] sm:$0xff pattern:$0x73625140]  ;;  %993 = vst [vmem:[#allocation1] ss:$4 sm:$0xff] %v976_v3  ;;  %v774_v3 = vsel %vm503_vm4, %v773_v61, %v772_v2 }
  0xf4   : > { %998 = vst [vmem:[#allocation1 + $0x20] ss:$4 sm:$0xff] %v977_v5  ;;  %v776_v4 = vsel %vm506_vm5, %v775_v62, %v774_v3  ;;  %v2258_v62 = vmov 0   ;;  %v2259_v3 = vmov 0.0  }
  0xf5   : > { %v778_v5 = vsel %vm509_vm6, %v777_v0, %v776_v4  ;;  %2190 = vset.pattern.permute.xlu0 %v2258_v62  ;;  %2191 = vset.pattern.permute.xlu2 %v2258_v62  ;;  %v1247_v0 = vld [vmem:[%s2349_s18 + $0x6] sm:$0x2]  ;;  %425 = vst.msk [vmem:[#allocation3 + $0x8] sm:$0xff] %vm419_vm8, %v2259_v3  ;;  %v1248_v4 = vld [vmem:[%s2349_s18 + $0x8] sm:$0x2] }
  0xf6   : > { %v779_v7 = vpack.c.b16 %v778_v5, %v778_v5  ;;  %2192 = vset.pattern.permute.xlu1 %v2258_v62  ;;  %424 = vst.msk [vmem:[#allocation3] sm:$0xff] %vm419_vm8, %v2259_v3  ;;  %v1249_v5 = vld [vmem:[%s2349_s18 + $0xa] sm:$0x2]  ;;  %v1255_v62 = vld [vmem:[%s2365_s22 + $0x6] sm:$0x2] }
  0xf7   : > { %426 = vst.msk [vmem:[#allocation3 + $0x10] sm:$0xff] %vm419_vm8, %v2259_v3 }
  0xf8   : > { %2118 = vmatmul.msk.bf16.vlgmr.msra.gmra.mxu2 %vm428_vm7, %v779_v7  ;;  %427 = vst.msk [vmem:[#allocation3 + $0x18] sm:$0xff] %vm419_vm8, %v2259_v3 }
  0xf9   : > { %429 = vst.msk [vmem:[#allocation4] sm:$0xff] %vm428_vm7, %v2259_v3 }
  0xfa   : > { %v2493_v11 = vld.sshfl [vmem:[#allocation1] sm:$0xff pattern:$0x73625140]  ;;  %430 = vst.msk [vmem:[#allocation4 + $0x8] sm:$0xff] %vm428_vm7, %v2259_v3 }
  0xfb   : > { %v2495_v12 = vld.sshfl [vmem:[#allocation1 + $0x20] sm:$0xff pattern:$0x73625140]  ;;  %1002 = vst [vmem:[#allocation1] ss:$4 sm:$0xff] %v978_v9 }
  0xfc   : > { %1006 = vst [vmem:[#allocation1 + $0x20] ss:$4 sm:$0xff] %v979_v10  ;;  %v988_v9 = vld [vmem:[%s2365_s22 + $0x8] sm:$0x2]  ;;  %v989_v10 = vld [vmem:[%s2365_s22 + $0xa] sm:$0x2] }
  0xfd   : > { %431 = vst.msk [vmem:[#allocation4 + $0x10] sm:$0xff] %vm428_vm7, %v2259_v3 }
  0xfe   : > { %432 = vst.msk [vmem:[#allocation4 + $0x18] sm:$0xff] %vm428_vm7, %v2259_v3  ;;  %v1256_v3 = vld [vmem:[%s2365_s22 + $0x8] sm:$0x2] }
 0x100   : > { %v584_v13 = vpop.f32.mrf.mxu0 }
 0x101   : > { %v2497_v14 = vmul.f32 0.35355338, %v584_v13 }
 0x102   : > { %v2503_v18 = vld.sshfl [vmem:[#allocation1] sm:$0xff pattern:$0x73625140] }
 0x103   : > { %v590_v16 = vsel %vm428_vm7, %v2497_v14, -inf  ;;  %v2505_v21 = vld.sshfl [vmem:[#allocation1 + $0x20] sm:$0xff pattern:$0x73625140]  ;;  %1010 = vst [vmem:[#allocation1] ss:$4 sm:$0xff] %v980_v15 }
 0x104   : > { %591 = vmax.xlane.f32.xlu0 %v590_v16  ;;  %1014 = vst [vmem:[#allocation1 + $0x20] ss:$4 sm:$0xff] %v981_v17  ;;  %v990_v16 = vld [vmem:[%s2365_s22 + $0xc] sm:$0x2]  ;;  %v991_v17 = vld [vmem:[%s2365_s22 + $0xe] sm:$0x2] }
 0x108   : > { %v586_v22 = vpop.f32.mrf.mxu0 }
 0x10a   : > { %v2509_v27 = vld.sshfl [vmem:[#allocation1] sm:$0xff pattern:$0x73625140] }
 0x10b   : > { %v2511_v28 = vld.sshfl [vmem:[#allocation1 + $0x20] sm:$0xff pattern:$0x73625140]  ;;  %1018 = vst [vmem:[#allocation1] ss:$4 sm:$0xff] %v982_v25 }
 0x10c   : > { %1022 = vst [vmem:[#allocation1 + $0x20] ss:$4 sm:$0xff] %v983_v26  ;;  %v1158_v26 = vld [vmem:[%s2386_s12] sm:$0x2] }
 0x112   : > { %v2515_v31 = vld.sshfl [vmem:[#allocation1] sm:$0xff pattern:$0x73625140] }
 0x113   : > { %v2517_v33 = vld.sshfl [vmem:[#allocation1 + $0x20] sm:$0xff pattern:$0x73625140]  ;;  %1049 = vst [vmem:[#allocation1] ss:$4 sm:$0xff] %v984_v29 }
 0x114   : > { %1054 = vst [vmem:[#allocation1 + $0x20] ss:$4 sm:$0xff] %v985_v30  ;;  %v1159_v29 = vld [vmem:[%s2386_s12 + $0x2] sm:$0x2] }
 0x11a   : > { %v2532_v60 = vld.sshfl [vmem:[#allocation1] sm:$0xff pattern:$0x73625140] }
 0x11b   : > { %v2536_v1 = vld.sshfl [vmem:[#allocation1 + $0x20] sm:$0xff pattern:$0x73625140]  ;;  %1058 = vst [vmem:[#allocation1] ss:$4 sm:$0xff] %v986_v58 }
 0x11c   : > { %1062 = vst [vmem:[#allocation1 + $0x20] ss:$4 sm:$0xff] %v987_v55  ;;  %v1245_v55 = vld [vmem:[%s2349_s18 + $0x2] sm:$0x2] }
 0x122   : > { %v2547_v13 = vld.sshfl [vmem:[#allocation1] sm:$0xff pattern:$0x73625140] }
 0x123   : > { %v2549_v15 = vld.sshfl [vmem:[#allocation1 + $0x20] sm:$0xff pattern:$0x73625140]  ;;  %1066 = vst [vmem:[#allocation1] ss:$4 sm:$0xff] %v988_v9 }
 0x124   : > { %1070 = vst [vmem:[#allocation1 + $0x20] ss:$4 sm:$0xff] %v989_v10  ;;  %v1250_v10 = vld [vmem:[%s2349_s18 + $0xc] sm:$0x2] }
 0x12a   : > { %v2553_v22 = vld.sshfl [vmem:[#allocation1] sm:$0xff pattern:$0x73625140] }
 0x12b   : > { %v2555_v25 = vld.sshfl [vmem:[#allocation1 + $0x20] sm:$0xff pattern:$0x73625140]  ;;  %1074 = vst [vmem:[#allocation1] ss:$4 sm:$0xff] %v990_v16 }
 0x12c   : > { %1078 = vst [vmem:[#allocation1 + $0x20] ss:$4 sm:$0xff] %v991_v17  ;;  %v1251_v16 = vld [vmem:[%s2349_s18 + $0xe] sm:$0x2] }
 0x132   : > { %v2559_v30 = vld.sshfl [vmem:[#allocation1] sm:$0xff pattern:$0x73625140] }
 0x133   : > { %v2561_v35 = vld.sshfl [vmem:[#allocation1 + $0x20] sm:$0xff pattern:$0x73625140]  ;;  %1167 = vst [vmem:[#allocation1] ss:$4 sm:$0xff] %v1158_v26 }
 0x134   : > { %1172 = vst [vmem:[#allocation1 + $0x20] ss:$4 sm:$0xff] %v1159_v29  ;;  %v2605_v29 = vld [vmem:[#allocation2] sm:$0xff] }
 0x13a   : > { %v2565_v38 = vld.sshfl [vmem:[#allocation1] sm:$0xff pattern:$0x73625140] }
 0x13b   : > { %3060 = vst [vmem:[#allocation7_spill] sm:$0xff] %v2565_v38  ;;  %v2567_v41 = vld.sshfl [vmem:[#allocation1 + $0x20] sm:$0xff pattern:$0x73625140] }
 0x13c   : > { %3061 = vst [vmem:[#allocation8_spill] sm:$0xff] %v2567_v41 }
 0x13d   : > { %1176 = vst [vmem:[#allocation1] ss:$4 sm:$0xff] %v1160_v36  ;;  %v1252_v36 = vld [vmem:[%s2365_s22] sm:$0x2] }
 0x13e   : > { %1180 = vst [vmem:[#allocation1 + $0x20] ss:$4 sm:$0xff] %v1161_v37  ;;  %v1253_v37 = vld [vmem:[%s2365_s22 + $0x2] sm:$0x2] }
 0x144   : > { %v2571_v47 = vld.sshfl [vmem:[#allocation1] sm:$0xff pattern:$0x73625140] }
 0x145   : > { %3062 = vst [vmem:[#allocation9_spill] sm:$0xff] %v2571_v47  ;;  %v2573_v53 = vld.sshfl [vmem:[#allocation1 + $0x20] sm:$0xff pattern:$0x73625140] }
 0x146   : > { %3063 = vst [vmem:[#allocation10_spill] sm:$0xff] %v2573_v53  ;;  %v1259_v53 = vld [vmem:[%s2365_s22 + $0xe] sm:$0x2] }
 0x147   : > { %1184 = vst [vmem:[#allocation1] ss:$4 sm:$0xff] %v1162_v42 }
 0x148   : > { %1188 = vst [vmem:[#allocation1 + $0x20] ss:$4 sm:$0xff] %v1163_v45 }
 0x14e   : > { %v2577_v51 = vld.sshfl [vmem:[#allocation1] sm:$0xff pattern:$0x73625140] }
 0x14f   : > { %3064 = vst [vmem:[#allocation11_spill] sm:$0xff] %v2577_v51  ;;  %v2579_v58 = vld.sshfl [vmem:[#allocation1 + $0x20] sm:$0xff pattern:$0x73625140] }
 0x150   : > { %3065 = vst [vmem:[#allocation12_spill] sm:$0xff] %v2579_v58 }
 0x151   : > { %1192 = vst [vmem:[#allocation1] ss:$4 sm:$0xff] %v1164_v54 }
 0x152   : > { %1196 = vst [vmem:[#allocation1 + $0x20] ss:$4 sm:$0xff] %v1165_v57 }
 0x158   : > { %v2582_v61 = vld.sshfl [vmem:[#allocation1] sm:$0xff pattern:$0x73625140] }
 0x159   : > { %3066 = vst [vmem:[#allocation13_spill] sm:$0xff] %v2582_v61  ;;  %v2585_v56 = vld.sshfl [vmem:[#allocation1 + $0x20] sm:$0xff pattern:$0x73625140] }
 0x15a   : > { %3067 = vst [vmem:[#allocation14_spill] sm:$0xff] %v2585_v56 }
 0x15b   : > { %1261 = vst [vmem:[#allocation1] ss:$4 sm:$0xff] %v1244_v52 }
 0x15c   : > { %1266 = vst [vmem:[#allocation1 + $0x20] ss:$4 sm:$0xff] %v1245_v55  ;;  %v1254_v55 = vld [vmem:[%s2365_s22 + $0x4] sm:$0x2] }
 0x162   : > { %v1262_v63 = vld.sshfl [vmem:[#allocation1] sm:$0xff pattern:$0x73625140] }
 0x163   : > { %v1267_v2 = vld.sshfl [vmem:[#allocation1 + $0x20] sm:$0xff pattern:$0x73625140]  ;;  %1270 = vst [vmem:[#allocation1] ss:$4 sm:$0xff] %v1246_v59 }
 0x164   : > { %1274 = vst [vmem:[#allocation1 + $0x20] ss:$4 sm:$0xff] %v1247_v0 }
 0x16a   : > { %v1271_v7 = vld.sshfl [vmem:[#allocation1] sm:$0xff pattern:$0x73625140] }
 0x16b   : > { %v2597_v9 = vld.sshfl [vmem:[#allocation1 + $0x20] sm:$0xff pattern:$0x73625140]  ;;  %1278 = vst [vmem:[#allocation1] ss:$4 sm:$0xff] %v1248_v4  ;;  %v1295_v58 = vunpack.c.l.b16 %v1271_v7 }
 0x16c   : > { %1282 = vst [vmem:[#allocation1 + $0x20] ss:$4 sm:$0xff] %v1249_v5 }
 0x172   : > { %v1279_v17 = vld.sshfl [vmem:[#allocation1] sm:$0xff pattern:$0x73625140] }
 0x173   : > { %v2603_v26 = vld.sshfl [vmem:[#allocation1 + $0x20] sm:$0xff pattern:$0x73625140]  ;;  %1286 = vst [vmem:[#allocation1] ss:$4 sm:$0xff] %v1250_v10 }
 0x174   : > { %1290 = vst [vmem:[#allocation1 + $0x20] ss:$4 sm:$0xff] %v1251_v16  ;;  %v1257_v10 = vld [vmem:[%s2365_s22 + $0xa] sm:$0x2] }
 0x177   : > { %v592_v42 = vpop.xlane.xlu0 %591 }
 0x178   : > { %v2612_v54 = vmax.f32 %v2605_v29, %v592_v42 }
 0x17a   : > { %v2609_v45 = vld.sshfl [vmem:[#allocation1] sm:$0xff pattern:$0x73625140]  ;;  %707 = vst.msk [vmem:[#allocation2] sm:$0xff] %vm419_vm8, %v2612_v54  ;;  %599 = vperm.xlu0 %2190, %v2612_v54  }
 0x17b   : > { %v2614_v57 = vld.sshfl [vmem:[#allocation1 + $0x20] sm:$0xff pattern:$0x73625140]  ;;  %1317 = vst [vmem:[#allocation1] ss:$4 sm:$0xff] %v1252_v36  ;;  %v1293_v36 = vunpack.c.l.b16 %v1262_v63 }
 0x17c   : > { %1322 = vst [vmem:[#allocation1 + $0x20] ss:$4 sm:$0xff] %v1253_v37  ;;  %v1294_v37 = vunpack.c.l.b16 %v1267_v2 }
 0x17d   : > { %v1301_v51 = vrot.slane %v1293_v36, 3 }
 0x17e   : > { %v1302_v47 = vrot.slane %v1294_v37, 2 }
 0x180   : > { %v1303_v63 = vsel %vm491_vm0, %v1302_v47, %v1301_v51  ;;  %v1299_v51 = vunpack.c.l.b16 %v2609_v45 }
 0x182   : > { %v1318_v59 = vld.sshfl [vmem:[#allocation1] sm:$0xff pattern:$0x73625140] }
 0x183   : > { %v1323_v0 = vld.sshfl [vmem:[#allocation1 + $0x20] sm:$0xff pattern:$0x73625140]  ;;  %1326 = vst [vmem:[#allocation1] ss:$4 sm:$0xff] %v1254_v55  ;;  %v1349_v4 = vunpack.c.l.b16 %v1318_v59 }
 0x184   : > { %1330 = vst [vmem:[#allocation1 + $0x20] ss:$4 sm:$0xff] %v1255_v62  ;;  %v1350_v5 = vunpack.c.l.b16 %v1323_v0  ;;  %v1258_v62 = vld [vmem:[%s2365_s22 + $0xc] sm:$0x2]  ;;  %v1304_v0 = vrot.slane %v1295_v58, 1  ;;  %v1298_v58 = vunpack.c.l.b16 %v2603_v26 }
 0x185   : > { %v1357_v56 = vrot.slane %v1349_v4, 3  ;;  %v1297_v4 = vunpack.c.l.b16 %v1279_v17 }
 0x186   : > { %v1358_v61 = vrot.slane %v1350_v5, 2  ;;  %v1296_v5 = vunpack.c.l.b16 %v2597_v9 }
 0x188   : > { %v1359_v59 = vsel %vm491_vm0, %v1358_v61, %v1357_v56  ;;  %v1307_v56 = vrot.slane %v1297_v4, 7 }
 0x18a   : > { %v1327_v16 = vld.sshfl [vmem:[#allocation1] sm:$0xff pattern:$0x73625140] }
 0x18b   : > { %v1331_v42 = vld.sshfl [vmem:[#allocation1 + $0x20] sm:$0xff pattern:$0x73625140]  ;;  %1334 = vst [vmem:[#allocation1] ss:$4 sm:$0xff] %v1256_v3  ;;  %v1351_v52 = vunpack.c.l.b16 %v1327_v16  ;;  %v1305_v16 = vsel %vm494_vm1, %v1304_v0, %v1303_v63 }
 0x18c   : > { %1338 = vst [vmem:[#allocation1 + $0x20] ss:$4 sm:$0xff] %v1257_v10  ;;  %v1352_v38 = vunpack.c.l.b16 %v1331_v42  ;;  %v1306_v47 = vsel %vm497_vm2, %v1296_v5, %v1305_v16 }
 0x18d   : > { %v1360_v55 = vrot.slane %v1351_v52, 1  ;;  %v1308_v9 = vsel %vm500_vm3, %v1307_v56, %v1306_v47  ;;  %v663_v56 = vunpack.c.l.b16 %v2405_v34  ;;  %v662_v47 = vunpack.c.l.b16 %v2402_v32 }
 0x18f   : > { %v1361_v10 = vsel %vm494_vm1, %v1360_v55, %v1359_v59  ;;  %v1311_v59 = vrot.slane %v1299_v51, 5  ;;  %v670_v51 = vrot.slane %v663_v56, 7 }
 0x190   : > { %v1362_v61 = vsel %vm497_vm2, %v1352_v38, %v1361_v10  ;;  %v1300_v38 = vunpack.c.l.b16 %v2614_v57  ;;  %v851_v57 = vpop.f32.mrf.mxu2 }
 0x191   : > { %v2646_v16 = vmul.f32 0.35355338, %v851_v57 }
 0x192   : > { %v1335_v41 = vld.sshfl [vmem:[#allocation1] sm:$0xff pattern:$0x73625140] }
 0x193   : > { %v1339_v2 = vld.sshfl [vmem:[#allocation1 + $0x20] sm:$0xff pattern:$0x73625140]  ;;  %1342 = vst [vmem:[#allocation1] ss:$4 sm:$0xff] %v1258_v62  ;;  %v1353_v3 = vunpack.c.l.b16 %v1335_v41 }
 0x194   : > { %1346 = vst [vmem:[#allocation1 + $0x20] ss:$4 sm:$0xff] %v1259_v53  ;;  %v1354_v7 = vunpack.c.l.b16 %v1339_v2  ;;  %v1309_v53 = vrot.slane %v1298_v58, 6 }
 0x195   : > { %v1363_v52 = vrot.slane %v1353_v3, 7  ;;  %v1313_v3 = vrot.slane %v1300_v38, 4 }
 0x196   : > { %v1365_v36 = vrot.slane %v1354_v7, 6  ;;  %v1310_v63 = vsel %vm503_vm4, %v1309_v53, %v1308_v9  ;;  %v667_v53 = vunpack.c.l.b16 %v2419_v44  ;;  %v671_v9 = vsel %vm491_vm0, %v670_v51, %v662_v47 }
 0x197   : > { %v1364_v41 = vsel %vm500_vm3, %v1363_v52, %v1362_v61  ;;  %v1312_v4 = vsel %vm506_vm5, %v1311_v59, %v1310_v63  ;;  %v858_v61 = vsel %vm428_vm7, %v2646_v16, -inf  ;;  %v1082_v63 = vunpack.c.l.b16 %v2536_v1 }
 0x198   : > { %v1366_v62 = vsel %vm503_vm4, %v1365_v36, %v1364_v41  ;;  %v1314_v5 = vsel %vm509_vm6, %v1313_v3, %v1312_v4  ;;  %859 = vmax.xlane.f32.xlu1 %v858_v61  ;;  %v853_v58 = vpop.f32.mrf.mxu2  ;;  %v664_v36 = vunpack.c.l.b16 %v2410_v39  ;;  %v665_v41 = vunpack.c.l.b16 %v2412_v40 }
 0x199   : > { %v1315_v52 = vpack.c.b16 %v1314_v5, %v1314_v5  ;;  %v678_v38 = vrot.slane %v667_v53, 3  ;;  %v1085_v3 = vunpack.c.l.b16 %v2553_v22  ;;  %v1087_v4 = vunpack.c.l.b16 %v2559_v30 }
 0x19a   : > { %v1343_v17 = vld.sshfl [vmem:[#allocation1] sm:$0xff pattern:$0x73625140]  ;;  %v1088_v5 = vunpack.c.l.b16 %v2561_v35  ;;  %v1090_v57 = vrot.slane %v1082_v63, 1  ;;  %v1025_v51 = vunpack.c.l.b16 %v2493_v11 }
 0x19b   : > { %v1347_v37 = vld.sshfl [vmem:[#allocation1 + $0x20] sm:$0xff pattern:$0x73625140]  ;;  %v1355_v42 = vunpack.c.l.b16 %v1343_v17  ;;  %v666_v17 = vunpack.c.l.b16 %v2417_v43  ;;  %v1095_v61 = vrot.slane %v1085_v3, 6  ;;  %v1099_v58 = vrot.slane %v1087_v4, 4 }
 0x19c   : > { %v1356_v55 = vunpack.c.l.b16 %v1347_v37  ;;  %v668_v37 = vunpack.c.l.b16 %v2422_v46 }
 0x19d   : > { %v1367_v26 = vrot.slane %v1355_v42, 5  ;;  %v669_v42 = vunpack.c.l.b16 %v2425_v48  ;;  %v676_v34 = vrot.slane %v666_v17, 4  ;;  %v1026_v17 = vunpack.c.l.b16 %v2495_v12 }
 0x19e   : > { %v1369_v0 = vrot.slane %v1356_v55, 4  ;;  %v672_v55 = vrot.slane %v664_v36, 6  ;;  %v680_v32 = vrot.slane %v668_v37, 2  ;;  %v1030_v12 = vunpack.c.l.b16 %v2511_v28 }
 0x19f   : > { %v1368_v2 = vsel %vm506_vm5, %v1367_v26, %v1366_v62  ;;  %v674_v62 = vrot.slane %v665_v41, 5  ;;  %v682_v26 = vrot.slane %v669_v42, 1  ;;  %v1033_v42 = vrot.slane %v1025_v51, 2 }
 0x1a0   : > { %v1370_v45 = vsel %vm509_vm6, %v1369_v0, %v1368_v2  ;;  %v673_v39 = vsel %vm494_vm1, %v672_v55, %v671_v9  ;;  %v1081_v0 = vunpack.c.l.b16 %v2532_v60  ;;  %v1083_v2 = vunpack.c.l.b16 %v2547_v13 }
 0x1a1   : > { %v1371_v10 = vpack.c.b16 %v1370_v45, %v1370_v45  ;;  %v675_v40 = vsel %vm497_vm2, %v674_v62, %v673_v39  ;;  %v1084_v45 = vunpack.c.l.b16 %v2549_v15  ;;  %v1034_v9 = vrot.slane %v1026_v17, 1 }
 0x1a2   : > { %v677_v43 = vsel %vm500_vm3, %v676_v34, %v675_v40  ;;  %v1028_v62 = vunpack.c.l.b16 %v2505_v21  ;;  %v1027_v34 = vunpack.c.l.b16 %v2503_v18  ;;  %v1029_v39 = vunpack.c.l.b16 %v2509_v27 }
 0x1a3   : > { %v1376_v7 = vsel %vm428_vm7, %v1371_v10, 0  ;;  %v679_v44 = vsel %vm503_vm4, %v678_v38, %v677_v43  ;;  %v1086_v10 = vunpack.c.l.b16 %v2555_v25  ;;  %v1093_v60 = vrot.slane %v1084_v45, 7 }
 0x1a4   : > { %1385 = vmatpush.bf16.xpose.msrb.mxu0 %v1376_v7  ;;  %v681_v46 = vsel %vm506_vm5, %v680_v32, %v679_v44  ;;  %v1101_v25 = vrot.slane %v1088_v5, 3  ;;  %v1035_v38 = vsel %vm491_vm0, %v1034_v9, %v1033_v42  ;;  %v1037_v32 = vrot.slane %v1028_v62, 7  ;;  %v1393_v9 = vld [vmem:[#allocation2 + $0x18] sm:$0xff] }
 0x1a5   : > { %v683_v48 = vsel %vm509_vm6, %v682_v26, %v681_v46  ;;  %v1097_v13 = vrot.slane %v1086_v10, 5  ;;  %v1036_v11 = vsel %vm494_vm1, %v1027_v34, %v1035_v38  ;;  %v1039_v40 = vrot.slane %v1029_v39, 6 }
 0x1a6   : > { %v684_v59 = vpack.c.b16 %v683_v48, %v683_v48  ;;  %v1031_v18 = vunpack.c.l.b16 %v2515_v31  ;;  %v1041_v43 = vrot.slane %v1030_v12, 5  ;;  %v1032_v44 = vunpack.c.l.b16 %v2517_v33 }
 0x1a8   : > { %v690_v7 = vsel %vm688_vm9, %v684_v59, 0  ;;  %v1043_v46 = vrot.slane %v1031_v18, 4  ;;  %v1045_v48 = vrot.slane %v1032_v44, 3  ;;  %v1427_v18 = vld [vmem:[%s2386_s12 + $0x2] sm:$0x2] }
 0x1a9   : > { %699 = vmatpush.bf16.msra.mxu1 %v690_v7  ;;  %1440 = vst [vmem:[#allocation1 + $0x20] ss:$4 sm:$0xff] %v1427_v18  ;;  %v1429_v44 = vld [vmem:[%s2386_s12 + $0x6] sm:$0x2] }
 0x1ab   : > { %2122 = vmatmul.msk.bf16.vlgmr.msrb.gmra.mxu0 %vm428_vm7, %v1315_v52  ;;  %v1089_v52 = vrot.slane %v1081_v0, 2 }
 0x1ad   : > { %v1091_v1 = vsel %vm491_vm0, %v1090_v57, %v1089_v52  ;;  %v931_v57 = vunpack.c.l.b16 %v2461_v19 }
 0x1ae   : > { %v1092_v15 = vsel %vm494_vm1, %v1083_v2, %v1091_v1  ;;  %v2705_v2 = vld [vmem:[#allocation2 + $0x8] sm:$0xff]  ;;  %v934_v1 = vunpack.c.l.b16 %v2469_v24 }
 0x1af   : > { %v1094_v22 = vsel %vm497_vm2, %v1093_v60, %v1092_v15  ;;  %v933_v60 = vunpack.c.l.b16 %v2467_v23  ;;  %v935_v15 = vunpack.c.l.b16 %v2474_v49  ;;  %v938_v23 = vunpack.c.l.b16 %v2489_v8 }
 0x1b0   : > { %v1096_v30 = vsel %vm500_vm3, %v1095_v61, %v1094_v22  ;;  %v932_v61 = vunpack.c.l.b16 %v2463_v20  ;;  %v936_v22 = vunpack.c.l.b16 %v2476_v50 }
 0x1b1   : > { %v1098_v56 = vsel %vm503_vm4, %v1097_v13, %v1096_v30  ;;  %v939_v13 = vrot.slane %v931_v57, 1  ;;  %v943_v30 = vrot.slane %v934_v1, 6  ;;  %v945_v19 = vrot.slane %v935_v15, 5 }
 0x1b2   : > { %v1100_v35 = vsel %vm506_vm5, %v1099_v58, %v1098_v56  ;;  %v941_v58 = vrot.slane %v933_v60, 7  ;;  %v937_v56 = vunpack.c.l.b16 %v2486_v6  ;;  %v947_v24 = vrot.slane %v936_v22, 4 }
 0x1b3   : > { %v1102_v36 = vsel %vm509_vm6, %v1101_v25, %v1100_v35  ;;  %v940_v25 = vsel %vm491_vm0, %v932_v61, %v939_v13  ;;  %v951_v51 = vrot.slane %v938_v23, 2 }
 0x1b4   : > { %v1103_v47 = vpack.c.b16 %v1102_v36, %v1102_v36  ;;  %v942_v35 = vsel %vm494_vm1, %v941_v58, %v940_v25 }
 0x1b5   : > { %v944_v20 = vsel %vm497_vm2, %v943_v30, %v942_v35 }
 0x1b6   : > { %v1108_v41 = vsel %vm428_vm7, %v1103_v47, 0  ;;  %v946_v49 = vsel %vm500_vm3, %v945_v19, %v944_v20 }
 0x1b7   : > { %1117 = vmatpush.bf16.xpose.msrb.mxu1 %v1108_v41  ;;  %v949_v41 = vrot.slane %v937_v56, 3  ;;  %v948_v50 = vsel %vm503_vm4, %v947_v24, %v946_v49 }
 0x1b9   : > { %v950_v17 = vsel %vm506_vm5, %v949_v41, %v948_v50 }
 0x1ec   : > { %v600_v53 = vpop.permute.xlu0 %599 }
 0x1ed   : > { %v602_v37 = vsub.f32 %v2497_v14, %v600_v53  ;;  %v1038_v14 = vsel %vm497_vm2, %v1037_v32, %v1036_v11  ;;  %v952_v53 = vsel %vm509_vm6, %v951_v51, %v950_v17 }
 0x1ee   : > { %v1040_v27 = vsel %vm500_vm3, %v1039_v40, %v1038_v14  ;;  %v953_v8 = vpack.c.b16 %v952_v53, %v952_v53 }
 0x1ef   : > { %v603_v55 = vmul.f32 1.442695, %v602_v37  ;;  %v1042_v28 = vsel %vm503_vm4, %v1041_v43, %v1040_v27  ;;  %v1428_v43 = vld [vmem:[%s2386_s12 + $0x4] sm:$0x2] }
 0x1f0   : > { %v1044_v59 = vsel %vm506_vm5, %v1043_v46, %v1042_v28  ;;  %v958_v37 = vsel %vm688_vm9, %v953_v8, 0  ;;  %v1441_v46 = vld.sshfl [vmem:[#allocation1 + $0x20] sm:$0xff pattern:$0x73625140] }
 0x1f1   : > { %2193 = vpow2.f32 %v603_v55  ;;  %v1046_v0 = vsel %vm509_vm6, %v1045_v48, %v1044_v59  ;;  %967 = vmatpush.bf16.msra.mxu3 %v958_v37  ;;  %1448 = vst [vmem:[#allocation1 + $0x20] ss:$4 sm:$0xff] %v1429_v44  ;;  %v1430_v48 = vld [vmem:[%s2386_s12 + $0x8] sm:$0x2]  ;;  %v1431_v59 = vld [vmem:[%s2386_s12 + $0xa] sm:$0x2]  ;;  %v1468_v57 = vunpack.c.l.b16 %v1441_v46 }
 0x1f2   : > { %v1047_v63 = vpack.c.b16 %v1046_v0, %v1046_v0 }
 0x1f3   : > { %v1476_v1 = vrot.slane %v1468_v57, 2  ;;  %v3071_v57 = vld [vmem:[#allocation10_spill] sm:$0xff] }
 0x1f7   : > { %v2692_v26 = vpop.eup %2193 }
 0x1f8   : > { %v620_v21 = vpack.c.bf16 %v2692_v26, %v2692_v26  ;;  %v607_v28 = vsel %vm428_vm7, %v2692_v26, 0.0 }
 0x1fa   : > { %2117 = vmatmul.msk.bf16.vlgmr.msra.gmra.mxu1 %vm428_vm7, %v620_v21  ;;  %v1426_v21 = vld [vmem:[%s2386_s12] sm:$0x2] }
 0x1fb   : > { %1435 = vst [vmem:[#allocation1] ss:$4 sm:$0xff] %v1426_v21 }
 0x202   : > { %v1436_v27 = vld.sshfl [vmem:[#allocation1] sm:$0xff pattern:$0x73625140] }
 0x203   : > { %1444 = vst [vmem:[#allocation1] ss:$4 sm:$0xff] %v1428_v43 }
 0x20a   : > { %2120 = vmatmul.msk.bf16.vlgmr.msrb.gmra.mxu1 %vm428_vm7, %v1047_v63  ;;  %v1445_v0 = vld.sshfl [vmem:[#allocation1] sm:$0xff pattern:$0x73625140] }
 0x20b   : > { %v860_v31 = vpop.xlane.xlu1 %859  ;;  %v1449_v63 = vld.sshfl [vmem:[#allocation1 + $0x20] sm:$0xff pattern:$0x73625140]  ;;  %1452 = vst [vmem:[#allocation1] ss:$4 sm:$0xff] %v1430_v48  ;;  %v1469_v60 = vunpack.c.l.b16 %v1445_v0  ;;  %v605_v48 = vld [vmem:[#allocation3] sm:$0xff] }
 0x20c   : > { %v2708_v45 = vmax.f32 %v2705_v2, %v860_v31  ;;  %1456 = vst [vmem:[#allocation1 + $0x20] ss:$4 sm:$0xff] %v1431_v59  ;;  %v1432_v31 = vld [vmem:[%s2386_s12 + $0xc] sm:$0x2]  ;;  %v1470_v15 = vunpack.c.l.b16 %v1449_v63 }
 0x20d   : > { %v1478_v26 = vrot.slane %v1469_v60, 1  ;;  %v1202_v60 = vunpack.c.l.b16 %v3071_v57  ;;  %v1150_v57 = vld [vmem:[#allocation4 + $0x10] sm:$0xff] }
 0x20e   : > { %v862_v33 = vsub.f32 %v2705_v2, %v2708_v45  ;;  %975 = vst.msk [vmem:[#allocation2 + $0x8] sm:$0xff] %vm419_vm8, %v2708_v45 }
 0x228   : > { %v1387_v3 = vpop.f32.mrf.mxu0 }
 0x229   : > { %v2714_v10 = vmul.f32 0.35355338, %v1387_v3  ;;  %v1433_v3 = vld [vmem:[%s2386_s12 + $0xe] sm:$0x2] }
 0x22b   : > { %v1394_v4 = vsel %vm428_vm7, %v2714_v10, -inf }
 0x22c   : > { %1395 = vmax.xlane.f32.xlu2 %v1394_v4  ;;  %v1453_v4 = vld.sshfl [vmem:[#allocation1] sm:$0xff pattern:$0x73625140] }
 0x22d   : > { %1460 = vst [vmem:[#allocation1] ss:$4 sm:$0xff] %v1432_v31  ;;  %v1471_v13 = vunpack.c.l.b16 %v1453_v4 }
 0x22f   : > { %v1481_v56 = vrot.slane %v1471_v13, 7  ;;  %v3072_v13 = vld [vmem:[#allocation9_spill] sm:$0xff] }
 0x230   : > { %v1389_v7 = vpop.f32.mrf.mxu0 }
 0x231   : > { %v1457_v7 = vld.sshfl [vmem:[#allocation1 + $0x20] sm:$0xff pattern:$0x73625140] }
 0x232   : > { %1464 = vst [vmem:[#allocation1 + $0x20] ss:$4 sm:$0xff] %v1433_v3  ;;  %v1472_v58 = vunpack.c.l.b16 %v1457_v7  ;;  %v3070_v7 = vld [vmem:[#allocation8_spill] sm:$0xff] }
 0x234   : > { %v1461_v25 = vld.sshfl [vmem:[#allocation1] sm:$0xff pattern:$0x73625140]  ;;  %v1483_v23 = vrot.slane %v1472_v58, 6 }
 0x235   : > { %v1473_v19 = vunpack.c.l.b16 %v1461_v25 }
 0x237   : > { %v1485_v41 = vrot.slane %v1473_v19, 5 }
 0x239   : > { %v1465_v35 = vld.sshfl [vmem:[#allocation1 + $0x20] sm:$0xff pattern:$0x73625140] }
 0x23a   : > { %v1474_v20 = vunpack.c.l.b16 %v1465_v35  ;;  %v3075_v35 = vld [vmem:[#allocation13_spill] sm:$0xff] }
 0x23b   : > { %v1205_v19 = vunpack.c.l.b16 %v3075_v35 }
 0x23c   : > { %v1487_v50 = vrot.slane %v1474_v20, 4  ;;  %v3076_v20 = vld [vmem:[#allocation14_spill] sm:$0xff] }
 0x244   : > { %867 = vperm.xlu2 %2191, %v2708_v45  }
 0x277   : > { %v2719_v5 = vpop.f32.mrf.mxu1 }
 0x27f   : > { %v703_v52 = vpop.f32.mrf.mxu1 }
 0x280   : > { %v1467_v52 = vunpack.c.l.b16 %v1436_v27  ;;  %v3068_v27 = vsub.f32 %v2605_v29, %v2612_v54  ;;  %v3069_v29 = vld [vmem:[#allocation7_spill] sm:$0xff] }
 0x281   : > { %v1199_v54 = vunpack.c.l.b16 %v3069_v29 }
 0x282   : > { %v1475_v61 = vrot.slane %v1467_v52, 3  ;;  %v595_v2 = vmul.f32 1.442695, %v3068_v27  ;;  %v1200_v52 = vunpack.c.l.b16 %v3070_v7 }
 0x284   : > { %v1477_v22 = vsel %vm491_vm0, %v1476_v1, %v1475_v61  ;;  %v1207_v61 = vrot.slane %v1199_v54, 2  ;;  %v1208_v1 = vrot.slane %v1200_v52, 1 }
 0x285   : > { %v1479_v30 = vsel %vm494_vm1, %v1478_v26, %v1477_v22  ;;  %v1201_v26 = vunpack.c.l.b16 %v3072_v13  ;;  %v3074_v22 = vld [vmem:[#allocation12_spill] sm:$0xff] }
 0x286   : > { %v1204_v25 = vunpack.c.l.b16 %v3074_v22 }
 0x287   : > { %v1119_v36 = vpop.f32.mrf.mxu1 }
 0x288   : > { %v2732_v47 = vmul.f32 0.35355338, %v1119_v36  ;;  %v1480_v36 = vsel %vm497_vm2, %v1470_v15, %v1479_v30  ;;  %v3073_v15 = vld [vmem:[#allocation11_spill] sm:$0xff]  ;;  %v1209_v30 = vsel %vm491_vm0, %v1208_v1, %v1207_v61 }
 0x289   : > { %v1482_v24 = vsel %vm500_vm3, %v1481_v56, %v1480_v36  ;;  %v1203_v58 = vunpack.c.l.b16 %v3073_v15  ;;  %v1211_v56 = vrot.slane %v1202_v60, 7  ;;  %v1210_v36 = vsel %vm494_vm1, %v1201_v26, %v1209_v30  ;;  %v613_v15 = vld [vmem:[#allocation4] sm:$0xff] }
 0x28a   : > { %v1126_v6 = vsel %vm428_vm7, %v2732_v47, -inf  ;;  %v1484_v49 = vsel %vm503_vm4, %v1483_v23, %v1482_v24  ;;  %v1206_v24 = vunpack.c.l.b16 %v3076_v20 }
 0x28b   : > { %1127 = vmax.xlane.f32.xlu1 %v1126_v6  ;;  %v1486_v51 = vsel %vm506_vm5, %v1485_v41, %v1484_v49  ;;  %v1213_v23 = vrot.slane %v1203_v58, 6  ;;  %v1212_v49 = vsel %vm497_vm2, %v1211_v56, %v1210_v36  ;;  %v1215_v41 = vrot.slane %v1204_v25, 5  ;;  %v882_v56 = vld [vmem:[#allocation4 + $0x8] sm:$0xff] }
 0x28c   : > { %v1488_v6 = vsel %vm509_vm6, %v1487_v50, %v1486_v51  ;;  %v1217_v51 = vrot.slane %v1205_v19, 4 }
 0x28d   : > { %v1489_v17 = vpack.c.b16 %v1488_v6, %v1488_v6  ;;  %v1214_v50 = vsel %vm500_vm3, %v1213_v23, %v1212_v49  ;;  %vm1821_vm3 = vcmask 58369  }
 0x28e   : > { %v1216_v6 = vsel %vm503_vm4, %v1215_v41, %v1214_v50  ;;  %vm1822_vm4 = vsmask.f32 1280 }
 0x28f   : > { %v1121_v42 = vpop.f32.mrf.mxu1  ;;  %v1494_v53 = vsel %vm688_vm9, %v1489_v17, 0  ;;  %v1219_v17 = vrot.slane %v1206_v24, 3 }
 0x290   : > { %1503 = vmatpush.bf16.msrb.mxu2 %v1494_v53  ;;  %v1218_v53 = vsel %vm506_vm5, %v1217_v51, %v1216_v6 }
 0x29f   : > { %v1396_v55 = vpop.xlane.xlu2 %1395 }
 0x2a0   : > { %v1397_v62 = vmax.f32 %v1393_v9, %v1396_v55 }
 0x2a2   : > { %1511 = vst.msk [vmem:[#allocation2 + $0x18] sm:$0xff] %vm419_vm8, %v1397_v62  ;;  %1403 = vperm.xlu2 %2191, %v1397_v62   ;;  %v1398_v40 = vsub.f32 %v1393_v9, %v1397_v62  ;;  %v1125_v9 = vld [vmem:[#allocation2 + $0x10] sm:$0xff] }
 0x2a4   : > { %v1399_v14 = vmul.f32 1.442695, %v1398_v40 }
 0x2a7   : > { %v868_v34 = vpop.permute.xlu2 %867 }
 0x2a8   : > { %v870_v38 = vsub.f32 %v2646_v16, %v868_v34 }
 0x2aa   : > { %v871_v39 = vmul.f32 1.442695, %v870_v38 }
 0x2ac   : > { %2195 = vpow2.f32 %v871_v39 }
 0x2ad   : > { %2197 = vpow2.f32 %v1399_v14  ;;  %v874_v14 = vld [vmem:[#allocation3 + $0x8] sm:$0xff] }
 0x2b2   : > { %v2196_v32 = vpop.eup %2195 }
 0x2b3   : > { %v876_v11 = vsel %vm428_vm7, %v2196_v32, 0.0  ;;  %v889_v12 = vpack.c.bf16 %v2196_v32, %v2196_v32  ;;  %v2747_v16 = vpop.eup %2197 }
 0x2b4   : > { %877 = vadd.xlane.f32.xlu0 %v876_v11 }
 0x2b5   : > { %2119 = vmatmul.msk.bf16.vlgmr.msra.gmra.mxu3 %vm428_vm7, %v889_v12 }
 0x2c8   : > { %1421 = vperm.xlu0 %2190, %v2747_v16  }
 0x2cb   : > { %608 = vadd.xlane.f32.xlu2 %v607_v28 }
 0x2fc   : > { %v1404_v8 = vpop.permute.xlu2 %1403 }
 0x2fd   : > { %v1406_v37 = vsub.f32 %v2714_v10, %v1404_v8  ;;  %v863_v10 = vmul.f32 1.442695, %v862_v33  ;;  %v1220_v8 = vsel %vm509_vm6, %v1219_v17, %v1218_v53 }
 0x2fe   : > { %v1128_v55 = vpop.xlane.xlu1 %1127 }
 0x2ff   : > { %v1407_v42 = vmul.f32 1.442695, %v1406_v37  ;;  %v1129_v62 = vmax.f32 %v1125_v9, %v1128_v55  ;;  %v1221_v37 = vpack.c.b16 %v1220_v8, %v1220_v8 }
 0x301   : > { %2199 = vpow2.f32 %v1407_v42  ;;  %1243 = vst.msk [vmem:[#allocation2 + $0x10] sm:$0xff] %vm419_vm8, %v1129_v62  ;;  %1135 = vperm.xlu1 %2192, %v1129_v62   ;;  %v1130_v32 = vsub.f32 %v1125_v9, %v1129_v62  ;;  %v1226_v42 = vsel %vm688_vm9, %v1221_v37, 0  ;;  %v1410_v62 = vld [vmem:[#allocation3 + $0x18] sm:$0xff] }
 0x302   : > { %1235 = vmatpush.bf16.msrb.mxu3 %v1226_v42 }
 0x303   : > { %v1131_v11 = vmul.f32 1.442695, %v1130_v32 }
 0x305   : > { %2201 = vpow2.f32 %v1131_v11 }
 0x306   : > { %2203 = vpow2.f32 %v863_v10 }
 0x307   : > { %v2200_v34 = vpop.eup %2199 }
 0x308   : > { %v1412_v38 = vsel %vm428_vm7, %v2200_v34, 0.0  ;;  %v1425_v39 = vpack.c.bf16 %v2200_v34, %v2200_v34 }
 0x309   : > { %1413 = vadd.xlane.f32.xlu2 %v1412_v38  ;;  %v1411_v38 = vmul.f32 %v2747_v16, %v1410_v62 }
 0x30a   : > { %2123 = vmatmul.msk.bf16.vlgmr.msrb.gmra.mxu2 %vm428_vm7, %v1425_v39 }
 0x30b   : > { %v2773_v12 = vpop.eup %2201 }
 0x30c   : > { %v2776_v40 = vpop.eup %2203 }
 0x30d   : > { %v875_v21 = vmul.f32 %v2776_v40, %v874_v14 }
 0x321   : > { %1153 = vperm.xlu2 %2191, %v2773_v12  }
 0x327   : > { %v878_v18 = vpop.xlane.xlu0 %877 }
 0x328   : > { %v879_v43 = vadd.f32 %v878_v18, %v875_v21  ;;  %v1418_v18 = vld [vmem:[#allocation4 + $0x18] sm:$0xff] }
 0x32a   : > { %880 = vst.msk [vmem:[#allocation3 + $0x8] sm:$0xff] %vm419_vm8, %v879_v43 }
 0x331   : > { %v1627_v45 = vld [vmem:[#allocation3 + $0x8] sm:$0xff] }
 0x332   : > { %2205 = vrcp.f32 %v1627_v45 }
 0x333   : > { %2207 = vpow2.f32 %v595_v2 }
 0x338   : > { %v2206_v33 = vpop.eup %2205  ;;  %v2783_v44 = vpop.f32.mrf.mxu3 }
 0x339   : > { %v1629_v46 = vmul.f32 %v2206_v33, %v1627_v45  ;;  %v2785_v28 = vpop.eup %2207 }
 0x33a   : > { %v606_v0 = vmul.f32 %v2785_v28, %v605_v48 }
 0x33b   : > { %v1630_v59 = vsub.f32 2.0, %v1629_v46 }
 0x33d   : > { %v1631_v63 = vmul.f32 %v2206_v33, %v1630_v59 }
 0x33e   : > { %v609_v31 = vpop.xlane.xlu2 %608 }
 0x33f   : > { %v610_v3 = vadd.f32 %v609_v31, %v606_v0  ;;  %1635 = vperm.xlu0 %2190, %v1631_v63  }
 0x340   : > { %v971_v4 = vpop.f32.mrf.mxu3 }
 0x341   : > { %612 = vst.msk [vmem:[#allocation3] sm:$0xff] %vm419_vm8, %v610_v3  ;;  %v1142_v4 = vld [vmem:[#allocation3 + $0x10] sm:$0xff] }
 0x342   : > { %v1143_v29 = vmul.f32 %v2773_v12, %v1142_v4  ;;  %v1612_v4 = vld [vmem:[%s2829_s25 + $0x6] sm:$0x1] }
 0x348   : > { %v1515_v59 = vld [vmem:[#allocation3] sm:$0xff] }
 0x373   : > { %v1136_v9 = vpop.permute.xlu1 %1135 }
 0x374   : > { %v1138_v55 = vsub.f32 %v2732_v47, %v1136_v9  ;;  %v1422_v47 = vpop.permute.xlu0 %1421 }
 0x375   : > { %v1424_v43 = vmul.f32 %v1422_v47, %v1418_v18 }
 0x376   : > { %v1139_v34 = vmul.f32 1.442695, %v1138_v55 }
 0x378   : > { %2209 = vpow2.f32 %v1139_v34 }
 0x37c   : > { %v1414_v39 = vpop.xlane.xlu2 %1413 }
 0x37d   : > { %v1415_v32 = vadd.f32 %v1414_v39, %v1411_v38  ;;  %v2260_v38 = vmov 857870592  }
 0x37e   : > { %v2210_v11 = vpop.eup %2209  ;;  %v1561_v39 = vunpack.c.l.s4 %v2260_v38 }
 0x37f   : > { %1416 = vst.msk [vmem:[#allocation3 + $0x18] sm:$0xff] %vm419_vm8, %v1415_v32  ;;  %v1144_v10 = vsel %vm428_vm7, %v2210_v11, 0.0  ;;  %v1157_v14 = vpack.c.bf16 %v2210_v11, %v2210_v11 }
 0x380   : > { %1145 = vadd.xlane.f32.xlu1 %v1144_v10 }
 0x381   : > { %2121 = vmatmul.msk.bf16.vlgmr.msrb.gmra.mxu3 %vm428_vm7, %v1157_v14 }
 0x384   : > { %v1154_v60 = vpop.permute.xlu2 %1153 }
 0x385   : > { %v1156_v61 = vmul.f32 %v1154_v60, %v1150_v57  ;;  %v1615_v57 = vld [vmem:[%s2829_s25 + $0x8] sm:$0x1] }
 0x386   : > { %v1848_v21 = vld [vmem:[#allocation3 + $0x18] sm:$0xff] }
 0x387   : > { %2211 = vrcp.f32 %v1848_v21 }
 0x388   : > { %2213 = vrcp.f32 %v1515_v59 }
 0x38d   : > { %v2212_v27 = vpop.eup %2211  ;;  %v1505_v2 = vpop.f32.mrf.mxu2 }
 0x38e   : > { %v1509_v45 = vadd.f32 %v1505_v2, %v1424_v43  ;;  %v1850_v16 = vmul.f32 %v2212_v27, %v1848_v21  ;;  %v2214_v0 = vpop.eup %2213  ;;  %v2833_v2 = vunpack.c.0.s8 %v1561_v39 }
 0x38f   : > { %v1517_v63 = vmul.f32 %v2214_v0, %v1515_v59  ;;  %v1609_v59 = vld [vmem:[%s2829_s25 + $0x4] sm:$0x1] }
 0x390   : > { %1510 = vst.msk [vmem:[#allocation4 + $0x18] sm:$0xff] %vm428_vm7, %v1509_v45  ;;  %v1851_v33 = vsub.f32 2.0, %v1850_v16  ;;  %v1603_v45 = vld [vmem:[%s2829_s25] sm:$0x1] }
 0x391   : > { %v1518_v31 = vsub.f32 2.0, %v1517_v63 }
 0x392   : > { %v1852_v46 = vmul.f32 %v2212_v27, %v1851_v33 }
 0x393   : > { %v1519_v3 = vmul.f32 %v2214_v0, %v1518_v31 }
 0x394   : > { %1856 = vperm.xlu0 %2190, %v1852_v46  }
 0x395   : > { %v1507_v48 = vpop.f32.mrf.mxu2 }
 0x396   : > { %v1606_v48 = vld [vmem:[%s2829_s25 + $0x2] sm:$0x1] }
 0x399   : > { %616 = vperm.xlu1 %2192, %v2785_v28  }
 0x3a1   : > { %885 = vperm.xlu1 %2192, %v2776_v40  }
 0x3a9   : > { %1523 = vperm.xlu1 %2192, %v1519_v3  }
 0x3b1   : > { %v1636_v41 = vpop.permute.xlu0 %1635 }
 0x3f3   : > { %v1146_v54 = vpop.xlane.xlu1 %1145 }
 0x3f4   : > { %v1147_v7 = vadd.f32 %v1146_v54, %v1143_v29 }
 0x3f6   : > { %1148 = vst.msk [vmem:[#allocation3 + $0x10] sm:$0xff] %vm419_vm8, %v1147_v7 }
 0x3fd   : > { %v1737_v52 = vld [vmem:[#allocation3 + $0x10] sm:$0xff] }
 0x3fe   : > { %2215 = vrcp.f32 %v1737_v52 }
 0x404   : > { %v2216_v28 = vpop.eup %2215  ;;  %v1237_v1 = vpop.f32.mrf.mxu3 }
 0x405   : > { %v1241_v13 = vadd.f32 %v1237_v1, %v1156_v61  ;;  %v1739_v26 = vmul.f32 %v2216_v28, %v1737_v52 }
 0x407   : > { %1242 = vst.msk [vmem:[#allocation4 + $0x10] sm:$0xff] %vm428_vm7, %v1241_v13  ;;  %v1740_v40 = vsub.f32 2.0, %v1739_v26  ;;  %v1618_v13 = vld [vmem:[%s2829_s25 + $0xa] sm:$0x1] }
 0x409   : > { %v1741_v58 = vmul.f32 %v2216_v28, %v1740_v40 }
 0x40b   : > { %v617_v22 = vpop.permute.xlu1 %616  ;;  %1745 = vperm.xlu2 %2191, %v1741_v58  }
 0x40c   : > { %v619_v12 = vmul.f32 %v617_v22, %v613_v15  ;;  %v1239_v25 = vpop.f32.mrf.mxu3  ;;  %v1621_v22 = vld [vmem:[%s2829_s25 + $0xc] sm:$0x1] }
 0x40e   : > { %v705_v30 = vadd.f32 %v2719_v5, %v619_v12 }
 0x410   : > { %706 = vst.msk [vmem:[#allocation4] sm:$0xff] %vm428_vm7, %v705_v30  ;;  %v1624_v30 = vld [vmem:[%s2829_s25 + $0xe] sm:$0x1] }
 0x413   : > { %v886_v35 = vpop.permute.xlu1 %885 }
 0x414   : > { %v888_v19 = vmul.f32 %v886_v35, %v882_v56 }
 0x416   : > { %v973_v36 = vadd.f32 %v2783_v44, %v888_v19 }
 0x417   : > { %v1520_v23 = vld [vmem:[#allocation4] sm:$0xff] }
 0x418   : > { %974 = vst.msk [vmem:[#allocation4 + $0x8] sm:$0xff] %vm428_vm7, %v973_v36 }
 0x41b   : > { %v1524_v20 = vpop.permute.xlu1 %1523 }
 0x41c   : > { %v1526_v24 = vmul.f32 %v1524_v20, %v1520_v23 }
 0x41e   : > { %v1527_v49 = vpack.c.bf16 %v1526_v24, %v1526_v24 }
 0x41f   : > { %v1632_v50 = vld [vmem:[#allocation4 + $0x8] sm:$0xff] }
 0x420   : > { %v1638_v51 = vmul.f32 %v1636_v41, %v1632_v50  ;;  %v1529_v6 = vrot.slane %v1527_v49, 3 }
 0x422   : > { %v1639_v5 = vpack.c.bf16 %v1638_v51, %v1638_v51  ;;  %v1533_v17 = vsel %vm1530_vm10, %v1527_v49, %v1529_v6  ;;  %v1535_v53 = vsel %vm491_vm0, %v1527_v49, %v1529_v6  ;;  %v1538_v8 = vsel %vm494_vm1, %v1527_v49, %v1529_v6 }
 0x423   : > { %v1537_v44 = vrot.slane %v1535_v53, 1  ;;  %v1541_v37 = vsel %vm497_vm2, %v1527_v49, %v1529_v6  ;;  %v1540_v42 = vrot.slane %v1538_v8, 2  ;;  %v1545_v9 = vunpack.i.h.s16 %v1533_v17 }
 0x424   : > { %v1641_v55 = vrot.slane %v1639_v5, 3  ;;  %v1543_v62 = vrot.slane %v1541_v37, 3  ;;  %v2124_v11 = vpack.i.b16 %v1533_v17, %v1533_v17 }
 0x425   : > { %v1547_v34 = vunpack.i.h.s16 %v1537_v44  ;;  %v1549_v32 = vunpack.i.h.s16 %v1540_v42  ;;  %v1553_v10 = vpack.i.b16 %v1545_v9, %v1545_v9  ;;  %v2125_v47 = vpack.i.b16 %v1537_v44, %v1537_v44 }
 0x426   : > { %v1646_v14 = vsel %vm491_vm0, %v1639_v5, %v1641_v55  ;;  %v1649_v21 = vsel %vm494_vm1, %v1639_v5, %v1641_v55  ;;  %v1551_v18 = vunpack.i.h.s16 %v1543_v62  ;;  %v2126_v27 = vpack.i.b16 %v1540_v42, %v1540_v42 }
 0x427   : > { %v1555_v43 = vpack.i.b16 %v1547_v34, %v1547_v34  ;;  %v1644_v16 = vsel %vm1530_vm10, %v1639_v5, %v1641_v55  ;;  %v1557_v33 = vpack.i.b16 %v1549_v32, %v1549_v32  ;;  %v1648_v0 = vrot.slane %v1646_v14, 1 }
 0x428   : > { %v1651_v63 = vrot.slane %v1649_v21, 2  ;;  %v1652_v31 = vsel %vm497_vm2, %v1639_v5, %v1641_v55  ;;  %v2127_v3 = vpack.i.b16 %v1543_v62, %v1543_v62  ;;  %v1559_v29 = vpack.i.b16 %v1551_v18, %v1551_v18 }
 0x429   : > { %v1563_v54 = vperm.slane %v2124_v11, %v2833_v2  ;;  %v1567_v7 = vperm.slane %v1553_v10, %v2833_v2  ;;  %v1571_v52 = vperm.slane %v2125_v47, %v2833_v2  ;;  %v1656_v60 = vunpack.i.h.s16 %v1644_v16 }
 0x42a   : > { %v1575_v61 = vperm.slane %v1555_v43, %v2833_v2  ;;  %v1579_v28 = vperm.slane %v2126_v27, %v2833_v2  ;;  %v1583_v1 = vperm.slane %v1557_v33, %v2833_v2  ;;  %v1587_v26 = vperm.slane %v2127_v3, %v2833_v2 }
 0x42b   : > { %v1604_v40 = vsel %vm2838_vm13, %v1563_v54, %v1603_v45  ;;  %v1607_v15 = vsel %vm2838_vm13, %v1567_v7, %v1606_v48  ;;  %v1610_v58 = vsel %vm2838_vm13, %v1571_v52, %v1609_v59  ;;  %v1591_v12 = vperm.slane %v1559_v29, %v2833_v2  ;;  %v1742_v29 = vld [vmem:[#allocation4 + $0x10] sm:$0xff] }
 0x42c   : > { %1605 = vst [vmem:[%s2829_s25] sm:$0x1] %v1604_v40  ;;  %v1613_v25 = vsel %vm2838_vm13, %v1575_v61, %v1612_v4  ;;  %v1654_v56 = vrot.slane %v1652_v31, 3  ;;  %v1658_v35 = vunpack.i.h.s16 %v1648_v0  ;;  %v1616_v19 = vsel %vm2838_vm13, %v1579_v28, %v1615_v57  ;;  %v1853_v31 = vld [vmem:[#allocation4 + $0x18] sm:$0xff] }
 0x42d   : > { %1608 = vst [vmem:[%s2829_s25 + $0x2] sm:$0x1] %v1607_v15  ;;  %v2128_v36 = vpack.i.b16 %v1644_v16, %v1644_v16  ;;  %v1619_v23 = vsel %vm2838_vm13, %v1583_v1, %v1618_v13  ;;  %v1660_v20 = vunpack.i.h.s16 %v1651_v63  ;;  %v1664_v24 = vpack.i.b16 %v1656_v60, %v1656_v60 }
 0x42e   : > { %1611 = vst [vmem:[%s2829_s25 + $0x4] sm:$0x1] %v1610_v58  ;;  %v1622_v49 = vsel %vm2838_vm13, %v1587_v26, %v1621_v22  ;;  %v2129_v41 = vpack.i.b16 %v1648_v0, %v1648_v0  ;;  %v1625_v50 = vsel %vm2838_vm13, %v1591_v12, %v1624_v30  ;;  %v1662_v51 = vunpack.i.h.s16 %v1654_v56 }
 0x42f   : > { %1614 = vst [vmem:[%s2829_s25 + $0x6] sm:$0x1] %v1613_v25  ;;  %v1666_v6 = vpack.i.b16 %v1658_v35, %v1658_v35  ;;  %v2130_v17 = vpack.i.b16 %v1651_v63, %v1651_v63  ;;  %v1674_v53 = vperm.slane %v2128_v36, %v2833_v2  ;;  %v1668_v8 = vpack.i.b16 %v1660_v20, %v1660_v20  ;;  %v1857_v63 = vpop.permute.xlu0 %1856  ;;  %v1824_v20 = vld [vmem:[%s2829_s25] sm:$0x2] }
 0x430   : > { %1617 = vst [vmem:[%s2829_s25 + $0x8] sm:$0x1] %v1616_v19  ;;  %v1678_v44 = vperm.slane %v1664_v24, %v2833_v2  ;;  %v2131_v42 = vpack.i.b16 %v1654_v56, %v1654_v56  ;;  %v1682_v9 = vperm.slane %v2129_v41, %v2833_v2  ;;  %v1670_v34 = vpack.i.b16 %v1662_v51, %v1662_v51  ;;  %v1827_v51 = vld [vmem:[%s2829_s25 + $0x2] sm:$0x2] }
 0x431   : > { %1620 = vst [vmem:[%s2829_s25 + $0xa] sm:$0x1] %v1619_v23  ;;  %v1686_v38 = vperm.slane %v1666_v6, %v2833_v2  ;;  %v1690_v11 = vperm.slane %v2130_v17, %v2833_v2  ;;  %v1694_v21 = vperm.slane %v1668_v8, %v2833_v2  ;;  %v1859_v3 = vmul.f32 %v1857_v63, %v1853_v31  ;;  %v1830_v8 = vld [vmem:[%s2829_s25 + $0x4] sm:$0x2] }
 0x432   : > { %1623 = vst [vmem:[%s2829_s25 + $0xc] sm:$0x1] %v1622_v49  ;;  %v1698_v43 = vperm.slane %v2131_v42, %v2833_v2  ;;  %v1702_v16 = vperm.slane %v1670_v34, %v2833_v2  ;;  %v1839_v34 = vld [vmem:[%s2829_s25 + $0xa] sm:$0x2] }
 0x433   : > { %1626 = vst [vmem:[%s2829_s25 + $0xe] sm:$0x1] %v1625_v50  ;;  %v1713_v37 = vld [vmem:[%s2829_s25] sm:$0x1]  ;;  %v1860_v4 = vpack.c.bf16 %v1859_v3, %v1859_v3 }
 0x434   : > { %v1714_v55 = vsel %vm2880_vm15, %v1674_v53, %v1713_v37  ;;  %v1716_v62 = vld [vmem:[%s2829_s25 + $0x2] sm:$0x1] }
 0x435   : > { %1715 = vst [vmem:[%s2829_s25] sm:$0x1] %v1714_v55  ;;  %v1717_v39 = vsel %vm2880_vm15, %v1678_v44, %v1716_v62  ;;  %v1719_v32 = vld [vmem:[%s2829_s25 + $0x4] sm:$0x1]  ;;  %v1862_v7 = vrot.slane %v1860_v4, 3  ;;  %v1836_v44 = vld [vmem:[%s2829_s25 + $0x8] sm:$0x2] }
 0x436   : > { %1718 = vst [vmem:[%s2829_s25 + $0x2] sm:$0x1] %v1717_v39  ;;  %v1720_v10 = vsel %vm2880_vm15, %v1682_v9, %v1719_v32  ;;  %v1722_v14 = vld [vmem:[%s2829_s25 + $0x6] sm:$0x1]  ;;  %v1833_v62 = vld [vmem:[%s2829_s25 + $0x6] sm:$0x2] }
 0x437   : > { %1721 = vst [vmem:[%s2829_s25 + $0x4] sm:$0x1] %v1720_v10  ;;  %v1723_v18 = vsel %vm2880_vm15, %v1686_v38, %v1722_v14  ;;  %v1725_v47 = vld [vmem:[%s2829_s25 + $0x8] sm:$0x1]  ;;  %v2928_v60 = vsel %vm1530_vm10, %v1860_v4, %v1862_v7  ;;  %v1867_v61 = vsel %vm491_vm0, %v1860_v4, %v1862_v7  ;;  %v1870_v1 = vsel %vm494_vm1, %v1860_v4, %v1862_v7  ;;  %v1842_v10 = vld [vmem:[%s2829_s25 + $0xc] sm:$0x2] }
 0x438   : > { %1724 = vst [vmem:[%s2829_s25 + $0x6] sm:$0x1] %v1723_v18  ;;  %v1726_v27 = vsel %vm2880_vm15, %v1690_v11, %v1725_v47  ;;  %v1728_v45 = vld [vmem:[%s2829_s25 + $0xa] sm:$0x1]  ;;  %v1873_v13 = vsel %vm497_vm2, %v1860_v4, %v1862_v7  ;;  %v2937_v56 = vrot.slane %v1867_v61, 1  ;;  %v2939_v35 = vrot.slane %v1870_v1, 2 }
 0x439   : > { %1727 = vst [vmem:[%s2829_s25 + $0x8] sm:$0x1] %v1726_v27  ;;  %v1729_v33 = vsel %vm2880_vm15, %v1694_v21, %v1728_v45  ;;  %v1731_v46 = vld [vmem:[%s2829_s25 + $0xc] sm:$0x1]  ;;  %v1877_v19 = vunpack.i.h.s16 %v2928_v60  ;;  %v1845_v45 = vld [vmem:[%s2829_s25 + $0xe] sm:$0x2] }
 0x43a   : > { %1730 = vst [vmem:[%s2829_s25 + $0xa] sm:$0x1] %v1729_v33  ;;  %v1732_v48 = vsel %vm2880_vm15, %v1698_v43, %v1731_v46  ;;  %v1734_v59 = vld [vmem:[%s2829_s25 + $0xe] sm:$0x1]  ;;  %v1875_v43 = vrot.slane %v1873_v13, 3  ;;  %v1879_v27 = vunpack.i.h.s16 %v2937_v56  ;;  %v2136_v46 = vpack.i.b16 %v2928_v60, %v2928_v60 }
 0x43b   : > { %1733 = vst [vmem:[%s2829_s25 + $0xc] sm:$0x1] %v1732_v48  ;;  %v1735_v0 = vsel %vm2880_vm15, %v1702_v16, %v1734_v59  ;;  %v1885_v63 = vpack.i.b16 %v1877_v19, %v1877_v19  ;;  %v2137_v3 = vpack.i.b16 %v2937_v56, %v2937_v56 }
 0x43c   : > { %1736 = vst [vmem:[%s2829_s25 + $0xe] sm:$0x1] %v1735_v0  ;;  %v1881_v0 = vunpack.i.h.s16 %v2939_v35  ;;  %v2139_v1 = vpack.i.b16 %v1875_v43, %v1875_v43 }
 0x43d   : > { %v1899_v61 = vperm.slane %v1885_v63, %v2833_v2  ;;  %v1903_v13 = vperm.slane %v2137_v3, %v2833_v2 }
 0x43e   : > { %v1889_v60 = vpack.i.b16 %v1881_v0, %v1881_v0  ;;  %v1919_v23 = vperm.slane %v2139_v1, %v2833_v2 }
 0x465   : > { %v1746_v54 = vpop.permute.xlu2 %1745 }
 0x466   : > { %v1748_v52 = vmul.f32 %v1746_v54, %v1742_v29  ;;  %v1883_v29 = vunpack.i.h.s16 %v1875_v43  ;;  %v1887_v54 = vpack.i.b16 %v1879_v27, %v1879_v27 }
 0x468   : > { %v1749_v57 = vpack.c.bf16 %v1748_v52, %v1748_v52  ;;  %v2138_v52 = vpack.i.b16 %v2939_v35, %v2939_v35  ;;  %v1915_v35 = vperm.slane %v1889_v60, %v2833_v2 }
 0x46a   : > { %v1751_v28 = vrot.slane %v1749_v57, 3 }
 0x46c   : > { %v1754_v26 = vsel %vm1530_vm10, %v1749_v57, %v1751_v28  ;;  %v1756_v40 = vsel %vm491_vm0, %v1749_v57, %v1751_v28  ;;  %v1759_v15 = vsel %vm494_vm1, %v1749_v57, %v1751_v28  ;;  %v1762_v58 = vsel %vm497_vm2, %v1749_v57, %v1751_v28  ;;  %vm2943_vm0 = vmand %vm1821_vm3, %vm1822_vm4 }
 0x46d   : > { %v1758_v22 = vrot.slane %v1756_v40, 1  ;;  %v1761_v12 = vrot.slane %v1759_v15, 2  ;;  %v1764_v25 = vrot.slane %v1762_v58, 3  ;;  %v1766_v30 = vunpack.i.h.s16 %v1754_v26 }
 0x46e   : > { %v2132_v36 = vpack.i.b16 %v1754_v26, %v1754_v26  ;;  %vm1932_vm1 = vsmask.f32 7942  ;;  %v1895_v57 = vperm.slane %v2136_v46, %v2833_v2  ;;  %v1891_v15 = vpack.i.b16 %v1883_v29, %v1883_v29 }
 0x46f   : > { %v1768_v24 = vunpack.i.h.s16 %v1758_v22  ;;  %v1770_v49 = vunpack.i.h.s16 %v1761_v12  ;;  %v1772_v41 = vunpack.i.h.s16 %v1764_v25  ;;  %v1774_v50 = vpack.i.b16 %v1766_v30, %v1766_v30  ;;  %vm2991_vm2 = vmand %vm1821_vm3, %vm1932_vm1 }
 0x470   : > { %v2133_v6 = vpack.i.b16 %v1758_v22, %v1758_v22  ;;  %v2134_v5 = vpack.i.b16 %v1761_v12, %v1761_v12  ;;  %v2135_v17 = vpack.i.b16 %v1764_v25, %v1764_v25  ;;  %v1784_v53 = vperm.slane %v2132_v36, %v2833_v2 }
 0x471   : > { %v1776_v37 = vpack.i.b16 %v1768_v24, %v1768_v24  ;;  %v1778_v42 = vpack.i.b16 %v1770_v49, %v1770_v49  ;;  %v1780_v9 = vpack.i.b16 %v1772_v41, %v1772_v41  ;;  %v1788_v55 = vperm.slane %v1774_v50, %v2833_v2 }
 0x472   : > { %v1792_v38 = vperm.slane %v2133_v6, %v2833_v2  ;;  %v1800_v39 = vperm.slane %v2134_v5, %v2833_v2  ;;  %v1808_v32 = vperm.slane %v2135_v17, %v2833_v2  ;;  %v1825_v11 = vsel %vm2943_vm0, %v1784_v53, %v1824_v20 }
 0x473   : > { %v1796_v14 = vperm.slane %v1776_v37, %v2833_v2  ;;  %v1804_v21 = vperm.slane %v1778_v42, %v2833_v2  ;;  %v1812_v18 = vperm.slane %v1780_v9, %v2833_v2  ;;  %1826 = vst [vmem:[%s2829_s25] sm:$0x2] %v1825_v11  ;;  %v1828_v47 = vsel %vm2943_vm0, %v1788_v55, %v1827_v51 }
 0x474   : > { %1829 = vst [vmem:[%s2829_s25 + $0x2] sm:$0x2] %v1828_v47  ;;  %v1831_v16 = vsel %vm2943_vm0, %v1792_v38, %v1830_v8  ;;  %v1837_v33 = vsel %vm2943_vm0, %v1800_v39, %v1836_v44  ;;  %v1843_v31 = vsel %vm2943_vm0, %v1808_v32, %v1842_v10  ;;  %v1907_v58 = vperm.slane %v1887_v54, %v2833_v2 }
 0x475   : > { %1832 = vst [vmem:[%s2829_s25 + $0x4] sm:$0x2] %v1831_v16  ;;  %v1834_v48 = vsel %vm2943_vm0, %v1796_v14, %v1833_v62  ;;  %v1840_v59 = vsel %vm2943_vm0, %v1804_v21, %v1839_v34  ;;  %v1846_v4 = vsel %vm2943_vm0, %v1812_v18, %v1845_v45  ;;  %v1911_v25 = vperm.slane %v2138_v52, %v2833_v2 }
 0x476   : > { %1835 = vst [vmem:[%s2829_s25 + $0x6] sm:$0x2] %v1834_v48  ;;  %v1923_v49 = vperm.slane %v1891_v15, %v2833_v2 }
 0x477   : > { %1838 = vst [vmem:[%s2829_s25 + $0x8] sm:$0x2] %v1837_v33 }
 0x478   : > { %1841 = vst [vmem:[%s2829_s25 + $0xa] sm:$0x2] %v1840_v59 }
 0x479   : > { %1844 = vst [vmem:[%s2829_s25 + $0xc] sm:$0x2] %v1843_v31 }
 0x47a   : > { %1847 = vst [vmem:[%s2829_s25 + $0xe] sm:$0x2] %v1846_v4  ;;  %v1934_v28 = vld [vmem:[%s2829_s25] sm:$0x2] }
 0x47b   : > { %v1935_v26 = vsel %vm2991_vm2, %v1895_v57, %v1934_v28  ;;  %v1937_v40 = vld [vmem:[%s2829_s25 + $0x2] sm:$0x2] }
 0x47c   : > { %1936 = vst [vmem:[%s2829_s25] sm:$0x2] %v1935_v26  ;;  %v1938_v22 = vsel %vm2991_vm2, %v1899_v61, %v1937_v40  ;;  %v1940_v12 = vld [vmem:[%s2829_s25 + $0x4] sm:$0x2] }
 0x47d   : > { %1939 = vst [vmem:[%s2829_s25 + $0x2] sm:$0x2] %v1938_v22  ;;  %v1941_v30 = vsel %vm2991_vm2, %v1903_v13, %v1940_v12  ;;  %v1943_v56 = vld [vmem:[%s2829_s25 + $0x6] sm:$0x2] }
 0x47e   : > { %1942 = vst [vmem:[%s2829_s25 + $0x4] sm:$0x2] %v1941_v30  ;;  %v1944_v19 = vsel %vm2991_vm2, %v1907_v58, %v1943_v56  ;;  %v1946_v36 = vld [vmem:[%s2829_s25 + $0x8] sm:$0x2] }
 0x47f   : > { %1945 = vst [vmem:[%s2829_s25 + $0x6] sm:$0x2] %v1944_v19  ;;  %v1947_v20 = vsel %vm2991_vm2, %v1911_v25, %v1946_v36  ;;  %v1949_v24 = vld [vmem:[%s2829_s25 + $0xa] sm:$0x2] }
 0x480   : > { %1948 = vst [vmem:[%s2829_s25 + $0x8] sm:$0x2] %v1947_v20  ;;  %v1950_v41 = vsel %vm2991_vm2, %v1915_v35, %v1949_v24  ;;  %v1952_v50 = vld [vmem:[%s2829_s25 + $0xc] sm:$0x2] }
 0x481   : > { %1951 = vst [vmem:[%s2829_s25 + $0xa] sm:$0x2] %v1950_v41  ;;  %v1953_v51 = vsel %vm2991_vm2, %v1919_v23, %v1952_v50  ;;  %v1955_v6 = vld [vmem:[%s2829_s25 + $0xe] sm:$0x2] }
 0x482   : > { %1954 = vst [vmem:[%s2829_s25 + $0xc] sm:$0x2] %v1953_v51  ;;  %v1956_v5 = vsel %vm2991_vm2, %v1923_v49, %v1955_v6 }
 0x483   : > { %1957 = vst [vmem:[%s2829_s25 + $0xe] sm:$0x2] %v1956_v5 }
 0x484 PF: > { %s13_s16 = sadd.s32 1, %s2255_s16   ;;  %s3085_s12 = smov %s2243_s13 }
 0x485   : > { %p10_p10 = scmp.ge.s32.totalorder %s13_s16, 4   ;;  %s3086_s13 = smov %s2320_s21 }
 0x486   : > { %s3087_s14 = smov %s2251_s15  ;;  %s3088_s15 = smov %s3090_s17 }
 0x487   :  { %12 = sbr.rel (!%p10_p10) target bundleno = 3 (0x3), region = 189 }

</bundles_post_ra>
